<compile_context>
chip_gen: v6e
topology: v6e:2x2x1
jax: 0.10.0
libtpu: 0.0.40
codegen_flags: <defaults>
</compile_context>

<pallas_src>
import functools

import jax
import jax.numpy as jnp
from jax import lax
from jax.experimental import pallas as pl
from jax.experimental.pallas import tpu as pltpu


# ----------------------------------------------------------------------------
# Generic matmul + bias (+ReLU) kernel  (used for LSTM input projection and FC)
# ----------------------------------------------------------------------------

def _matmul_bias_kernel(x_ref, w_ref, b_ref, o_ref, *, relu):
    acc = jnp.dot(x_ref[...].astype(jnp.bfloat16),
                  w_ref[...].astype(jnp.bfloat16),
                  preferred_element_type=jnp.float32)
    acc = acc + b_ref[...]
    if relu:
        acc = jnp.maximum(acc, 0.0)
    o_ref[...] = acc


def matmul_bias_act(x, w, b, *, relu=False, tile_m=256):
    """y = act(x @ w + b). x:(M,K) f32, w:(K,N) f32, b:(N,).  Tiled over M with
    no M-padding copy (partial last block is masked by Pallas)."""
    M, K = x.shape
    Kw, N = w.shape
    assert K == Kw
    tm = M if M <= tile_m else tile_m
    grid_m = pl.cdiv(M, tm)
    return pl.pallas_call(
        functools.partial(_matmul_bias_kernel, relu=relu),
        out_shape=jax.ShapeDtypeStruct((M, N), jnp.float32),
        grid=(grid_m,),
        in_specs=[
            pl.BlockSpec((tm, K), lambda i: (i, 0)),
            pl.BlockSpec((K, N), lambda i: (0, 0)),
            pl.BlockSpec((1, N), lambda i: (0, 0)),
        ],
        out_specs=pl.BlockSpec((tm, N), lambda i: (i, 0)),
        compiler_params=pltpu.CompilerParams(dimension_semantics=("parallel",)),
    )(x, w, b.reshape(1, N))


# ----------------------------------------------------------------------------
# 3x3 conv + ReLU as implicit GEMM (no im2col materialisation)
# ----------------------------------------------------------------------------

def _conv3x3_relu_kernel(x_ref, w_ref, b_ref, o_ref, *, H, W, Cin, Cout):
    # x_ref: (1, H+2, W+2, Cin) padded image (resident across the H grid steps)
    # w_ref: (9, Cin, Cout);  b_ref: (1, Cout);  o_ref: (1, 1, W, Cout)
    h = pl.program_id(1)
    acc = jnp.zeros((W, Cout), jnp.float32)
    for tap in range(9):
        dy, dx = divmod(tap, 3)
        row = x_ref[0, h + dy, pl.ds(dx, W), :]          # (W, Cin)
        wt = w_ref[tap]                                  # (Cin, Cout)
        if Cin == 1:
            # Degenerate K=1 matmul -> do it on the VPU as an outer product.
            acc = acc + row * wt                         # (W,1)*(1,Cout)
        else:
            acc = acc + jnp.dot(row.astype(jnp.bfloat16),
                                wt.astype(jnp.bfloat16),
                                preferred_element_type=jnp.float32)
    o_ref[0, 0] = jnp.maximum(acc + b_ref[...], 0.0)


def conv2d_3x3_relu(x, w, b):
    """3x3 same-padding conv + ReLU. x: (N,H,W,Cin), w: (3,3,Cin,Cout) HWIO."""
    N, H, W, Cin = x.shape
    Cout = w.shape[-1]
    xp = jnp.pad(x, ((0, 0), (1, 1), (1, 1), (0, 0)))
    w9 = w.reshape(9, Cin, Cout)                         # tap-major (dy*3+dx)
    return pl.pallas_call(
        functools.partial(_conv3x3_relu_kernel, H=H, W=W, Cin=Cin, Cout=Cout),
        out_shape=jax.ShapeDtypeStruct((N, H, W, Cout), jnp.float32),
        grid=(N, H),
        in_specs=[
            pl.BlockSpec((1, H + 2, W + 2, Cin), lambda n, h: (n, 0, 0, 0)),
            pl.BlockSpec((9, Cin, Cout), lambda n, h: (0, 0, 0)),
            pl.BlockSpec((1, Cout), lambda n, h: (0, 0)),
        ],
        out_specs=pl.BlockSpec((1, 1, W, Cout), lambda n, h: (n, h, 0, 0)),
        compiler_params=pltpu.CompilerParams(
            dimension_semantics=("parallel", "arbitrary")),
    )(xp, w9, b.reshape(1, Cout))


# ----------------------------------------------------------------------------
# MaxPool2d: elementwise max over the k*k strided views (no stacked tensor)
# ----------------------------------------------------------------------------

def _make_max_kernel(n_views):
    def kernel(*refs):
        o_ref = refs[-1]
        acc = refs[0][...]
        for r in refs[1:-1]:
            acc = jnp.maximum(acc, r[...])
        o_ref[...] = acc
    return kernel


def maxpool2d(x, k, s):
    N, H, W, C = x.shape
    Ho = (H - k) // s + 1
    Wo = (W - k) // s + 1
    views = [x[:, dy:dy + (Ho - 1) * s + 1:s, dx:dx + (Wo - 1) * s + 1:s, :]
             for dy in range(k) for dx in range(k)]       # each (N, Ho, Wo, C)
    return pl.pallas_call(
        _make_max_kernel(len(views)),
        out_shape=jax.ShapeDtypeStruct((N, Ho, Wo, C), x.dtype),
        grid=(N,),
        in_specs=[pl.BlockSpec((1, Ho, Wo, C), lambda n: (n, 0, 0, 0))] * len(views),
        out_specs=pl.BlockSpec((1, Ho, Wo, C), lambda n: (n, 0, 0, 0)),
        compiler_params=pltpu.CompilerParams(dimension_semantics=("parallel",)),
    )(*views)


# ----------------------------------------------------------------------------
# AdaptiveAvgPool2d((1, None)): mean over H
# ----------------------------------------------------------------------------

def _mean_h_kernel(x_ref, o_ref):
    o_ref[...] = jnp.mean(x_ref[...], axis=1)


def adaptive_avgpool_h(x):
    N, H, W, C = x.shape
    return pl.pallas_call(
        _mean_h_kernel,
        out_shape=jax.ShapeDtypeStruct((N, W, C), jnp.float32),
        grid=(N,),
        in_specs=[pl.BlockSpec((1, H, W, C), lambda n: (n, 0, 0, 0))],
        out_specs=pl.BlockSpec((1, W, C), lambda n: (n, 0, 0)),
        compiler_params=pltpu.CompilerParams(dimension_semantics=("parallel",)),
    )(x)


# ----------------------------------------------------------------------------
# Bidirectional LSTM layer (fused directions, hoisted input projection)
# ----------------------------------------------------------------------------

def _sigmoid(z):
    # exact, overflow-free sigmoid; tanh runs on the EUP slot.
    return 0.5 * (1.0 + jnp.tanh(0.5 * z))


def _bilstm_kernel(gx_ref, whh_ref, o_ref, h_sc, c_sc, *, T):
    # gx_ref : (1, 4, T, B, H) f32  -- precomputed x@W_ih + b for this direction
    # whh_ref: (1, 4, H, H)   f32   -- per-gate recurrent weights
    # o_ref  : (1, T, B, H)   f32
    d = pl.program_id(0)                      # 0 = forward, 1 = backward
    h_sc[...] = jnp.zeros_like(h_sc)
    c_sc[...] = jnp.zeros_like(c_sc)
    whh = whh_ref[0].astype(jnp.bfloat16)     # (4, H, H), hoisted out of the loop

    def step(t, carry):
        tt = jnp.where(d == 0, t, T - 1 - t)  # backward walks the time axis reversed
        hb = h_sc[...].astype(jnp.bfloat16)

        def gate(g):
            return gx_ref[0, g, tt] + jnp.dot(hb, whh[g],
                                              preferred_element_type=jnp.float32)

        i_g = _sigmoid(gate(0))
        f_g = _sigmoid(gate(1))
        g_g = jnp.tanh(gate(2))
        o_g = _sigmoid(gate(3))
        c_new = f_g * c_sc[...] + i_g * g_g
        h_new = o_g * jnp.tanh(c_new)
        c_sc[...] = c_new
        h_sc[...] = h_new
        o_ref[0, tt] = h_new
        return carry

    lax.fori_loop(0, T, step, 0, unroll=True)


def bilstm_layer(seq, layer):
    """seq: (T, B, F) time-major.  Returns (T, B, 2H) with [fwd | bwd] features."""
    T, B, F = seq.shape
    Hs = layer["w_hh"].shape[-1]

    # Hoisted input projection for BOTH directions as one lane-dense GEMM:
    # columns of w_ih are [dir0: i,f,g,o | dir1: i,f,g,o], each Hs wide.
    gx = matmul_bias_act(seq.reshape(T * B, F), layer["w_ih"], layer["b"], relu=False)
    gx = gx.reshape(T, B, 2, 4, Hs).transpose(2, 3, 0, 1, 4)   # (2, 4, T, B, Hs)

    out = pl.pallas_call(
        functools.partial(_bilstm_kernel, T=T),
        out_shape=jax.ShapeDtypeStruct((2, T, B, Hs), jnp.float32),
        grid=(2,),                                            # direction axis
        in_specs=[
            pl.BlockSpec((1, 4, T, B, Hs), lambda d: (d, 0, 0, 0, 0)),
            pl.BlockSpec((1, 4, Hs, Hs), lambda d: (d, 0, 0, 0)),
        ],
        out_specs=pl.BlockSpec((1, T, B, Hs), lambda d: (d, 0, 0, 0)),
        scratch_shapes=[pltpu.VMEM((B, Hs), jnp.float32),      # h state
                        pltpu.VMEM((B, Hs), jnp.float32)],     # c state
        compiler_params=pltpu.CompilerParams(dimension_semantics=("parallel",)),
    )(gx, layer["w_hh"])

    return jnp.concatenate([out[0], out[1]], axis=-1)          # (T, B, 2H)


# ----------------------------------------------------------------------------
# Parameters and full forward pass
# ----------------------------------------------------------------------------

def init_params(key, vocab_size, hidden_size=32, num_layers=2):
    def rnd(k, shape, scale=0.05):
        return scale * jax.random.normal(k, shape, dtype=jnp.float32)

    keys = jax.random.split(key, 16)
    p = {
        "conv1_w": rnd(keys[0], (3, 3, 1, 64)),    "conv1_b": rnd(keys[1], (64,)),
        "conv2_w": rnd(keys[2], (3, 3, 64, 128)),  "conv2_b": rnd(keys[3], (128,)),
        "conv3_w": rnd(keys[4], (3, 3, 128, 256)), "conv3_b": rnd(keys[5], (256,)),
    }
    layers = []
    in_f, ki, H = 256, 6, hidden_size
    for _ in range(num_layers):
        layers.append({
            # (In, 8H): columns = [fwd i,f,g,o | bwd i,f,g,o]
            "w_ih": rnd(keys[ki + 0], (in_f, 2 * 4 * H)),
            # single combined bias (b_ih + b_hh in PyTorch terms), same column order
            "b":    rnd(keys[ki + 1], (2 * 4 * H,)),
            # (direction, gate, H_in, H_out)
            "w_hh": rnd(keys[ki + 2], (2, 4, H, H)),
        })
        ki += 3
        in_f = 2 * H
    p["lstm"] = layers
    p["fc_w"] = rnd(keys[ki], (2 * H, vocab_size))
    p["fc_b"] = rnd(keys[ki + 1], (vocab_size,))
    return p


def plate_recognition_forward(params, x_nchw):
    """Matches PlateRecognitionModel.forward.  x_nchw: (N, 1, H, W) float32.
    Returns (T, N, vocab) where T = W // 4 - 1."""
    x = jnp.transpose(x_nchw, (0, 2, 3, 1))                     # NCHW -> NHWC
    x = conv2d_3x3_relu(x, params["conv1_w"], params["conv1_b"])
    x = maxpool2d(x, 2, 2)
    x = conv2d_3x3_relu(x, params["conv2_w"], params["conv2_b"])
    x = maxpool2d(x, 2, 2)
    x = conv2d_3x3_relu(x, params["conv3_w"], params["conv3_b"])
    x = maxpool2d(x, 2, 1)
    x = adaptive_avgpool_h(x)                                   # (N, W', 256)
    seq = jnp.transpose(x, (1, 0, 2))                           # (T, B, 256) time-major

    for layer in params["lstm"]:
        seq = bilstm_layer(seq, layer)                          # (T, B, 2H)

    T, B, F = seq.shape
    vocab = params["fc_b"].shape[0]
    npad = ((vocab + 127) // 128) * 128                         # lane-dense FC output
    fc_w = jnp.pad(params["fc_w"], ((0, 0), (0, npad - vocab)))
    fc_b = jnp.pad(params["fc_b"], ((0, npad - vocab),))
    logits = matmul_bias_act(seq.reshape(T * B, F), fc_w, fc_b, relu=False)[:, :vocab]
    return logits.reshape(T, B, vocab)                          # == torch out.permute(1,0,2)


if __name__ == "__main__":
    key = jax.random.PRNGKey(0)
    pkey, xkey = jax.random.split(key)
    vocab_size, hidden_size, num_layers = 37, 32, 2
    params = init_params(pkey, vocab_size, hidden_size, num_layers)
    # Small input consistent with the module: batch=2, 1 channel, 16x32 image.
    x = jax.random.normal(xkey, (2, 1, 16, 32), dtype=jnp.float32)
    out = jax.jit(plate_recognition_forward)(params, x)
    jax.block_until_ready(out)
    # CNN: 16x32 -> 8x16 -> 4x8 -> 3x7 -> avg over H -> seq len T = 7
    assert out.shape == (7, 2, vocab_size), out.shape
    assert bool(jnp.all(jnp.isfinite(out)))
    print("KERNEL_OK")
</pallas_src>

<mosaic_0001>
module attributes {stable_mosaic.version = 11 : i64} {
  func.func @_conv3x3_relu_kernel(%arg0: i32, %arg1: i32, %arg2: memref<1x18x34x1xf32, #tpu.memory_space<vmem>>, %arg3: memref<9x1x64xf32, #tpu.memory_space<vmem>>, %arg4: memref<1x64xf32, #tpu.memory_space<vmem>>, %arg5: memref<1x1x32x64xf32, #tpu.memory_space<vmem>>) attributes {dimension_semantics = [#tpu.dimension_semantics<parallel>, #tpu.dimension_semantics<arbitrary>], iteration_bounds = array<i64: 2, 16>, scalar_prefetch = 0 : i64, scratch_operands = 0 : i64, tpu.core_type = #tpu.core_type<tc>, window_params = [{transform_indices = @transform_0, window_bounds = array<i64: 1, 18, 34, 1>}, {pipeline_mode = #tpu.pipeline_mode<synchronous>, transform_indices = @transform_1, window_bounds = array<i64: 9, 1, 64>}, {pipeline_mode = #tpu.pipeline_mode<synchronous>, transform_indices = @transform_2, window_bounds = array<i64: 1, 64>}, {transform_indices = @transform_3, window_bounds = array<i64: 1, 1, 32, 64>}]} {
    %cst = arith.constant 0.000000e+00 : f32
    %0 = vector.broadcast %cst : f32 to vector<32x64xf32>
    %c0_i32 = arith.constant 0 : i32
    %1 = arith.addi %arg1, %c0_i32 : i32
    %c0 = arith.constant 0 : index
    %2 = arith.index_cast %1 : i32 to index
    %c0_0 = arith.constant 0 : index
    %c0_1 = arith.constant 0 : index
    %3 = vector.load %arg2[%c0, %2, %c0_0, %c0_1] : memref<1x18x34x1xf32, #tpu.memory_space<vmem>>, vector<1x1x32x1xf32>
    %4 = vector.shape_cast %3 : vector<1x1x32x1xf32> to vector<32x1xf32>
    %c0_2 = arith.constant 0 : index
    %c0_3 = arith.constant 0 : index
    %c0_4 = arith.constant 0 : index
    %5 = vector.load %arg3[%c0_2, %c0_3, %c0_4] : memref<9x1x64xf32, #tpu.memory_space<vmem>>, vector<1x1x64xf32>
    %6 = vector.shape_cast %5 : vector<1x1x64xf32> to vector<1x64xf32>
    %7 = vector.broadcast %4 : vector<32x1xf32> to vector<32x64xf32>
    %8 = vector.broadcast %6 : vector<1x64xf32> to vector<32x64xf32>
    %9 = arith.mulf %7, %8 : vector<32x64xf32>
    %10 = arith.addf %0, %9 : vector<32x64xf32>
    %c0_i32_5 = arith.constant 0 : i32
    %11 = arith.addi %arg1, %c0_i32_5 : i32
    %c0_6 = arith.constant 0 : index
    %12 = arith.index_cast %11 : i32 to index
    %c1 = arith.constant 1 : index
    %c0_7 = arith.constant 0 : index
    %13 = vector.load %arg2[%c0_6, %12, %c1, %c0_7] : memref<1x18x34x1xf32, #tpu.memory_space<vmem>>, vector<1x1x32x1xf32>
    %14 = vector.shape_cast %13 : vector<1x1x32x1xf32> to vector<32x1xf32>
    %c1_8 = arith.constant 1 : index
    %c0_9 = arith.constant 0 : index
    %c0_10 = arith.constant 0 : index
    %15 = vector.load %arg3[%c1_8, %c0_9, %c0_10] : memref<9x1x64xf32, #tpu.memory_space<vmem>>, vector<1x1x64xf32>
    %16 = vector.shape_cast %15 : vector<1x1x64xf32> to vector<1x64xf32>
    %17 = vector.broadcast %14 : vector<32x1xf32> to vector<32x64xf32>
    %18 = vector.broadcast %16 : vector<1x64xf32> to vector<32x64xf32>
    %19 = arith.mulf %17, %18 : vector<32x64xf32>
    %20 = arith.addf %10, %19 : vector<32x64xf32>
    %c0_i32_11 = arith.constant 0 : i32
    %21 = arith.addi %arg1, %c0_i32_11 : i32
    %c0_12 = arith.constant 0 : index
    %22 = arith.index_cast %21 : i32 to index
    %c2 = arith.constant 2 : index
    %c0_13 = arith.constant 0 : index
    %23 = vector.load %arg2[%c0_12, %22, %c2, %c0_13] : memref<1x18x34x1xf32, #tpu.memory_space<vmem>>, vector<1x1x32x1xf32>
    %24 = vector.shape_cast %23 : vector<1x1x32x1xf32> to vector<32x1xf32>
    %c2_14 = arith.constant 2 : index
    %c0_15 = arith.constant 0 : index
    %c0_16 = arith.constant 0 : index
    %25 = vector.load %arg3[%c2_14, %c0_15, %c0_16] : memref<9x1x64xf32, #tpu.memory_space<vmem>>, vector<1x1x64xf32>
    %26 = vector.shape_cast %25 : vector<1x1x64xf32> to vector<1x64xf32>
    %27 = vector.broadcast %24 : vector<32x1xf32> to vector<32x64xf32>
    %28 = vector.broadcast %26 : vector<1x64xf32> to vector<32x64xf32>
    %29 = arith.mulf %27, %28 : vector<32x64xf32>
    %30 = arith.addf %20, %29 : vector<32x64xf32>
    %c1_i32 = arith.constant 1 : i32
    %31 = arith.addi %arg1, %c1_i32 : i32
    %c0_17 = arith.constant 0 : index
    %32 = arith.index_cast %31 : i32 to index
    %c0_18 = arith.constant 0 : index
    %c0_19 = arith.constant 0 : index
    %33 = vector.load %arg2[%c0_17, %32, %c0_18, %c0_19] : memref<1x18x34x1xf32, #tpu.memory_space<vmem>>, vector<1x1x32x1xf32>
    %34 = vector.shape_cast %33 : vector<1x1x32x1xf32> to vector<32x1xf32>
    %c3 = arith.constant 3 : index
    %c0_20 = arith.constant 0 : index
    %c0_21 = arith.constant 0 : index
    %35 = vector.load %arg3[%c3, %c0_20, %c0_21] : memref<9x1x64xf32, #tpu.memory_space<vmem>>, vector<1x1x64xf32>
    %36 = vector.shape_cast %35 : vector<1x1x64xf32> to vector<1x64xf32>
    %37 = vector.broadcast %34 : vector<32x1xf32> to vector<32x64xf32>
    %38 = vector.broadcast %36 : vector<1x64xf32> to vector<32x64xf32>
    %39 = arith.mulf %37, %38 : vector<32x64xf32>
    %40 = arith.addf %30, %39 : vector<32x64xf32>
    %c1_i32_22 = arith.constant 1 : i32
    %41 = arith.addi %arg1, %c1_i32_22 : i32
    %c0_23 = arith.constant 0 : index
    %42 = arith.index_cast %41 : i32 to index
    %c1_24 = arith.constant 1 : index
    %c0_25 = arith.constant 0 : index
    %43 = vector.load %arg2[%c0_23, %42, %c1_24, %c0_25] : memref<1x18x34x1xf32, #tpu.memory_space<vmem>>, vector<1x1x32x1xf32>
    %44 = vector.shape_cast %43 : vector<1x1x32x1xf32> to vector<32x1xf32>
    %c4 = arith.constant 4 : index
    %c0_26 = arith.constant 0 : index
    %c0_27 = arith.constant 0 : index
    %45 = vector.load %arg3[%c4, %c0_26, %c0_27] : memref<9x1x64xf32, #tpu.memory_space<vmem>>, vector<1x1x64xf32>
    %46 = vector.shape_cast %45 : vector<1x1x64xf32> to vector<1x64xf32>
    %47 = vector.broadcast %44 : vector<32x1xf32> to vector<32x64xf32>
    %48 = vector.broadcast %46 : vector<1x64xf32> to vector<32x64xf32>
    %49 = arith.mulf %47, %48 : vector<32x64xf32>
    %50 = arith.addf %40, %49 : vector<32x64xf32>
    %c1_i32_28 = arith.constant 1 : i32
    %51 = arith.addi %arg1, %c1_i32_28 : i32
    %c0_29 = arith.constant 0 : index
    %52 = arith.index_cast %51 : i32 to index
    %c2_30 = arith.constant 2 : index
    %c0_31 = arith.constant 0 : index
    %53 = vector.load %arg2[%c0_29, %52, %c2_30, %c0_31] : memref<1x18x34x1xf32, #tpu.memory_space<vmem>>, vector<1x1x32x1xf32>
    %54 = vector.shape_cast %53 : vector<1x1x32x1xf32> to vector<32x1xf32>
    %c5 = arith.constant 5 : index
    %c0_32 = arith.constant 0 : index
    %c0_33 = arith.constant 0 : index
    %55 = vector.load %arg3[%c5, %c0_32, %c0_33] : memref<9x1x64xf32, #tpu.memory_space<vmem>>, vector<1x1x64xf32>
    %56 = vector.shape_cast %55 : vector<1x1x64xf32> to vector<1x64xf32>
    %57 = vector.broadcast %54 : vector<32x1xf32> to vector<32x64xf32>
    %58 = vector.broadcast %56 : vector<1x64xf32> to vector<32x64xf32>
    %59 = arith.mulf %57, %58 : vector<32x64xf32>
    %60 = arith.addf %50, %59 : vector<32x64xf32>
    %c2_i32 = arith.constant 2 : i32
    %61 = arith.addi %arg1, %c2_i32 : i32
    %c0_34 = arith.constant 0 : index
    %62 = arith.index_cast %61 : i32 to index
    %c0_35 = arith.constant 0 : index
    %c0_36 = arith.constant 0 : index
    %63 = vector.load %arg2[%c0_34, %62, %c0_35, %c0_36] : memref<1x18x34x1xf32, #tpu.memory_space<vmem>>, vector<1x1x32x1xf32>
    %64 = vector.shape_cast %63 : vector<1x1x32x1xf32> to vector<32x1xf32>
    %c6 = arith.constant 6 : index
    %c0_37 = arith.constant 0 : index
    %c0_38 = arith.constant 0 : index
    %65 = vector.load %arg3[%c6, %c0_37, %c0_38] : memref<9x1x64xf32, #tpu.memory_space<vmem>>, vector<1x1x64xf32>
    %66 = vector.shape_cast %65 : vector<1x1x64xf32> to vector<1x64xf32>
    %67 = vector.broadcast %64 : vector<32x1xf32> to vector<32x64xf32>
    %68 = vector.broadcast %66 : vector<1x64xf32> to vector<32x64xf32>
    %69 = arith.mulf %67, %68 : vector<32x64xf32>
    %70 = arith.addf %60, %69 : vector<32x64xf32>
    %c2_i32_39 = arith.constant 2 : i32
    %71 = arith.addi %arg1, %c2_i32_39 : i32
    %c0_40 = arith.constant 0 : index
    %72 = arith.index_cast %71 : i32 to index
    %c1_41 = arith.constant 1 : index
    %c0_42 = arith.constant 0 : index
    %73 = vector.load %arg2[%c0_40, %72, %c1_41, %c0_42] : memref<1x18x34x1xf32, #tpu.memory_space<vmem>>, vector<1x1x32x1xf32>
    %74 = vector.shape_cast %73 : vector<1x1x32x1xf32> to vector<32x1xf32>
    %c7 = arith.constant 7 : index
    %c0_43 = arith.constant 0 : index
    %c0_44 = arith.constant 0 : index
    %75 = vector.load %arg3[%c7, %c0_43, %c0_44] : memref<9x1x64xf32, #tpu.memory_space<vmem>>, vector<1x1x64xf32>
    %76 = vector.shape_cast %75 : vector<1x1x64xf32> to vector<1x64xf32>
    %77 = vector.broadcast %74 : vector<32x1xf32> to vector<32x64xf32>
    %78 = vector.broadcast %76 : vector<1x64xf32> to vector<32x64xf32>
    %79 = arith.mulf %77, %78 : vector<32x64xf32>
    %80 = arith.addf %70, %79 : vector<32x64xf32>
    %c2_i32_45 = arith.constant 2 : i32
    %81 = arith.addi %arg1, %c2_i32_45 : i32
    %c0_46 = arith.constant 0 : index
    %82 = arith.index_cast %81 : i32 to index
    %c2_47 = arith.constant 2 : index
    %c0_48 = arith.constant 0 : index
    %83 = vector.load %arg2[%c0_46, %82, %c2_47, %c0_48] : memref<1x18x34x1xf32, #tpu.memory_space<vmem>>, vector<1x1x32x1xf32>
    %84 = vector.shape_cast %83 : vector<1x1x32x1xf32> to vector<32x1xf32>
    %c8 = arith.constant 8 : index
    %c0_49 = arith.constant 0 : index
    %c0_50 = arith.constant 0 : index
    %85 = vector.load %arg3[%c8, %c0_49, %c0_50] : memref<9x1x64xf32, #tpu.memory_space<vmem>>, vector<1x1x64xf32>
    %86 = vector.shape_cast %85 : vector<1x1x64xf32> to vector<1x64xf32>
    %87 = vector.broadcast %84 : vector<32x1xf32> to vector<32x64xf32>
    %88 = vector.broadcast %86 : vector<1x64xf32> to vector<32x64xf32>
    %89 = arith.mulf %87, %88 : vector<32x64xf32>
    %90 = arith.addf %80, %89 : vector<32x64xf32>
    %c0_51 = arith.constant 0 : index
    %c0_52 = arith.constant 0 : index
    %91 = vector.load %arg4[%c0_51, %c0_52] : memref<1x64xf32, #tpu.memory_space<vmem>>, vector<1x64xf32>
    %92 = vector.broadcast %91 : vector<1x64xf32> to vector<32x64xf32>
    %93 = arith.addf %90, %92 : vector<32x64xf32>
    %cst_53 = arith.constant 0.000000e+00 : f32
    %94 = vector.broadcast %cst_53 : f32 to vector<32x64xf32>
    %95 = arith.maximumf %93, %94 : vector<32x64xf32>
    %c0_54 = arith.constant 0 : index
    %c0_55 = arith.constant 0 : index
    %c0_56 = arith.constant 0 : index
    %c0_57 = arith.constant 0 : index
    %96 = vector.load %arg5[%c0_54, %c0_55, %c0_56, %c0_57] : memref<1x1x32x64xf32, #tpu.memory_space<vmem>>, vector<1x1x32x64xf32>
    %97 = vector.shape_cast %96 : vector<1x1x32x64xf32> to vector<32x64xf32>
    %98 = vector.shape_cast %95 : vector<32x64xf32> to vector<1x1x32x64xf32>
    tpu.vector_store %arg5[%c0_54, %c0_55, %c0_56, %c0_57], %98 {strides = array<i32>} : memref<1x1x32x64xf32, #tpu.memory_space<vmem>>, vector<1x1x32x64xf32>,
    return
  }
  func.func @transform_0(%arg0: i32, %arg1: i32) -> (i32, i32, i32, i32) {
    %c0_i32 = arith.constant 0 : i32
    %c0_i32_0 = arith.constant 0 : i32
    %c0_i32_1 = arith.constant 0 : i32
    %c0_i32_2 = arith.constant 0 : i32
    return %arg0, %c0_i32, %c0_i32_0, %c0_i32_1 : i32, i32, i32, i32
  }
  func.func @transform_1(%arg0: i32, %arg1: i32) -> (i32, i32, i32) {
    %c0_i32 = arith.constant 0 : i32
    %c0_i32_0 = arith.constant 0 : i32
    %c0_i32_1 = arith.constant 0 : i32
    %c0_i32_2 = arith.constant 0 : i32
    return %c0_i32, %c0_i32_0, %c0_i32_1 : i32, i32, i32
  }
  func.func @transform_2(%arg0: i32, %arg1: i32) -> (i32, i32) {
    %c0_i32 = arith.constant 0 : i32
    %c0_i32_0 = arith.constant 0 : i32
    %c0_i32_1 = arith.constant 0 : i32
    return %c0_i32, %c0_i32_0 : i32, i32
  }
  func.func @transform_3(%arg0: i32, %arg1: i32) -> (i32, i32, i32, i32) {
    %c0_i32 = arith.constant 0 : i32
    %c0_i32_0 = arith.constant 0 : i32
    %c0_i32_1 = arith.constant 0 : i32
    return %arg0, %arg1, %c0_i32, %c0_i32_0 : i32, i32, i32, i32
  }
}

module attributes {stable_mosaic.version = 11 : i64} {
  func.func @kernel(%arg0: i32, %arg1: memref<1x8x16x64xf32, #tpu.memory_space<vmem>>, %arg2: memref<1x8x16x64xf32, #tpu.memory_space<vmem>>, %arg3: memref<1x8x16x64xf32, #tpu.memory_space<vmem>>, %arg4: memref<1x8x16x64xf32, #tpu.memory_space<vmem>>, %arg5: memref<1x8x16x64xf32, #tpu.memory_space<vmem>>) attributes {dimension_semantics = [#tpu.dimension_semantics<parallel>], iteration_bounds = array<i64: 2>, scalar_prefetch = 0 : i64, scratch_operands = 0 : i64, tpu.core_type = #tpu.core_type<tc>, window_params = [{transform_indices = @transform_0, window_bounds = array<i64: 1, 8, 16, 64>}, {transform_indices = @transform_1, window_bounds = array<i64: 1, 8, 16, 64>}, {transform_indices = @transform_2, window_bounds = array<i64: 1, 8, 16, 64>}, {transform_indices = @transform_3, window_bounds = array<i64: 1, 8, 16, 64>}, {transform_indices = @transform_4, window_bounds = array<i64: 1, 8, 16, 64>}]} {
    %c0 = arith.constant 0 : index
    %c0_0 = arith.constant 0 : index
    %c0_1 = arith.constant 0 : index
    %c0_2 = arith.constant 0 : index
    %0 = vector.load %arg1[%c0, %c0_0, %c0_1, %c0_2] : memref<1x8x16x64xf32, #tpu.memory_space<vmem>>, vector<1x8x16x64xf32>
    %c0_3 = arith.constant 0 : index
    %c0_4 = arith.constant 0 : index
    %c0_5 = arith.constant 0 : index
    %c0_6 = arith.constant 0 : index
    %1 = vector.load %arg2[%c0_3, %c0_4, %c0_5, %c0_6] : memref<1x8x16x64xf32, #tpu.memory_space<vmem>>, vector<1x8x16x64xf32>
    %2 = arith.maximumf %0, %1 : vector<1x8x16x64xf32>
    %c0_7 = arith.constant 0 : index
    %c0_8 = arith.constant 0 : index
    %c0_9 = arith.constant 0 : index
    %c0_10 = arith.constant 0 : index
    %3 = vector.load %arg3[%c0_7, %c0_8, %c0_9, %c0_10] : memref<1x8x16x64xf32, #tpu.memory_space<vmem>>, vector<1x8x16x64xf32>
    %4 = arith.maximumf %2, %3 : vector<1x8x16x64xf32>
    %c0_11 = arith.constant 0 : index
    %c0_12 = arith.constant 0 : index
    %c0_13 = arith.constant 0 : index
    %c0_14 = arith.constant 0 : index
    %5 = vector.load %arg4[%c0_11, %c0_12, %c0_13, %c0_14] : memref<1x8x16x64xf32, #tpu.memory_space<vmem>>, vector<1x8x16x64xf32>
    %6 = arith.maximumf %4, %5 : vector<1x8x16x64xf32>
    %c0_15 = arith.constant 0 : index
    %c0_16 = arith.constant 0 : index
    %c0_17 = arith.constant 0 : index
    %c0_18 = arith.constant 0 : index
    %7 = vector.load %arg5[%c0_15, %c0_16, %c0_17, %c0_18] : memref<1x8x16x64xf32, #tpu.memory_space<vmem>>, vector<1x8x16x64xf32>
    tpu.vector_store %arg5[%c0_15, %c0_16, %c0_17, %c0_18], %6 {strides = array<i32>} : memref<1x8x16x64xf32, #tpu.memory_space<vmem>>, vector<1x8x16x64xf32>,
    return
  }
  func.func @transform_0(%arg0: i32) -> (i32, i32, i32, i32) {
    %c0_i32 = arith.constant 0 : i32
    %c0_i32_0 = arith.constant 0 : i32
    %c0_i32_1 = arith.constant 0 : i32
    %c0_i32_2 = arith.constant 0 : i32
    return %arg0, %c0_i32, %c0_i32_0, %c0_i32_1 : i32, i32, i32, i32
  }
  func.func @transform_1(%arg0: i32) -> (i32, i32, i32, i32) {
    %c0_i32 = arith.constant 0 : i32
    %c0_i32_0 = arith.constant 0 : i32
    %c0_i32_1 = arith.constant 0 : i32
    %c0_i32_2 = arith.constant 0 : i32
    return %arg0, %c0_i32, %c0_i32_0, %c0_i32_1 : i32, i32, i32, i32
  }
  func.func @transform_2(%arg0: i32) -> (i32, i32, i32, i32) {
    %c0_i32 = arith.constant 0 : i32
    %c0_i32_0 = arith.constant 0 : i32
    %c0_i32_1 = arith.constant 0 : i32
    %c0_i32_2 = arith.constant 0 : i32
    return %arg0, %c0_i32, %c0_i32_0, %c0_i32_1 : i32, i32, i32, i32
  }
  func.func @transform_3(%arg0: i32) -> (i32, i32, i32, i32) {
    %c0_i32 = arith.constant 0 : i32
    %c0_i32_0 = arith.constant 0 : i32
    %c0_i32_1 = arith.constant 0 : i32
    %c0_i32_2 = arith.constant 0 : i32
    return %arg0, %c0_i32, %c0_i32_0, %c0_i32_1 : i32, i32, i32, i32
  }
  func.func @transform_4(%arg0: i32) -> (i32, i32, i32, i32) {
    %c0_i32 = arith.constant 0 : i32
    %c0_i32_0 = arith.constant 0 : i32
    %c0_i32_1 = arith.constant 0 : i32
    %c0_i32_2 = arith.constant 0 : i32
    return %arg0, %c0_i32, %c0_i32_0, %c0_i32_1 : i32, i32, i32, i32
  }
}

module attributes {stable_mosaic.version = 11 : i64} {
  func.func @_conv3x3_relu_kernel(%arg0: i32, %arg1: i32, %arg2: memref<1x10x18x64xf32, #tpu.memory_space<vmem>>, %arg3: memref<9x64x128xf32, #tpu.memory_space<vmem>>, %arg4: memref<1x128xf32, #tpu.memory_space<vmem>>, %arg5: memref<1x1x16x128xf32, #tpu.memory_space<vmem>>) attributes {dimension_semantics = [#tpu.dimension_semantics<parallel>, #tpu.dimension_semantics<arbitrary>], iteration_bounds = array<i64: 2, 8>, scalar_prefetch = 0 : i64, scratch_operands = 0 : i64, tpu.core_type = #tpu.core_type<tc>, window_params = [{transform_indices = @transform_0, window_bounds = array<i64: 1, 10, 18, 64>}, {pipeline_mode = #tpu.pipeline_mode<synchronous>, transform_indices = @transform_1, window_bounds = array<i64: 9, 64, 128>}, {pipeline_mode = #tpu.pipeline_mode<synchronous>, transform_indices = @transform_2, window_bounds = array<i64: 1, 128>}, {transform_indices = @transform_3, window_bounds = array<i64: 1, 1, 16, 128>}]} {
    %cst = arith.constant 0.000000e+00 : f32
    %0 = vector.broadcast %cst : f32 to vector<16x128xf32>
    %c0_i32 = arith.constant 0 : i32
    %1 = arith.addi %arg1, %c0_i32 : i32
    %c0 = arith.constant 0 : index
    %2 = arith.index_cast %1 : i32 to index
    %c0_0 = arith.constant 0 : index
    %c0_1 = arith.constant 0 : index
    %3 = vector.load %arg2[%c0, %2, %c0_0, %c0_1] : memref<1x10x18x64xf32, #tpu.memory_space<vmem>>, vector<1x1x16x64xf32>
    %4 = vector.shape_cast %3 : vector<1x1x16x64xf32> to vector<16x64xf32>
    %c0_2 = arith.constant 0 : index
    %c0_3 = arith.constant 0 : index
    %c0_4 = arith.constant 0 : index
    %5 = vector.load %arg3[%c0_2, %c0_3, %c0_4] : memref<9x64x128xf32, #tpu.memory_space<vmem>>, vector<1x64x128xf32>
    %6 = vector.shape_cast %5 : vector<1x64x128xf32> to vector<64x128xf32>
    %7 = arith.truncf %4 : vector<16x64xf32> to vector<16x64xbf16>
    %8 = arith.truncf %6 : vector<64x128xf32> to vector<64x128xbf16>
    %cst_5 = arith.constant dense<0.000000e+00> : vector<16x128xf32>
    %9 = tpu.matmul %7, %8, %cst_5 {dimension_numbers = #tpu.dot_dimension_numbers<[1], [0], [0], [1], [0, 0, 1, 1], [], []>} : vector<16x64xbf16>, vector<64x128xbf16>, vector<16x128xf32> -> vector<16x128xf32>
    %10 = arith.addf %0, %9 : vector<16x128xf32>
    %c0_i32_6 = arith.constant 0 : i32
    %11 = arith.addi %arg1, %c0_i32_6 : i32
    %c0_7 = arith.constant 0 : index
    %12 = arith.index_cast %11 : i32 to index
    %c1 = arith.constant 1 : index
    %c0_8 = arith.constant 0 : index
    %13 = vector.load %arg2[%c0_7, %12, %c1, %c0_8] : memref<1x10x18x64xf32, #tpu.memory_space<vmem>>, vector<1x1x16x64xf32>
    %14 = vector.shape_cast %13 : vector<1x1x16x64xf32> to vector<16x64xf32>
    %c1_9 = arith.constant 1 : index
    %c0_10 = arith.constant 0 : index
    %c0_11 = arith.constant 0 : index
    %15 = vector.load %arg3[%c1_9, %c0_10, %c0_11] : memref<9x64x128xf32, #tpu.memory_space<vmem>>, vector<1x64x128xf32>
    %16 = vector.shape_cast %15 : vector<1x64x128xf32> to vector<64x128xf32>
    %17 = arith.truncf %14 : vector<16x64xf32> to vector<16x64xbf16>
    %18 = arith.truncf %16 : vector<64x128xf32> to vector<64x128xbf16>
    %cst_12 = arith.constant dense<0.000000e+00> : vector<16x128xf32>
    %19 = tpu.matmul %17, %18, %cst_12 {dimension_numbers = #tpu.dot_dimension_numbers<[1], [0], [0], [1], [0, 0, 1, 1], [], []>} : vector<16x64xbf16>, vector<64x128xbf16>, vector<16x128xf32> -> vector<16x128xf32>
    %20 = arith.addf %10, %19 : vector<16x128xf32>
    %c0_i32_13 = arith.constant 0 : i32
    %21 = arith.addi %arg1, %c0_i32_13 : i32
    %c0_14 = arith.constant 0 : index
    %22 = arith.index_cast %21 : i32 to index
    %c2 = arith.constant 2 : index
    %c0_15 = arith.constant 0 : index
    %23 = vector.load %arg2[%c0_14, %22, %c2, %c0_15] : memref<1x10x18x64xf32, #tpu.memory_space<vmem>>, vector<1x1x16x64xf32>
    %24 = vector.shape_cast %23 : vector<1x1x16x64xf32> to vector<16x64xf32>
    %c2_16 = arith.constant 2 : index
    %c0_17 = arith.constant 0 : index
    %c0_18 = arith.constant 0 : index
    %25 = vector.load %arg3[%c2_16, %c0_17, %c0_18] : memref<9x64x128xf32, #tpu.memory_space<vmem>>, vector<1x64x128xf32>
    %26 = vector.shape_cast %25 : vector<1x64x128xf32> to vector<64x128xf32>
    %27 = arith.truncf %24 : vector<16x64xf32> to vector<16x64xbf16>
    %28 = arith.truncf %26 : vector<64x128xf32> to vector<64x128xbf16>
    %cst_19 = arith.constant dense<0.000000e+00> : vector<16x128xf32>
    %29 = tpu.matmul %27, %28, %cst_19 {dimension_numbers = #tpu.dot_dimension_numbers<[1], [0], [0], [1], [0, 0, 1, 1], [], []>} : vector<16x64xbf16>, vector<64x128xbf16>, vector<16x128xf32> -> vector<16x128xf32>
    %30 = arith.addf %20, %29 : vector<16x128xf32>
    %c1_i32 = arith.constant 1 : i32
    %31 = arith.addi %arg1, %c1_i32 : i32
    %c0_20 = arith.constant 0 : index
    %32 = arith.index_cast %31 : i32 to index
    %c0_21 = arith.constant 0 : index
    %c0_22 = arith.constant 0 : index
    %33 = vector.load %arg2[%c0_20, %32, %c0_21, %c0_22] : memref<1x10x18x64xf32, #tpu.memory_space<vmem>>, vector<1x1x16x64xf32>
    %34 = vector.shape_cast %33 : vector<1x1x16x64xf32> to vector<16x64xf32>
    %c3 = arith.constant 3 : index
    %c0_23 = arith.constant 0 : index
    %c0_24 = arith.constant 0 : index
    %35 = vector.load %arg3[%c3, %c0_23, %c0_24] : memref<9x64x128xf32, #tpu.memory_space<vmem>>, vector<1x64x128xf32>
    %36 = vector.shape_cast %35 : vector<1x64x128xf32> to vector<64x128xf32>
    %37 = arith.truncf %34 : vector<16x64xf32> to vector<16x64xbf16>
    %38 = arith.truncf %36 : vector<64x128xf32> to vector<64x128xbf16>
    %cst_25 = arith.constant dense<0.000000e+00> : vector<16x128xf32>
    %39 = tpu.matmul %37, %38, %cst_25 {dimension_numbers = #tpu.dot_dimension_numbers<[1], [0], [0], [1], [0, 0, 1, 1], [], []>} : vector<16x64xbf16>, vector<64x128xbf16>, vector<16x128xf32> -> vector<16x128xf32>
    %40 = arith.addf %30, %39 : vector<16x128xf32>
    %c1_i32_26 = arith.constant 1 : i32
    %41 = arith.addi %arg1, %c1_i32_26 : i32
    %c0_27 = arith.constant 0 : index
    %42 = arith.index_cast %41 : i32 to index
    %c1_28 = arith.constant 1 : index
    %c0_29 = arith.constant 0 : index
    %43 = vector.load %arg2[%c0_27, %42, %c1_28, %c0_29] : memref<1x10x18x64xf32, #tpu.memory_space<vmem>>, vector<1x1x16x64xf32>
    %44 = vector.shape_cast %43 : vector<1x1x16x64xf32> to vector<16x64xf32>
    %c4 = arith.constant 4 : index
    %c0_30 = arith.constant 0 : index
    %c0_31 = arith.constant 0 : index
    %45 = vector.load %arg3[%c4, %c0_30, %c0_31] : memref<9x64x128xf32, #tpu.memory_space<vmem>>, vector<1x64x128xf32>
    %46 = vector.shape_cast %45 : vector<1x64x128xf32> to vector<64x128xf32>
    %47 = arith.truncf %44 : vector<16x64xf32> to vector<16x64xbf16>
    %48 = arith.truncf %46 : vector<64x128xf32> to vector<64x128xbf16>
    %cst_32 = arith.constant dense<0.000000e+00> : vector<16x128xf32>
    %49 = tpu.matmul %47, %48, %cst_32 {dimension_numbers = #tpu.dot_dimension_numbers<[1], [0], [0], [1], [0, 0, 1, 1], [], []>} : vector<16x64xbf16>, vector<64x128xbf16>, vector<16x128xf32> -> vector<16x128xf32>
    %50 = arith.addf %40, %49 : vector<16x128xf32>
    %c1_i32_33 = arith.constant 1 : i32
    %51 = arith.addi %arg1, %c1_i32_33 : i32
    %c0_34 = arith.constant 0 : index
    %52 = arith.index_cast %51 : i32 to index
    %c2_35 = arith.constant 2 : index
    %c0_36 = arith.constant 0 : index
    %53 = vector.load %arg2[%c0_34, %52, %c2_35, %c0_36] : memref<1x10x18x64xf32, #tpu.memory_space<vmem>>, vector<1x1x16x64xf32>
    %54 = vector.shape_cast %53 : vector<1x1x16x64xf32> to vector<16x64xf32>
    %c5 = arith.constant 5 : index
    %c0_37 = arith.constant 0 : index
    %c0_38 = arith.constant 0 : index
    %55 = vector.load %arg3[%c5, %c0_37, %c0_38] : memref<9x64x128xf32, #tpu.memory_space<vmem>>, vector<1x64x128xf32>
    %56 = vector.shape_cast %55 : vector<1x64x128xf32> to vector<64x128xf32>
    %57 = arith.truncf %54 : vector<16x64xf32> to vector<16x64xbf16>
    %58 = arith.truncf %56 : vector<64x128xf32> to vector<64x128xbf16>
    %cst_39 = arith.constant dense<0.000000e+00> : vector<16x128xf32>
    %59 = tpu.matmul %57, %58, %cst_39 {dimension_numbers = #tpu.dot_dimension_numbers<[1], [0], [0], [1], [0, 0, 1, 1], [], []>} : vector<16x64xbf16>, vector<64x128xbf16>, vector<16x128xf32> -> vector<16x128xf32>
    %60 = arith.addf %50, %59 : vector<16x128xf32>
    %c2_i32 = arith.constant 2 : i32
    %61 = arith.addi %arg1, %c2_i32 : i32
    %c0_40 = arith.constant 0 : index
    %62 = arith.index_cast %61 : i32 to index
    %c0_41 = arith.constant 0 : index
    %c0_42 = arith.constant 0 : index
    %63 = vector.load %arg2[%c0_40, %62, %c0_41, %c0_42] : memref<1x10x18x64xf32, #tpu.memory_space<vmem>>, vector<1x1x16x64xf32>
    %64 = vector.shape_cast %63 : vector<1x1x16x64xf32> to vector<16x64xf32>
    %c6 = arith.constant 6 : index
    %c0_43 = arith.constant 0 : index
    %c0_44 = arith.constant 0 : index
    %65 = vector.load %arg3[%c6, %c0_43, %c0_44] : memref<9x64x128xf32, #tpu.memory_space<vmem>>, vector<1x64x128xf32>
    %66 = vector.shape_cast %65 : vector<1x64x128xf32> to vector<64x128xf32>
    %67 = arith.truncf %64 : vector<16x64xf32> to vector<16x64xbf16>
    %68 = arith.truncf %66 : vector<64x128xf32> to vector<64x128xbf16>
    %cst_45 = arith.constant dense<0.000000e+00> : vector<16x128xf32>
    %69 = tpu.matmul %67, %68, %cst_45 {dimension_numbers = #tpu.dot_dimension_numbers<[1], [0], [0], [1], [0, 0, 1, 1], [], []>} : vector<16x64xbf16>, vector<64x128xbf16>, vector<16x128xf32> -> vector<16x128xf32>
    %70 = arith.addf %60, %69 : vector<16x128xf32>
    %c2_i32_46 = arith.constant 2 : i32
    %71 = arith.addi %arg1, %c2_i32_46 : i32
    %c0_47 = arith.constant 0 : index
    %72 = arith.index_cast %71 : i32 to index
    %c1_48 = arith.constant 1 : index
    %c0_49 = arith.constant 0 : index
    %73 = vector.load %arg2[%c0_47, %72, %c1_48, %c0_49] : memref<1x10x18x64xf32, #tpu.memory_space<vmem>>, vector<1x1x16x64xf32>
    %74 = vector.shape_cast %73 : vector<1x1x16x64xf32> to vector<16x64xf32>
    %c7 = arith.constant 7 : index
    %c0_50 = arith.constant 0 : index
    %c0_51 = arith.constant 0 : index
    %75 = vector.load %arg3[%c7, %c0_50, %c0_51] : memref<9x64x128xf32, #tpu.memory_space<vmem>>, vector<1x64x128xf32>
    %76 = vector.shape_cast %75 : vector<1x64x128xf32> to vector<64x128xf32>
    %77 = arith.truncf %74 : vector<16x64xf32> to vector<16x64xbf16>
    %78 = arith.truncf %76 : vector<64x128xf32> to vector<64x128xbf16>
    %cst_52 = arith.constant dense<0.000000e+00> : vector<16x128xf32>
    %79 = tpu.matmul %77, %78, %cst_52 {dimension_numbers = #tpu.dot_dimension_numbers<[1], [0], [0], [1], [0, 0, 1, 1], [], []>} : vector<16x64xbf16>, vector<64x128xbf16>, vector<16x128xf32> -> vector<16x128xf32>
    %80 = arith.addf %70, %79 : vector<16x128xf32>
    %c2_i32_53 = arith.constant 2 : i32
    %81 = arith.addi %arg1, %c2_i32_53 : i32
    %c0_54 = arith.constant 0 : index
    %82 = arith.index_cast %81 : i32 to index
    %c2_55 = arith.constant 2 : index
    %c0_56 = arith.constant 0 : index
    %83 = vector.load %arg2[%c0_54, %82, %c2_55, %c0_56] : memref<1x10x18x64xf32, #tpu.memory_space<vmem>>, vector<1x1x16x64xf32>
    %84 = vector.shape_cast %83 : vector<1x1x16x64xf32> to vector<16x64xf32>
    %c8 = arith.constant 8 : index
    %c0_57 = arith.constant 0 : index
    %c0_58 = arith.constant 0 : index
    %85 = vector.load %arg3[%c8, %c0_57, %c0_58] : memref<9x64x128xf32, #tpu.memory_space<vmem>>, vector<1x64x128xf32>
    %86 = vector.shape_cast %85 : vector<1x64x128xf32> to vector<64x128xf32>
    %87 = arith.truncf %84 : vector<16x64xf32> to vector<16x64xbf16>
    %88 = arith.truncf %86 : vector<64x128xf32> to vector<64x128xbf16>
    %cst_59 = arith.constant dense<0.000000e+00> : vector<16x128xf32>
    %89 = tpu.matmul %87, %88, %cst_59 {dimension_numbers = #tpu.dot_dimension_numbers<[1], [0], [0], [1], [0, 0, 1, 1], [], []>} : vector<16x64xbf16>, vector<64x128xbf16>, vector<16x128xf32> -> vector<16x128xf32>
    %90 = arith.addf %80, %89 : vector<16x128xf32>
    %c0_60 = arith.constant 0 : index
    %c0_61 = arith.constant 0 : index
    %91 = vector.load %arg4[%c0_60, %c0_61] : memref<1x128xf32, #tpu.memory_space<vmem>>, vector<1x128xf32>
    %92 = vector.broadcast %91 : vector<1x128xf32> to vector<16x128xf32>
    %93 = arith.addf %90, %92 : vector<16x128xf32>
    %cst_62 = arith.constant 0.000000e+00 : f32
    %94 = vector.broadcast %cst_62 : f32 to vector<16x128xf32>
    %95 = arith.maximumf %93, %94 : vector<16x128xf32>
    %c0_63 = arith.constant 0 : index
    %c0_64 = arith.constant 0 : index
    %c0_65 = arith.constant 0 : index
    %c0_66 = arith.constant 0 : index
    %96 = vector.load %arg5[%c0_63, %c0_64, %c0_65, %c0_66] : memref<1x1x16x128xf32, #tpu.memory_space<vmem>>, vector<1x1x16x128xf32>
    %97 = vector.shape_cast %96 : vector<1x1x16x128xf32> to vector<16x128xf32>
    %98 = vector.shape_cast %95 : vector<16x128xf32> to vector<1x1x16x128xf32>
    tpu.vector_store %arg5[%c0_63, %c0_64, %c0_65, %c0_66], %98 {strides = array<i32>} : memref<1x1x16x128xf32, #tpu.memory_space<vmem>>, vector<1x1x16x128xf32>,
    return
  }
  func.func @transform_0(%arg0: i32, %arg1: i32) -> (i32, i32, i32, i32) {
    %c0_i32 = arith.constant 0 : i32
    %c0_i32_0 = arith.constant 0 : i32
    %c0_i32_1 = arith.constant 0 : i32
    %c0_i32_2 = arith.constant 0 : i32
    return %arg0, %c0_i32, %c0_i32_0, %c0_i32_1 : i32, i32, i32, i32
  }
  func.func @transform_1(%arg0: i32, %arg1: i32) -> (i32, i32, i32) {
    %c0_i32 = arith.constant 0 : i32
    %c0_i32_0 = arith.constant 0 : i32
    %c0_i32_1 = arith.constant 0 : i32
    %c0_i32_2 = arith.constant 0 : i32
    return %c0_i32, %c0_i32_0, %c0_i32_1 : i32, i32, i32
  }
  func.func @transform_2(%arg0: i32, %arg1: i32) -> (i32, i32) {
    %c0_i32 = arith.constant 0 : i32
    %c0_i32_0 = arith.constant 0 : i32
    %c0_i32_1 = arith.constant 0 : i32
    return %c0_i32, %c0_i32_0 : i32, i32
  }
  func.func @transform_3(%arg0: i32, %arg1: i32) -> (i32, i32, i32, i32) {
    %c0_i32 = arith.constant 0 : i32
    %c0_i32_0 = arith.constant 0 : i32
    %c0_i32_1 = arith.constant 0 : i32
    return %arg0, %arg1, %c0_i32, %c0_i32_0 : i32, i32, i32, i32
  }
}

module attributes {stable_mosaic.version = 11 : i64} {
  func.func @kernel(%arg0: i32, %arg1: memref<1x4x8x128xf32, #tpu.memory_space<vmem>>, %arg2: memref<1x4x8x128xf32, #tpu.memory_space<vmem>>, %arg3: memref<1x4x8x128xf32, #tpu.memory_space<vmem>>, %arg4: memref<1x4x8x128xf32, #tpu.memory_space<vmem>>, %arg5: memref<1x4x8x128xf32, #tpu.memory_space<vmem>>) attributes {dimension_semantics = [#tpu.dimension_semantics<parallel>], iteration_bounds = array<i64: 2>, scalar_prefetch = 0 : i64, scratch_operands = 0 : i64, tpu.core_type = #tpu.core_type<tc>, window_params = [{transform_indices = @transform_0, window_bounds = array<i64: 1, 4, 8, 128>}, {transform_indices = @transform_1, window_bounds = array<i64: 1, 4, 8, 128>}, {transform_indices = @transform_2, window_bounds = array<i64: 1, 4, 8, 128>}, {transform_indices = @transform_3, window_bounds = array<i64: 1, 4, 8, 128>}, {transform_indices = @transform_4, window_bounds = array<i64: 1, 4, 8, 128>}]} {
    %c0 = arith.constant 0 : index
    %c0_0 = arith.constant 0 : index
    %c0_1 = arith.constant 0 : index
    %c0_2 = arith.constant 0 : index
    %0 = vector.load %arg1[%c0, %c0_0, %c0_1, %c0_2] : memref<1x4x8x128xf32, #tpu.memory_space<vmem>>, vector<1x4x8x128xf32>
    %c0_3 = arith.constant 0 : index
    %c0_4 = arith.constant 0 : index
    %c0_5 = arith.constant 0 : index
    %c0_6 = arith.constant 0 : index
    %1 = vector.load %arg2[%c0_3, %c0_4, %c0_5, %c0_6] : memref<1x4x8x128xf32, #tpu.memory_space<vmem>>, vector<1x4x8x128xf32>
    %2 = arith.maximumf %0, %1 : vector<1x4x8x128xf32>
    %c0_7 = arith.constant 0 : index
    %c0_8 = arith.constant 0 : index
    %c0_9 = arith.constant 0 : index
    %c0_10 = arith.constant 0 : index
    %3 = vector.load %arg3[%c0_7, %c0_8, %c0_9, %c0_10] : memref<1x4x8x128xf32, #tpu.memory_space<vmem>>, vector<1x4x8x128xf32>
    %4 = arith.maximumf %2, %3 : vector<1x4x8x128xf32>
    %c0_11 = arith.constant 0 : index
    %c0_12 = arith.constant 0 : index
    %c0_13 = arith.constant 0 : index
    %c0_14 = arith.constant 0 : index
    %5 = vector.load %arg4[%c0_11, %c0_12, %c0_13, %c0_14] : memref<1x4x8x128xf32, #tpu.memory_space<vmem>>, vector<1x4x8x128xf32>
    %6 = arith.maximumf %4, %5 : vector<1x4x8x128xf32>
    %c0_15 = arith.constant 0 : index
    %c0_16 = arith.constant 0 : index
    %c0_17 = arith.constant 0 : index
    %c0_18 = arith.constant 0 : index
    %7 = vector.load %arg5[%c0_15, %c0_16, %c0_17, %c0_18] : memref<1x4x8x128xf32, #tpu.memory_space<vmem>>, vector<1x4x8x128xf32>
    tpu.vector_store %arg5[%c0_15, %c0_16, %c0_17, %c0_18], %6 {strides = array<i32>} : memref<1x4x8x128xf32, #tpu.memory_space<vmem>>, vector<1x4x8x128xf32>,
    return
  }
  func.func @transform_0(%arg0: i32) -> (i32, i32, i32, i32) {
    %c0_i32 = arith.constant 0 : i32
    %c0_i32_0 = arith.constant 0 : i32
    %c0_i32_1 = arith.constant 0 : i32
    %c0_i32_2 = arith.constant 0 : i32
    return %arg0, %c0_i32, %c0_i32_0, %c0_i32_1 : i32, i32, i32, i32
  }
  func.func @transform_1(%arg0: i32) -> (i32, i32, i32, i32) {
    %c0_i32 = arith.constant 0 : i32
    %c0_i32_0 = arith.constant 0 : i32
    %c0_i32_1 = arith.constant 0 : i32
    %c0_i32_2 = arith.constant 0 : i32
    return %arg0, %c0_i32, %c0_i32_0, %c0_i32_1 : i32, i32, i32, i32
  }
  func.func @transform_2(%arg0: i32) -> (i32, i32, i32, i32) {
    %c0_i32 = arith.constant 0 : i32
    %c0_i32_0 = arith.constant 0 : i32
    %c0_i32_1 = arith.constant 0 : i32
    %c0_i32_2 = arith.constant 0 : i32
    return %arg0, %c0_i32, %c0_i32_0, %c0_i32_1 : i32, i32, i32, i32
  }
  func.func @transform_3(%arg0: i32) -> (i32, i32, i32, i32) {
    %c0_i32 = arith.constant 0 : i32
    %c0_i32_0 = arith.constant 0 : i32
    %c0_i32_1 = arith.constant 0 : i32
    %c0_i32_2 = arith.constant 0 : i32
    return %arg0, %c0_i32, %c0_i32_0, %c0_i32_1 : i32, i32, i32, i32
  }
  func.func @transform_4(%arg0: i32) -> (i32, i32, i32, i32) {
    %c0_i32 = arith.constant 0 : i32
    %c0_i32_0 = arith.constant 0 : i32
    %c0_i32_1 = arith.constant 0 : i32
    %c0_i32_2 = arith.constant 0 : i32
    return %arg0, %c0_i32, %c0_i32_0, %c0_i32_1 : i32, i32, i32, i32
  }
}

module attributes {stable_mosaic.version = 11 : i64} {
  func.func @_conv3x3_relu_kernel(%arg0: i32, %arg1: i32, %arg2: memref<1x6x10x128xf32, #tpu.memory_space<vmem>>, %arg3: memref<9x128x256xf32, #tpu.memory_space<vmem>>, %arg4: memref<1x256xf32, #tpu.memory_space<vmem>>, %arg5: memref<1x1x8x256xf32, #tpu.memory_space<vmem>>) attributes {dimension_semantics = [#tpu.dimension_semantics<parallel>, #tpu.dimension_semantics<arbitrary>], iteration_bounds = array<i64: 2, 4>, scalar_prefetch = 0 : i64, scratch_operands = 0 : i64, tpu.core_type = #tpu.core_type<tc>, window_params = [{transform_indices = @transform_0, window_bounds = array<i64: 1, 6, 10, 128>}, {pipeline_mode = #tpu.pipeline_mode<synchronous>, transform_indices = @transform_1, window_bounds = array<i64: 9, 128, 256>}, {pipeline_mode = #tpu.pipeline_mode<synchronous>, transform_indices = @transform_2, window_bounds = array<i64: 1, 256>}, {transform_indices = @transform_3, window_bounds = array<i64: 1, 1, 8, 256>}]} {
    %cst = arith.constant 0.000000e+00 : f32
    %0 = vector.broadcast %cst : f32 to vector<8x256xf32>
    %c0_i32 = arith.constant 0 : i32
    %1 = arith.addi %arg1, %c0_i32 : i32
    %c0 = arith.constant 0 : index
    %2 = arith.index_cast %1 : i32 to index
    %c0_0 = arith.constant 0 : index
    %c0_1 = arith.constant 0 : index
    %3 = vector.load %arg2[%c0, %2, %c0_0, %c0_1] : memref<1x6x10x128xf32, #tpu.memory_space<vmem>>, vector<1x1x8x128xf32>
    %4 = vector.shape_cast %3 : vector<1x1x8x128xf32> to vector<8x128xf32>
    %c0_2 = arith.constant 0 : index
    %c0_3 = arith.constant 0 : index
    %c0_4 = arith.constant 0 : index
    %5 = vector.load %arg3[%c0_2, %c0_3, %c0_4] : memref<9x128x256xf32, #tpu.memory_space<vmem>>, vector<1x128x256xf32>
    %6 = vector.shape_cast %5 : vector<1x128x256xf32> to vector<128x256xf32>
    %7 = arith.truncf %4 : vector<8x128xf32> to vector<8x128xbf16>
    %8 = arith.truncf %6 : vector<128x256xf32> to vector<128x256xbf16>
    %cst_5 = arith.constant dense<0.000000e+00> : vector<8x256xf32>
    %9 = tpu.matmul %7, %8, %cst_5 {dimension_numbers = #tpu.dot_dimension_numbers<[1], [0], [0], [1], [0, 0, 1, 1], [], []>} : vector<8x128xbf16>, vector<128x256xbf16>, vector<8x256xf32> -> vector<8x256xf32>
    %10 = arith.addf %0, %9 : vector<8x256xf32>
    %c0_i32_6 = arith.constant 0 : i32
    %11 = arith.addi %arg1, %c0_i32_6 : i32
    %c0_7 = arith.constant 0 : index
    %12 = arith.index_cast %11 : i32 to index
    %c1 = arith.constant 1 : index
    %c0_8 = arith.constant 0 : index
    %13 = vector.load %arg2[%c0_7, %12, %c1, %c0_8] : memref<1x6x10x128xf32, #tpu.memory_space<vmem>>, vector<1x1x8x128xf32>
    %14 = vector.shape_cast %13 : vector<1x1x8x128xf32> to vector<8x128xf32>
    %c1_9 = arith.constant 1 : index
    %c0_10 = arith.constant 0 : index
    %c0_11 = arith.constant 0 : index
    %15 = vector.load %arg3[%c1_9, %c0_10, %c0_11] : memref<9x128x256xf32, #tpu.memory_space<vmem>>, vector<1x128x256xf32>
    %16 = vector.shape_cast %15 : vector<1x128x256xf32> to vector<128x256xf32>
    %17 = arith.truncf %14 : vector<8x128xf32> to vector<8x128xbf16>
    %18 = arith.truncf %16 : vector<128x256xf32> to vector<128x256xbf16>
    %cst_12 = arith.constant dense<0.000000e+00> : vector<8x256xf32>
    %19 = tpu.matmul %17, %18, %cst_12 {dimension_numbers = #tpu.dot_dimension_numbers<[1], [0], [0], [1], [0, 0, 1, 1], [], []>} : vector<8x128xbf16>, vector<128x256xbf16>, vector<8x256xf32> -> vector<8x256xf32>
    %20 = arith.addf %10, %19 : vector<8x256xf32>
    %c0_i32_13 = arith.constant 0 : i32
    %21 = arith.addi %arg1, %c0_i32_13 : i32
    %c0_14 = arith.constant 0 : index
    %22 = arith.index_cast %21 : i32 to index
    %c2 = arith.constant 2 : index
    %c0_15 = arith.constant 0 : index
    %23 = vector.load %arg2[%c0_14, %22, %c2, %c0_15] : memref<1x6x10x128xf32, #tpu.memory_space<vmem>>, vector<1x1x8x128xf32>
    %24 = vector.shape_cast %23 : vector<1x1x8x128xf32> to vector<8x128xf32>
    %c2_16 = arith.constant 2 : index
    %c0_17 = arith.constant 0 : index
    %c0_18 = arith.constant 0 : index
    %25 = vector.load %arg3[%c2_16, %c0_17, %c0_18] : memref<9x128x256xf32, #tpu.memory_space<vmem>>, vector<1x128x256xf32>
    %26 = vector.shape_cast %25 : vector<1x128x256xf32> to vector<128x256xf32>
    %27 = arith.truncf %24 : vector<8x128xf32> to vector<8x128xbf16>
    %28 = arith.truncf %26 : vector<128x256xf32> to vector<128x256xbf16>
    %cst_19 = arith.constant dense<0.000000e+00> : vector<8x256xf32>
    %29 = tpu.matmul %27, %28, %cst_19 {dimension_numbers = #tpu.dot_dimension_numbers<[1], [0], [0], [1], [0, 0, 1, 1], [], []>} : vector<8x128xbf16>, vector<128x256xbf16>, vector<8x256xf32> -> vector<8x256xf32>
    %30 = arith.addf %20, %29 : vector<8x256xf32>
    %c1_i32 = arith.constant 1 : i32
    %31 = arith.addi %arg1, %c1_i32 : i32
    %c0_20 = arith.constant 0 : index
    %32 = arith.index_cast %31 : i32 to index
    %c0_21 = arith.constant 0 : index
    %c0_22 = arith.constant 0 : index
    %33 = vector.load %arg2[%c0_20, %32, %c0_21, %c0_22] : memref<1x6x10x128xf32, #tpu.memory_space<vmem>>, vector<1x1x8x128xf32>
    %34 = vector.shape_cast %33 : vector<1x1x8x128xf32> to vector<8x128xf32>
    %c3 = arith.constant 3 : index
    %c0_23 = arith.constant 0 : index
    %c0_24 = arith.constant 0 : index
    %35 = vector.load %arg3[%c3, %c0_23, %c0_24] : memref<9x128x256xf32, #tpu.memory_space<vmem>>, vector<1x128x256xf32>
    %36 = vector.shape_cast %35 : vector<1x128x256xf32> to vector<128x256xf32>
    %37 = arith.truncf %34 : vector<8x128xf32> to vector<8x128xbf16>
    %38 = arith.truncf %36 : vector<128x256xf32> to vector<128x256xbf16>
    %cst_25 = arith.constant dense<0.000000e+00> : vector<8x256xf32>
    %39 = tpu.matmul %37, %38, %cst_25 {dimension_numbers = #tpu.dot_dimension_numbers<[1], [0], [0], [1], [0, 0, 1, 1], [], []>} : vector<8x128xbf16>, vector<128x256xbf16>, vector<8x256xf32> -> vector<8x256xf32>
    %40 = arith.addf %30, %39 : vector<8x256xf32>
    %c1_i32_26 = arith.constant 1 : i32
    %41 = arith.addi %arg1, %c1_i32_26 : i32
    %c0_27 = arith.constant 0 : index
    %42 = arith.index_cast %41 : i32 to index
    %c1_28 = arith.constant 1 : index
    %c0_29 = arith.constant 0 : index
    %43 = vector.load %arg2[%c0_27, %42, %c1_28, %c0_29] : memref<1x6x10x128xf32, #tpu.memory_space<vmem>>, vector<1x1x8x128xf32>
    %44 = vector.shape_cast %43 : vector<1x1x8x128xf32> to vector<8x128xf32>
    %c4 = arith.constant 4 : index
    %c0_30 = arith.constant 0 : index
    %c0_31 = arith.constant 0 : index
    %45 = vector.load %arg3[%c4, %c0_30, %c0_31] : memref<9x128x256xf32, #tpu.memory_space<vmem>>, vector<1x128x256xf32>
    %46 = vector.shape_cast %45 : vector<1x128x256xf32> to vector<128x256xf32>
    %47 = arith.truncf %44 : vector<8x128xf32> to vector<8x128xbf16>
    %48 = arith.truncf %46 : vector<128x256xf32> to vector<128x256xbf16>
    %cst_32 = arith.constant dense<0.000000e+00> : vector<8x256xf32>
    %49 = tpu.matmul %47, %48, %cst_32 {dimension_numbers = #tpu.dot_dimension_numbers<[1], [0], [0], [1], [0, 0, 1, 1], [], []>} : vector<8x128xbf16>, vector<128x256xbf16>, vector<8x256xf32> -> vector<8x256xf32>
    %50 = arith.addf %40, %49 : vector<8x256xf32>
    %c1_i32_33 = arith.constant 1 : i32
    %51 = arith.addi %arg1, %c1_i32_33 : i32
    %c0_34 = arith.constant 0 : index
    %52 = arith.index_cast %51 : i32 to index
    %c2_35 = arith.constant 2 : index
    %c0_36 = arith.constant 0 : index
    %53 = vector.load %arg2[%c0_34, %52, %c2_35, %c0_36] : memref<1x6x10x128xf32, #tpu.memory_space<vmem>>, vector<1x1x8x128xf32>
    %54 = vector.shape_cast %53 : vector<1x1x8x128xf32> to vector<8x128xf32>
    %c5 = arith.constant 5 : index
    %c0_37 = arith.constant 0 : index
    %c0_38 = arith.constant 0 : index
    %55 = vector.load %arg3[%c5, %c0_37, %c0_38] : memref<9x128x256xf32, #tpu.memory_space<vmem>>, vector<1x128x256xf32>
    %56 = vector.shape_cast %55 : vector<1x128x256xf32> to vector<128x256xf32>
    %57 = arith.truncf %54 : vector<8x128xf32> to vector<8x128xbf16>
    %58 = arith.truncf %56 : vector<128x256xf32> to vector<128x256xbf16>
    %cst_39 = arith.constant dense<0.000000e+00> : vector<8x256xf32>
    %59 = tpu.matmul %57, %58, %cst_39 {dimension_numbers = #tpu.dot_dimension_numbers<[1], [0], [0], [1], [0, 0, 1, 1], [], []>} : vector<8x128xbf16>, vector<128x256xbf16>, vector<8x256xf32> -> vector<8x256xf32>
    %60 = arith.addf %50, %59 : vector<8x256xf32>
    %c2_i32 = arith.constant 2 : i32
    %61 = arith.addi %arg1, %c2_i32 : i32
    %c0_40 = arith.constant 0 : index
    %62 = arith.index_cast %61 : i32 to index
    %c0_41 = arith.constant 0 : index
    %c0_42 = arith.constant 0 : index
    %63 = vector.load %arg2[%c0_40, %62, %c0_41, %c0_42] : memref<1x6x10x128xf32, #tpu.memory_space<vmem>>, vector<1x1x8x128xf32>
    %64 = vector.shape_cast %63 : vector<1x1x8x128xf32> to vector<8x128xf32>
    %c6 = arith.constant 6 : index
    %c0_43 = arith.constant 0 : index
    %c0_44 = arith.constant 0 : index
    %65 = vector.load %arg3[%c6, %c0_43, %c0_44] : memref<9x128x256xf32, #tpu.memory_space<vmem>>, vector<1x128x256xf32>
    %66 = vector.shape_cast %65 : vector<1x128x256xf32> to vector<128x256xf32>
    %67 = arith.truncf %64 : vector<8x128xf32> to vector<8x128xbf16>
    %68 = arith.truncf %66 : vector<128x256xf32> to vector<128x256xbf16>
    %cst_45 = arith.constant dense<0.000000e+00> : vector<8x256xf32>
    %69 = tpu.matmul %67, %68, %cst_45 {dimension_numbers = #tpu.dot_dimension_numbers<[1], [0], [0], [1], [0, 0, 1, 1], [], []>} : vector<8x128xbf16>, vector<128x256xbf16>, vector<8x256xf32> -> vector<8x256xf32>
    %70 = arith.addf %60, %69 : vector<8x256xf32>
    %c2_i32_46 = arith.constant 2 : i32
    %71 = arith.addi %arg1, %c2_i32_46 : i32
    %c0_47 = arith.constant 0 : index
    %72 = arith.index_cast %71 : i32 to index
    %c1_48 = arith.constant 1 : index
    %c0_49 = arith.constant 0 : index
    %73 = vector.load %arg2[%c0_47, %72, %c1_48, %c0_49] : memref<1x6x10x128xf32, #tpu.memory_space<vmem>>, vector<1x1x8x128xf32>
    %74 = vector.shape_cast %73 : vector<1x1x8x128xf32> to vector<8x128xf32>
    %c7 = arith.constant 7 : index
    %c0_50 = arith.constant 0 : index
    %c0_51 = arith.constant 0 : index
    %75 = vector.load %arg3[%c7, %c0_50, %c0_51] : memref<9x128x256xf32, #tpu.memory_space<vmem>>, vector<1x128x256xf32>
    %76 = vector.shape_cast %75 : vector<1x128x256xf32> to vector<128x256xf32>
    %77 = arith.truncf %74 : vector<8x128xf32> to vector<8x128xbf16>
    %78 = arith.truncf %76 : vector<128x256xf32> to vector<128x256xbf16>
    %cst_52 = arith.constant dense<0.000000e+00> : vector<8x256xf32>
    %79 = tpu.matmul %77, %78, %cst_52 {dimension_numbers = #tpu.dot_dimension_numbers<[1], [0], [0], [1], [0, 0, 1, 1], [], []>} : vector<8x128xbf16>, vector<128x256xbf16>, vector<8x256xf32> -> vector<8x256xf32>
    %80 = arith.addf %70, %79 : vector<8x256xf32>
    %c2_i32_53 = arith.constant 2 : i32
    %81 = arith.addi %arg1, %c2_i32_53 : i32
    %c0_54 = arith.constant 0 : index
    %82 = arith.index_cast %81 : i32 to index
    %c2_55 = arith.constant 2 : index
    %c0_56 = arith.constant 0 : index
    %83 = vector.load %arg2[%c0_54, %82, %c2_55, %c0_56] : memref<1x6x10x128xf32, #tpu.memory_space<vmem>>, vector<1x1x8x128xf32>
    %84 = vector.shape_cast %83 : vector<1x1x8x128xf32> to vector<8x128xf32>
    %c8 = arith.constant 8 : index
    %c0_57 = arith.constant 0 : index
    %c0_58 = arith.constant 0 : index
    %85 = vector.load %arg3[%c8, %c0_57, %c0_58] : memref<9x128x256xf32, #tpu.memory_space<vmem>>, vector<1x128x256xf32>
    %86 = vector.shape_cast %85 : vector<1x128x256xf32> to vector<128x256xf32>
    %87 = arith.truncf %84 : vector<8x128xf32> to vector<8x128xbf16>
    %88 = arith.truncf %86 : vector<128x256xf32> to vector<128x256xbf16>
    %cst_59 = arith.constant dense<0.000000e+00> : vector<8x256xf32>
    %89 = tpu.matmul %87, %88, %cst_59 {dimension_numbers = #tpu.dot_dimension_numbers<[1], [0], [0], [1], [0, 0, 1, 1], [], []>} : vector<8x128xbf16>, vector<128x256xbf16>, vector<8x256xf32> -> vector<8x256xf32>
    %90 = arith.addf %80, %89 : vector<8x256xf32>
    %c0_60 = arith.constant 0 : index
    %c0_61 = arith.constant 0 : index
    %91 = vector.load %arg4[%c0_60, %c0_61] : memref<1x256xf32, #tpu.memory_space<vmem>>, vector<1x256xf32>
    %92 = vector.broadcast %91 : vector<1x256xf32> to vector<8x256xf32>
    %93 = arith.addf %90, %92 : vector<8x256xf32>
    %cst_62 = arith.constant 0.000000e+00 : f32
    %94 = vector.broadcast %cst_62 : f32 to vector<8x256xf32>
    %95 = arith.maximumf %93, %94 : vector<8x256xf32>
    %c0_63 = arith.constant 0 : index
    %c0_64 = arith.constant 0 : index
    %c0_65 = arith.constant 0 : index
    %c0_66 = arith.constant 0 : index
    %96 = vector.load %arg5[%c0_63, %c0_64, %c0_65, %c0_66] : memref<1x1x8x256xf32, #tpu.memory_space<vmem>>, vector<1x1x8x256xf32>
    %97 = vector.shape_cast %96 : vector<1x1x8x256xf32> to vector<8x256xf32>
    %98 = vector.shape_cast %95 : vector<8x256xf32> to vector<1x1x8x256xf32>
    tpu.vector_store %arg5[%c0_63, %c0_64, %c0_65, %c0_66], %98 {strides = array<i32>} : memref<1x1x8x256xf32, #tpu.memory_space<vmem>>, vector<1x1x8x256xf32>,
    return
  }
  func.func @transform_0(%arg0: i32, %arg1: i32) -> (i32, i32, i32, i32) {
    %c0_i32 = arith.constant 0 : i32
    %c0_i32_0 = arith.constant 0 : i32
    %c0_i32_1 = arith.constant 0 : i32
    %c0_i32_2 = arith.constant 0 : i32
    return %arg0, %c0_i32, %c0_i32_0, %c0_i32_1 : i32, i32, i32, i32
  }
  func.func @transform_1(%arg0: i32, %arg1: i32) -> (i32, i32, i32) {
    %c0_i32 = arith.constant 0 : i32
    %c0_i32_0 = arith.constant 0 : i32
    %c0_i32_1 = arith.constant 0 : i32
    %c0_i32_2 = arith.constant 0 : i32
    return %c0_i32, %c0_i32_0, %c0_i32_1 : i32, i32, i32
  }
  func.func @transform_2(%arg0: i32, %arg1: i32) -> (i32, i32) {
    %c0_i32 = arith.constant 0 : i32
    %c0_i32_0 = arith.constant 0 : i32
    %c0_i32_1 = arith.constant 0 : i32
    return %c0_i32, %c0_i32_0 : i32, i32
  }
  func.func @transform_3(%arg0: i32, %arg1: i32) -> (i32, i32, i32, i32) {
    %c0_i32 = arith.constant 0 : i32
    %c0_i32_0 = arith.constant 0 : i32
    %c0_i32_1 = arith.constant 0 : i32
    return %arg0, %arg1, %c0_i32, %c0_i32_0 : i32, i32, i32, i32
  }
}

module attributes {stable_mosaic.version = 11 : i64} {
  func.func @kernel(%arg0: i32, %arg1: memref<1x3x7x256xf32, #tpu.memory_space<vmem>>, %arg2: memref<1x3x7x256xf32, #tpu.memory_space<vmem>>, %arg3: memref<1x3x7x256xf32, #tpu.memory_space<vmem>>, %arg4: memref<1x3x7x256xf32, #tpu.memory_space<vmem>>, %arg5: memref<1x3x7x256xf32, #tpu.memory_space<vmem>>) attributes {dimension_semantics = [#tpu.dimension_semantics<parallel>], iteration_bounds = array<i64: 2>, scalar_prefetch = 0 : i64, scratch_operands = 0 : i64, tpu.core_type = #tpu.core_type<tc>, window_params = [{transform_indices = @transform_0, window_bounds = array<i64: 1, 3, 7, 256>}, {transform_indices = @transform_1, window_bounds = array<i64: 1, 3, 7, 256>}, {transform_indices = @transform_2, window_bounds = array<i64: 1, 3, 7, 256>}, {transform_indices = @transform_3, window_bounds = array<i64: 1, 3, 7, 256>}, {transform_indices = @transform_4, window_bounds = array<i64: 1, 3, 7, 256>}]} {
    %c0 = arith.constant 0 : index
    %c0_0 = arith.constant 0 : index
    %c0_1 = arith.constant 0 : index
    %c0_2 = arith.constant 0 : index
    %0 = vector.load %arg1[%c0, %c0_0, %c0_1, %c0_2] : memref<1x3x7x256xf32, #tpu.memory_space<vmem>>, vector<1x3x7x256xf32>
    %c0_3 = arith.constant 0 : index
    %c0_4 = arith.constant 0 : index
    %c0_5 = arith.constant 0 : index
    %c0_6 = arith.constant 0 : index
    %1 = vector.load %arg2[%c0_3, %c0_4, %c0_5, %c0_6] : memref<1x3x7x256xf32, #tpu.memory_space<vmem>>, vector<1x3x7x256xf32>
    %2 = arith.maximumf %0, %1 : vector<1x3x7x256xf32>
    %c0_7 = arith.constant 0 : index
    %c0_8 = arith.constant 0 : index
    %c0_9 = arith.constant 0 : index
    %c0_10 = arith.constant 0 : index
    %3 = vector.load %arg3[%c0_7, %c0_8, %c0_9, %c0_10] : memref<1x3x7x256xf32, #tpu.memory_space<vmem>>, vector<1x3x7x256xf32>
    %4 = arith.maximumf %2, %3 : vector<1x3x7x256xf32>
    %c0_11 = arith.constant 0 : index
    %c0_12 = arith.constant 0 : index
    %c0_13 = arith.constant 0 : index
    %c0_14 = arith.constant 0 : index
    %5 = vector.load %arg4[%c0_11, %c0_12, %c0_13, %c0_14] : memref<1x3x7x256xf32, #tpu.memory_space<vmem>>, vector<1x3x7x256xf32>
    %6 = arith.maximumf %4, %5 : vector<1x3x7x256xf32>
    %c0_15 = arith.constant 0 : index
    %c0_16 = arith.constant 0 : index
    %c0_17 = arith.constant 0 : index
    %c0_18 = arith.constant 0 : index
    %7 = vector.load %arg5[%c0_15, %c0_16, %c0_17, %c0_18] : memref<1x3x7x256xf32, #tpu.memory_space<vmem>>, vector<1x3x7x256xf32>
    tpu.vector_store %arg5[%c0_15, %c0_16, %c0_17, %c0_18], %6 {strides = array<i32>} : memref<1x3x7x256xf32, #tpu.memory_space<vmem>>, vector<1x3x7x256xf32>,
    return
  }
  func.func @transform_0(%arg0: i32) -> (i32, i32, i32, i32) {
    %c0_i32 = arith.constant 0 : i32
    %c0_i32_0 = arith.constant 0 : i32
    %c0_i32_1 = arith.constant 0 : i32
    %c0_i32_2 = arith.constant 0 : i32
    return %arg0, %c0_i32, %c0_i32_0, %c0_i32_1 : i32, i32, i32, i32
  }
  func.func @transform_1(%arg0: i32) -> (i32, i32, i32, i32) {
    %c0_i32 = arith.constant 0 : i32
    %c0_i32_0 = arith.constant 0 : i32
    %c0_i32_1 = arith.constant 0 : i32
    %c0_i32_2 = arith.constant 0 : i32
    return %arg0, %c0_i32, %c0_i32_0, %c0_i32_1 : i32, i32, i32, i32
  }
  func.func @transform_2(%arg0: i32) -> (i32, i32, i32, i32) {
    %c0_i32 = arith.constant 0 : i32
    %c0_i32_0 = arith.constant 0 : i32
    %c0_i32_1 = arith.constant 0 : i32
    %c0_i32_2 = arith.constant 0 : i32
    return %arg0, %c0_i32, %c0_i32_0, %c0_i32_1 : i32, i32, i32, i32
  }
  func.func @transform_3(%arg0: i32) -> (i32, i32, i32, i32) {
    %c0_i32 = arith.constant 0 : i32
    %c0_i32_0 = arith.constant 0 : i32
    %c0_i32_1 = arith.constant 0 : i32
    %c0_i32_2 = arith.constant 0 : i32
    return %arg0, %c0_i32, %c0_i32_0, %c0_i32_1 : i32, i32, i32, i32
  }
  func.func @transform_4(%arg0: i32) -> (i32, i32, i32, i32) {
    %c0_i32 = arith.constant 0 : i32
    %c0_i32_0 = arith.constant 0 : i32
    %c0_i32_1 = arith.constant 0 : i32
    %c0_i32_2 = arith.constant 0 : i32
    return %arg0, %c0_i32, %c0_i32_0, %c0_i32_1 : i32, i32, i32, i32
  }
}

module attributes {stable_mosaic.version = 11 : i64} {
  func.func @_mean_h_kernel(%arg0: i32, %arg1: memref<1x3x7x256xf32, #tpu.memory_space<vmem>>, %arg2: memref<1x7x256xf32, #tpu.memory_space<vmem>>) attributes {dimension_semantics = [#tpu.dimension_semantics<parallel>], iteration_bounds = array<i64: 2>, scalar_prefetch = 0 : i64, scratch_operands = 0 : i64, tpu.core_type = #tpu.core_type<tc>, window_params = [{transform_indices = @transform_0, window_bounds = array<i64: 1, 3, 7, 256>}, {transform_indices = @transform_1, window_bounds = array<i64: 1, 7, 256>}]} {
    %c0 = arith.constant 0 : index
    %c0_0 = arith.constant 0 : index
    %c0_1 = arith.constant 0 : index
    %c0_2 = arith.constant 0 : index
    %0 = vector.load %arg1[%c0, %c0_0, %c0_1, %c0_2] : memref<1x3x7x256xf32, #tpu.memory_space<vmem>>, vector<1x3x7x256xf32>
    %cst = arith.constant dense<0.000000e+00> : vector<1x7x256xf32>
    %1 = vector.multi_reduction <add>, %0, %cst [1] : vector<1x3x7x256xf32> to vector<1x7x256xf32>
    %cst_3 = arith.constant 3.000000e+00 : f32
    %2 = vector.broadcast %cst_3 : f32 to vector<1x7x256xf32>
    %3 = arith.divf %1, %2 : vector<1x7x256xf32>
    %c0_4 = arith.constant 0 : index
    %c0_5 = arith.constant 0 : index
    %c0_6 = arith.constant 0 : index
    %4 = vector.load %arg2[%c0_4, %c0_5, %c0_6] : memref<1x7x256xf32, #tpu.memory_space<vmem>>, vector<1x7x256xf32>
    tpu.vector_store %arg2[%c0_4, %c0_5, %c0_6], %3 {strides = array<i32>} : memref<1x7x256xf32, #tpu.memory_space<vmem>>, vector<1x7x256xf32>,
    return
  }
  func.func @transform_0(%arg0: i32) -> (i32, i32, i32, i32) {
    %c0_i32 = arith.constant 0 : i32
    %c0_i32_0 = arith.constant 0 : i32
    %c0_i32_1 = arith.constant 0 : i32
    %c0_i32_2 = arith.constant 0 : i32
    return %arg0, %c0_i32, %c0_i32_0, %c0_i32_1 : i32, i32, i32, i32
  }
  func.func @transform_1(%arg0: i32) -> (i32, i32, i32) {
    %c0_i32 = arith.constant 0 : i32
    %c0_i32_0 = arith.constant 0 : i32
    %c0_i32_1 = arith.constant 0 : i32
    return %arg0, %c0_i32, %c0_i32_0 : i32, i32, i32
  }
}

module attributes {stable_mosaic.version = 11 : i64} {
  func.func @_matmul_bias_kernel(%arg0: i32, %arg1: memref<14x256xf32, #tpu.memory_space<vmem>>, %arg2: memref<256x256xf32, #tpu.memory_space<vmem>>, %arg3: memref<1x256xf32, #tpu.memory_space<vmem>>, %arg4: memref<14x256xf32, #tpu.memory_space<vmem>>) attributes {dimension_semantics = [#tpu.dimension_semantics<parallel>], iteration_bounds = array<i64: 1>, scalar_prefetch = 0 : i64, scratch_operands = 0 : i64, tpu.core_type = #tpu.core_type<tc>, window_params = [{transform_indices = @transform_0, window_bounds = array<i64: 14, 256>}, {pipeline_mode = #tpu.pipeline_mode<synchronous>, transform_indices = @transform_1, window_bounds = array<i64: 256, 256>}, {pipeline_mode = #tpu.pipeline_mode<synchronous>, transform_indices = @transform_2, window_bounds = array<i64: 1, 256>}, {transform_indices = @transform_3, window_bounds = array<i64: 14, 256>}]} {
    %c0 = arith.constant 0 : index
    %c0_0 = arith.constant 0 : index
    %0 = vector.load %arg1[%c0, %c0_0] : memref<14x256xf32, #tpu.memory_space<vmem>>, vector<14x256xf32>
    %1 = arith.truncf %0 : vector<14x256xf32> to vector<14x256xbf16>
    %c0_1 = arith.constant 0 : index
    %c0_2 = arith.constant 0 : index
    %2 = vector.load %arg2[%c0_1, %c0_2] : memref<256x256xf32, #tpu.memory_space<vmem>>, vector<256x256xf32>
    %3 = arith.truncf %2 : vector<256x256xf32> to vector<256x256xbf16>
    %cst = arith.constant dense<0.000000e+00> : vector<14x256xf32>
    %4 = tpu.matmul %1, %3, %cst {dimension_numbers = #tpu.dot_dimension_numbers<[1], [0], [0], [1], [0, 0, 1, 1], [], []>} : vector<14x256xbf16>, vector<256x256xbf16>, vector<14x256xf32> -> vector<14x256xf32>
    %c0_3 = arith.constant 0 : index
    %c0_4 = arith.constant 0 : index
    %5 = vector.load %arg3[%c0_3, %c0_4] : memref<1x256xf32, #tpu.memory_space<vmem>>, vector<1x256xf32>
    %6 = vector.broadcast %5 : vector<1x256xf32> to vector<14x256xf32>
    %7 = arith.addf %4, %6 : vector<14x256xf32>
    %c0_5 = arith.constant 0 : index
    %c0_6 = arith.constant 0 : index
    %8 = vector.load %arg4[%c0_5, %c0_6] : memref<14x256xf32, #tpu.memory_space<vmem>>, vector<14x256xf32>
    tpu.vector_store %arg4[%c0_5, %c0_6], %7 {strides = array<i32>} : memref<14x256xf32, #tpu.memory_space<vmem>>, vector<14x256xf32>,
    return
  }
  func.func @transform_0(%arg0: i32) -> (i32, i32) {
    %c0_i32 = arith.constant 0 : i32
    %c0_i32_0 = arith.constant 0 : i32
    return %arg0, %c0_i32 : i32, i32
  }
  func.func @transform_1(%arg0: i32) -> (i32, i32) {
    %c0_i32 = arith.constant 0 : i32
    %c0_i32_0 = arith.constant 0 : i32
    %c0_i32_1 = arith.constant 0 : i32
    return %c0_i32, %c0_i32_0 : i32, i32
  }
  func.func @transform_2(%arg0: i32) -> (i32, i32) {
    %c0_i32 = arith.constant 0 : i32
    %c0_i32_0 = arith.constant 0 : i32
    %c0_i32_1 = arith.constant 0 : i32
    return %c0_i32, %c0_i32_0 : i32, i32
  }
  func.func @transform_3(%arg0: i32) -> (i32, i32) {
    %c0_i32 = arith.constant 0 : i32
    %c0_i32_0 = arith.constant 0 : i32
    return %arg0, %c0_i32 : i32, i32
  }
}

module attributes {stable_mosaic.version = 11 : i64} {
  func.func @_matmul_bias_kernel(%arg0: i32, %arg1: memref<14x64xf32, #tpu.memory_space<vmem>>, %arg2: memref<64x256xf32, #tpu.memory_space<vmem>>, %arg3: memref<1x256xf32, #tpu.memory_space<vmem>>, %arg4: memref<14x256xf32, #tpu.memory_space<vmem>>) attributes {dimension_semantics = [#tpu.dimension_semantics<parallel>], iteration_bounds = array<i64: 1>, scalar_prefetch = 0 : i64, scratch_operands = 0 : i64, tpu.core_type = #tpu.core_type<tc>, window_params = [{transform_indices = @transform_0, window_bounds = array<i64: 14, 64>}, {pipeline_mode = #tpu.pipeline_mode<synchronous>, transform_indices = @transform_1, window_bounds = array<i64: 64, 256>}, {pipeline_mode = #tpu.pipeline_mode<synchronous>, transform_indices = @transform_2, window_bounds = array<i64: 1, 256>}, {transform_indices = @transform_3, window_bounds = array<i64: 14, 256>}]} {
    %c0 = arith.constant 0 : index
    %c0_0 = arith.constant 0 : index
    %0 = vector.load %arg1[%c0, %c0_0] : memref<14x64xf32, #tpu.memory_space<vmem>>, vector<14x64xf32>
    %1 = arith.truncf %0 : vector<14x64xf32> to vector<14x64xbf16>
    %c0_1 = arith.constant 0 : index
    %c0_2 = arith.constant 0 : index
    %2 = vector.load %arg2[%c0_1, %c0_2] : memref<64x256xf32, #tpu.memory_space<vmem>>, vector<64x256xf32>
    %3 = arith.truncf %2 : vector<64x256xf32> to vector<64x256xbf16>
    %cst = arith.constant dense<0.000000e+00> : vector<14x256xf32>
    %4 = tpu.matmul %1, %3, %cst {dimension_numbers = #tpu.dot_dimension_numbers<[1], [0], [0], [1], [0, 0, 1, 1], [], []>} : vector<14x64xbf16>, vector<64x256xbf16>, vector<14x256xf32> -> vector<14x256xf32>
    %c0_3 = arith.constant 0 : index
    %c0_4 = arith.constant 0 : index
    %5 = vector.load %arg3[%c0_3, %c0_4] : memref<1x256xf32, #tpu.memory_space<vmem>>, vector<1x256xf32>
    %6 = vector.broadcast %5 : vector<1x256xf32> to vector<14x256xf32>
    %7 = arith.addf %4, %6 : vector<14x256xf32>
    %c0_5 = arith.constant 0 : index
    %c0_6 = arith.constant 0 : index
    %8 = vector.load %arg4[%c0_5, %c0_6] : memref<14x256xf32, #tpu.memory_space<vmem>>, vector<14x256xf32>
    tpu.vector_store %arg4[%c0_5, %c0_6], %7 {strides = array<i32>} : memref<14x256xf32, #tpu.memory_space<vmem>>, vector<14x256xf32>,
    return
  }
  func.func @transform_0(%arg0: i32) -> (i32, i32) {
    %c0_i32 = arith.constant 0 : i32
    %c0_i32_0 = arith.constant 0 : i32
    return %arg0, %c0_i32 : i32, i32
  }
  func.func @transform_1(%arg0: i32) -> (i32, i32) {
    %c0_i32 = arith.constant 0 : i32
    %c0_i32_0 = arith.constant 0 : i32
    %c0_i32_1 = arith.constant 0 : i32
    return %c0_i32, %c0_i32_0 : i32, i32
  }
  func.func @transform_2(%arg0: i32) -> (i32, i32) {
    %c0_i32 = arith.constant 0 : i32
    %c0_i32_0 = arith.constant 0 : i32
    %c0_i32_1 = arith.constant 0 : i32
    return %c0_i32, %c0_i32_0 : i32, i32
  }
  func.func @transform_3(%arg0: i32) -> (i32, i32) {
    %c0_i32 = arith.constant 0 : i32
    %c0_i32_0 = arith.constant 0 : i32
    return %arg0, %c0_i32 : i32, i32
  }
}

module attributes {stable_mosaic.version = 11 : i64} {
  func.func @_bilstm_kernel(%arg0: i32, %arg1: memref<1x4x7x2x32xf32, #tpu.memory_space<vmem>>, %arg2: memref<1x4x32x32xf32, #tpu.memory_space<vmem>>, %arg3: memref<1x7x2x32xf32, #tpu.memory_space<vmem>>, %arg4: memref<2x32xf32, #tpu.memory_space<vmem>>, %arg5: memref<2x32xf32, #tpu.memory_space<vmem>>) attributes {dimension_semantics = [#tpu.dimension_semantics<parallel>], iteration_bounds = array<i64: 2>, scalar_prefetch = 0 : i64, scratch_operands = 2 : i64, tpu.core_type = #tpu.core_type<tc>, window_params = [{transform_indices = @transform_0, window_bounds = array<i64: 1, 4, 7, 2, 32>}, {transform_indices = @transform_1, window_bounds = array<i64: 1, 4, 32, 32>}, {transform_indices = @transform_2, window_bounds = array<i64: 1, 7, 2, 32>}]} {
    %cst = arith.constant 0.000000e+00 : f32
    %0 = vector.broadcast %cst : f32 to vector<2x32xf32>
    %c0 = arith.constant 0 : index
    %c0_0 = arith.constant 0 : index
    %1 = vector.load %arg4[%c0, %c0_0] : memref<2x32xf32, #tpu.memory_space<vmem>>, vector<2x32xf32>
    tpu.vector_store %arg4[%c0, %c0_0], %0 {strides = array<i32>} : memref<2x32xf32, #tpu.memory_space<vmem>>, vector<2x32xf32>,
    %cst_1 = arith.constant 0.000000e+00 : f32
    %2 = vector.broadcast %cst_1 : f32 to vector<2x32xf32>
    %c0_2 = arith.constant 0 : index
    %c0_3 = arith.constant 0 : index
    %3 = vector.load %arg5[%c0_2, %c0_3] : memref<2x32xf32, #tpu.memory_space<vmem>>, vector<2x32xf32>
    tpu.vector_store %arg5[%c0_2, %c0_3], %2 {strides = array<i32>} : memref<2x32xf32, #tpu.memory_space<vmem>>, vector<2x32xf32>,
    %c0_4 = arith.constant 0 : index
    %c0_5 = arith.constant 0 : index
    %c0_6 = arith.constant 0 : index
    %c0_7 = arith.constant 0 : index
    %4 = vector.load %arg2[%c0_4, %c0_5, %c0_6, %c0_7] : memref<1x4x32x32xf32, #tpu.memory_space<vmem>>, vector<1x4x32x32xf32>
    %5 = vector.shape_cast %4 : vector<1x4x32x32xf32> to vector<4x32x32xf32>
    %6 = arith.truncf %5 : vector<4x32x32xf32> to vector<4x32x32xbf16>
    %c0_i32 = arith.constant 0 : i32
    %c0_i32_8 = arith.constant 0 : i32
    %7 = arith.cmpi eq, %arg0, %c0_i32_8 : i32
    %c6_i32 = arith.constant 6 : i32
    %8 = arith.subi %c6_i32, %c0_i32 : i32
    %9 = arith.select %7, %c0_i32, %8 : i32
    %c0_9 = arith.constant 0 : index
    %c0_10 = arith.constant 0 : index
    %10 = vector.load %arg4[%c0_9, %c0_10] : memref<2x32xf32, #tpu.memory_space<vmem>>, vector<2x32xf32>
    %11 = arith.truncf %10 : vector<2x32xf32> to vector<2x32xbf16>
    %c0_11 = arith.constant 0 : index
    %c0_12 = arith.constant 0 : index
    %12 = arith.index_cast %9 : i32 to index
    %c0_13 = arith.constant 0 : index
    %c0_14 = arith.constant 0 : index
    %13 = vector.load %arg1[%c0_11, %c0_12, %12, %c0_13, %c0_14] : memref<1x4x7x2x32xf32, #tpu.memory_space<vmem>>, vector<1x1x1x2x32xf32>
    %14 = vector.shape_cast %13 : vector<1x1x1x2x32xf32> to vector<2x32xf32>
    %15 = vector.extract_strided_slice %6 {offsets = [0, 0, 0], sizes = [1, 32, 32], strides = [1, 1, 1]} : vector<4x32x32xbf16> to vector<1x32x32xbf16>
    %16 = vector.shape_cast %15 : vector<1x32x32xbf16> to vector<32x32xbf16>
    %cst_15 = arith.constant dense<0.000000e+00> : vector<2x32xf32>
    %17 = tpu.matmul %11, %16, %cst_15 {dimension_numbers = #tpu.dot_dimension_numbers<[1], [0], [0], [1], [0, 0, 1, 1], [], []>} : vector<2x32xbf16>, vector<32x32xbf16>, vector<2x32xf32> -> vector<2x32xf32>
    %18 = arith.addf %14, %17 : vector<2x32xf32>
    %cst_16 = arith.constant 5.000000e-01 : f32
    %19 = vector.broadcast %cst_16 : f32 to vector<2x32xf32>
    %20 = arith.mulf %19, %18 : vector<2x32xf32>
    %21 = math.tanh %20 : vector<2x32xf32>
    %cst_17 = arith.constant 1.000000e+00 : f32
    %22 = vector.broadcast %cst_17 : f32 to vector<2x32xf32>
    %23 = arith.addf %22, %21 : vector<2x32xf32>
    %cst_18 = arith.constant 5.000000e-01 : f32
    %24 = vector.broadcast %cst_18 : f32 to vector<2x32xf32>
    %25 = arith.mulf %24, %23 : vector<2x32xf32>
    %c0_19 = arith.constant 0 : index
    %c1 = arith.constant 1 : index
    %26 = arith.index_cast %9 : i32 to index
    %c0_20 = arith.constant 0 : index
    %c0_21 = arith.constant 0 : index
    %27 = vector.load %arg1[%c0_19, %c1, %26, %c0_20, %c0_21] : memref<1x4x7x2x32xf32, #tpu.memory_space<vmem>>, vector<1x1x1x2x32xf32>
    %28 = vector.shape_cast %27 : vector<1x1x1x2x32xf32> to vector<2x32xf32>
    %29 = vector.extract_strided_slice %6 {offsets = [1, 0, 0], sizes = [1, 32, 32], strides = [1, 1, 1]} : vector<4x32x32xbf16> to vector<1x32x32xbf16>
    %30 = vector.shape_cast %29 : vector<1x32x32xbf16> to vector<32x32xbf16>
    %cst_22 = arith.constant dense<0.000000e+00> : vector<2x32xf32>
    %31 = tpu.matmul %11, %30, %cst_22 {dimension_numbers = #tpu.dot_dimension_numbers<[1], [0], [0], [1], [0, 0, 1, 1], [], []>} : vector<2x32xbf16>, vector<32x32xbf16>, vector<2x32xf32> -> vector<2x32xf32>
    %32 = arith.addf %28, %31 : vector<2x32xf32>
    %cst_23 = arith.constant 5.000000e-01 : f32
    %33 = vector.broadcast %cst_23 : f32 to vector<2x32xf32>
    %34 = arith.mulf %33, %32 : vector<2x32xf32>
    %35 = math.tanh %34 : vector<2x32xf32>
    %cst_24 = arith.constant 1.000000e+00 : f32
    %36 = vector.broadcast %cst_24 : f32 to vector<2x32xf32>
    %37 = arith.addf %36, %35 : vector<2x32xf32>
    %cst_25 = arith.constant 5.000000e-01 : f32
    %38 = vector.broadcast %cst_25 : f32 to vector<2x32xf32>
    %39 = arith.mulf %38, %37 : vector<2x32xf32>
    %c0_26 = arith.constant 0 : index
    %c2 = arith.constant 2 : index
    %40 = arith.index_cast %9 : i32 to index
    %c0_27 = arith.constant 0 : index
    %c0_28 = arith.constant 0 : index
    %41 = vector.load %arg1[%c0_26, %c2, %40, %c0_27, %c0_28] : memref<1x4x7x2x32xf32, #tpu.memory_space<vmem>>, vector<1x1x1x2x32xf32>
    %42 = vector.shape_cast %41 : vector<1x1x1x2x32xf32> to vector<2x32xf32>
    %43 = vector.extract_strided_slice %6 {offsets = [2, 0, 0], sizes = [1, 32, 32], strides = [1, 1, 1]} : vector<4x32x32xbf16> to vector<1x32x32xbf16>
    %44 = vector.shape_cast %43 : vector<1x32x32xbf16> to vector<32x32xbf16>
    %cst_29 = arith.constant dense<0.000000e+00> : vector<2x32xf32>
    %45 = tpu.matmul %11, %44, %cst_29 {dimension_numbers = #tpu.dot_dimension_numbers<[1], [0], [0], [1], [0, 0, 1, 1], [], []>} : vector<2x32xbf16>, vector<32x32xbf16>, vector<2x32xf32> -> vector<2x32xf32>
    %46 = arith.addf %42, %45 : vector<2x32xf32>
    %47 = math.tanh %46 : vector<2x32xf32>
    %c0_30 = arith.constant 0 : index
    %c3 = arith.constant 3 : index
    %48 = arith.index_cast %9 : i32 to index
    %c0_31 = arith.constant 0 : index
    %c0_32 = arith.constant 0 : index
    %49 = vector.load %arg1[%c0_30, %c3, %48, %c0_31, %c0_32] : memref<1x4x7x2x32xf32, #tpu.memory_space<vmem>>, vector<1x1x1x2x32xf32>
    %50 = vector.shape_cast %49 : vector<1x1x1x2x32xf32> to vector<2x32xf32>
    %51 = vector.extract_strided_slice %6 {offsets = [3, 0, 0], sizes = [1, 32, 32], strides = [1, 1, 1]} : vector<4x32x32xbf16> to vector<1x32x32xbf16>
    %52 = vector.shape_cast %51 : vector<1x32x32xbf16> to vector<32x32xbf16>
    %cst_33 = arith.constant dense<0.000000e+00> : vector<2x32xf32>
    %53 = tpu.matmul %11, %52, %cst_33 {dimension_numbers = #tpu.dot_dimension_numbers<[1], [0], [0], [1], [0, 0, 1, 1], [], []>} : vector<2x32xbf16>, vector<32x32xbf16>, vector<2x32xf32> -> vector<2x32xf32>
    %54 = arith.addf %50, %53 : vector<2x32xf32>
    %cst_34 = arith.constant 5.000000e-01 : f32
    %55 = vector.broadcast %cst_34 : f32 to vector<2x32xf32>
    %56 = arith.mulf %55, %54 : vector<2x32xf32>
    %57 = math.tanh %56 : vector<2x32xf32>
    %cst_35 = arith.constant 1.000000e+00 : f32
    %58 = vector.broadcast %cst_35 : f32 to vector<2x32xf32>
    %59 = arith.addf %58, %57 : vector<2x32xf32>
    %cst_36 = arith.constant 5.000000e-01 : f32
    %60 = vector.broadcast %cst_36 : f32 to vector<2x32xf32>
    %61 = arith.mulf %60, %59 : vector<2x32xf32>
    %c0_37 = arith.constant 0 : index
    %c0_38 = arith.constant 0 : index
    %62 = vector.load %arg5[%c0_37, %c0_38] : memref<2x32xf32, #tpu.memory_space<vmem>>, vector<2x32xf32>
    %63 = arith.mulf %39, %62 : vector<2x32xf32>
    %64 = arith.mulf %25, %47 : vector<2x32xf32>
    %65 = arith.addf %63, %64 : vector<2x32xf32>
    %66 = math.tanh %65 : vector<2x32xf32>
    %67 = arith.mulf %61, %66 : vector<2x32xf32>
    %c0_39 = arith.constant 0 : index
    %c0_40 = arith.constant 0 : index
    %68 = vector.load %arg5[%c0_39, %c0_40] : memref<2x32xf32, #tpu.memory_space<vmem>>, vector<2x32xf32>
    tpu.vector_store %arg5[%c0_39, %c0_40], %65 {strides = array<i32>} : memref<2x32xf32, #tpu.memory_space<vmem>>, vector<2x32xf32>,
    %c0_41 = arith.constant 0 : index
    %c0_42 = arith.constant 0 : index
    %69 = vector.load %arg4[%c0_41, %c0_42] : memref<2x32xf32, #tpu.memory_space<vmem>>, vector<2x32xf32>
    tpu.vector_store %arg4[%c0_41, %c0_42], %67 {strides = array<i32>} : memref<2x32xf32, #tpu.memory_space<vmem>>, vector<2x32xf32>,
    %c0_43 = arith.constant 0 : index
    %70 = arith.index_cast %9 : i32 to index
    %c0_44 = arith.constant 0 : index
    %c0_45 = arith.constant 0 : index
    %71 = vector.load %arg3[%c0_43, %70, %c0_44, %c0_45] : memref<1x7x2x32xf32, #tpu.memory_space<vmem>>, vector<1x1x2x32xf32>
    %72 = vector.shape_cast %71 : vector<1x1x2x32xf32> to vector<2x32xf32>
    %73 = vector.shape_cast %67 : vector<2x32xf32> to vector<1x1x2x32xf32>
    tpu.vector_store %arg3[%c0_43, %70, %c0_44, %c0_45], %73 {strides = array<i32>} : memref<1x7x2x32xf32, #tpu.memory_space<vmem>>, vector<1x1x2x32xf32>,
    %c1_i32 = arith.constant 1 : i32
    %c0_i32_46 = arith.constant 0 : i32
    %74 = arith.cmpi eq, %arg0, %c0_i32_46 : i32
    %c6_i32_47 = arith.constant 6 : i32
    %75 = arith.subi %c6_i32_47, %c1_i32 : i32
    %76 = arith.select %74, %c1_i32, %75 : i32
    %c0_48 = arith.constant 0 : index
    %c0_49 = arith.constant 0 : index
    %77 = vector.load %arg4[%c0_48, %c0_49] : memref<2x32xf32, #tpu.memory_space<vmem>>, vector<2x32xf32>
    %78 = arith.truncf %77 : vector<2x32xf32> to vector<2x32xbf16>
    %c0_50 = arith.constant 0 : index
    %c0_51 = arith.constant 0 : index
    %79 = arith.index_cast %76 : i32 to index
    %c0_52 = arith.constant 0 : index
    %c0_53 = arith.constant 0 : index
    %80 = vector.load %arg1[%c0_50, %c0_51, %79, %c0_52, %c0_53] : memref<1x4x7x2x32xf32, #tpu.memory_space<vmem>>, vector<1x1x1x2x32xf32>
    %81 = vector.shape_cast %80 : vector<1x1x1x2x32xf32> to vector<2x32xf32>
    %82 = vector.extract_strided_slice %6 {offsets = [0, 0, 0], sizes = [1, 32, 32], strides = [1, 1, 1]} : vector<4x32x32xbf16> to vector<1x32x32xbf16>
    %83 = vector.shape_cast %82 : vector<1x32x32xbf16> to vector<32x32xbf16>
    %cst_54 = arith.constant dense<0.000000e+00> : vector<2x32xf32>
    %84 = tpu.matmul %78, %83, %cst_54 {dimension_numbers = #tpu.dot_dimension_numbers<[1], [0], [0], [1], [0, 0, 1, 1], [], []>} : vector<2x32xbf16>, vector<32x32xbf16>, vector<2x32xf32> -> vector<2x32xf32>
    %85 = arith.addf %81, %84 : vector<2x32xf32>
    %cst_55 = arith.constant 5.000000e-01 : f32
    %86 = vector.broadcast %cst_55 : f32 to vector<2x32xf32>
    %87 = arith.mulf %86, %85 : vector<2x32xf32>
    %88 = math.tanh %87 : vector<2x32xf32>
    %cst_56 = arith.constant 1.000000e+00 : f32
    %89 = vector.broadcast %cst_56 : f32 to vector<2x32xf32>
    %90 = arith.addf %89, %88 : vector<2x32xf32>
    %cst_57 = arith.constant 5.000000e-01 : f32
    %91 = vector.broadcast %cst_57 : f32 to vector<2x32xf32>
    %92 = arith.mulf %91, %90 : vector<2x32xf32>
    %c0_58 = arith.constant 0 : index
    %c1_59 = arith.constant 1 : index
    %93 = arith.index_cast %76 : i32 to index
    %c0_60 = arith.constant 0 : index
    %c0_61 = arith.constant 0 : index
    %94 = vector.load %arg1[%c0_58, %c1_59, %93, %c0_60, %c0_61] : memref<1x4x7x2x32xf32, #tpu.memory_space<vmem>>, vector<1x1x1x2x32xf32>
    %95 = vector.shape_cast %94 : vector<1x1x1x2x32xf32> to vector<2x32xf32>
    %96 = vector.extract_strided_slice %6 {offsets = [1, 0, 0], sizes = [1, 32, 32], strides = [1, 1, 1]} : vector<4x32x32xbf16> to vector<1x32x32xbf16>
    %97 = vector.shape_cast %96 : vector<1x32x32xbf16> to vector<32x32xbf16>
    %cst_62 = arith.constant dense<0.000000e+00> : vector<2x32xf32>
    %98 = tpu.matmul %78, %97, %cst_62 {dimension_numbers = #tpu.dot_dimension_numbers<[1], [0], [0], [1], [0, 0, 1, 1], [], []>} : vector<2x32xbf16>, vector<32x32xbf16>, vector<2x32xf32> -> vector<2x32xf32>
    %99 = arith.addf %95, %98 : vector<2x32xf32>
    %cst_63 = arith.constant 5.000000e-01 : f32
    %100 = vector.broadcast %cst_63 : f32 to vector<2x32xf32>
    %101 = arith.mulf %100, %99 : vector<2x32xf32>
    %102 = math.tanh %101 : vector<2x32xf32>
    %cst_64 = arith.constant 1.000000e+00 : f32
    %103 = vector.broadcast %cst_64 : f32 to vector<2x32xf32>
    %104 = arith.addf %103, %102 : vector<2x32xf32>
    %cst_65 = arith.constant 5.000000e-01 : f32
    %105 = vector.broadcast %cst_65 : f32 to vector<2x32xf32>
    %106 = arith.mulf %105, %104 : vector<2x32xf32>
    %c0_66 = arith.constant 0 : index
    %c2_67 = arith.constant 2 : index
    %107 = arith.index_cast %76 : i32 to index
    %c0_68 = arith.constant 0 : index
    %c0_69 = arith.constant 0 : index
    %108 = vector.load %arg1[%c0_66, %c2_67, %107, %c0_68, %c0_69] : memref<1x4x7x2x32xf32, #tpu.memory_space<vmem>>, vector<1x1x1x2x32xf32>
    %109 = vector.shape_cast %108 : vector<1x1x1x2x32xf32> to vector<2x32xf32>
    %110 = vector.extract_strided_slice %6 {offsets = [2, 0, 0], sizes = [1, 32, 32], strides = [1, 1, 1]} : vector<4x32x32xbf16> to vector<1x32x32xbf16>
    %111 = vector.shape_cast %110 : vector<1x32x32xbf16> to vector<32x32xbf16>
    %cst_70 = arith.constant dense<0.000000e+00> : vector<2x32xf32>
    %112 = tpu.matmul %78, %111, %cst_70 {dimension_numbers = #tpu.dot_dimension_numbers<[1], [0], [0], [1], [0, 0, 1, 1], [], []>} : vector<2x32xbf16>, vector<32x32xbf16>, vector<2x32xf32> -> vector<2x32xf32>
    %113 = arith.addf %109, %112 : vector<2x32xf32>
    %114 = math.tanh %113 : vector<2x32xf32>
    %c0_71 = arith.constant 0 : index
    %c3_72 = arith.constant 3 : index
    %115 = arith.index_cast %76 : i32 to index
    %c0_73 = arith.constant 0 : index
    %c0_74 = arith.constant 0 : index
    %116 = vector.load %arg1[%c0_71, %c3_72, %115, %c0_73, %c0_74] : memref<1x4x7x2x32xf32, #tpu.memory_space<vmem>>, vector<1x1x1x2x32xf32>
    %117 = vector.shape_cast %116 : vector<1x1x1x2x32xf32> to vector<2x32xf32>
    %118 = vector.extract_strided_slice %6 {offsets = [3, 0, 0], sizes = [1, 32, 32], strides = [1, 1, 1]} : vector<4x32x32xbf16> to vector<1x32x32xbf16>
    %119 = vector.shape_cast %118 : vector<1x32x32xbf16> to vector<32x32xbf16>
    %cst_75 = arith.constant dense<0.000000e+00> : vector<2x32xf32>
    %120 = tpu.matmul %78, %119, %cst_75 {dimension_numbers = #tpu.dot_dimension_numbers<[1], [0], [0], [1], [0, 0, 1, 1], [], []>} : vector<2x32xbf16>, vector<32x32xbf16>, vector<2x32xf32> -> vector<2x32xf32>
    %121 = arith.addf %117, %120 : vector<2x32xf32>
    %cst_76 = arith.constant 5.000000e-01 : f32
    %122 = vector.broadcast %cst_76 : f32 to vector<2x32xf32>
    %123 = arith.mulf %122, %121 : vector<2x32xf32>
    %124 = math.tanh %123 : vector<2x32xf32>
    %cst_77 = arith.constant 1.000000e+00 : f32
    %125 = vector.broadcast %cst_77 : f32 to vector<2x32xf32>
    %126 = arith.addf %125, %124 : vector<2x32xf32>
    %cst_78 = arith.constant 5.000000e-01 : f32
    %127 = vector.broadcast %cst_78 : f32 to vector<2x32xf32>
    %128 = arith.mulf %127, %126 : vector<2x32xf32>
    %c0_79 = arith.constant 0 : index
    %c0_80 = arith.constant 0 : index
    %129 = vector.load %arg5[%c0_79, %c0_80] : memref<2x32xf32, #tpu.memory_space<vmem>>, vector<2x32xf32>
    %130 = arith.mulf %106, %129 : vector<2x32xf32>
    %131 = arith.mulf %92, %114 : vector<2x32xf32>
    %132 = arith.addf %130, %131 : vector<2x32xf32>
    %133 = math.tanh %132 : vector<2x32xf32>
    %134 = arith.mulf %128, %133 : vector<2x32xf32>
    %c0_81 = arith.constant 0 : index
    %c0_82 = arith.constant 0 : index
    %135 = vector.load %arg5[%c0_81, %c0_82] : memref<2x32xf32, #tpu.memory_space<vmem>>, vector<2x32xf32>
    tpu.vector_store %arg5[%c0_81, %c0_82], %132 {strides = array<i32>} : memref<2x32xf32, #tpu.memory_space<vmem>>, vector<2x32xf32>,
    %c0_83 = arith.constant 0 : index
    %c0_84 = arith.constant 0 : index
    %136 = vector.load %arg4[%c0_83, %c0_84] : memref<2x32xf32, #tpu.memory_space<vmem>>, vector<2x32xf32>
    tpu.vector_store %arg4[%c0_83, %c0_84], %134 {strides = array<i32>} : memref<2x32xf32, #tpu.memory_space<vmem>>, vector<2x32xf32>,
    %c0_85 = arith.constant 0 : index
    %137 = arith.index_cast %76 : i32 to index
    %c0_86 = arith.constant 0 : index
    %c0_87 = arith.constant 0 : index
    %138 = vector.load %arg3[%c0_85, %137, %c0_86, %c0_87] : memref<1x7x2x32xf32, #tpu.memory_space<vmem>>, vector<1x1x2x32xf32>
    %139 = vector.shape_cast %138 : vector<1x1x2x32xf32> to vector<2x32xf32>
    %140 = vector.shape_cast %134 : vector<2x32xf32> to vector<1x1x2x32xf32>
    tpu.vector_store %arg3[%c0_85, %137, %c0_86, %c0_87], %140 {strides = array<i32>} : memref<1x7x2x32xf32, #tpu.memory_space<vmem>>, vector<1x1x2x32xf32>,
    %c2_i32 = arith.constant 2 : i32
    %c0_i32_88 = arith.constant 0 : i32
    %141 = arith.cmpi eq, %arg0, %c0_i32_88 : i32
    %c6_i32_89 = arith.constant 6 : i32
    %142 = arith.subi %c6_i32_89, %c2_i32 : i32
    %143 = arith.select %141, %c2_i32, %142 : i32
    %c0_90 = arith.constant 0 : index
    %c0_91 = arith.constant 0 : index
    %144 = vector.load %arg4[%c0_90, %c0_91] : memref<2x32xf32, #tpu.memory_space<vmem>>, vector<2x32xf32>
    %145 = arith.truncf %144 : vector<2x32xf32> to vector<2x32xbf16>
    %c0_92 = arith.constant 0 : index
    %c0_93 = arith.constant 0 : index
    %146 = arith.index_cast %143 : i32 to index
    %c0_94 = arith.constant 0 : index
    %c0_95 = arith.constant 0 : index
    %147 = vector.load %arg1[%c0_92, %c0_93, %146, %c0_94, %c0_95] : memref<1x4x7x2x32xf32, #tpu.memory_space<vmem>>, vector<1x1x1x2x32xf32>
    %148 = vector.shape_cast %147 : vector<1x1x1x2x32xf32> to vector<2x32xf32>
    %149 = vector.extract_strided_slice %6 {offsets = [0, 0, 0], sizes = [1, 32, 32], strides = [1, 1, 1]} : vector<4x32x32xbf16> to vector<1x32x32xbf16>
    %150 = vector.shape_cast %149 : vector<1x32x32xbf16> to vector<32x32xbf16>
    %cst_96 = arith.constant dense<0.000000e+00> : vector<2x32xf32>
    %151 = tpu.matmul %145, %150, %cst_96 {dimension_numbers = #tpu.dot_dimension_numbers<[1], [0], [0], [1], [0, 0, 1, 1], [], []>} : vector<2x32xbf16>, vector<32x32xbf16>, vector<2x32xf32> -> vector<2x32xf32>
    %152 = arith.addf %148, %151 : vector<2x32xf32>
    %cst_97 = arith.constant 5.000000e-01 : f32
    %153 = vector.broadcast %cst_97 : f32 to vector<2x32xf32>
    %154 = arith.mulf %153, %152 : vector<2x32xf32>
    %155 = math.tanh %154 : vector<2x32xf32>
    %cst_98 = arith.constant 1.000000e+00 : f32
    %156 = vector.broadcast %cst_98 : f32 to vector<2x32xf32>
    %157 = arith.addf %156, %155 : vector<2x32xf32>
    %cst_99 = arith.constant 5.000000e-01 : f32
    %158 = vector.broadcast %cst_99 : f32 to vector<2x32xf32>
    %159 = arith.mulf %158, %157 : vector<2x32xf32>
    %c0_100 = arith.constant 0 : index
    %c1_101 = arith.constant 1 : index
    %160 = arith.index_cast %143 : i32 to index
    %c0_102 = arith.constant 0 : index
    %c0_103 = arith.constant 0 : index
    %161 = vector.load %arg1[%c0_100, %c1_101, %160, %c0_102, %c0_103] : memref<1x4x7x2x32xf32, #tpu.memory_space<vmem>>, vector<1x1x1x2x32xf32>
    %162 = vector.shape_cast %161 : vector<1x1x1x2x32xf32> to vector<2x32xf32>
    %163 = vector.extract_strided_slice %6 {offsets = [1, 0, 0], sizes = [1, 32, 32], strides = [1, 1, 1]} : vector<4x32x32xbf16> to vector<1x32x32xbf16>
    %164 = vector.shape_cast %163 : vector<1x32x32xbf16> to vector<32x32xbf16>
    %cst_104 = arith.constant dense<0.000000e+00> : vector<2x32xf32>
    %165 = tpu.matmul %145, %164, %cst_104 {dimension_numbers = #tpu.dot_dimension_numbers<[1], [0], [0], [1], [0, 0, 1, 1], [], []>} : vector<2x32xbf16>, vector<32x32xbf16>, vector<2x32xf32> -> vector<2x32xf32>
    %166 = arith.addf %162, %165 : vector<2x32xf32>
    %cst_105 = arith.constant 5.000000e-01 : f32
    %167 = vector.broadcast %cst_105 : f32 to vector<2x32xf32>
    %168 = arith.mulf %167, %166 : vector<2x32xf32>
    %169 = math.tanh %168 : vector<2x32xf32>
    %cst_106 = arith.constant 1.000000e+00 : f32
    %170 = vector.broadcast %cst_106 : f32 to vector<2x32xf32>
    %171 = arith.addf %170, %169 : vector<2x32xf32>
    %cst_107 = arith.constant 5.000000e-01 : f32
    %172 = vector.broadcast %cst_107 : f32 to vector<2x32xf32>
    %173 = arith.mulf %172, %171 : vector<2x32xf32>
    %c0_108 = arith.constant 0 : index
    %c2_109 = arith.constant 2 : index
    %174 = arith.index_cast %143 : i32 to index
    %c0_110 = arith.constant 0 : index
    %c0_111 = arith.constant 0 : index
    %175 = vector.load %arg1[%c0_108, %c2_109, %174, %c0_110, %c0_111] : memref<1x4x7x2x32xf32, #tpu.memory_space<vmem>>, vector<1x1x1x2x32xf32>
    %176 = vector.shape_cast %175 : vector<1x1x1x2x32xf32> to vector<2x32xf32>
    %177 = vector.extract_strided_slice %6 {offsets = [2, 0, 0], sizes = [1, 32, 32], strides = [1, 1, 1]} : vector<4x32x32xbf16> to vector<1x32x32xbf16>
    %178 = vector.shape_cast %177 : vector<1x32x32xbf16> to vector<32x32xbf16>
    %cst_112 = arith.constant dense<0.000000e+00> : vector<2x32xf32>
    %179 = tpu.matmul %145, %178, %cst_112 {dimension_numbers = #tpu.dot_dimension_numbers<[1], [0], [0], [1], [0, 0, 1, 1], [], []>} : vector<2x32xbf16>, vector<32x32xbf16>, vector<2x32xf32> -> vector<2x32xf32>
    %180 = arith.addf %176, %179 : vector<2x32xf32>
    %181 = math.tanh %180 : vector<2x32xf32>
    %c0_113 = arith.constant 0 : index
    %c3_114 = arith.constant 3 : index
    %182 = arith.index_cast %143 : i32 to index
    %c0_115 = arith.constant 0 : index
    %c0_116 = arith.constant 0 : index
    %183 = vector.load %arg1[%c0_113, %c3_114, %182, %c0_115, %c0_116] : memref<1x4x7x2x32xf32, #tpu.memory_space<vmem>>, vector<1x1x1x2x32xf32>
    %184 = vector.shape_cast %183 : vector<1x1x1x2x32xf32> to vector<2x32xf32>
    %185 = vector.extract_strided_slice %6 {offsets = [3, 0, 0], sizes = [1, 32, 32], strides = [1, 1, 1]} : vector<4x32x32xbf16> to vector<1x32x32xbf16>
    %186 = vector.shape_cast %185 : vector<1x32x32xbf16> to vector<32x32xbf16>
    %cst_117 = arith.constant dense<0.000000e+00> : vector<2x32xf32>
    %187 = tpu.matmul %145, %186, %cst_117 {dimension_numbers = #tpu.dot_dimension_numbers<[1], [0], [0], [1], [0, 0, 1, 1], [], []>} : vector<2x32xbf16>, vector<32x32xbf16>, vector<2x32xf32> -> vector<2x32xf32>
    %188 = arith.addf %184, %187 : vector<2x32xf32>
    %cst_118 = arith.constant 5.000000e-01 : f32
    %189 = vector.broadcast %cst_118 : f32 to vector<2x32xf32>
    %190 = arith.mulf %189, %188 : vector<2x32xf32>
    %191 = math.tanh %190 : vector<2x32xf32>
    %cst_119 = arith.constant 1.000000e+00 : f32
    %192 = vector.broadcast %cst_119 : f32 to vector<2x32xf32>
    %193 = arith.addf %192, %191 : vector<2x32xf32>
    %cst_120 = arith.constant 5.000000e-01 : f32
    %194 = vector.broadcast %cst_120 : f32 to vector<2x32xf32>
    %195 = arith.mulf %194, %193 : vector<2x32xf32>
    %c0_121 = arith.constant 0 : index
    %c0_122 = arith.constant 0 : index
    %196 = vector.load %arg5[%c0_121, %c0_122] : memref<2x32xf32, #tpu.memory_space<vmem>>, vector<2x32xf32>
    %197 = arith.mulf %173, %196 : vector<2x32xf32>
    %198 = arith.mulf %159, %181 : vector<2x32xf32>
    %199 = arith.addf %197, %198 : vector<2x32xf32>
    %200 = math.tanh %199 : vector<2x32xf32>
    %201 = arith.mulf %195, %200 : vector<2x32xf32>
    %c0_123 = arith.constant 0 : index
    %c0_124 = arith.constant 0 : index
    %202 = vector.load %arg5[%c0_123, %c0_124] : memref<2x32xf32, #tpu.memory_space<vmem>>, vector<2x32xf32>
    tpu.vector_store %arg5[%c0_123, %c0_124], %199 {strides = array<i32>} : memref<2x32xf32, #tpu.memory_space<vmem>>, vector<2x32xf32>,
    %c0_125 = arith.constant 0 : index
    %c0_126 = arith.constant 0 : index
    %203 = vector.load %arg4[%c0_125, %c0_126] : memref<2x32xf32, #tpu.memory_space<vmem>>, vector<2x32xf32>
    tpu.vector_store %arg4[%c0_125, %c0_126], %201 {strides = array<i32>} : memref<2x32xf32, #tpu.memory_space<vmem>>, vector<2x32xf32>,
    %c0_127 = arith.constant 0 : index
    %204 = arith.index_cast %143 : i32 to index
    %c0_128 = arith.constant 0 : index
    %c0_129 = arith.constant 0 : index
    %205 = vector.load %arg3[%c0_127, %204, %c0_128, %c0_129] : memref<1x7x2x32xf32, #tpu.memory_space<vmem>>, vector<1x1x2x32xf32>
    %206 = vector.shape_cast %205 : vector<1x1x2x32xf32> to vector<2x32xf32>
    %207 = vector.shape_cast %201 : vector<2x32xf32> to vector<1x1x2x32xf32>
    tpu.vector_store %arg3[%c0_127, %204, %c0_128, %c0_129], %207 {strides = array<i32>} : memref<1x7x2x32xf32, #tpu.memory_space<vmem>>, vector<1x1x2x32xf32>,
    %c3_i32 = arith.constant 3 : i32
    %c0_i32_130 = arith.constant 0 : i32
    %208 = arith.cmpi eq, %arg0, %c0_i32_130 : i32
    %c6_i32_131 = arith.constant 6 : i32
    %209 = arith.subi %c6_i32_131, %c3_i32 : i32
    %210 = arith.select %208, %c3_i32, %209 : i32
    %c0_132 = arith.constant 0 : index
    %c0_133 = arith.constant 0 : index
    %211 = vector.load %arg4[%c0_132, %c0_133] : memref<2x32xf32, #tpu.memory_space<vmem>>, vector<2x32xf32>
    %212 = arith.truncf %211 : vector<2x32xf32> to vector<2x32xbf16>
    %c0_134 = arith.constant 0 : index
    %c0_135 = arith.constant 0 : index
    %213 = arith.index_cast %210 : i32 to index
    %c0_136 = arith.constant 0 : index
    %c0_137 = arith.constant 0 : index
    %214 = vector.load %arg1[%c0_134, %c0_135, %213, %c0_136, %c0_137] : memref<1x4x7x2x32xf32, #tpu.memory_space<vmem>>, vector<1x1x1x2x32xf32>
    %215 = vector.shape_cast %214 : vector<1x1x1x2x32xf32> to vector<2x32xf32>
    %216 = vector.extract_strided_slice %6 {offsets = [0, 0, 0], sizes = [1, 32, 32], strides = [1, 1, 1]} : vector<4x32x32xbf16> to vector<1x32x32xbf16>
    %217 = vector.shape_cast %216 : vector<1x32x32xbf16> to vector<32x32xbf16>
    %cst_138 = arith.constant dense<0.000000e+00> : vector<2x32xf32>
    %218 = tpu.matmul %212, %217, %cst_138 {dimension_numbers = #tpu.dot_dimension_numbers<[1], [0], [0], [1], [0, 0, 1, 1], [], []>} : vector<2x32xbf16>, vector<32x32xbf16>, vector<2x32xf32> -> vector<2x32xf32>
    %219 = arith.addf %215, %218 : vector<2x32xf32>
    %cst_139 = arith.constant 5.000000e-01 : f32
    %220 = vector.broadcast %cst_139 : f32 to vector<2x32xf32>
    %221 = arith.mulf %220, %219 : vector<2x32xf32>
    %222 = math.tanh %221 : vector<2x32xf32>
    %cst_140 = arith.constant 1.000000e+00 : f32
    %223 = vector.broadcast %cst_140 : f32 to vector<2x32xf32>
    %224 = arith.addf %223, %222 : vector<2x32xf32>
    %cst_141 = arith.constant 5.000000e-01 : f32
    %225 = vector.broadcast %cst_141 : f32 to vector<2x32xf32>
    %226 = arith.mulf %225, %224 : vector<2x32xf32>
    %c0_142 = arith.constant 0 : index
    %c1_143 = arith.constant 1 : index
    %227 = arith.index_cast %210 : i32 to index
    %c0_144 = arith.constant 0 : index
    %c0_145 = arith.constant 0 : index
    %228 = vector.load %arg1[%c0_142, %c1_143, %227, %c0_144, %c0_145] : memref<1x4x7x2x32xf32, #tpu.memory_space<vmem>>, vector<1x1x1x2x32xf32>
    %229 = vector.shape_cast %228 : vector<1x1x1x2x32xf32> to vector<2x32xf32>
    %230 = vector.extract_strided_slice %6 {offsets = [1, 0, 0], sizes = [1, 32, 32], strides = [1, 1, 1]} : vector<4x32x32xbf16> to vector<1x32x32xbf16>
    %231 = vector.shape_cast %230 : vector<1x32x32xbf16> to vector<32x32xbf16>
    %cst_146 = arith.constant dense<0.000000e+00> : vector<2x32xf32>
    %232 = tpu.matmul %212, %231, %cst_146 {dimension_numbers = #tpu.dot_dimension_numbers<[1], [0], [0], [1], [0, 0, 1, 1], [], []>} : vector<2x32xbf16>, vector<32x32xbf16>, vector<2x32xf32> -> vector<2x32xf32>
    %233 = arith.addf %229, %232 : vector<2x32xf32>
    %cst_147 = arith.constant 5.000000e-01 : f32
    %234 = vector.broadcast %cst_147 : f32 to vector<2x32xf32>
    %235 = arith.mulf %234, %233 : vector<2x32xf32>
    %236 = math.tanh %235 : vector<2x32xf32>
    %cst_148 = arith.constant 1.000000e+00 : f32
    %237 = vector.broadcast %cst_148 : f32 to vector<2x32xf32>
    %238 = arith.addf %237, %236 : vector<2x32xf32>
    %cst_149 = arith.constant 5.000000e-01 : f32
    %239 = vector.broadcast %cst_149 : f32 to vector<2x32xf32>
    %240 = arith.mulf %239, %238 : vector<2x32xf32>
    %c0_150 = arith.constant 0 : index
    %c2_151 = arith.constant 2 : index
    %241 = arith.index_cast %210 : i32 to index
    %c0_152 = arith.constant 0 : index
    %c0_153 = arith.constant 0 : index
    %242 = vector.load %arg1[%c0_150, %c2_151, %241, %c0_152, %c0_153] : memref<1x4x7x2x32xf32, #tpu.memory_space<vmem>>, vector<1x1x1x2x32xf32>
    %243 = vector.shape_cast %242 : vector<1x1x1x2x32xf32> to vector<2x32xf32>
    %244 = vector.extract_strided_slice %6 {offsets = [2, 0, 0], sizes = [1, 32, 32], strides = [1, 1, 1]} : vector<4x32x32xbf16> to vector<1x32x32xbf16>
    %245 = vector.shape_cast %244 : vector<1x32x32xbf16> to vector<32x32xbf16>
    %cst_154 = arith.constant dense<0.000000e+00> : vector<2x32xf32>
    %246 = tpu.matmul %212, %245, %cst_154 {dimension_numbers = #tpu.dot_dimension_numbers<[1], [0], [0], [1], [0, 0, 1, 1], [], []>} : vector<2x32xbf16>, vector<32x32xbf16>, vector<2x32xf32> -> vector<2x32xf32>
    %247 = arith.addf %243, %246 : vector<2x32xf32>
    %248 = math.tanh %247 : vector<2x32xf32>
    %c0_155 = arith.constant 0 : index
    %c3_156 = arith.constant 3 : index
    %249 = arith.index_cast %210 : i32 to index
    %c0_157 = arith.constant 0 : index
    %c0_158 = arith.constant 0 : index
    %250 = vector.load %arg1[%c0_155, %c3_156, %249, %c0_157, %c0_158] : memref<1x4x7x2x32xf32, #tpu.memory_space<vmem>>, vector<1x1x1x2x32xf32>
    %251 = vector.shape_cast %250 : vector<1x1x1x2x32xf32> to vector<2x32xf32>
    %252 = vector.extract_strided_slice %6 {offsets = [3, 0, 0], sizes = [1, 32, 32], strides = [1, 1, 1]} : vector<4x32x32xbf16> to vector<1x32x32xbf16>
    %253 = vector.shape_cast %252 : vector<1x32x32xbf16> to vector<32x32xbf16>
    %cst_159 = arith.constant dense<0.000000e+00> : vector<2x32xf32>
    %254 = tpu.matmul %212, %253, %cst_159 {dimension_numbers = #tpu.dot_dimension_numbers<[1], [0], [0], [1], [0, 0, 1, 1], [], []>} : vector<2x32xbf16>, vector<32x32xbf16>, vector<2x32xf32> -> vector<2x32xf32>
    %255 = arith.addf %251, %254 : vector<2x32xf32>
    %cst_160 = arith.constant 5.000000e-01 : f32
    %256 = vector.broadcast %cst_160 : f32 to vector<2x32xf32>
    %257 = arith.mulf %256, %255 : vector<2x32xf32>
    %258 = math.tanh %257 : vector<2x32xf32>
    %cst_161 = arith.constant 1.000000e+00 : f32
    %259 = vector.broadcast %cst_161 : f32 to vector<2x32xf32>
    %260 = arith.addf %259, %258 : vector<2x32xf32>
    %cst_162 = arith.constant 5.000000e-01 : f32
    %261 = vector.broadcast %cst_162 : f32 to vector<2x32xf32>
    %262 = arith.mulf %261, %260 : vector<2x32xf32>
    %c0_163 = arith.constant 0 : index
    %c0_164 = arith.constant 0 : index
    %263 = vector.load %arg5[%c0_163, %c0_164] : memref<2x32xf32, #tpu.memory_space<vmem>>, vector<2x32xf32>
    %264 = arith.mulf %240, %263 : vector<2x32xf32>
    %265 = arith.mulf %226, %248 : vector<2x32xf32>
    %266 = arith.addf %264, %265 : vector<2x32xf32>
    %267 = math.tanh %266 : vector<2x32xf32>
    %268 = arith.mulf %262, %267 : vector<2x32xf32>
    %c0_165 = arith.constant 0 : index
    %c0_166 = arith.constant 0 : index
    %269 = vector.load %arg5[%c0_165, %c0_166] : memref<2x32xf32, #tpu.memory_space<vmem>>, vector<2x32xf32>
    tpu.vector_store %arg5[%c0_165, %c0_166], %266 {strides = array<i32>} : memref<2x32xf32, #tpu.memory_space<vmem>>, vector<2x32xf32>,
    %c0_167 = arith.constant 0 : index
    %c0_168 = arith.constant 0 : index
    %270 = vector.load %arg4[%c0_167, %c0_168] : memref<2x32xf32, #tpu.memory_space<vmem>>, vector<2x32xf32>
    tpu.vector_store %arg4[%c0_167, %c0_168], %268 {strides = array<i32>} : memref<2x32xf32, #tpu.memory_space<vmem>>, vector<2x32xf32>,
    %c0_169 = arith.constant 0 : index
    %271 = arith.index_cast %210 : i32 to index
    %c0_170 = arith.constant 0 : index
    %c0_171 = arith.constant 0 : index
    %272 = vector.load %arg3[%c0_169, %271, %c0_170, %c0_171] : memref<1x7x2x32xf32, #tpu.memory_space<vmem>>, vector<1x1x2x32xf32>
    %273 = vector.shape_cast %272 : vector<1x1x2x32xf32> to vector<2x32xf32>
    %274 = vector.shape_cast %268 : vector<2x32xf32> to vector<1x1x2x32xf32>
    tpu.vector_store %arg3[%c0_169, %271, %c0_170, %c0_171], %274 {strides = array<i32>} : memref<1x7x2x32xf32, #tpu.memory_space<vmem>>, vector<1x1x2x32xf32>,
    %c4_i32 = arith.constant 4 : i32
    %c0_i32_172 = arith.constant 0 : i32
    %275 = arith.cmpi eq, %arg0, %c0_i32_172 : i32
    %c6_i32_173 = arith.constant 6 : i32
    %276 = arith.subi %c6_i32_173, %c4_i32 : i32
    %277 = arith.select %275, %c4_i32, %276 : i32
    %c0_174 = arith.constant 0 : index
    %c0_175 = arith.constant 0 : index
    %278 = vector.load %arg4[%c0_174, %c0_175] : memref<2x32xf32, #tpu.memory_space<vmem>>, vector<2x32xf32>
    %279 = arith.truncf %278 : vector<2x32xf32> to vector<2x32xbf16>
    %c0_176 = arith.constant 0 : index
    %c0_177 = arith.constant 0 : index
    %280 = arith.index_cast %277 : i32 to index
    %c0_178 = arith.constant 0 : index
    %c0_179 = arith.constant 0 : index
    %281 = vector.load %arg1[%c0_176, %c0_177, %280, %c0_178, %c0_179] : memref<1x4x7x2x32xf32, #tpu.memory_space<vmem>>, vector<1x1x1x2x32xf32>
    %282 = vector.shape_cast %281 : vector<1x1x1x2x32xf32> to vector<2x32xf32>
    %283 = vector.extract_strided_slice %6 {offsets = [0, 0, 0], sizes = [1, 32, 32], strides = [1, 1, 1]} : vector<4x32x32xbf16> to vector<1x32x32xbf16>
    %284 = vector.shape_cast %283 : vector<1x32x32xbf16> to vector<32x32xbf16>
    %cst_180 = arith.constant dense<0.000000e+00> : vector<2x32xf32>
    %285 = tpu.matmul %279, %284, %cst_180 {dimension_numbers = #tpu.dot_dimension_numbers<[1], [0], [0], [1], [0, 0, 1, 1], [], []>} : vector<2x32xbf16>, vector<32x32xbf16>, vector<2x32xf32> -> vector<2x32xf32>
    %286 = arith.addf %282, %285 : vector<2x32xf32>
    %cst_181 = arith.constant 5.000000e-01 : f32
    %287 = vector.broadcast %cst_181 : f32 to vector<2x32xf32>
    %288 = arith.mulf %287, %286 : vector<2x32xf32>
    %289 = math.tanh %288 : vector<2x32xf32>
    %cst_182 = arith.constant 1.000000e+00 : f32
    %290 = vector.broadcast %cst_182 : f32 to vector<2x32xf32>
    %291 = arith.addf %290, %289 : vector<2x32xf32>
    %cst_183 = arith.constant 5.000000e-01 : f32
    %292 = vector.broadcast %cst_183 : f32 to vector<2x32xf32>
    %293 = arith.mulf %292, %291 : vector<2x32xf32>
    %c0_184 = arith.constant 0 : index
    %c1_185 = arith.constant 1 : index
    %294 = arith.index_cast %277 : i32 to index
    %c0_186 = arith.constant 0 : index
    %c0_187 = arith.constant 0 : index
    %295 = vector.load %arg1[%c0_184, %c1_185, %294, %c0_186, %c0_187] : memref<1x4x7x2x32xf32, #tpu.memory_space<vmem>>, vector<1x1x1x2x32xf32>
    %296 = vector.shape_cast %295 : vector<1x1x1x2x32xf32> to vector<2x32xf32>
    %297 = vector.extract_strided_slice %6 {offsets = [1, 0, 0], sizes = [1, 32, 32], strides = [1, 1, 1]} : vector<4x32x32xbf16> to vector<1x32x32xbf16>
    %298 = vector.shape_cast %297 : vector<1x32x32xbf16> to vector<32x32xbf16>
    %cst_188 = arith.constant dense<0.000000e+00> : vector<2x32xf32>
    %299 = tpu.matmul %279, %298, %cst_188 {dimension_numbers = #tpu.dot_dimension_numbers<[1], [0], [0], [1], [0, 0, 1, 1], [], []>} : vector<2x32xbf16>, vector<32x32xbf16>, vector<2x32xf32> -> vector<2x32xf32>
    %300 = arith.addf %296, %299 : vector<2x32xf32>
    %cst_189 = arith.constant 5.000000e-01 : f32
    %301 = vector.broadcast %cst_189 : f32 to vector<2x32xf32>
    %302 = arith.mulf %301, %300 : vector<2x32xf32>
    %303 = math.tanh %302 : vector<2x32xf32>
    %cst_190 = arith.constant 1.000000e+00 : f32
    %304 = vector.broadcast %cst_190 : f32 to vector<2x32xf32>
    %305 = arith.addf %304, %303 : vector<2x32xf32>
    %cst_191 = arith.constant 5.000000e-01 : f32
    %306 = vector.broadcast %cst_191 : f32 to vector<2x32xf32>
    %307 = arith.mulf %306, %305 : vector<2x32xf32>
    %c0_192 = arith.constant 0 : index
    %c2_193 = arith.constant 2 : index
    %308 = arith.index_cast %277 : i32 to index
    %c0_194 = arith.constant 0 : index
    %c0_195 = arith.constant 0 : index
    %309 = vector.load %arg1[%c0_192, %c2_193, %308, %c0_194, %c0_195] : memref<1x4x7x2x32xf32, #tpu.memory_space<vmem>>, vector<1x1x1x2x32xf32>
    %310 = vector.shape_cast %309 : vector<1x1x1x2x32xf32> to vector<2x32xf32>
    %311 = vector.extract_strided_slice %6 {offsets = [2, 0, 0], sizes = [1, 32, 32], strides = [1, 1, 1]} : vector<4x32x32xbf16> to vector<1x32x32xbf16>
    %312 = vector.shape_cast %311 : vector<1x32x32xbf16> to vector<32x32xbf16>
    %cst_196 = arith.constant dense<0.000000e+00> : vector<2x32xf32>
    %313 = tpu.matmul %279, %312, %cst_196 {dimension_numbers = #tpu.dot_dimension_numbers<[1], [0], [0], [1], [0, 0, 1, 1], [], []>} : vector<2x32xbf16>, vector<32x32xbf16>, vector<2x32xf32> -> vector<2x32xf32>
    %314 = arith.addf %310, %313 : vector<2x32xf32>
    %315 = math.tanh %314 : vector<2x32xf32>
    %c0_197 = arith.constant 0 : index
    %c3_198 = arith.constant 3 : index
    %316 = arith.index_cast %277 : i32 to index
    %c0_199 = arith.constant 0 : index
    %c0_200 = arith.constant 0 : index
    %317 = vector.load %arg1[%c0_197, %c3_198, %316, %c0_199, %c0_200] : memref<1x4x7x2x32xf32, #tpu.memory_space<vmem>>, vector<1x1x1x2x32xf32>
    %318 = vector.shape_cast %317 : vector<1x1x1x2x32xf32> to vector<2x32xf32>
    %319 = vector.extract_strided_slice %6 {offsets = [3, 0, 0], sizes = [1, 32, 32], strides = [1, 1, 1]} : vector<4x32x32xbf16> to vector<1x32x32xbf16>
    %320 = vector.shape_cast %319 : vector<1x32x32xbf16> to vector<32x32xbf16>
    %cst_201 = arith.constant dense<0.000000e+00> : vector<2x32xf32>
    %321 = tpu.matmul %279, %320, %cst_201 {dimension_numbers = #tpu.dot_dimension_numbers<[1], [0], [0], [1], [0, 0, 1, 1], [], []>} : vector<2x32xbf16>, vector<32x32xbf16>, vector<2x32xf32> -> vector<2x32xf32>
    %322 = arith.addf %318, %321 : vector<2x32xf32>
    %cst_202 = arith.constant 5.000000e-01 : f32
    %323 = vector.broadcast %cst_202 : f32 to vector<2x32xf32>
    %324 = arith.mulf %323, %322 : vector<2x32xf32>
    %325 = math.tanh %324 : vector<2x32xf32>
    %cst_203 = arith.constant 1.000000e+00 : f32
    %326 = vector.broadcast %cst_203 : f32 to vector<2x32xf32>
    %327 = arith.addf %326, %325 : vector<2x32xf32>
    %cst_204 = arith.constant 5.000000e-01 : f32
    %328 = vector.broadcast %cst_204 : f32 to vector<2x32xf32>
    %329 = arith.mulf %328, %327 : vector<2x32xf32>
    %c0_205 = arith.constant 0 : index
    %c0_206 = arith.constant 0 : index
    %330 = vector.load %arg5[%c0_205, %c0_206] : memref<2x32xf32, #tpu.memory_space<vmem>>, vector<2x32xf32>
    %331 = arith.mulf %307, %330 : vector<2x32xf32>
    %332 = arith.mulf %293, %315 : vector<2x32xf32>
    %333 = arith.addf %331, %332 : vector<2x32xf32>
    %334 = math.tanh %333 : vector<2x32xf32>
    %335 = arith.mulf %329, %334 : vector<2x32xf32>
    %c0_207 = arith.constant 0 : index
    %c0_208 = arith.constant 0 : index
    %336 = vector.load %arg5[%c0_207, %c0_208] : memref<2x32xf32, #tpu.memory_space<vmem>>, vector<2x32xf32>
    tpu.vector_store %arg5[%c0_207, %c0_208], %333 {strides = array<i32>} : memref<2x32xf32, #tpu.memory_space<vmem>>, vector<2x32xf32>,
    %c0_209 = arith.constant 0 : index
    %c0_210 = arith.constant 0 : index
    %337 = vector.load %arg4[%c0_209, %c0_210] : memref<2x32xf32, #tpu.memory_space<vmem>>, vector<2x32xf32>
    tpu.vector_store %arg4[%c0_209, %c0_210], %335 {strides = array<i32>} : memref<2x32xf32, #tpu.memory_space<vmem>>, vector<2x32xf32>,
    %c0_211 = arith.constant 0 : index
    %338 = arith.index_cast %277 : i32 to index
    %c0_212 = arith.constant 0 : index
    %c0_213 = arith.constant 0 : index
    %339 = vector.load %arg3[%c0_211, %338, %c0_212, %c0_213] : memref<1x7x2x32xf32, #tpu.memory_space<vmem>>, vector<1x1x2x32xf32>
    %340 = vector.shape_cast %339 : vector<1x1x2x32xf32> to vector<2x32xf32>
    %341 = vector.shape_cast %335 : vector<2x32xf32> to vector<1x1x2x32xf32>
    tpu.vector_store %arg3[%c0_211, %338, %c0_212, %c0_213], %341 {strides = array<i32>} : memref<1x7x2x32xf32, #tpu.memory_space<vmem>>, vector<1x1x2x32xf32>,
    %c5_i32 = arith.constant 5 : i32
    %c0_i32_214 = arith.constant 0 : i32
    %342 = arith.cmpi eq, %arg0, %c0_i32_214 : i32
    %c6_i32_215 = arith.constant 6 : i32
    %343 = arith.subi %c6_i32_215, %c5_i32 : i32
    %344 = arith.select %342, %c5_i32, %343 : i32
    %c0_216 = arith.constant 0 : index
    %c0_217 = arith.constant 0 : index
    %345 = vector.load %arg4[%c0_216, %c0_217] : memref<2x32xf32, #tpu.memory_space<vmem>>, vector<2x32xf32>
    %346 = arith.truncf %345 : vector<2x32xf32> to vector<2x32xbf16>
    %c0_218 = arith.constant 0 : index
    %c0_219 = arith.constant 0 : index
    %347 = arith.index_cast %344 : i32 to index
    %c0_220 = arith.constant 0 : index
    %c0_221 = arith.constant 0 : index
    %348 = vector.load %arg1[%c0_218, %c0_219, %347, %c0_220, %c0_221] : memref<1x4x7x2x32xf32, #tpu.memory_space<vmem>>, vector<1x1x1x2x32xf32>
    %349 = vector.shape_cast %348 : vector<1x1x1x2x32xf32> to vector<2x32xf32>
    %350 = vector.extract_strided_slice %6 {offsets = [0, 0, 0], sizes = [1, 32, 32], strides = [1, 1, 1]} : vector<4x32x32xbf16> to vector<1x32x32xbf16>
    %351 = vector.shape_cast %350 : vector<1x32x32xbf16> to vector<32x32xbf16>
    %cst_222 = arith.constant dense<0.000000e+00> : vector<2x32xf32>
    %352 = tpu.matmul %346, %351, %cst_222 {dimension_numbers = #tpu.dot_dimension_numbers<[1], [0], [0], [1], [0, 0, 1, 1], [], []>} : vector<2x32xbf16>, vector<32x32xbf16>, vector<2x32xf32> -> vector<2x32xf32>
    %353 = arith.addf %349, %352 : vector<2x32xf32>
    %cst_223 = arith.constant 5.000000e-01 : f32
    %354 = vector.broadcast %cst_223 : f32 to vector<2x32xf32>
    %355 = arith.mulf %354, %353 : vector<2x32xf32>
    %356 = math.tanh %355 : vector<2x32xf32>
    %cst_224 = arith.constant 1.000000e+00 : f32
    %357 = vector.broadcast %cst_224 : f32 to vector<2x32xf32>
    %358 = arith.addf %357, %356 : vector<2x32xf32>
    %cst_225 = arith.constant 5.000000e-01 : f32
    %359 = vector.broadcast %cst_225 : f32 to vector<2x32xf32>
    %360 = arith.mulf %359, %358 : vector<2x32xf32>
    %c0_226 = arith.constant 0 : index
    %c1_227 = arith.constant 1 : index
    %361 = arith.index_cast %344 : i32 to index
    %c0_228 = arith.constant 0 : index
    %c0_229 = arith.constant 0 : index
    %362 = vector.load %arg1[%c0_226, %c1_227, %361, %c0_228, %c0_229] : memref<1x4x7x2x32xf32, #tpu.memory_space<vmem>>, vector<1x1x1x2x32xf32>
    %363 = vector.shape_cast %362 : vector<1x1x1x2x32xf32> to vector<2x32xf32>
    %364 = vector.extract_strided_slice %6 {offsets = [1, 0, 0], sizes = [1, 32, 32], strides = [1, 1, 1]} : vector<4x32x32xbf16> to vector<1x32x32xbf16>
    %365 = vector.shape_cast %364 : vector<1x32x32xbf16> to vector<32x32xbf16>
    %cst_230 = arith.constant dense<0.000000e+00> : vector<2x32xf32>
    %366 = tpu.matmul %346, %365, %cst_230 {dimension_numbers = #tpu.dot_dimension_numbers<[1], [0], [0], [1], [0, 0, 1, 1], [], []>} : vector<2x32xbf16>, vector<32x32xbf16>, vector<2x32xf32> -> vector<2x32xf32>
    %367 = arith.addf %363, %366 : vector<2x32xf32>
    %cst_231 = arith.constant 5.000000e-01 : f32
    %368 = vector.broadcast %cst_231 : f32 to vector<2x32xf32>
    %369 = arith.mulf %368, %367 : vector<2x32xf32>
    %370 = math.tanh %369 : vector<2x32xf32>
    %cst_232 = arith.constant 1.000000e+00 : f32
    %371 = vector.broadcast %cst_232 : f32 to vector<2x32xf32>
    %372 = arith.addf %371, %370 : vector<2x32xf32>
    %cst_233 = arith.constant 5.000000e-01 : f32
    %373 = vector.broadcast %cst_233 : f32 to vector<2x32xf32>
    %374 = arith.mulf %373, %372 : vector<2x32xf32>
    %c0_234 = arith.constant 0 : index
    %c2_235 = arith.constant 2 : index
    %375 = arith.index_cast %344 : i32 to index
    %c0_236 = arith.constant 0 : index
    %c0_237 = arith.constant 0 : index
    %376 = vector.load %arg1[%c0_234, %c2_235, %375, %c0_236, %c0_237] : memref<1x4x7x2x32xf32, #tpu.memory_space<vmem>>, vector<1x1x1x2x32xf32>
    %377 = vector.shape_cast %376 : vector<1x1x1x2x32xf32> to vector<2x32xf32>
    %378 = vector.extract_strided_slice %6 {offsets = [2, 0, 0], sizes = [1, 32, 32], strides = [1, 1, 1]} : vector<4x32x32xbf16> to vector<1x32x32xbf16>
    %379 = vector.shape_cast %378 : vector<1x32x32xbf16> to vector<32x32xbf16>
    %cst_238 = arith.constant dense<0.000000e+00> : vector<2x32xf32>
    %380 = tpu.matmul %346, %379, %cst_238 {dimension_numbers = #tpu.dot_dimension_numbers<[1], [0], [0], [1], [0, 0, 1, 1], [], []>} : vector<2x32xbf16>, vector<32x32xbf16>, vector<2x32xf32> -> vector<2x32xf32>
    %381 = arith.addf %377, %380 : vector<2x32xf32>
    %382 = math.tanh %381 : vector<2x32xf32>
    %c0_239 = arith.constant 0 : index
    %c3_240 = arith.constant 3 : index
    %383 = arith.index_cast %344 : i32 to index
    %c0_241 = arith.constant 0 : index
    %c0_242 = arith.constant 0 : index
    %384 = vector.load %arg1[%c0_239, %c3_240, %383, %c0_241, %c0_242] : memref<1x4x7x2x32xf32, #tpu.memory_space<vmem>>, vector<1x1x1x2x32xf32>
    %385 = vector.shape_cast %384 : vector<1x1x1x2x32xf32> to vector<2x32xf32>
    %386 = vector.extract_strided_slice %6 {offsets = [3, 0, 0], sizes = [1, 32, 32], strides = [1, 1, 1]} : vector<4x32x32xbf16> to vector<1x32x32xbf16>
    %387 = vector.shape_cast %386 : vector<1x32x32xbf16> to vector<32x32xbf16>
    %cst_243 = arith.constant dense<0.000000e+00> : vector<2x32xf32>
    %388 = tpu.matmul %346, %387, %cst_243 {dimension_numbers = #tpu.dot_dimension_numbers<[1], [0], [0], [1], [0, 0, 1, 1], [], []>} : vector<2x32xbf16>, vector<32x32xbf16>, vector<2x32xf32> -> vector<2x32xf32>
    %389 = arith.addf %385, %388 : vector<2x32xf32>
    %cst_244 = arith.constant 5.000000e-01 : f32
    %390 = vector.broadcast %cst_244 : f32 to vector<2x32xf32>
    %391 = arith.mulf %390, %389 : vector<2x32xf32>
    %392 = math.tanh %391 : vector<2x32xf32>
    %cst_245 = arith.constant 1.000000e+00 : f32
    %393 = vector.broadcast %cst_245 : f32 to vector<2x32xf32>
    %394 = arith.addf %393, %392 : vector<2x32xf32>
    %cst_246 = arith.constant 5.000000e-01 : f32
    %395 = vector.broadcast %cst_246 : f32 to vector<2x32xf32>
    %396 = arith.mulf %395, %394 : vector<2x32xf32>
    %c0_247 = arith.constant 0 : index
    %c0_248 = arith.constant 0 : index
    %397 = vector.load %arg5[%c0_247, %c0_248] : memref<2x32xf32, #tpu.memory_space<vmem>>, vector<2x32xf32>
    %398 = arith.mulf %374, %397 : vector<2x32xf32>
    %399 = arith.mulf %360, %382 : vector<2x32xf32>
    %400 = arith.addf %398, %399 : vector<2x32xf32>
    %401 = math.tanh %400 : vector<2x32xf32>
    %402 = arith.mulf %396, %401 : vector<2x32xf32>
    %c0_249 = arith.constant 0 : index
    %c0_250 = arith.constant 0 : index
    %403 = vector.load %arg5[%c0_249, %c0_250] : memref<2x32xf32, #tpu.memory_space<vmem>>, vector<2x32xf32>
    tpu.vector_store %arg5[%c0_249, %c0_250], %400 {strides = array<i32>} : memref<2x32xf32, #tpu.memory_space<vmem>>, vector<2x32xf32>,
    %c0_251 = arith.constant 0 : index
    %c0_252 = arith.constant 0 : index
    %404 = vector.load %arg4[%c0_251, %c0_252] : memref<2x32xf32, #tpu.memory_space<vmem>>, vector<2x32xf32>
    tpu.vector_store %arg4[%c0_251, %c0_252], %402 {strides = array<i32>} : memref<2x32xf32, #tpu.memory_space<vmem>>, vector<2x32xf32>,
    %c0_253 = arith.constant 0 : index
    %405 = arith.index_cast %344 : i32 to index
    %c0_254 = arith.constant 0 : index
    %c0_255 = arith.constant 0 : index
    %406 = vector.load %arg3[%c0_253, %405, %c0_254, %c0_255] : memref<1x7x2x32xf32, #tpu.memory_space<vmem>>, vector<1x1x2x32xf32>
    %407 = vector.shape_cast %406 : vector<1x1x2x32xf32> to vector<2x32xf32>
    %408 = vector.shape_cast %402 : vector<2x32xf32> to vector<1x1x2x32xf32>
    tpu.vector_store %arg3[%c0_253, %405, %c0_254, %c0_255], %408 {strides = array<i32>} : memref<1x7x2x32xf32, #tpu.memory_space<vmem>>, vector<1x1x2x32xf32>,
    %c6_i32_256 = arith.constant 6 : i32
    %c0_i32_257 = arith.constant 0 : i32
    %409 = arith.cmpi eq, %arg0, %c0_i32_257 : i32
    %c6_i32_258 = arith.constant 6 : i32
    %410 = arith.subi %c6_i32_258, %c6_i32_256 : i32
    %411 = arith.select %409, %c6_i32_256, %410 : i32
    %c0_259 = arith.constant 0 : index
    %c0_260 = arith.constant 0 : index
    %412 = vector.load %arg4[%c0_259, %c0_260] : memref<2x32xf32, #tpu.memory_space<vmem>>, vector<2x32xf32>
    %413 = arith.truncf %412 : vector<2x32xf32> to vector<2x32xbf16>
    %c0_261 = arith.constant 0 : index
    %c0_262 = arith.constant 0 : index
    %414 = arith.index_cast %411 : i32 to index
    %c0_263 = arith.constant 0 : index
    %c0_264 = arith.constant 0 : index
    %415 = vector.load %arg1[%c0_261, %c0_262, %414, %c0_263, %c0_264] : memref<1x4x7x2x32xf32, #tpu.memory_space<vmem>>, vector<1x1x1x2x32xf32>
    %416 = vector.shape_cast %415 : vector<1x1x1x2x32xf32> to vector<2x32xf32>
    %417 = vector.extract_strided_slice %6 {offsets = [0, 0, 0], sizes = [1, 32, 32], strides = [1, 1, 1]} : vector<4x32x32xbf16> to vector<1x32x32xbf16>
    %418 = vector.shape_cast %417 : vector<1x32x32xbf16> to vector<32x32xbf16>
    %cst_265 = arith.constant dense<0.000000e+00> : vector<2x32xf32>
    %419 = tpu.matmul %413, %418, %cst_265 {dimension_numbers = #tpu.dot_dimension_numbers<[1], [0], [0], [1], [0, 0, 1, 1], [], []>} : vector<2x32xbf16>, vector<32x32xbf16>, vector<2x32xf32> -> vector<2x32xf32>
    %420 = arith.addf %416, %419 : vector<2x32xf32>
    %cst_266 = arith.constant 5.000000e-01 : f32
    %421 = vector.broadcast %cst_266 : f32 to vector<2x32xf32>
    %422 = arith.mulf %421, %420 : vector<2x32xf32>
    %423 = math.tanh %422 : vector<2x32xf32>
    %cst_267 = arith.constant 1.000000e+00 : f32
    %424 = vector.broadcast %cst_267 : f32 to vector<2x32xf32>
    %425 = arith.addf %424, %423 : vector<2x32xf32>
    %cst_268 = arith.constant 5.000000e-01 : f32
    %426 = vector.broadcast %cst_268 : f32 to vector<2x32xf32>
    %427 = arith.mulf %426, %425 : vector<2x32xf32>
    %c0_269 = arith.constant 0 : index
    %c1_270 = arith.constant 1 : index
    %428 = arith.index_cast %411 : i32 to index
    %c0_271 = arith.constant 0 : index
    %c0_272 = arith.constant 0 : index
    %429 = vector.load %arg1[%c0_269, %c1_270, %428, %c0_271, %c0_272] : memref<1x4x7x2x32xf32, #tpu.memory_space<vmem>>, vector<1x1x1x2x32xf32>
    %430 = vector.shape_cast %429 : vector<1x1x1x2x32xf32> to vector<2x32xf32>
    %431 = vector.extract_strided_slice %6 {offsets = [1, 0, 0], sizes = [1, 32, 32], strides = [1, 1, 1]} : vector<4x32x32xbf16> to vector<1x32x32xbf16>
    %432 = vector.shape_cast %431 : vector<1x32x32xbf16> to vector<32x32xbf16>
    %cst_273 = arith.constant dense<0.000000e+00> : vector<2x32xf32>
    %433 = tpu.matmul %413, %432, %cst_273 {dimension_numbers = #tpu.dot_dimension_numbers<[1], [0], [0], [1], [0, 0, 1, 1], [], []>} : vector<2x32xbf16>, vector<32x32xbf16>, vector<2x32xf32> -> vector<2x32xf32>
    %434 = arith.addf %430, %433 : vector<2x32xf32>
    %cst_274 = arith.constant 5.000000e-01 : f32
    %435 = vector.broadcast %cst_274 : f32 to vector<2x32xf32>
    %436 = arith.mulf %435, %434 : vector<2x32xf32>
    %437 = math.tanh %436 : vector<2x32xf32>
    %cst_275 = arith.constant 1.000000e+00 : f32
    %438 = vector.broadcast %cst_275 : f32 to vector<2x32xf32>
    %439 = arith.addf %438, %437 : vector<2x32xf32>
    %cst_276 = arith.constant 5.000000e-01 : f32
    %440 = vector.broadcast %cst_276 : f32 to vector<2x32xf32>
    %441 = arith.mulf %440, %439 : vector<2x32xf32>
    %c0_277 = arith.constant 0 : index
    %c2_278 = arith.constant 2 : index
    %442 = arith.index_cast %411 : i32 to index
    %c0_279 = arith.constant 0 : index
    %c0_280 = arith.constant 0 : index
    %443 = vector.load %arg1[%c0_277, %c2_278, %442, %c0_279, %c0_280] : memref<1x4x7x2x32xf32, #tpu.memory_space<vmem>>, vector<1x1x1x2x32xf32>
    %444 = vector.shape_cast %443 : vector<1x1x1x2x32xf32> to vector<2x32xf32>
    %445 = vector.extract_strided_slice %6 {offsets = [2, 0, 0], sizes = [1, 32, 32], strides = [1, 1, 1]} : vector<4x32x32xbf16> to vector<1x32x32xbf16>
    %446 = vector.shape_cast %445 : vector<1x32x32xbf16> to vector<32x32xbf16>
    %cst_281 = arith.constant dense<0.000000e+00> : vector<2x32xf32>
    %447 = tpu.matmul %413, %446, %cst_281 {dimension_numbers = #tpu.dot_dimension_numbers<[1], [0], [0], [1], [0, 0, 1, 1], [], []>} : vector<2x32xbf16>, vector<32x32xbf16>, vector<2x32xf32> -> vector<2x32xf32>
    %448 = arith.addf %444, %447 : vector<2x32xf32>
    %449 = math.tanh %448 : vector<2x32xf32>
    %c0_282 = arith.constant 0 : index
    %c3_283 = arith.constant 3 : index
    %450 = arith.index_cast %411 : i32 to index
    %c0_284 = arith.constant 0 : index
    %c0_285 = arith.constant 0 : index
    %451 = vector.load %arg1[%c0_282, %c3_283, %450, %c0_284, %c0_285] : memref<1x4x7x2x32xf32, #tpu.memory_space<vmem>>, vector<1x1x1x2x32xf32>
    %452 = vector.shape_cast %451 : vector<1x1x1x2x32xf32> to vector<2x32xf32>
    %453 = vector.extract_strided_slice %6 {offsets = [3, 0, 0], sizes = [1, 32, 32], strides = [1, 1, 1]} : vector<4x32x32xbf16> to vector<1x32x32xbf16>
    %454 = vector.shape_cast %453 : vector<1x32x32xbf16> to vector<32x32xbf16>
    %cst_286 = arith.constant dense<0.000000e+00> : vector<2x32xf32>
    %455 = tpu.matmul %413, %454, %cst_286 {dimension_numbers = #tpu.dot_dimension_numbers<[1], [0], [0], [1], [0, 0, 1, 1], [], []>} : vector<2x32xbf16>, vector<32x32xbf16>, vector<2x32xf32> -> vector<2x32xf32>
    %456 = arith.addf %452, %455 : vector<2x32xf32>
    %cst_287 = arith.constant 5.000000e-01 : f32
    %457 = vector.broadcast %cst_287 : f32 to vector<2x32xf32>
    %458 = arith.mulf %457, %456 : vector<2x32xf32>
    %459 = math.tanh %458 : vector<2x32xf32>
    %cst_288 = arith.constant 1.000000e+00 : f32
    %460 = vector.broadcast %cst_288 : f32 to vector<2x32xf32>
    %461 = arith.addf %460, %459 : vector<2x32xf32>
    %cst_289 = arith.constant 5.000000e-01 : f32
    %462 = vector.broadcast %cst_289 : f32 to vector<2x32xf32>
    %463 = arith.mulf %462, %461 : vector<2x32xf32>
    %c0_290 = arith.constant 0 : index
    %c0_291 = arith.constant 0 : index
    %464 = vector.load %arg5[%c0_290, %c0_291] : memref<2x32xf32, #tpu.memory_space<vmem>>, vector<2x32xf32>
    %465 = arith.mulf %441, %464 : vector<2x32xf32>
    %466 = arith.mulf %427, %449 : vector<2x32xf32>
    %467 = arith.addf %465, %466 : vector<2x32xf32>
    %468 = math.tanh %467 : vector<2x32xf32>
    %469 = arith.mulf %463, %468 : vector<2x32xf32>
    %c0_292 = arith.constant 0 : index
    %c0_293 = arith.constant 0 : index
    %470 = vector.load %arg5[%c0_292, %c0_293] : memref<2x32xf32, #tpu.memory_space<vmem>>, vector<2x32xf32>
    tpu.vector_store %arg5[%c0_292, %c0_293], %467 {strides = array<i32>} : memref<2x32xf32, #tpu.memory_space<vmem>>, vector<2x32xf32>,
    %c0_294 = arith.constant 0 : index
    %c0_295 = arith.constant 0 : index
    %471 = vector.load %arg4[%c0_294, %c0_295] : memref<2x32xf32, #tpu.memory_space<vmem>>, vector<2x32xf32>
    tpu.vector_store %arg4[%c0_294, %c0_295], %469 {strides = array<i32>} : memref<2x32xf32, #tpu.memory_space<vmem>>, vector<2x32xf32>,
    %c0_296 = arith.constant 0 : index
    %472 = arith.index_cast %411 : i32 to index
    %c0_297 = arith.constant 0 : index
    %c0_298 = arith.constant 0 : index
    %473 = vector.load %arg3[%c0_296, %472, %c0_297, %c0_298] : memref<1x7x2x32xf32, #tpu.memory_space<vmem>>, vector<1x1x2x32xf32>
    %474 = vector.shape_cast %473 : vector<1x1x2x32xf32> to vector<2x32xf32>
    %475 = vector.shape_cast %469 : vector<2x32xf32> to vector<1x1x2x32xf32>
    tpu.vector_store %arg3[%c0_296, %472, %c0_297, %c0_298], %475 {strides = array<i32>} : memref<1x7x2x32xf32, #tpu.memory_space<vmem>>, vector<1x1x2x32xf32>,
    %c7_i32 = arith.constant 7 : i32
    return
  }
  func.func @transform_0(%arg0: i32) -> (i32, i32, i32, i32, i32) {
    %c0_i32 = arith.constant 0 : i32
    %c0_i32_0 = arith.constant 0 : i32
    %c0_i32_1 = arith.constant 0 : i32
    %c0_i32_2 = arith.constant 0 : i32
    %c0_i32_3 = arith.constant 0 : i32
    return %arg0, %c0_i32, %c0_i32_0, %c0_i32_1, %c0_i32_2 : i32, i32, i32, i32, i32
  }
  func.func @transform_1(%arg0: i32) -> (i32, i32, i32, i32) {
    %c0_i32 = arith.constant 0 : i32
    %c0_i32_0 = arith.constant 0 : i32
    %c0_i32_1 = arith.constant 0 : i32
    %c0_i32_2 = arith.constant 0 : i32
    return %arg0, %c0_i32, %c0_i32_0, %c0_i32_1 : i32, i32, i32, i32
  }
  func.func @transform_2(%arg0: i32) -> (i32, i32, i32, i32) {
    %c0_i32 = arith.constant 0 : i32
    %c0_i32_0 = arith.constant 0 : i32
    %c0_i32_1 = arith.constant 0 : i32
    %c0_i32_2 = arith.constant 0 : i32
    return %arg0, %c0_i32, %c0_i32_0, %c0_i32_1 : i32, i32, i32, i32
  }
}

module attributes {stable_mosaic.version = 11 : i64} {
  func.func @_matmul_bias_kernel(%arg0: i32, %arg1: memref<14x64xf32, #tpu.memory_space<vmem>>, %arg2: memref<64x128xf32, #tpu.memory_space<vmem>>, %arg3: memref<1x128xf32, #tpu.memory_space<vmem>>, %arg4: memref<14x128xf32, #tpu.memory_space<vmem>>) attributes {dimension_semantics = [#tpu.dimension_semantics<parallel>], iteration_bounds = array<i64: 1>, scalar_prefetch = 0 : i64, scratch_operands = 0 : i64, tpu.core_type = #tpu.core_type<tc>, window_params = [{transform_indices = @transform_0, window_bounds = array<i64: 14, 64>}, {pipeline_mode = #tpu.pipeline_mode<synchronous>, transform_indices = @transform_1, window_bounds = array<i64: 64, 128>}, {pipeline_mode = #tpu.pipeline_mode<synchronous>, transform_indices = @transform_2, window_bounds = array<i64: 1, 128>}, {transform_indices = @transform_3, window_bounds = array<i64: 14, 128>}]} {
    %c0 = arith.constant 0 : index
    %c0_0 = arith.constant 0 : index
    %0 = vector.load %arg1[%c0, %c0_0] : memref<14x64xf32, #tpu.memory_space<vmem>>, vector<14x64xf32>
    %1 = arith.truncf %0 : vector<14x64xf32> to vector<14x64xbf16>
    %c0_1 = arith.constant 0 : index
    %c0_2 = arith.constant 0 : index
    %2 = vector.load %arg2[%c0_1, %c0_2] : memref<64x128xf32, #tpu.memory_space<vmem>>, vector<64x128xf32>
    %3 = arith.truncf %2 : vector<64x128xf32> to vector<64x128xbf16>
    %cst = arith.constant dense<0.000000e+00> : vector<14x128xf32>
    %4 = tpu.matmul %1, %3, %cst {dimension_numbers = #tpu.dot_dimension_numbers<[1], [0], [0], [1], [0, 0, 1, 1], [], []>} : vector<14x64xbf16>, vector<64x128xbf16>, vector<14x128xf32> -> vector<14x128xf32>
    %c0_3 = arith.constant 0 : index
    %c0_4 = arith.constant 0 : index
    %5 = vector.load %arg3[%c0_3, %c0_4] : memref<1x128xf32, #tpu.memory_space<vmem>>, vector<1x128xf32>
    %6 = vector.broadcast %5 : vector<1x128xf32> to vector<14x128xf32>
    %7 = arith.addf %4, %6 : vector<14x128xf32>
    %c0_5 = arith.constant 0 : index
    %c0_6 = arith.constant 0 : index
    %8 = vector.load %arg4[%c0_5, %c0_6] : memref<14x128xf32, #tpu.memory_space<vmem>>, vector<14x128xf32>
    tpu.vector_store %arg4[%c0_5, %c0_6], %7 {strides = array<i32>} : memref<14x128xf32, #tpu.memory_space<vmem>>, vector<14x128xf32>,
    return
  }
  func.func @transform_0(%arg0: i32) -> (i32, i32) {
    %c0_i32 = arith.constant 0 : i32
    %c0_i32_0 = arith.constant 0 : i32
    return %arg0, %c0_i32 : i32, i32
  }
  func.func @transform_1(%arg0: i32) -> (i32, i32) {
    %c0_i32 = arith.constant 0 : i32
    %c0_i32_0 = arith.constant 0 : i32
    %c0_i32_1 = arith.constant 0 : i32
    return %c0_i32, %c0_i32_0 : i32, i32
  }
  func.func @transform_2(%arg0: i32) -> (i32, i32) {
    %c0_i32 = arith.constant 0 : i32
    %c0_i32_0 = arith.constant 0 : i32
    %c0_i32_1 = arith.constant 0 : i32
    return %c0_i32, %c0_i32_0 : i32, i32
  }
  func.func @transform_3(%arg0: i32) -> (i32, i32) {
    %c0_i32 = arith.constant 0 : i32
    %c0_i32_0 = arith.constant 0 : i32
    return %arg0, %c0_i32 : i32, i32
  }
}

</mosaic_0001>

<bundles_post_ra>
// kernel: plate_recognition_forward.12
= control target key start
LH: loop header
LB: loop body
LE: loop exit
PB: predicated region body
PF: predicated region fallthrough
CT: control target
= control target key end

     0   :  { %s832_s12 = smov 0   ;;  %s834_s13 = smov 0   ;;  %s965_s0 = inlined_call_operand.vmem [shape: f32[2,18,34,1], index: 0, kind: input, shape index: {}]   ;;  %s966_s1 = inlined_call_operand.vmem [shape: f32[9,1,64], index: 1, kind: input, shape index: {}]   ;;  %s967_s2 = inlined_call_operand.vmem [shape: f32[1,64], index: 2, kind: input, shape index: {}]   ;;  %s968_s3 = inlined_call_operand.vmem [shape: f32[2,16,32,64], index: 3, kind: output, shape index: {}]  }
   0x1   :  { %s836_s14 = smov 0   ;;  %s838_s15 = smov 0  }
   0x2   :  { %s840_s16 = smov 0  }
   0x3 LB: > { %s22_s17 = sadd.s32 1, %s801_s14  ;;  %s25_s18 = sadd.s32 1, %s805_s15  ;;  %s809_s16 = sphi %s840_s16, %s13_s16   ;;  %s805_s15 = sphi %s838_s15, %s972_s15   ;;  %s801_s14 = sphi %s836_s14, %s971_s14   ;;  %s797_s13 = sphi %s834_s13, %s970_s13   ;;  %s793_s12 = sphi %s832_s12, %s969_s12  }
   0x4   : > { %p23_p0 = scmp.ge.s32.totalorder %s22_s17, 16  ;;  %p678_p1 = scmp.ge.s32.totalorder %s809_s16, 1 }
   0x5   : > { %p151_p2 = scmp.lt.s32.totalorder %s809_s16, 33 }
   0x6   : > { %s974_s17 = smov (%p23_p0, %s22_s17), 0  ;;  %s976_s18 = smov (!%p23_p0, %s25_s18), %s805_s15 }
   0x7   : > { %p152_p3 = pnand %p678_p1, %p151_p2  ;;  %p27_p4 = scmp.ge.s32.totalorder %s976_s18, 2 }
   0x8   : > { %p179_p5 = scmp.lt.s32.totalorder (!%p152_p3), %s797_s13, 1  ;;  %s193_s19 = smul.u32 (!%p152_p3), 40, %s793_s12 }
   0x9   : > { %s978_s18 = smov (%p27_p4, %s976_s18), 0  ;;  %155 = sbr.rel (%p152_p3) target bundleno = 221 (0xdd), region = 32 }
   0xa   : > { %p186_p6 = scmp.lt.s32.totalorder (!%p152_p3), %s793_s12, 15 }
   0xe   : > { %v811_v0 = vmov 0   ;;  %s980_s13 = smov (!%p179_p5, %s797_s13), 1  ;;  %v685_v61 = vld [vmem:[%s966_s1 + $0x1] ss:$0 sm:$0xff]  ;;  %v683_v62 = vld [vmem:[%s966_s1] ss:$0 sm:$0xff] }
   0xf   : > { %770 = vset.pattern.permute.xlu1 %v811_v0  ;;  %769 = vset.pattern.permute.xlu0 %v811_v0  ;;  %s727_s20 = smul.u32 720, %s980_s13  ;;  %v687_v63 = vld [vmem:[%s966_s1 + $0x2] ss:$0 sm:$0xff]  ;;  %s982_s12 = smov (!%p186_p6, %s793_s12), 15  ;;  %vm575_vm0 = vcmask 523264  }
  0x10   : > { %s680_s21 = sshll.u32 %s982_s12, 2  ;;  %s681_s22 = sshll.u32 %s980_s13, 6 }
  0x11   : > { %s183_s23 = scalar_lea.vmem %s965_s0, %s727_s20  ;;  %s190_s25 = sadd.s32 %s681_s22, %s680_s21 }
  0x12   : > { %s871_s24 = scalar_lea.vmem %s183_s23, %s193_s19  ;;  %s682_s26 = sshll.u32 %s190_s25, 3 }
  0x13   : > { %v197_v1 = vld [vmem:[%s871_s24 + $0x10] sm:$0xff]  ;;  %v195_v2 = vld [vmem:[%s871_s24] sm:$0xff]  ;;  %v198_v3 = vld [vmem:[%s871_s24 + $0x18] sm:$0xff]  ;;  %s192_s29 = scalar_lea.vmem %s968_s3, %s682_s26 }
  0x14   : > { %212 = vperm.xlu1 %770, %v197_v1   ;;  %202 = vperm.xlu0 %769, %v195_v2   ;;  %v196_v4 = vld [vmem:[%s871_s24 + $0x8] sm:$0xff]  ;;  %v237_v7 = vld [vmem:[%s871_s24 + $0x19] sm:$0xff]  ;;  %v236_v8 = vld [vmem:[%s871_s24 + $0x11] sm:$0xff] }
  0x15   : > { %v235_v5 = vld [vmem:[%s871_s24 + $0x9] sm:$0xff]  ;;  %v234_v6 = vld [vmem:[%s871_s24 + $0x1] sm:$0xff]  ;;  %v276_v12 = vld [vmem:[%s871_s24 + $0x12] sm:$0xff] }
  0x16   : > { %v275_v9 = vld [vmem:[%s871_s24 + $0xa] sm:$0xff]  ;;  %v274_v10 = vld [vmem:[%s871_s24 + $0x2] sm:$0xff]  ;;  %v277_v11 = vld [vmem:[%s871_s24 + $0x1a] sm:$0xff] }
  0x17   : > { %v689_v13 = vld [vmem:[%s871_s24 + $0x30] sm:$0xff]  ;;  %v688_v14 = vld [vmem:[%s871_s24 + $0x28] sm:$0xff]  ;;  %v691_v15 = vld [vmem:[%s871_s24 + $0x40] sm:$0xff] }
  0x18   : > { %217 = vperm.xlu1 %770, %v198_v3   ;;  %207 = vperm.xlu0 %769, %v196_v4   ;;  %v690_v16 = vld [vmem:[%s871_s24 + $0x38] sm:$0xff]  ;;  %v694_v18 = vld [vmem:[%s871_s24 + $0x29] sm:$0xff]  ;;  %v697_v19 = vld [vmem:[%s871_s24 + $0x41] sm:$0xff] }
  0x19   : > { %v695_v17 = vld [vmem:[%s871_s24 + $0x31] sm:$0xff]  ;;  %v696_v20 = vld [vmem:[%s871_s24 + $0x39] sm:$0xff]  ;;  %v703_v23 = vld [vmem:[%s871_s24 + $0x42] sm:$0xff] }
  0x1a   : > { %v701_v21 = vld [vmem:[%s871_s24 + $0x32] sm:$0xff]  ;;  %v700_v22 = vld [vmem:[%s871_s24 + $0x2a] sm:$0xff]  ;;  %v702_v24 = vld [vmem:[%s871_s24 + $0x3a] sm:$0xff] }
  0x1b   : > { %v707_v25 = vld [vmem:[%s871_s24 + $0x58] sm:$0xff]  ;;  %v706_v26 = vld [vmem:[%s871_s24 + $0x50] sm:$0xff]  ;;  %v709_v27 = vld [vmem:[%s871_s24 + $0x68] sm:$0xff] }
  0x1c   : > { %247 = vperm.xlu1 %770, %v235_v5   ;;  %242 = vperm.xlu0 %769, %v234_v6   ;;  %v708_v28 = vld [vmem:[%s871_s24 + $0x60] sm:$0xff]  ;;  %v712_v30 = vld [vmem:[%s871_s24 + $0x51] sm:$0xff]  ;;  %v715_v31 = vld [vmem:[%s871_s24 + $0x69] sm:$0xff] }
  0x1d   : > { %v713_v29 = vld [vmem:[%s871_s24 + $0x59] sm:$0xff]  ;;  %v714_v32 = vld [vmem:[%s871_s24 + $0x61] sm:$0xff]  ;;  %v721_v35 = vld [vmem:[%s871_s24 + $0x6a] sm:$0xff] }
  0x1e   : > { %v719_v33 = vld [vmem:[%s871_s24 + $0x5a] sm:$0xff]  ;;  %v718_v34 = vld [vmem:[%s871_s24 + $0x52] sm:$0xff]  ;;  %v720_v36 = vld [vmem:[%s871_s24 + $0x62] sm:$0xff] }
  0x1f   : > { %v693_v4 = vld [vmem:[%s966_s1 + $0x3] ss:$0 sm:$0xff] }
  0x20   : > { %257 = vperm.xlu1 %770, %v237_v7   ;;  %252 = vperm.xlu0 %769, %v236_v8  }
  0x24   : > { %287 = vperm.xlu1 %770, %v275_v9   ;;  %282 = vperm.xlu0 %769, %v274_v10  }
  0x28   : > { %297 = vperm.xlu1 %770, %v277_v11   ;;  %292 = vperm.xlu0 %769, %v276_v12   ;;  %v699_v11 = vld [vmem:[%s966_s1 + $0x4] ss:$0 sm:$0xff] }
  0x2c   : > { %330 = vperm.xlu1 %770, %v689_v13   ;;  %325 = vperm.xlu0 %769, %v688_v14  }
  0x30   : > { %340 = vperm.xlu1 %770, %v691_v15   ;;  %335 = vperm.xlu0 %769, %v690_v16  }
  0x34   : > { %370 = vperm.xlu1 %770, %v695_v17   ;;  %365 = vperm.xlu0 %769, %v694_v18  }
  0x38   : > { %380 = vperm.xlu1 %770, %v697_v19   ;;  %375 = vperm.xlu0 %769, %v696_v20  }
  0x3c   : > { %410 = vperm.xlu1 %770, %v701_v21   ;;  %405 = vperm.xlu0 %769, %v700_v22   ;;  %v705_v22 = vld [vmem:[%s966_s1 + $0x5] ss:$0 sm:$0xff] }
  0x40   : > { %420 = vperm.xlu1 %770, %v703_v23   ;;  %415 = vperm.xlu0 %769, %v702_v24  }
  0x44   : > { %453 = vperm.xlu1 %770, %v707_v25   ;;  %448 = vperm.xlu0 %769, %v706_v26  }
  0x48   : > { %463 = vperm.xlu1 %770, %v709_v27   ;;  %458 = vperm.xlu0 %769, %v708_v28  }
  0x4c   : > { %493 = vperm.xlu1 %770, %v713_v29   ;;  %488 = vperm.xlu0 %769, %v712_v30  }
  0x50   : > { %503 = vperm.xlu1 %770, %v715_v31   ;;  %498 = vperm.xlu0 %769, %v714_v32   ;;  %v711_v31 = vld [vmem:[%s966_s1 + $0x6] ss:$0 sm:$0xff] }
  0x54   : > { %533 = vperm.xlu1 %770, %v719_v33   ;;  %528 = vperm.xlu0 %769, %v718_v34  }
  0x58   : > { %543 = vperm.xlu1 %770, %v721_v35   ;;  %538 = vperm.xlu0 %769, %v720_v36  }
  0x8f   : > { %v213_v37 = vpop.permute.xlu1 %212  ;;  %v203_v38 = vpop.permute.xlu0 %202 }
  0x90   : > { %v226_v5 = vmul.f32 %v683_v62, %v203_v38  ;;  %v228_v18 = vmul.f32 %v683_v62, %v213_v37 }
  0x93   : > { %v218_v39 = vpop.permute.xlu1 %217  ;;  %v208_v40 = vpop.permute.xlu0 %207 }
  0x94   : > { %v227_v6 = vmul.f32 %v683_v62, %v208_v40  ;;  %v229_v19 = vmul.f32 %v683_v62, %v218_v39 }
  0x97   : > { %v248_v41 = vpop.permute.xlu1 %247  ;;  %v243_v42 = vpop.permute.xlu0 %242 }
  0x98   : > { %v267_v2 = vmul.f32 %v685_v61, %v248_v41  ;;  %v266_v3 = vmul.f32 %v685_v61, %v243_v42  ;;  %v717_v42 = vld [vmem:[%s966_s1 + $0x7] ss:$0 sm:$0xff] }
  0x9a   : > { %v271_v14 = vadd.f32 %v267_v2, %v227_v6  ;;  %v270_v15 = vadd.f32 %v266_v3, %v226_v5 }
  0x9b   : > { %v258_v43 = vpop.permute.xlu1 %257  ;;  %v253_v44 = vpop.permute.xlu0 %252 }
  0x9c   : > { %v269_v9 = vmul.f32 %v685_v61, %v258_v43  ;;  %v268_v10 = vmul.f32 %v685_v61, %v253_v44 }
  0x9e   : > { %v273_v27 = vadd.f32 %v269_v9, %v229_v19  ;;  %v272_v28 = vadd.f32 %v268_v10, %v228_v18 }
  0x9f   : > { %v288_v45 = vpop.permute.xlu1 %287  ;;  %v283_v46 = vpop.permute.xlu0 %282 }
  0xa0   : > { %v307_v7 = vmul.f32 %v687_v63, %v288_v45  ;;  %v306_v8 = vmul.f32 %v687_v63, %v283_v46 }
  0xa2   : > { %v311_v23 = vadd.f32 %v307_v7, %v271_v14  ;;  %v310_v24 = vadd.f32 %v306_v8, %v270_v15 }
  0xa3   : > { %v298_v47 = vpop.permute.xlu1 %297  ;;  %v293_v48 = vpop.permute.xlu0 %292 }
  0xa4   : > { %v309_v20 = vmul.f32 %v687_v63, %v298_v47  ;;  %v308_v21 = vmul.f32 %v687_v63, %v293_v48  ;;  %v723_v63 = vld [vmem:[%s966_s1 + $0x8] ss:$0 sm:$0xff] }
  0xa6   : > { %v313_v38 = vadd.f32 %v309_v20, %v273_v27  ;;  %v312_v39 = vadd.f32 %v308_v21, %v272_v28 }
  0xa7   : > { %v331_v49 = vpop.permute.xlu1 %330  ;;  %v326_v50 = vpop.permute.xlu0 %325 }
  0xa8   : > { %v350_v16 = vmul.f32 %v693_v4, %v331_v49  ;;  %v349_v17 = vmul.f32 %v693_v4, %v326_v50 }
  0xaa   : > { %v354_v34 = vadd.f32 %v350_v16, %v311_v23  ;;  %v353_v35 = vadd.f32 %v349_v17, %v310_v24 }
  0xab   : > { %v341_v51 = vpop.permute.xlu1 %340  ;;  %v336_v52 = vpop.permute.xlu0 %335 }
  0xac   : > { %v352_v29 = vmul.f32 %v693_v4, %v341_v51  ;;  %v351_v30 = vmul.f32 %v693_v4, %v336_v52 }
  0xae   : > { %v356_v47 = vadd.f32 %v352_v29, %v313_v38  ;;  %v355_v48 = vadd.f32 %v351_v30, %v312_v39 }
  0xaf   : > { %v371_v53 = vpop.permute.xlu1 %370  ;;  %v366_v54 = vpop.permute.xlu0 %365 }
  0xb0   : > { %v390_v25 = vmul.f32 %v699_v11, %v371_v53  ;;  %v389_v26 = vmul.f32 %v699_v11, %v366_v54 }
  0xb2   : > { %v394_v43 = vadd.f32 %v390_v25, %v354_v34  ;;  %v393_v44 = vadd.f32 %v389_v26, %v353_v35 }
  0xb3   : > { %v381_v55 = vpop.permute.xlu1 %380  ;;  %v376_v56 = vpop.permute.xlu0 %375 }
  0xb4   : > { %v392_v40 = vmul.f32 %v699_v11, %v381_v55  ;;  %v391_v41 = vmul.f32 %v699_v11, %v376_v56 }
  0xb7   : > { %v411_v57 = vpop.permute.xlu1 %410  ;;  %v406_v58 = vpop.permute.xlu0 %405 }
  0xb8   : > { %v430_v36 = vmul.f32 %v705_v22, %v411_v57  ;;  %v429_v37 = vmul.f32 %v705_v22, %v406_v58  ;;  %v396_v57 = vadd.f32 %v392_v40, %v356_v47  ;;  %v395_v58 = vadd.f32 %v391_v41, %v355_v48 }
  0xba   : > { %v434_v53 = vadd.f32 %v430_v36, %v394_v43  ;;  %v433_v54 = vadd.f32 %v429_v37, %v393_v44 }
  0xbb   : > { %v421_v59 = vpop.permute.xlu1 %420  ;;  %v416_v60 = vpop.permute.xlu0 %415 }
  0xbc   : > { %v432_v49 = vmul.f32 %v705_v22, %v421_v59  ;;  %v431_v50 = vmul.f32 %v705_v22, %v416_v60 }
  0xbe   : > { %v436_v59 = vadd.f32 %v432_v49, %v396_v57  ;;  %v435_v60 = vadd.f32 %v431_v50, %v395_v58 }
  0xbf   : > { %v454_v0 = vpop.permute.xlu1 %453  ;;  %v449_v1 = vpop.permute.xlu0 %448 }
  0xc0   : > { %v473_v45 = vmul.f32 %v711_v31, %v454_v0  ;;  %v472_v46 = vmul.f32 %v711_v31, %v449_v1 }
  0xc2   : > { %v477_v0 = vadd.f32 %v473_v45, %v434_v53  ;;  %v476_v1 = vadd.f32 %v472_v46, %v433_v54 }
  0xc3   : > { %v464_v12 = vpop.permute.xlu1 %463  ;;  %v459_v13 = vpop.permute.xlu0 %458 }
  0xc4   : > { %v475_v61 = vmul.f32 %v711_v31, %v464_v12  ;;  %v474_v62 = vmul.f32 %v711_v31, %v459_v13  ;;  %v724_v12 = vld [vmem:[%s967_s2] ss:$0 sm:$0xff] }
  0xc6   : > { %v479_v10 = vadd.f32 %v475_v61, %v436_v59  ;;  %v478_v11 = vadd.f32 %v474_v62, %v435_v60 }
  0xc7   : > { %v494_v32 = vpop.permute.xlu1 %493  ;;  %v489_v33 = vpop.permute.xlu0 %488 }
  0xc8   : > { %v513_v55 = vmul.f32 %v717_v42, %v494_v32  ;;  %v512_v56 = vmul.f32 %v717_v42, %v489_v33 }
  0xca   : > { %v517_v6 = vadd.f32 %v513_v55, %v477_v0  ;;  %v516_v7 = vadd.f32 %v512_v56, %v476_v1 }
  0xcb   : > { %v504_v51 = vpop.permute.xlu1 %503  ;;  %v499_v52 = vpop.permute.xlu0 %498 }
  0xcc   : > { %v515_v2 = vmul.f32 %v717_v42, %v504_v51  ;;  %v514_v3 = vmul.f32 %v717_v42, %v499_v52 }
  0xce   : > { %v519_v15 = vadd.f32 %v515_v2, %v479_v10  ;;  %v518_v16 = vadd.f32 %v514_v3, %v478_v11 }
  0xcf   : > { %v534_v4 = vpop.permute.xlu1 %533  ;;  %v529_v5 = vpop.permute.xlu0 %528 }
  0xd0   : > { %v553_v8 = vmul.f32 %v723_v63, %v534_v4  ;;  %v552_v9 = vmul.f32 %v723_v63, %v529_v5 }
  0xd2   : > { %v557_v13 = vadd.f32 %v553_v8, %v517_v6  ;;  %v556_v14 = vadd.f32 %v552_v9, %v516_v7 }
  0xd3   : > { %v544_v17 = vpop.permute.xlu1 %543  ;;  %v539_v18 = vpop.permute.xlu0 %538 }
  0xd4   : > { %v568_v19 = vadd.f32 %v724_v12, %v557_v13  ;;  %v567_v20 = vadd.f32 %v724_v12, %v556_v14  ;;  %v555_v21 = vmul.f32 %v723_v63, %v544_v17  ;;  %v554_v22 = vmul.f32 %v723_v63, %v539_v18 }
  0xd6   : > { %v572_v23 = vmax.f32 %v568_v19, 0.0  ;;  %v571_v24 = vmax.f32 %v567_v20, 0.0  ;;  %v559_v25 = vadd.f32 %v555_v21, %v519_v15  ;;  %v558_v26 = vadd.f32 %v554_v22, %v518_v16 }
  0xd8   : > { %577 = vst.msk [vmem:[%s192_s29 + $0x8] sm:$0xff] %vm575_vm0, %v572_v23  ;;  %576 = vst.msk [vmem:[%s192_s29] sm:$0xff] %vm575_vm0, %v571_v24  ;;  %v570_v27 = vadd.f32 %v724_v12, %v559_v25  ;;  %v569_v28 = vadd.f32 %v724_v12, %v558_v26 }
  0xda   : > { %v574_v29 = vmax.f32 %v570_v27, 0.0  ;;  %v573_v30 = vmax.f32 %v569_v28, 0.0 }
  0xdc   : > { %579 = vst.msk [vmem:[%s192_s29 + $0x18] sm:$0xff] %vm575_vm0, %v574_v29  ;;  %578 = vst.msk [vmem:[%s192_s29 + $0x10] sm:$0xff] %vm575_vm0, %v573_v30 }
  0xdd PF: > { %s13_s16 = sadd.s32 1, %s809_s16   ;;  %s969_s12 = smov %s801_s14 }
  0xde   : > { %p10_p7 = scmp.ge.s32.totalorder %s13_s16, 34   ;;  %s970_s13 = smov %s805_s15 }
  0xdf   : > { %s971_s14 = smov %s974_s17  ;;  %s972_s15 = smov %s978_s18 }
  0xe0   :  { %12 = sbr.rel (!%p10_p7) target bundleno = 3 (0x3), region = 73 }

// kernel: plate_recognition_forward.13
= control target key start
LH: loop header
LB: loop body
LE: loop exit
PB: predicated region body
PF: predicated region fallthrough
CT: control target
= control target key end

     0   :  { %s541_s15 = smov 0   ;;  %s673_s0 = inlined_call_operand.vmem [shape: f32[2,8,16,64], index: 0, kind: input, shape index: {}]   ;;  %s674_s1 = inlined_call_operand.vmem [shape: f32[2,8,16,64], index: 1, kind: input, shape index: {}]   ;;  %s675_s2 = inlined_call_operand.vmem [shape: f32[2,8,16,64], index: 2, kind: input, shape index: {}]   ;;  %s676_s3 = inlined_call_operand.vmem [shape: f32[2,8,16,64], index: 3, kind: input, shape index: {}]   ;;  %s677_s4 = inlined_call_operand.vmem [shape: f32[2,8,16,64], index: 4, kind: output, shape index: {}]  }
   0x1 LB: > { %s478_s16 = sadd.s32 4294967295, %s514_s15   ;;  %p482_p0 = scmp.ge.s32.totalorder %s514_s15, 1  ;;  %s514_s15 = sphi %s541_s15, %s14_s15  }
   0x2   : > { %p192_p1 = scmp.lt.s32.totalorder %s514_s15, 3 }
   0x4   : > { %p193_p2 = pnand %p482_p0, %p192_p1 }
   0x5   : > { %p233_p3 = scmp.lt.s32.totalorder (!%p193_p2), %s478_s16, 1 }
   0x6   : > { %196 = sbr.rel (%p193_p2) target bundleno = 42 (0x2a), region = 36 }
   0xb   : > { %s679_s16 = smov (!%p233_p3, %s478_s16), 1  ;;  %vm370_vm0 = vcmask 523264  }
   0xc   : > { %s495_s17 = sshll.u32 %s679_s16, 7 }
   0xd   : > { %s552_s20 = scalar_lea.vmem %s673_s0, %s495_s17  ;;  %s557_s23 = scalar_lea.vmem %s674_s1, %s495_s17 }
   0xe   : > { %s562_s26 = scalar_lea.vmem %s675_s2, %s495_s17  ;;  %s567_s29 = scalar_lea.vmem %s676_s3, %s495_s17  ;;  %v258_v0 = vld [vmem:[%s552_s20] sm:$0xff]  ;;  %v259_v2 = vld [vmem:[%s552_s20 + $0x8] sm:$0xff]  ;;  %v260_v9 = vld [vmem:[%s552_s20 + $0x10] sm:$0xff] }
   0xf   : > { %v274_v1 = vld [vmem:[%s557_s23] sm:$0xff]  ;;  %v275_v5 = vld [vmem:[%s557_s23 + $0x8] sm:$0xff]  ;;  %v276_v12 = vld [vmem:[%s557_s23 + $0x10] sm:$0xff]  ;;  %s583_s6 = scalar_lea.vmem %s677_s4, %s495_s17 }
  0x10   : > { %v290_v3 = vmax.f32 %v258_v0, %v274_v1  ;;  %v306_v4 = vld [vmem:[%s562_s26] sm:$0xff]  ;;  %v291_v7 = vmax.f32 %v259_v2, %v275_v5  ;;  %v307_v8 = vld [vmem:[%s562_s26 + $0x8] sm:$0xff]  ;;  %v308_v13 = vld [vmem:[%s562_s26 + $0x10] sm:$0xff]  ;;  %v292_v15 = vmax.f32 %v260_v9, %v276_v12 }
  0x11   : > { %v338_v6 = vld [vmem:[%s567_s29] sm:$0xff]  ;;  %v339_v11 = vld [vmem:[%s567_s29 + $0x8] sm:$0xff]  ;;  %v261_v16 = vld [vmem:[%s552_s20 + $0x18] sm:$0xff] }
  0x12   : > { %v322_v10 = vmax.f32 %v290_v3, %v306_v4  ;;  %v323_v14 = vmax.f32 %v291_v7, %v307_v8  ;;  %v277_v17 = vld [vmem:[%s557_s23 + $0x18] sm:$0xff]  ;;  %v340_v20 = vld [vmem:[%s567_s29 + $0x10] sm:$0xff]  ;;  %v262_v22 = vld [vmem:[%s552_s20 + $0x20] sm:$0xff]  ;;  %v324_v25 = vmax.f32 %v292_v15, %v308_v13 }
  0x13   : > { %v309_v18 = vld [vmem:[%s562_s26 + $0x18] sm:$0xff]  ;;  %v293_v21 = vmax.f32 %v261_v16, %v277_v17  ;;  %v278_v23 = vld [vmem:[%s557_s23 + $0x20] sm:$0xff]  ;;  %v263_v29 = vld [vmem:[%s552_s20 + $0x28] sm:$0xff] }
  0x14   : > { %v354_v19 = vmax.f32 %v322_v10, %v338_v6  ;;  %v355_v24 = vmax.f32 %v323_v14, %v339_v11  ;;  %v341_v26 = vld [vmem:[%s567_s29 + $0x18] sm:$0xff]  ;;  %v294_v27 = vmax.f32 %v262_v22, %v278_v23  ;;  %v310_v28 = vld [vmem:[%s562_s26 + $0x20] sm:$0xff]  ;;  %v279_v32 = vld [vmem:[%s557_s23 + $0x28] sm:$0xff]  ;;  %v356_v34 = vmax.f32 %v324_v25, %v340_v20 }
  0x15   : > { %v325_v30 = vmax.f32 %v293_v21, %v309_v18  ;;  %v342_v31 = vld [vmem:[%s567_s29 + $0x20] sm:$0xff]  ;;  %v311_v33 = vld [vmem:[%s562_s26 + $0x28] sm:$0xff]  ;;  %v295_v36 = vmax.f32 %v263_v29, %v279_v32  ;;  %v264_v37 = vld [vmem:[%s552_s20 + $0x30] sm:$0xff] }
  0x16   : > { %371 = vst.msk [vmem:[%s583_s6] sm:$0xff] %vm370_vm0, %v354_v19  ;;  %372 = vst.msk [vmem:[%s583_s6 + $0x8] sm:$0xff] %vm370_vm0, %v355_v24  ;;  %v326_v35 = vmax.f32 %v294_v27, %v310_v28  ;;  %v280_v38 = vld [vmem:[%s557_s23 + $0x30] sm:$0xff]  ;;  %v343_v41 = vld [vmem:[%s567_s29 + $0x28] sm:$0xff] }
  0x17   : > { %v312_v39 = vld [vmem:[%s562_s26 + $0x30] sm:$0xff]  ;;  %v357_v40 = vmax.f32 %v325_v30, %v341_v26  ;;  %v296_v42 = vmax.f32 %v264_v37, %v280_v38  ;;  %v265_v43 = vld [vmem:[%s552_s20 + $0x38] sm:$0xff]  ;;  %373 = vst.msk [vmem:[%s583_s6 + $0x10] sm:$0xff] %vm370_vm0, %v356_v34  ;;  %v327_v46 = vmax.f32 %v295_v36, %v311_v33  ;;  %v266_v50 = vld [vmem:[%s552_s20 + $0x40] sm:$0xff] }
  0x18   : > { %v281_v44 = vld [vmem:[%s557_s23 + $0x38] sm:$0xff]  ;;  %v358_v45 = vmax.f32 %v326_v35, %v342_v31  ;;  %v344_v47 = vld [vmem:[%s567_s29 + $0x30] sm:$0xff]  ;;  %v282_v53 = vld [vmem:[%s557_s23 + $0x40] sm:$0xff] }
  0x19   : > { %v297_v48 = vmax.f32 %v265_v43, %v281_v44  ;;  %v313_v49 = vld [vmem:[%s562_s26 + $0x38] sm:$0xff]  ;;  %374 = vst.msk [vmem:[%s583_s6 + $0x18] sm:$0xff] %vm370_vm0, %v357_v40  ;;  %v328_v51 = vmax.f32 %v296_v42, %v312_v39  ;;  %v314_v54 = vld [vmem:[%s562_s26 + $0x40] sm:$0xff]  ;;  %v359_v55 = vmax.f32 %v327_v46, %v343_v41  ;;  %v298_v57 = vmax.f32 %v266_v50, %v282_v53  ;;  %v267_v58 = vld [vmem:[%s552_s20 + $0x48] sm:$0xff] }
  0x1a   : > { %v345_v52 = vld [vmem:[%s567_s29 + $0x38] sm:$0xff]  ;;  %375 = vst.msk [vmem:[%s583_s6 + $0x20] sm:$0xff] %vm370_vm0, %v358_v45  ;;  %v283_v59 = vld [vmem:[%s557_s23 + $0x48] sm:$0xff]  ;;  %v346_v62 = vld [vmem:[%s567_s29 + $0x40] sm:$0xff] }
  0x1b   : > { %v329_v56 = vmax.f32 %v297_v48, %v313_v49  ;;  %v315_v60 = vld [vmem:[%s562_s26 + $0x48] sm:$0xff]  ;;  %v360_v61 = vmax.f32 %v328_v51, %v344_v47  ;;  %v299_v63 = vmax.f32 %v267_v58, %v283_v59  ;;  %v268_v0 = vld [vmem:[%s552_s20 + $0x50] sm:$0xff]  ;;  %376 = vst.msk [vmem:[%s583_s6 + $0x28] sm:$0xff] %vm370_vm0, %v359_v55  ;;  %v330_v3 = vmax.f32 %v298_v57, %v314_v54  ;;  %v269_v7 = vld [vmem:[%s552_s20 + $0x58] sm:$0xff] }
  0x1c   : > { %v284_v1 = vld [vmem:[%s557_s23 + $0x50] sm:$0xff]  ;;  %v347_v4 = vld [vmem:[%s567_s29 + $0x48] sm:$0xff]  ;;  %v285_v10 = vld [vmem:[%s557_s23 + $0x58] sm:$0xff] }
  0x1d   : > { %v361_v2 = vmax.f32 %v329_v56, %v345_v52  ;;  %v300_v5 = vmax.f32 %v268_v0, %v284_v1  ;;  %v316_v6 = vld [vmem:[%s562_s26 + $0x50] sm:$0xff]  ;;  %377 = vst.msk [vmem:[%s583_s6 + $0x30] sm:$0xff] %vm370_vm0, %v360_v61  ;;  %v331_v8 = vmax.f32 %v299_v63, %v315_v60  ;;  %v317_v11 = vld [vmem:[%s562_s26 + $0x58] sm:$0xff]  ;;  %v362_v12 = vmax.f32 %v330_v3, %v346_v62  ;;  %v270_v15 = vld [vmem:[%s552_s20 + $0x60] sm:$0xff] }
  0x1e   : > { %v348_v9 = vld [vmem:[%s567_s29 + $0x50] sm:$0xff]  ;;  %v301_v14 = vmax.f32 %v269_v7, %v285_v10  ;;  %v286_v16 = vld [vmem:[%s557_s23 + $0x60] sm:$0xff]  ;;  %v349_v19 = vld [vmem:[%s567_s29 + $0x58] sm:$0xff] }
  0x1f   : > { %378 = vst.msk [vmem:[%s583_s6 + $0x38] sm:$0xff] %vm370_vm0, %v361_v2  ;;  %v332_v13 = vmax.f32 %v300_v5, %v316_v6  ;;  %v318_v17 = vld [vmem:[%s562_s26 + $0x60] sm:$0xff]  ;;  %v363_v18 = vmax.f32 %v331_v8, %v347_v4  ;;  %v302_v20 = vmax.f32 %v270_v15, %v286_v16  ;;  %v271_v21 = vld [vmem:[%s552_s20 + $0x68] sm:$0xff]  ;;  %379 = vst.msk [vmem:[%s583_s6 + $0x40] sm:$0xff] %vm370_vm0, %v362_v12 }
  0x20   : > { %v287_v22 = vld [vmem:[%s557_s23 + $0x68] sm:$0xff]  ;;  %v333_v24 = vmax.f32 %v301_v14, %v317_v11  ;;  %v350_v25 = vld [vmem:[%s567_s29 + $0x60] sm:$0xff]  ;;  %v272_v28 = vld [vmem:[%s552_s20 + $0x70] sm:$0xff] }
  0x21   : > { %v364_v23 = vmax.f32 %v332_v13, %v348_v9  ;;  %v303_v26 = vmax.f32 %v271_v21, %v287_v22  ;;  %v319_v27 = vld [vmem:[%s562_s26 + $0x68] sm:$0xff]  ;;  %380 = vst.msk [vmem:[%s583_s6 + $0x48] sm:$0xff] %vm370_vm0, %v363_v18  ;;  %v334_v29 = vmax.f32 %v302_v20, %v318_v17  ;;  %v288_v31 = vld [vmem:[%s557_s23 + $0x70] sm:$0xff]  ;;  %v273_v36 = vld [vmem:[%s552_s20 + $0x78] sm:$0xff] }
  0x22   : > { %v351_v30 = vld [vmem:[%s567_s29 + $0x68] sm:$0xff]  ;;  %v320_v32 = vld [vmem:[%s562_s26 + $0x70] sm:$0xff]  ;;  %v365_v33 = vmax.f32 %v333_v24, %v349_v19  ;;  %v304_v35 = vmax.f32 %v272_v28, %v288_v31  ;;  %v289_v37 = vld [vmem:[%s557_s23 + $0x78] sm:$0xff] }
  0x23   : > { %381 = vst.msk [vmem:[%s583_s6 + $0x50] sm:$0xff] %vm370_vm0, %v364_v23  ;;  %v335_v34 = vmax.f32 %v303_v26, %v319_v27  ;;  %v321_v38 = vld [vmem:[%s562_s26 + $0x78] sm:$0xff]  ;;  %v366_v39 = vmax.f32 %v334_v29, %v350_v25  ;;  %v352_v40 = vld [vmem:[%s567_s29 + $0x70] sm:$0xff]  ;;  %v305_v41 = vmax.f32 %v273_v36, %v289_v37 }
  0x24   : > { %382 = vst.msk [vmem:[%s583_s6 + $0x58] sm:$0xff] %vm370_vm0, %v365_v33  ;;  %v336_v43 = vmax.f32 %v304_v35, %v320_v32  ;;  %v353_v44 = vld [vmem:[%s567_s29 + $0x78] sm:$0xff] }
  0x25   : > { %v367_v42 = vmax.f32 %v335_v34, %v351_v30  ;;  %383 = vst.msk [vmem:[%s583_s6 + $0x60] sm:$0xff] %vm370_vm0, %v366_v39  ;;  %v337_v45 = vmax.f32 %v305_v41, %v321_v38 }
  0x26   : > { %v368_v46 = vmax.f32 %v336_v43, %v352_v40 }
  0x27   : > { %384 = vst.msk [vmem:[%s583_s6 + $0x68] sm:$0xff] %vm370_vm0, %v367_v42  ;;  %v369_v47 = vmax.f32 %v337_v45, %v353_v44 }
  0x28   : > { %385 = vst.msk [vmem:[%s583_s6 + $0x70] sm:$0xff] %vm370_vm0, %v368_v46 }
  0x29   : > { %386 = vst.msk [vmem:[%s583_s6 + $0x78] sm:$0xff] %vm370_vm0, %v369_v47 }
  0x2a PF: > { %s14_s15 = sadd.s32 1, %s514_s15  }
  0x2b   : > { %p11_p4 = scmp.ge.s32.totalorder %s14_s15, 4  }
  0x2d   :  { %13 = sbr.rel (!%p11_p4) target bundleno = 1 (0x1), region = 75 }

// kernel: plate_recognition_forward.15
= control target key start
LH: loop header
LB: loop body
LE: loop exit
PB: predicated region body
PF: predicated region fallthrough
CT: control target
= control target key end

     0   :  { %s444_s15 = smov 0   ;;  %s470_s0 = inlined_call_operand.vmem [shape: f32[2,4,8,128], index: 0, kind: input, shape index: {}]   ;;  %s471_s1 = inlined_call_operand.vmem [shape: f32[2,4,8,128], index: 1, kind: input, shape index: {}]   ;;  %s472_s2 = inlined_call_operand.vmem [shape: f32[2,4,8,128], index: 2, kind: input, shape index: {}]   ;;  %s473_s3 = inlined_call_operand.vmem [shape: f32[2,4,8,128], index: 3, kind: input, shape index: {}]   ;;  %s474_s4 = inlined_call_operand.vmem [shape: f32[2,4,8,128], index: 4, kind: output, shape index: {}]  }
   0x1 LB: > { %s381_s16 = sadd.s32 4294967295, %s417_s15   ;;  %p385_p0 = scmp.ge.s32.totalorder %s417_s15, 1  ;;  %s417_s15 = sphi %s444_s15, %s14_s15  }
   0x2   : > { %p192_p1 = scmp.lt.s32.totalorder %s417_s15, 3 }
   0x4   : > { %p193_p2 = pnand %p385_p0, %p192_p1 }
   0x5   : > { %p233_p3 = scmp.lt.s32.totalorder (!%p193_p2), %s381_s16, 1 }
   0x6   : > { %196 = sbr.rel (%p193_p2) target bundleno = 26 (0x1a), region = 36 }
   0xb   : > { %s476_s16 = smov (!%p233_p3, %s381_s16), 1 }
   0xc   : > { %s398_s17 = sshll.u32 %s476_s16, 5 }
   0xd   : > { %s237_s20 = scalar_lea.vmem %s470_s0, %s398_s17  ;;  %s242_s23 = scalar_lea.vmem %s471_s1, %s398_s17 }
   0xe   : > { %s247_s26 = scalar_lea.vmem %s472_s2, %s398_s17  ;;  %s252_s29 = scalar_lea.vmem %s473_s3, %s398_s17  ;;  %v258_v0 = vld [vmem:[%s237_s20] sm:$0xff]  ;;  %v259_v2 = vld [vmem:[%s237_s20 + $0x8] sm:$0xff]  ;;  %v260_v9 = vld [vmem:[%s237_s20 + $0x10] sm:$0xff] }
   0xf   : > { %v262_v1 = vld [vmem:[%s242_s23] sm:$0xff]  ;;  %v263_v5 = vld [vmem:[%s242_s23 + $0x8] sm:$0xff]  ;;  %v264_v12 = vld [vmem:[%s242_s23 + $0x10] sm:$0xff]  ;;  %s257_s6 = scalar_lea.vmem %s474_s4, %s398_s17 }
  0x10   : > { %v266_v3 = vmax.f32 %v258_v0, %v262_v1  ;;  %v270_v4 = vld [vmem:[%s247_s26] sm:$0xff]  ;;  %v267_v7 = vmax.f32 %v259_v2, %v263_v5  ;;  %v271_v8 = vld [vmem:[%s247_s26 + $0x8] sm:$0xff]  ;;  %v272_v13 = vld [vmem:[%s247_s26 + $0x10] sm:$0xff]  ;;  %v268_v15 = vmax.f32 %v260_v9, %v264_v12 }
  0x11   : > { %v278_v6 = vld [vmem:[%s252_s29] sm:$0xff]  ;;  %v279_v11 = vld [vmem:[%s252_s29 + $0x8] sm:$0xff]  ;;  %v261_v16 = vld [vmem:[%s237_s20 + $0x18] sm:$0xff] }
  0x12   : > { %v274_v10 = vmax.f32 %v266_v3, %v270_v4  ;;  %v275_v14 = vmax.f32 %v267_v7, %v271_v8  ;;  %v265_v17 = vld [vmem:[%s242_s23 + $0x18] sm:$0xff]  ;;  %v280_v20 = vld [vmem:[%s252_s29 + $0x10] sm:$0xff]  ;;  %v276_v23 = vmax.f32 %v268_v15, %v272_v13 }
  0x13   : > { %v273_v18 = vld [vmem:[%s247_s26 + $0x18] sm:$0xff]  ;;  %v269_v21 = vmax.f32 %v261_v16, %v265_v17 }
  0x14   : > { %v282_v19 = vmax.f32 %v274_v10, %v278_v6  ;;  %v283_v22 = vmax.f32 %v275_v14, %v279_v11  ;;  %v281_v24 = vld [vmem:[%s252_s29 + $0x18] sm:$0xff]  ;;  %v284_v26 = vmax.f32 %v276_v23, %v280_v20 }
  0x15   : > { %v277_v25 = vmax.f32 %v269_v21, %v273_v18 }
  0x16   : > { %286 = vst [vmem:[%s257_s6] sm:$0xff] %v282_v19  ;;  %287 = vst [vmem:[%s257_s6 + $0x8] sm:$0xff] %v283_v22 }
  0x17   : > { %v285_v27 = vmax.f32 %v277_v25, %v281_v24  ;;  %288 = vst [vmem:[%s257_s6 + $0x10] sm:$0xff] %v284_v26 }
  0x19   : > { %289 = vst [vmem:[%s257_s6 + $0x18] sm:$0xff] %v285_v27 }
  0x1a PF: > { %s14_s15 = sadd.s32 1, %s417_s15  }
  0x1b   : > { %p11_p4 = scmp.ge.s32.totalorder %s14_s15, 4  }
  0x1d   :  { %13 = sbr.rel (!%p11_p4) target bundleno = 1 (0x1), region = 75 }

// kernel: plate_recognition_forward.14
= control target key start
LH: loop header
LB: loop body
LE: loop exit
PB: predicated region body
PF: predicated region fallthrough
CT: control target
= control target key end

     0   :  { %s1218_s12 = smov 0   ;;  %s1220_s13 = smov 0   ;;  %s1586_s0 = inlined_call_operand.vmem [shape: f32[2,10,18,64], index: 0, kind: input, shape index: {}]   ;;  %s1587_s1 = inlined_call_operand.vmem [shape: f32[9,64,128], index: 1, kind: input, shape index: {}]   ;;  %s1588_s2 = inlined_call_operand.vmem [shape: f32[1,128], index: 2, kind: input, shape index: {}]   ;;  %s1589_s3 = inlined_call_operand.vmem [shape: f32[2,8,16,128], index: 3, kind: output, shape index: {}]  }
   0x1   :  { %s1222_s14 = smov 0   ;;  %s1224_s15 = smov 0  }
   0x2   :  { %s1226_s16 = smov 0  }
   0x3 LB: > { %s22_s17 = sadd.s32 1, %s1186_s14  ;;  %s25_s18 = sadd.s32 1, %s1190_s15  ;;  %s1194_s16 = sphi %s1226_s16, %s13_s16   ;;  %s1190_s15 = sphi %s1224_s15, %s1593_s15   ;;  %s1186_s14 = sphi %s1222_s14, %s1592_s14   ;;  %s1182_s13 = sphi %s1220_s13, %s1591_s13   ;;  %s1178_s12 = sphi %s1218_s12, %s1590_s12  }
   0x4   : > { %p23_p0 = scmp.ge.s32.totalorder %s22_s17, 8  ;;  %p867_p1 = scmp.ge.s32.totalorder %s1194_s16, 1 }
   0x5   : > { %p151_p2 = scmp.lt.s32.totalorder %s1194_s16, 17 }
   0x6   : > { %s1595_s17 = smov (%p23_p0, %s22_s17), 0  ;;  %s1597_s18 = smov (!%p23_p0, %s25_s18), %s1190_s15 }
   0x7   : > { %p152_p3 = pnand %p867_p1, %p151_p2  ;;  %p27_p4 = scmp.ge.s32.totalorder %s1597_s18, 2 }
   0x8   : > { %p179_p5 = scmp.lt.s32.totalorder (!%p152_p3), %s1182_s13, 1  ;;  %s194_s8 = smul.u32 (!%p152_p3), 24, %s1178_s12 }
   0x9   : > { %s1599_s18 = smov (%p27_p4, %s1597_s18), 0  ;;  %155 = sbr.rel (%p152_p3) target bundleno = 300 (0x12c), region = 32 }
   0xa   : > { %p186_p6 = scmp.lt.s32.totalorder (!%p152_p3), %s1178_s12, 7 }
   0xe   : > { %v878_v0 = vld [vmem:[%s1587_s1 + $0x70] sm:$0xff]  ;;  %v879_v1 = vld [vmem:[%s1587_s1 + $0x78] sm:$0xff]  ;;  %v1196_v3 = vmov 0.0   ;;  %v876_v6 = vld [vmem:[%s1587_s1 + $0x60] sm:$0xff]  ;;  %vm1197_vm0 = vmmov 0   ;;  %s1601_s13 = smov (!%p179_p5, %s1182_s13), 1 }
   0xf   : > { %v204_v2 = vld [vmem:[%s1587_s1 + $0x30] sm:$0xff]  ;;  %1005 = vmatprep.subr.bf16.mxu0 %v1196_v3  ;;  %1017 = vmatprep.subr.bf16.mxu1 %v1196_v3  ;;  %v226_v4 = vpack.c.bf16 %v879_v1, %v878_v0  ;;  %v205_v5 = vld [vmem:[%s1587_s1 + $0x38] sm:$0xff]  ;;  %v877_v7 = vld [vmem:[%s1587_s1 + $0x68] sm:$0xff]  ;;  %s1113_s20 = smul.u32 240, %s1601_s13  ;;  %vm227_vm1 = vcmask 523264   ;;  %s1603_s12 = smov (!%p186_p6, %s1178_s12), 7 }
  0x10   : > { %v210_v8 = vpack.c.bf16 %v205_v5, %v204_v2  ;;  %v202_v9 = vld [vmem:[%s1587_s1 + $0x20] sm:$0xff]  ;;  %v203_v10 = vld [vmem:[%s1587_s1 + $0x28] sm:$0xff]  ;;  %1013 = vmatprep.mubr.msk.bf16.mxu0 %vm1197_vm0, %v1196_v3  ;;  %1025 = vmatprep.mubr.msk.bf16.mxu1 %vm1197_vm0, %v1196_v3  ;;  %v225_v11 = vpack.c.bf16 %v877_v7, %v876_v6  ;;  %v874_v13 = vld [vmem:[%s1587_s1 + $0x50] sm:$0xff]  ;;  %s870_s9 = sshll.u32 %s1601_s13, 4 }
  0x11   : > { %1006 = vmatpush3.bf16.msra.mxu0 %v226_v4  ;;  %v209_v12 = vpack.c.bf16 %v203_v10, %v202_v9  ;;  %v875_v14 = vld [vmem:[%s1587_s1 + $0x58] sm:$0xff]  ;;  %v200_v15 = vld [vmem:[%s1587_s1 + $0x10] sm:$0xff]  ;;  %s183_s27 = scalar_lea.vmem %s1586_s0, %s1113_s20  ;;  %v872_v19 = vld [vmem:[%s1587_s1 + $0x40] sm:$0xff] }
  0x12   : > { %1018 = vmatpush3.bf16.msra.mxu1 %v210_v8  ;;  %1007 = vmatprep.subr.bf16.mxu0 %v1196_v3  ;;  %v201_v16 = vld [vmem:[%s1587_s1 + $0x18] sm:$0xff]  ;;  %v224_v17 = vpack.c.bf16 %v875_v14, %v874_v13  ;;  %v873_v20 = vld [vmem:[%s1587_s1 + $0x48] sm:$0xff]  ;;  %s1314_s5 = scalar_lea.vmem %s183_s27, %s194_s8  ;;  %v198_v21 = vld [vmem:[%s1587_s1] sm:$0xff] }
  0x13   : > { %1019 = vmatprep.subr.bf16.mxu1 %v1196_v3  ;;  %v208_v18 = vpack.c.bf16 %v201_v16, %v200_v15  ;;  %v199_v22 = vld [vmem:[%s1587_s1 + $0x8] sm:$0xff]  ;;  %v223_v23 = vpack.c.bf16 %v873_v20, %v872_v19  ;;  %v888_v26 = vld [vmem:[%s1587_s1 + $0xb0] sm:$0xff]  ;;  %v196_v28 = vld [vmem:[%s1314_s5] sm:$0xff] }
  0x14   : > { %v211_v24 = vld [vmem:[%s1314_s5 + $0x1] sm:$0xff]  ;;  %v212_v25 = vld [vmem:[%s1314_s5 + $0x9] sm:$0xff]  ;;  %v207_v27 = vpack.c.bf16 %v199_v22, %v198_v21  ;;  %v889_v30 = vld [vmem:[%s1587_s1 + $0xb8] sm:$0xff] }
  0x15   : > { %1008 = vmatpush3.bf16.msra.mxu0 %v225_v11  ;;  %v197_v29 = vld [vmem:[%s1314_s5 + $0x8] sm:$0xff]  ;;  %v899_v31 = vld [vmem:[%s1587_s1 + $0xf0] sm:$0xff]  ;;  %v900_v32 = vld [vmem:[%s1587_s1 + $0xf8] sm:$0xff]  ;;  %v222_v33 = vpack.c.bf16 %v212_v25, %v211_v24  ;;  %v331_v35 = vpack.c.bf16 %v889_v30, %v888_v26 }
  0x16   : > { %1020 = vmatpush3.bf16.msra.mxu1 %v209_v12  ;;  %1009 = vmatprep.subr.bf16.mxu0 %v1196_v3  ;;  %v206_v34 = vpack.c.bf16 %v197_v29, %v196_v28  ;;  %v396_v36 = vpack.c.bf16 %v900_v32, %v899_v31  ;;  %v886_v37 = vld [vmem:[%s1587_s1 + $0xa0] sm:$0xff]  ;;  %v887_v38 = vld [vmem:[%s1587_s1 + $0xa8] sm:$0xff]  ;;  %v884_v43 = vld [vmem:[%s1587_s1 + $0x90] sm:$0xff] }
  0x17   : > { %1021 = vmatprep.subr.bf16.mxu1 %v1196_v3  ;;  %v897_v39 = vld [vmem:[%s1587_s1 + $0xe0] sm:$0xff]  ;;  %v898_v40 = vld [vmem:[%s1587_s1 + $0xe8] sm:$0xff]  ;;  %v330_v41 = vpack.c.bf16 %v887_v38, %v886_v37  ;;  %v885_v44 = vld [vmem:[%s1587_s1 + $0x98] sm:$0xff] }
  0x18   : > { %v395_v42 = vpack.c.bf16 %v898_v40, %v897_v39  ;;  %v895_v45 = vld [vmem:[%s1587_s1 + $0xd0] sm:$0xff]  ;;  %v896_v46 = vld [vmem:[%s1587_s1 + $0xd8] sm:$0xff]  ;;  %v329_v47 = vpack.c.bf16 %v885_v44, %v884_v43  ;;  %v882_v49 = vld [vmem:[%s1587_s1 + $0x80] sm:$0xff] }
  0x19   : > { %1010 = vmatpush3.bf16.msra.mxu0 %v224_v17  ;;  %v394_v48 = vpack.c.bf16 %v896_v46, %v895_v45  ;;  %v883_v50 = vld [vmem:[%s1587_s1 + $0x88] sm:$0xff]  ;;  %v893_v51 = vld [vmem:[%s1587_s1 + $0xc0] sm:$0xff]  ;;  %v910_v56 = vld [vmem:[%s1587_s1 + $0x130] sm:$0xff] }
  0x1a   : > { %1022 = vmatpush3.bf16.msra.mxu1 %v208_v18  ;;  %1011 = vmatprep.subr.bf16.mxu0 %v1196_v3  ;;  %v894_v52 = vld [vmem:[%s1587_s1 + $0xc8] sm:$0xff]  ;;  %v328_v53 = vpack.c.bf16 %v883_v50, %v882_v49  ;;  %v911_v58 = vld [vmem:[%s1587_s1 + $0x138] sm:$0xff]  ;;  %v892_v60 = vld [vmem:[%s1314_s5 + $0x20] sm:$0xff] }
  0x1b   : > { %1023 = vmatprep.subr.bf16.mxu1 %v1196_v3  ;;  %v316_v54 = vld [vmem:[%s1314_s5 + $0x2] sm:$0xff]  ;;  %v317_v55 = vld [vmem:[%s1314_s5 + $0xa] sm:$0xff]  ;;  %v393_v57 = vpack.c.bf16 %v894_v52, %v893_v51  ;;  %v891_v59 = vld [vmem:[%s1314_s5 + $0x18] sm:$0xff]  ;;  %v458_v0 = vpack.c.bf16 %v911_v58, %v910_v56 }
  0x1c   : > { %v921_v61 = vld [vmem:[%s1587_s1 + $0x170] sm:$0xff]  ;;  %v922_v62 = vld [vmem:[%s1587_s1 + $0x178] sm:$0xff]  ;;  %v327_v63 = vpack.c.bf16 %v317_v55, %v316_v54  ;;  %v392_v1 = vpack.c.bf16 %v892_v60, %v891_v59  ;;  %v908_v4 = vld [vmem:[%s1587_s1 + $0x120] sm:$0xff] }
  0x1d   : > { %1012 = vmatpush3.bf16.msra.mxu0 %v223_v23  ;;  %v520_v2 = vpack.c.bf16 %v922_v62, %v921_v61  ;;  %v909_v5 = vld [vmem:[%s1587_s1 + $0x128] sm:$0xff]  ;;  %v919_v6 = vld [vmem:[%s1587_s1 + $0x160] sm:$0xff]  ;;  %v906_v10 = vld [vmem:[%s1587_s1 + $0x110] sm:$0xff] }
  0x1e   : > { %1024 = vmatpush3.bf16.msra.mxu1 %v207_v27  ;;  %1029 = vmatprep.subr.bf16.mxu0 %v1196_v3  ;;  %v920_v7 = vld [vmem:[%s1587_s1 + $0x168] sm:$0xff]  ;;  %v457_v8 = vpack.c.bf16 %v909_v5, %v908_v4  ;;  %v907_v11 = vld [vmem:[%s1587_s1 + $0x118] sm:$0xff]  ;;  %v917_v12 = vld [vmem:[%s1587_s1 + $0x150] sm:$0xff] }
  0x1f   : > { %1041 = vmatprep.subr.bf16.mxu1 %v1196_v3  ;;  %v519_v9 = vpack.c.bf16 %v920_v7, %v919_v6  ;;  %v918_v13 = vld [vmem:[%s1587_s1 + $0x158] sm:$0xff]  ;;  %v456_v14 = vpack.c.bf16 %v907_v11, %v906_v10  ;;  %v904_v16 = vld [vmem:[%s1587_s1 + $0x100] sm:$0xff]  ;;  %v905_v17 = vld [vmem:[%s1587_s1 + $0x108] sm:$0xff] }
  0x20   : > { %1014 = vmatmul.mubr.msk.bf16.vlgmr.msra.gmra.mxu0 %vm227_vm1, %v222_v33  ;;  %v518_v15 = vpack.c.bf16 %v918_v13, %v917_v12  ;;  %v915_v18 = vld [vmem:[%s1587_s1 + $0x140] sm:$0xff]  ;;  %v916_v19 = vld [vmem:[%s1587_s1 + $0x148] sm:$0xff]  ;;  %v455_v20 = vpack.c.bf16 %v905_v17, %v904_v16  ;;  %v932_v23 = vld [vmem:[%s1587_s1 + $0x1b0] sm:$0xff] }
  0x21   : > { %1026 = vmatmul.mubr.msk.bf16.vlgmr.msra.gmra.mxu1 %vm227_vm1, %v206_v34  ;;  %1030 = vmatpush3.bf16.msra.mxu0 %v331_v35  ;;  %v902_v21 = vld [vmem:[%s1314_s5 + $0x19] sm:$0xff]  ;;  %v903_v22 = vld [vmem:[%s1314_s5 + $0x21] sm:$0xff]  ;;  %v517_v24 = vpack.c.bf16 %v916_v19, %v915_v18  ;;  %v943_v28 = vld [vmem:[%s1587_s1 + $0x1f0] sm:$0xff] }
  0x22   : > { %1042 = vmatpush3.bf16.msra.mxu1 %v396_v36  ;;  %1031 = vmatprep.subr.bf16.mxu0 %v1196_v3  ;;  %v933_v25 = vld [vmem:[%s1587_s1 + $0x1b8] sm:$0xff]  ;;  %v914_v27 = vld [vmem:[%s1314_s5 + $0x22] sm:$0xff]  ;;  %v454_v30 = vpack.c.bf16 %v903_v22, %v902_v21  ;;  %v928_v40 = vld [vmem:[%s1587_s1 + $0x190] sm:$0xff] }
  0x23   : > { %1043 = vmatprep.subr.bf16.mxu1 %v1196_v3  ;;  %1037 = vmatprep.mubr.msk.bf16.mxu0 %vm1197_vm0, %v1196_v3  ;;  %v913_v26 = vld [vmem:[%s1314_s5 + $0x1a] sm:$0xff]  ;;  %v585_v31 = vpack.c.bf16 %v933_v25, %v932_v23  ;;  %v931_v35 = vld [vmem:[%s1587_s1 + $0x1a8] sm:$0xff]  ;;  %v924_v51 = vld [vmem:[%s1314_s5 + $0x30] sm:$0xff] }
  0x24   : > { %1049 = vmatprep.mubr.msk.bf16.mxu1 %vm1197_vm0, %v1196_v3  ;;  %v944_v29 = vld [vmem:[%s1587_s1 + $0x1f8] sm:$0xff]  ;;  %v516_v32 = vpack.c.bf16 %v914_v27, %v913_v26  ;;  %v930_v34 = vld [vmem:[%s1587_s1 + $0x1a0] sm:$0xff]  ;;  %v942_v37 = vld [vmem:[%s1587_s1 + $0x1e8] sm:$0xff] }
  0x25   : > { %1032 = vmatpush3.bf16.msra.mxu0 %v330_v41  ;;  %v647_v33 = vpack.c.bf16 %v944_v29, %v943_v28  ;;  %v941_v36 = vld [vmem:[%s1587_s1 + $0x1e0] sm:$0xff]  ;;  %v584_v38 = vpack.c.bf16 %v931_v35, %v930_v34  ;;  %v929_v41 = vld [vmem:[%s1587_s1 + $0x198] sm:$0xff]  ;;  %v938_v49 = vld [vmem:[%s1587_s1 + $0x1c8] sm:$0xff] }
  0x26   : > { %1044 = vmatpush3.bf16.msra.mxu1 %v395_v42  ;;  %1033 = vmatprep.subr.bf16.mxu0 %v1196_v3  ;;  %v646_v39 = vpack.c.bf16 %v942_v37, %v941_v36  ;;  %v939_v42 = vld [vmem:[%s1587_s1 + $0x1d0] sm:$0xff]  ;;  %v940_v43 = vld [vmem:[%s1587_s1 + $0x1d8] sm:$0xff]  ;;  %v583_v44 = vpack.c.bf16 %v929_v41, %v928_v40  ;;  %v926_v46 = vld [vmem:[%s1587_s1 + $0x180] sm:$0xff] }
  0x27   : > { %1045 = vmatprep.subr.bf16.mxu1 %v1196_v3  ;;  %v645_v45 = vpack.c.bf16 %v940_v43, %v939_v42  ;;  %v925_v52 = vld [vmem:[%s1314_s5 + $0x38] sm:$0xff]  ;;  %v952_v61 = vld [vmem:[%s1587_s1 + $0x220] sm:$0xff]  ;;  %v953_v62 = vld [vmem:[%s1587_s1 + $0x228] sm:$0xff] }
  0x28   : > { %v955_v55 = vld [vmem:[%s1587_s1 + $0x238] sm:$0xff]  ;;  %v581_v58 = vpack.c.bf16 %v925_v52, %v924_v51  ;;  %v948_v4 = vld [vmem:[%s1587_s1 + $0x200] sm:$0xff]  ;;  %v949_v5 = vld [vmem:[%s1587_s1 + $0x208] sm:$0xff] }
  0x29   : > { %1034 = vmatpush3.bf16.msra.mxu0 %v329_v47  ;;  %v927_v47 = vld [vmem:[%s1587_s1 + $0x188] sm:$0xff]  ;;  %v935_v56 = vld [vmem:[%s1314_s5 + $0x31] sm:$0xff]  ;;  %v706_v6 = vpack.c.bf16 %v949_v5, %v948_v4 }
  0x2a   : > { %1046 = vmatpush3.bf16.msra.mxu1 %v394_v48  ;;  %1035 = vmatprep.subr.bf16.mxu0 %v1196_v3  ;;  %v937_v48 = vld [vmem:[%s1587_s1 + $0x1c0] sm:$0xff]  ;;  %v582_v50 = vpack.c.bf16 %v927_v47, %v926_v46  ;;  %v946_v7 = vld [vmem:[%s1314_s5 + $0x32] sm:$0xff] }
  0x2b   : > { %1047 = vmatprep.subr.bf16.mxu1 %v1196_v3  ;;  %v644_v54 = vpack.c.bf16 %v938_v49, %v937_v48 }
  0x2d   : > { %1036 = vmatpush3.bf16.msra.mxu0 %v328_v53  ;;  %v954_v53 = vld [vmem:[%s1587_s1 + $0x230] sm:$0xff] }
  0x2e   : > { %1048 = vmatpush3.bf16.msra.mxu1 %v393_v57  ;;  %1053 = vmatprep.subr.bf16.mxu0 %v1196_v3  ;;  %v936_v57 = vld [vmem:[%s1314_s5 + $0x39] sm:$0xff]  ;;  %v709_v59 = vpack.c.bf16 %v955_v55, %v954_v53 }
  0x2f   : > { %1065 = vmatprep.subr.bf16.mxu1 %v1196_v3  ;;  %v643_v60 = vpack.c.bf16 %v936_v57, %v935_v56  ;;  %v957_v55 = vld [vmem:[%s1588_s2] ss:$0 sm:$0xff] }
  0x30   : > { %1038 = vmatmul.mubr.msk.bf16.vlgmr.msra.gmra.mxu0 %vm227_vm1, %v327_v63  ;;  %v708_v63 = vpack.c.bf16 %v953_v62, %v952_v61 }
  0x31   : > { %1054 = vmatpush3.bf16.msra.mxu0 %v458_v0  ;;  %1050 = vmatmul.mubr.msk.bf16.vlgmr.msra.gmra.mxu1 %vm227_vm1, %v392_v1  ;;  %v950_v0 = vld [vmem:[%s1587_s1 + $0x210] sm:$0xff]  ;;  %v951_v1 = vld [vmem:[%s1587_s1 + $0x218] sm:$0xff] }
  0x32   : > { %1066 = vmatpush3.bf16.msra.mxu1 %v520_v2  ;;  %1055 = vmatprep.subr.bf16.mxu0 %v1196_v3  ;;  %v707_v2 = vpack.c.bf16 %v951_v1, %v950_v0 }
  0x33   : > { %1067 = vmatprep.subr.bf16.mxu1 %v1196_v3  ;;  %1061 = vmatprep.mubr.msk.bf16.mxu0 %vm1197_vm0, %v1196_v3 }
  0x34   : > { %1073 = vmatprep.mubr.msk.bf16.mxu1 %vm1197_vm0, %v1196_v3 }
  0x35   : > { %1056 = vmatpush3.bf16.msra.mxu0 %v457_v8  ;;  %v947_v8 = vld [vmem:[%s1314_s5 + $0x3a] sm:$0xff]  ;;  %s869_s5 = sshll.u32 %s1603_s12, 1 }
  0x36   : > { %1068 = vmatpush3.bf16.msra.mxu1 %v519_v9  ;;  %1057 = vmatprep.subr.bf16.mxu0 %v1196_v3  ;;  %v705_v9 = vpack.c.bf16 %v947_v8, %v946_v7  ;;  %s190_s10 = sadd.s32 %s870_s9, %s869_s5 }
  0x37   : > { %1069 = vmatprep.subr.bf16.mxu1 %v1196_v3  ;;  %s871_s19 = sshll.u32 %s190_s10, 3 }
  0x38   : > { %s192_s22 = scalar_lea.vmem %s1589_s3, %s871_s19 }
  0x39   : > { %1058 = vmatpush3.bf16.msra.mxu0 %v456_v14 }
  0x3a   : > { %1070 = vmatpush3.bf16.msra.mxu1 %v518_v15  ;;  %1059 = vmatprep.subr.bf16.mxu0 %v1196_v3 }
  0x3b   : > { %1071 = vmatprep.subr.bf16.mxu1 %v1196_v3 }
  0x3d   : > { %1060 = vmatpush3.bf16.msra.mxu0 %v455_v20 }
  0x3e   : > { %1072 = vmatpush3.bf16.msra.mxu1 %v517_v24  ;;  %1077 = vmatprep.subr.bf16.mxu0 %v1196_v3 }
  0x3f   : > { %1089 = vmatprep.subr.bf16.mxu1 %v1196_v3 }
  0x40   : > { %1062 = vmatmul.mubr.msk.bf16.vlgmr.msra.gmra.mxu0 %vm227_vm1, %v454_v30 }
  0x41   : > { %1078 = vmatpush3.bf16.msra.mxu0 %v585_v31  ;;  %1074 = vmatmul.mubr.msk.bf16.vlgmr.msra.gmra.mxu1 %vm227_vm1, %v516_v32 }
  0x42   : > { %1090 = vmatpush3.bf16.msra.mxu1 %v647_v33  ;;  %1079 = vmatprep.subr.bf16.mxu0 %v1196_v3 }
  0x43   : > { %1091 = vmatprep.subr.bf16.mxu1 %v1196_v3  ;;  %1085 = vmatprep.mubr.msk.bf16.mxu0 %vm1197_vm0, %v1196_v3 }
  0x44   : > { %1097 = vmatprep.mubr.msk.bf16.mxu1 %vm1197_vm0, %v1196_v3 }
  0x45   : > { %1080 = vmatpush3.bf16.msra.mxu0 %v584_v38 }
  0x46   : > { %1092 = vmatpush3.bf16.msra.mxu1 %v646_v39  ;;  %1081 = vmatprep.subr.bf16.mxu0 %v1196_v3 }
  0x47   : > { %1093 = vmatprep.subr.bf16.mxu1 %v1196_v3 }
  0x49   : > { %1082 = vmatpush3.bf16.msra.mxu0 %v583_v44 }
  0x4a   : > { %1094 = vmatpush3.bf16.msra.mxu1 %v645_v45  ;;  %1083 = vmatprep.subr.bf16.mxu0 %v1196_v3 }
  0x4b   : > { %1095 = vmatprep.subr.bf16.mxu1 %v1196_v3 }
  0x4d   : > { %1084 = vmatpush3.bf16.msra.mxu0 %v582_v50 }
  0x4e   : > { %1096 = vmatpush3.bf16.msra.mxu1 %v644_v54  ;;  %1101 = vmatprep.subr.bf16.mxu0 %v1196_v3 }
  0x50   : > { %1086 = vmatmul.mubr.msk.bf16.vlgmr.msra.gmra.mxu0 %vm227_vm1, %v581_v58 }
  0x51   : > { %1102 = vmatpush3.bf16.msra.mxu0 %v709_v59  ;;  %1098 = vmatmul.mubr.msk.bf16.vlgmr.msra.gmra.mxu1 %vm227_vm1, %v643_v60 }
  0x52   : > { %1103 = vmatprep.subr.bf16.mxu0 %v1196_v3  ;;  %1109 = vmatprep.mubr.msk.bf16.mxu0 %vm1197_vm0, %v1196_v3 }
  0x55   : > { %1104 = vmatpush3.bf16.msra.mxu0 %v708_v63 }
  0x56   : > { %1105 = vmatprep.subr.bf16.mxu0 %v1196_v3 }
  0x59   : > { %1106 = vmatpush3.bf16.msra.mxu0 %v707_v2 }
  0x5a   : > { %1107 = vmatprep.subr.bf16.mxu0 %v1196_v3 }
  0x5d   : > { %1108 = vmatpush3.bf16.msra.mxu0 %v706_v6 }
  0x60   : > { %1110 = vmatmul.mubr.msk.bf16.vlgmr.msra.gmra.mxu0 %vm227_vm1, %v705_v9 }
  0xe0   : > { %v265_v10 = vpop.f32.mrf.mxu0 }
  0xe1   : > { %v309_v11 = vpop.f32.mrf.mxu1 }
  0xe2   : > { %v1015_v12 = vpop.f32.mrf.mxu0  ;;  %v310_v33 = vadd.f32 %v309_v11, %v265_v10 }
  0xe3   : > { %v1027_v13 = vpop.f32.mrf.mxu1 }
  0xe4   : > { %v268_v14 = vpop.f32.mrf.mxu0 }
  0xe5   : > { %v312_v15 = vpop.f32.mrf.mxu1 }
  0xe6   : > { %v1016_v16 = vpop.f32.mrf.mxu0  ;;  %v313_v36 = vadd.f32 %v312_v15, %v268_v14 }
  0xe7   : > { %v1028_v17 = vpop.f32.mrf.mxu1 }
  0xf0   : > { %v369_v18 = vpop.f32.mrf.mxu0 }
  0xf1   : > { %v434_v19 = vpop.f32.mrf.mxu1  ;;  %v376_v34 = vadd.f32 %v369_v18, %v310_v33 }
  0xf2   : > { %v1039_v20 = vpop.f32.mrf.mxu0 }
  0xf3   : > { %v1051_v21 = vpop.f32.mrf.mxu1  ;;  %v441_v39 = vadd.f32 %v434_v19, %v376_v34 }
  0xf4   : > { %v372_v22 = vpop.f32.mrf.mxu0 }
  0xf5   : > { %v437_v23 = vpop.f32.mrf.mxu1  ;;  %v377_v40 = vadd.f32 %v372_v22, %v313_v36 }
  0xf6   : > { %v1040_v24 = vpop.f32.mrf.mxu0 }
  0xf7   : > { %v1052_v3 = vpop.f32.mrf.mxu1  ;;  %v442_v46 = vadd.f32 %v437_v23, %v377_v40 }
 0x100   : > { %v496_v25 = vpop.f32.mrf.mxu0 }
 0x101   : > { %v558_v26 = vpop.f32.mrf.mxu1  ;;  %v503_v43 = vadd.f32 %v496_v25, %v441_v39 }
 0x102   : > { %v1063_v27 = vpop.f32.mrf.mxu0 }
 0x103   : > { %v1075_v28 = vpop.f32.mrf.mxu1  ;;  %v565_v48 = vadd.f32 %v558_v26, %v503_v43 }
 0x104   : > { %v499_v29 = vpop.f32.mrf.mxu0 }
 0x105   : > { %v561_v30 = vpop.f32.mrf.mxu1  ;;  %v504_v49 = vadd.f32 %v499_v29, %v442_v46 }
 0x106   : > { %v1064_v31 = vpop.f32.mrf.mxu0 }
 0x107   : > { %v1076_v32 = vpop.f32.mrf.mxu1  ;;  %v566_v51 = vadd.f32 %v561_v30, %v504_v49 }
 0x110   : > { %v623_v35 = vpop.f32.mrf.mxu0 }
 0x111   : > { %v685_v37 = vpop.f32.mrf.mxu1  ;;  %v630_v50 = vadd.f32 %v623_v35, %v565_v48 }
 0x112   : > { %v1087_v38 = vpop.f32.mrf.mxu0 }
 0x113   : > { %v1099_v41 = vpop.f32.mrf.mxu1  ;;  %v692_v52 = vadd.f32 %v685_v37, %v630_v50 }
 0x114   : > { %v626_v42 = vpop.f32.mrf.mxu0 }
 0x115   : > { %v688_v44 = vpop.f32.mrf.mxu1  ;;  %v631_v53 = vadd.f32 %v626_v42, %v566_v51 }
 0x116   : > { %v1088_v45 = vpop.f32.mrf.mxu0 }
 0x117   : > { %v1100_v47 = vpop.f32.mrf.mxu1  ;;  %v693_v58 = vadd.f32 %v688_v44, %v631_v53 }
 0x120   : > { %v747_v54 = vpop.f32.mrf.mxu0 }
 0x121   : > { %v754_v56 = vadd.f32 %v747_v54, %v692_v52 }
 0x122   : > { %v1111_v57 = vpop.f32.mrf.mxu0 }
 0x123   : > { %v763_v59 = vadd.f32 %v957_v55, %v754_v56 }
 0x124   : > { %v750_v60 = vpop.f32.mrf.mxu0 }
 0x125   : > { %v765_v61 = vmax.f32 %v763_v59, 0.0  ;;  %v755_v62 = vadd.f32 %v750_v60, %v693_v58 }
 0x126   : > { %v1112_v63 = vpop.f32.mrf.mxu0 }
 0x127   : > { %767 = vst [vmem:[%s192_s22] sm:$0xff] %v765_v61  ;;  %v764_v0 = vadd.f32 %v957_v55, %v755_v62 }
 0x129   : > { %v766_v1 = vmax.f32 %v764_v0, 0.0 }
 0x12b   : > { %768 = vst [vmem:[%s192_s22 + $0x8] sm:$0xff] %v766_v1 }
 0x12c PF: > { %s13_s16 = sadd.s32 1, %s1194_s16   ;;  %s1590_s12 = smov %s1186_s14 }
 0x12d   : > { %p10_p7 = scmp.ge.s32.totalorder %s13_s16, 18   ;;  %s1591_s13 = smov %s1190_s15 }
 0x12e   : > { %s1592_s14 = smov %s1595_s17  ;;  %s1593_s15 = smov %s1599_s18 }
 0x12f   :  { %12 = sbr.rel (!%p10_p7) target bundleno = 3 (0x3), region = 73 }

// kernel: plate_recognition_forward.17
= control target key start
LH: loop header
LB: loop body
LE: loop exit
PB: predicated region body
PF: predicated region fallthrough
CT: control target
= control target key end

     0   :  { %s451_s15 = smov 0   ;;  %s517_s0 = inlined_call_operand.vmem [shape: f32[2,3,7,256], index: 0, kind: input, shape index: {}]   ;;  %s518_s1 = inlined_call_operand.vmem [shape: f32[2,3,7,256], index: 1, kind: input, shape index: {}]   ;;  %s519_s2 = inlined_call_operand.vmem [shape: f32[2,3,7,256], index: 2, kind: input, shape index: {}]   ;;  %s520_s3 = inlined_call_operand.vmem [shape: f32[2,3,7,256], index: 3, kind: input, shape index: {}]   ;;  %s521_s4 = inlined_call_operand.vmem [shape: f32[2,3,7,256], index: 4, kind: output, shape index: {}]  }
   0x1 LB: > { %s397_s16 = sadd.s32 4294967295, %s424_s15   ;;  %p401_p0 = scmp.ge.s32.totalorder %s424_s15, 1  ;;  %s424_s15 = sphi %s451_s15, %s14_s15  }
   0x2   : > { %p192_p1 = scmp.lt.s32.totalorder %s424_s15, 3 }
   0x4   : > { %p193_p2 = pnand %p401_p0, %p192_p1 }
   0x5   : > { %p233_p3 = scmp.lt.s32.totalorder (!%p193_p2), %s397_s16, 1 }
   0x6   : > { %196 = sbr.rel (%p193_p2) target bundleno = 29 (0x1d), region = 36 }
   0xb   : > { %s523_s16 = smov (!%p233_p3, %s397_s16), 1 }
   0xc   : > { %s409_s17 = smul.u32 48, %s523_s16 }
   0xe   : > { %s462_s20 = scalar_lea.vmem %s517_s0, %s409_s17  ;;  %s467_s23 = scalar_lea.vmem %s518_s1, %s409_s17 }
   0xf   : > { %s472_s26 = scalar_lea.vmem %s519_s2, %s409_s17  ;;  %s477_s29 = scalar_lea.vmem %s520_s3, %s409_s17  ;;  %v258_v0 = vld [vmem:[%s462_s20] sm:$0x7f]  ;;  %v259_v2 = vld [vmem:[%s462_s20 + $0x8] sm:$0x7f]  ;;  %v260_v9 = vld [vmem:[%s462_s20 + $0x10] sm:$0x7f] }
  0x10   : > { %v264_v1 = vld [vmem:[%s467_s23] sm:$0x7f]  ;;  %v265_v5 = vld [vmem:[%s467_s23 + $0x8] sm:$0x7f]  ;;  %v266_v12 = vld [vmem:[%s467_s23 + $0x10] sm:$0x7f]  ;;  %s493_s6 = scalar_lea.vmem %s521_s4, %s409_s17 }
  0x11   : > { %v270_v3 = vmax.f32 %v258_v0, %v264_v1  ;;  %v276_v4 = vld [vmem:[%s472_s26] sm:$0x7f]  ;;  %v271_v7 = vmax.f32 %v259_v2, %v265_v5  ;;  %v277_v8 = vld [vmem:[%s472_s26 + $0x8] sm:$0x7f]  ;;  %v278_v13 = vld [vmem:[%s472_s26 + $0x10] sm:$0x7f]  ;;  %v272_v15 = vmax.f32 %v260_v9, %v266_v12 }
  0x12   : > { %v288_v6 = vld [vmem:[%s477_s29] sm:$0x7f]  ;;  %v289_v11 = vld [vmem:[%s477_s29 + $0x8] sm:$0x7f]  ;;  %v261_v16 = vld [vmem:[%s462_s20 + $0x18] sm:$0x7f] }
  0x13   : > { %v282_v10 = vmax.f32 %v270_v3, %v276_v4  ;;  %v283_v14 = vmax.f32 %v271_v7, %v277_v8  ;;  %v267_v17 = vld [vmem:[%s467_s23 + $0x18] sm:$0x7f]  ;;  %v290_v20 = vld [vmem:[%s477_s29 + $0x10] sm:$0x7f]  ;;  %v262_v22 = vld [vmem:[%s462_s20 + $0x20] sm:$0x7f]  ;;  %v284_v25 = vmax.f32 %v272_v15, %v278_v13 }
  0x14   : > { %v279_v18 = vld [vmem:[%s472_s26 + $0x18] sm:$0x7f]  ;;  %v273_v21 = vmax.f32 %v261_v16, %v267_v17  ;;  %v268_v23 = vld [vmem:[%s467_s23 + $0x20] sm:$0x7f]  ;;  %v263_v29 = vld [vmem:[%s462_s20 + $0x28] sm:$0x7f] }
  0x15   : > { %v294_v19 = vmax.f32 %v282_v10, %v288_v6  ;;  %v295_v24 = vmax.f32 %v283_v14, %v289_v11  ;;  %v291_v26 = vld [vmem:[%s477_s29 + $0x18] sm:$0x7f]  ;;  %v274_v27 = vmax.f32 %v262_v22, %v268_v23  ;;  %v280_v28 = vld [vmem:[%s472_s26 + $0x20] sm:$0x7f]  ;;  %v269_v32 = vld [vmem:[%s467_s23 + $0x28] sm:$0x7f]  ;;  %v296_v34 = vmax.f32 %v284_v25, %v290_v20 }
  0x16   : > { %v285_v30 = vmax.f32 %v273_v21, %v279_v18  ;;  %v292_v31 = vld [vmem:[%s477_s29 + $0x20] sm:$0x7f]  ;;  %v281_v33 = vld [vmem:[%s472_s26 + $0x28] sm:$0x7f]  ;;  %v275_v36 = vmax.f32 %v263_v29, %v269_v32 }
  0x17   : > { %300 = vst [vmem:[%s493_s6] sm:$0x7f] %v294_v19  ;;  %301 = vst [vmem:[%s493_s6 + $0x8] sm:$0x7f] %v295_v24  ;;  %v286_v35 = vmax.f32 %v274_v27, %v280_v28  ;;  %v293_v38 = vld [vmem:[%s477_s29 + $0x28] sm:$0x7f] }
  0x18   : > { %v297_v37 = vmax.f32 %v285_v30, %v291_v26  ;;  %302 = vst [vmem:[%s493_s6 + $0x10] sm:$0x7f] %v296_v34  ;;  %v287_v40 = vmax.f32 %v275_v36, %v281_v33 }
  0x19   : > { %v298_v39 = vmax.f32 %v286_v35, %v292_v31 }
  0x1a   : > { %303 = vst [vmem:[%s493_s6 + $0x18] sm:$0x7f] %v297_v37  ;;  %v299_v41 = vmax.f32 %v287_v40, %v293_v38 }
  0x1b   : > { %304 = vst [vmem:[%s493_s6 + $0x20] sm:$0x7f] %v298_v39 }
  0x1c   : > { %305 = vst [vmem:[%s493_s6 + $0x28] sm:$0x7f] %v299_v41 }
  0x1d PF: > { %s14_s15 = sadd.s32 1, %s424_s15  }
  0x1e   : > { %p11_p4 = scmp.ge.s32.totalorder %s14_s15, 4  }
  0x20   :  { %13 = sbr.rel (!%p11_p4) target bundleno = 1 (0x1), region = 75 }

// kernel: plate_recognition_forward.18
= control target key start
LH: loop header
LB: loop body
LE: loop exit
PB: predicated region body
PF: predicated region fallthrough
CT: control target
= control target key end

     0   :  { %s232_s6 = smov 0   ;;  %s249_s0 = inlined_call_operand.vmem [shape: f32[2,3,7,256], index: 0, kind: input, shape index: {}]   ;;  %s250_s1 = inlined_call_operand.vmem [shape: f32[2,7,256], index: 1, kind: output, shape index: {}]  }
   0x1 LB: > { %s194_s7 = sadd.s32 4294967295, %s220_s6   ;;  %p198_p0 = scmp.ge.s32.totalorder %s220_s6, 1  ;;  %s220_s6 = sphi %s232_s6, %s11_s6  }
   0x2   : > { %p87_p1 = scmp.lt.s32.totalorder %s220_s6, 3 }
   0x4   : > { %p88_p2 = pnand %p198_p0, %p87_p1 }
   0x5   : > { %p107_p3 = scmp.lt.s32.totalorder (!%p88_p2), %s194_s7, 1 }
   0x6   : > { %91 = sbr.rel (%p88_p2) target bundleno = 25 (0x19), region = 24 }
   0xb   : > { %s252_s7 = smov (!%p107_p3, %s194_s7), 1  ;;  %vm123_vm0 = vcmask 1046528  }
   0xc   : > { %s205_s8 = smul.u32 48, %s252_s7  ;;  %s204_s12 = sshll.u32 %s252_s7, 4 }
   0xd   : > { %s116_s15 = scalar_lea.vmem %s250_s1, %s204_s12 }
   0xe   : > { %s111_s11 = scalar_lea.vmem %s249_s0, %s205_s8 }
   0xf   : > { %v117_v0 = vld [vmem:[%s111_s11] sm:$0x7f]  ;;  %v119_v1 = vld [vmem:[%s111_s11 + $0x10] sm:$0x7f]  ;;  %v118_v6 = vld [vmem:[%s111_s11 + $0x8] sm:$0x7f] }
  0x10   : > { %v121_v2 = vld [vmem:[%s111_s11 + $0x20] sm:$0x7f]  ;;  %v124_v3 = vsel %vm123_vm0, %v117_v0, 0.0  ;;  %v125_v4 = vsel %vm123_vm0, %v119_v1, 0.0  ;;  %v120_v8 = vld [vmem:[%s111_s11 + $0x18] sm:$0x7f] }
  0x11   : > { %v127_v5 = vsel %vm123_vm0, %v121_v2, 0.0  ;;  %v126_v7 = vadd.f32 %v125_v4, %v124_v3  ;;  %v122_v9 = vld [vmem:[%s111_s11 + $0x28] sm:$0x7f]  ;;  %v129_v10 = vsel %vm123_vm0, %v118_v6, 0.0  ;;  %v130_v11 = vsel %vm123_vm0, %v120_v8, 0.0 }
  0x12   : > { %v132_v12 = vsel %vm123_vm0, %v122_v9, 0.0  ;;  %v131_v14 = vadd.f32 %v130_v11, %v129_v10 }
  0x13   : > { %v128_v13 = vadd.f32 %v127_v5, %v126_v7 }
  0x14   : > { %v133_v16 = vadd.f32 %v132_v12, %v131_v14 }
  0x15   : > { %v135_v15 = vmul.f32 0.33333334, %v128_v13 }
  0x16   : > { %v136_v17 = vmul.f32 0.33333334, %v133_v16 }
  0x17   : > { %137 = vst [vmem:[%s116_s15] sm:$0x7f] %v135_v15 }
  0x18   : > { %138 = vst [vmem:[%s116_s15 + $0x8] sm:$0x7f] %v136_v17 }
  0x19 PF: > { %s11_s6 = sadd.s32 1, %s220_s6  }
  0x1a   : > { %p8_p4 = scmp.ge.s32.totalorder %s11_s6, 4  }
  0x1c   :  { %10 = sbr.rel (!%p8_p4) target bundleno = 1 (0x1), region = 54 }

// kernel: plate_recognition_forward.19
= control target key start
LH: loop header
LB: loop body
LE: loop exit
PB: predicated region body
PF: predicated region fallthrough
CT: control target
= control target key end

     0   :  { %s418_s1 = inlined_call_operand.vmem [shape: f32[256,256], index: 1, kind: input, shape index: {}]   ;;  %s419_s0 = inlined_call_operand.vmem [shape: f32[14,256], index: 0, kind: input, shape index: {}]   ;;  %s420_s2 = inlined_call_operand.vmem [shape: f32[1,256], index: 2, kind: input, shape index: {}]   ;;  %s421_s3 = inlined_call_operand.vmem [shape: f32[14,256], index: 3, kind: output, shape index: {}]  }
   0x1   :  { %v49_v0 = vld [vmem:[%s418_s1 + $0xe8] sm:$0xff]  ;;  %v51_v1 = vld [vmem:[%s418_s1 + $0xf8] sm:$0xff]  ;;  %v48_v2 = vld [vmem:[%s418_s1 + $0xe0] sm:$0xff] }
   0x2   :  { %v99_v3 = vpack.c.bf16 %v51_v1, %v49_v0  ;;  %v50_v4 = vld [vmem:[%s418_s1 + $0xf0] sm:$0xff]  ;;  %v45_v5 = vld [vmem:[%s418_s1 + $0xc8] sm:$0xff]  ;;  %v47_v6 = vld [vmem:[%s418_s1 + $0xd8] sm:$0xff] }
   0x3   :  { %v98_v7 = vpack.c.bf16 %v50_v4, %v48_v2  ;;  %v97_v8 = vpack.c.bf16 %v47_v6, %v45_v5  ;;  %v44_v9 = vld [vmem:[%s418_s1 + $0xc0] sm:$0xff]  ;;  %v46_v10 = vld [vmem:[%s418_s1 + $0xd0] sm:$0xff]  ;;  %v41_v11 = vld [vmem:[%s418_s1 + $0xa8] sm:$0xff] }
   0x4   :  { %128 = vmatprep.subr.bf16.mxu0 %v99_v3  ;;  %v43_v12 = vld [vmem:[%s418_s1 + $0xb8] sm:$0xff]  ;;  %v96_v13 = vpack.c.bf16 %v46_v10, %v44_v9  ;;  %v40_v15 = vld [vmem:[%s418_s1 + $0xa0] sm:$0xff]  ;;  %v42_v16 = vld [vmem:[%s418_s1 + $0xb0] sm:$0xff] }
   0x5   :  { %129 = vmatpush1.bf16.msra.mxu0 %v98_v7  ;;  %v95_v14 = vpack.c.bf16 %v43_v12, %v41_v11  ;;  %v37_v17 = vld [vmem:[%s418_s1 + $0x88] sm:$0xff]  ;;  %v39_v18 = vld [vmem:[%s418_s1 + $0x98] sm:$0xff]  ;;  %v94_v19 = vpack.c.bf16 %v42_v16, %v40_v15  ;;  %v36_v21 = vld [vmem:[%s418_s1 + $0x80] sm:$0xff] }
   0x6   :  { %130 = vmatprep.subr.bf16.mxu0 %v97_v8  ;;  %v93_v20 = vpack.c.bf16 %v39_v18, %v37_v17  ;;  %v38_v22 = vld [vmem:[%s418_s1 + $0x90] sm:$0xff]  ;;  %v33_v23 = vld [vmem:[%s418_s1 + $0x68] sm:$0xff]  ;;  %v35_v24 = vld [vmem:[%s418_s1 + $0x78] sm:$0xff] }
   0x7   :  { %v92_v25 = vpack.c.bf16 %v38_v22, %v36_v21  ;;  %v91_v26 = vpack.c.bf16 %v35_v24, %v33_v23  ;;  %v32_v27 = vld [vmem:[%s418_s1 + $0x60] sm:$0xff]  ;;  %v34_v28 = vld [vmem:[%s418_s1 + $0x70] sm:$0xff]  ;;  %v29_v29 = vld [vmem:[%s418_s1 + $0x48] sm:$0xff] }
   0x8   :  { %v31_v30 = vld [vmem:[%s418_s1 + $0x58] sm:$0xff]  ;;  %v90_v31 = vpack.c.bf16 %v34_v28, %v32_v27  ;;  %v28_v33 = vld [vmem:[%s418_s1 + $0x40] sm:$0xff]  ;;  %v30_v34 = vld [vmem:[%s418_s1 + $0x50] sm:$0xff] }
   0x9   :  { %131 = vmatpush1.bf16.msra.mxu0 %v96_v13  ;;  %v89_v32 = vpack.c.bf16 %v31_v30, %v29_v29  ;;  %v25_v35 = vld [vmem:[%s418_s1 + $0x28] sm:$0xff]  ;;  %v27_v36 = vld [vmem:[%s418_s1 + $0x38] sm:$0xff]  ;;  %v88_v37 = vpack.c.bf16 %v30_v34, %v28_v33  ;;  %v24_v38 = vld [vmem:[%s418_s1 + $0x20] sm:$0xff] }
   0xa   :  { %132 = vmatprep.subr.bf16.mxu0 %v95_v14  ;;  %v87_v39 = vpack.c.bf16 %v27_v36, %v25_v35  ;;  %v26_v40 = vld [vmem:[%s418_s1 + $0x30] sm:$0xff]  ;;  %v15_v41 = vld [vmem:[%s419_s0 + $0x8] sm:$0xff]  ;;  %v17_v42 = vld [vmem:[%s419_s0 + $0x18] sm:$0x3f] }
   0xb   :  { %v21_v43 = vld [vmem:[%s418_s1 + $0x8] sm:$0xff]  ;;  %v23_v44 = vld [vmem:[%s418_s1 + $0x18] sm:$0xff]  ;;  %v19_v45 = vpack.c.bf16 %v17_v42, %v15_v41  ;;  %v86_v46 = vpack.c.bf16 %v26_v40, %v24_v38  ;;  %v20_v48 = vld [vmem:[%s418_s1] sm:$0xff]  ;;  %v118_v38 = vlaneseq }
   0xc   :  { %v85_v47 = vpack.c.bf16 %v23_v44, %v21_v43  ;;  %v22_v49 = vld [vmem:[%s418_s1 + $0x10] sm:$0xff]  ;;  %v81_v50 = vld [vmem:[%s418_s1 + $0x1e8] sm:$0xff]  ;;  %v83_v51 = vld [vmem:[%s418_s1 + $0x1f8] sm:$0xff] }
   0xd   :  { %133 = vmatpush1.bf16.msra.mxu0 %v94_v19  ;;  %160 = vmatprep.mubr.bf16.mxu0 %v19_v45  ;;  %v84_v52 = vpack.c.bf16 %v22_v49, %v20_v48  ;;  %v115_v53 = vpack.c.bf16 %v83_v51, %v81_v50  ;;  %v80_v54 = vld [vmem:[%s418_s1 + $0x1e0] sm:$0xff]  ;;  %v82_v55 = vld [vmem:[%s418_s1 + $0x1f0] sm:$0xff]  ;;  %v77_v56 = vld [vmem:[%s418_s1 + $0x1c8] sm:$0xff] }
   0xe   :  { %134 = vmatprep.subr.bf16.mxu0 %v93_v20  ;;  %v79_v57 = vld [vmem:[%s418_s1 + $0x1d8] sm:$0xff]  ;;  %v114_v58 = vpack.c.bf16 %v82_v55, %v80_v54  ;;  %v76_v60 = vld [vmem:[%s418_s1 + $0x1c0] sm:$0xff]  ;;  %v78_v61 = vld [vmem:[%s418_s1 + $0x1d0] sm:$0xff] }
   0xf   :  { %v113_v59 = vpack.c.bf16 %v79_v57, %v77_v56  ;;  %v73_v62 = vld [vmem:[%s418_s1 + $0x1a8] sm:$0xff]  ;;  %v75_v63 = vld [vmem:[%s418_s1 + $0x1b8] sm:$0xff]  ;;  %v112_v0 = vpack.c.bf16 %v78_v61, %v76_v60  ;;  %v72_v2 = vld [vmem:[%s418_s1 + $0x1a0] sm:$0xff] }
  0x10   :  { %v111_v1 = vpack.c.bf16 %v75_v63, %v73_v62  ;;  %v74_v3 = vld [vmem:[%s418_s1 + $0x1b0] sm:$0xff]  ;;  %v69_v4 = vld [vmem:[%s418_s1 + $0x188] sm:$0xff]  ;;  %v71_v5 = vld [vmem:[%s418_s1 + $0x198] sm:$0xff] }
  0x11   :  { %135 = vmatpush1.bf16.msra.mxu0 %v92_v25  ;;  %v110_v6 = vpack.c.bf16 %v74_v3, %v72_v2  ;;  %v109_v7 = vpack.c.bf16 %v71_v5, %v69_v4  ;;  %v68_v8 = vld [vmem:[%s418_s1 + $0x180] sm:$0xff]  ;;  %v70_v9 = vld [vmem:[%s418_s1 + $0x190] sm:$0xff]  ;;  %v65_v10 = vld [vmem:[%s418_s1 + $0x168] sm:$0xff] }
  0x12   :  { %136 = vmatprep.subr.bf16.mxu0 %v91_v26  ;;  %v67_v11 = vld [vmem:[%s418_s1 + $0x178] sm:$0xff]  ;;  %v108_v12 = vpack.c.bf16 %v70_v9, %v68_v8  ;;  %v64_v14 = vld [vmem:[%s418_s1 + $0x160] sm:$0xff]  ;;  %v66_v15 = vld [vmem:[%s418_s1 + $0x170] sm:$0xff] }
  0x13   :  { %v107_v13 = vpack.c.bf16 %v67_v11, %v65_v10  ;;  %v61_v16 = vld [vmem:[%s418_s1 + $0x148] sm:$0xff]  ;;  %v63_v17 = vld [vmem:[%s418_s1 + $0x158] sm:$0xff]  ;;  %v106_v18 = vpack.c.bf16 %v66_v15, %v64_v14  ;;  %v60_v20 = vld [vmem:[%s418_s1 + $0x140] sm:$0xff] }
  0x14   :  { %v105_v19 = vpack.c.bf16 %v63_v17, %v61_v16  ;;  %v62_v21 = vld [vmem:[%s418_s1 + $0x150] sm:$0xff]  ;;  %v57_v22 = vld [vmem:[%s418_s1 + $0x128] sm:$0xff]  ;;  %v59_v23 = vld [vmem:[%s418_s1 + $0x138] sm:$0xff] }
  0x15   :  { %137 = vmatpush1.bf16.msra.mxu0 %v90_v31  ;;  %v104_v24 = vpack.c.bf16 %v62_v21, %v60_v20  ;;  %v103_v25 = vpack.c.bf16 %v59_v23, %v57_v22  ;;  %v56_v26 = vld [vmem:[%s418_s1 + $0x120] sm:$0xff]  ;;  %v58_v27 = vld [vmem:[%s418_s1 + $0x130] sm:$0xff]  ;;  %v53_v28 = vld [vmem:[%s418_s1 + $0x108] sm:$0xff] }
  0x16   :  { %138 = vmatprep.subr.bf16.mxu0 %v89_v32  ;;  %v55_v29 = vld [vmem:[%s418_s1 + $0x118] sm:$0xff]  ;;  %v102_v30 = vpack.c.bf16 %v58_v27, %v56_v26  ;;  %v52_v32 = vld [vmem:[%s418_s1 + $0x100] sm:$0xff]  ;;  %v54_v33 = vld [vmem:[%s418_s1 + $0x110] sm:$0xff] }
  0x17   :  { %v101_v31 = vpack.c.bf16 %v55_v29, %v53_v28  ;;  %v100_v34 = vpack.c.bf16 %v54_v33, %v52_v32  ;;  %v14_v35 = vld [vmem:[%s419_s0] sm:$0xff]  ;;  %v16_v36 = vld [vmem:[%s419_s0 + $0x10] sm:$0x3f] }
  0x18   :  { %v116_v41 = vld [vmem:[%s420_s2] sm:$0x3] }
  0x19   :  { %139 = vmatpush1.bf16.msra.mxu0 %v88_v37  ;;  %v18_v37 = vpack.c.bf16 %v16_v36, %v14_v35 }
  0x1a   :  { %140 = vmatprep.subr.bf16.mxu0 %v87_v39  ;;  %v119_v39 = vshrl.u32 %v118_v38, 7 }
  0x1c   :  { %v120_v40 = vsub.s32 0, %v119_v39  ;;  %v124_v42 = vsub.s32 1, %v119_v39 }
  0x1d   :  { %141 = vmatpush1.bf16.msra.mxu0 %v86_v46 }
  0x1e   :  { %142 = vmatprep.subr.bf16.mxu0 %v85_v47  ;;  %v121_v43 = vrot.slane %v116_v41, %v120_v40  ;;  %v125_v44 = vrot.slane %v116_v41, %v124_v42 }
  0x21   :  { %143 = vmatpush1.bf16.msra.mxu0 %v84_v52 }
  0x22   :  { %144 = vmatprep.subr.bf16.mxu0 %v115_v53 }
  0x25   :  { %145 = vmatpush2.bf16.msra.mxu0 %v114_v58 }
  0x26   :  { %146 = vmatprep.subr.bf16.mxu0 %v113_v59 }
  0x29   :  { %147 = vmatpush2.bf16.msra.mxu0 %v112_v0 }
  0x2a   :  { %148 = vmatprep.subr.bf16.mxu0 %v111_v1 }
  0x2d   :  { %149 = vmatpush2.bf16.msra.mxu0 %v110_v6 }
  0x2e   :  { %150 = vmatprep.subr.bf16.mxu0 %v109_v7 }
  0x31   :  { %151 = vmatpush2.bf16.msra.mxu0 %v108_v12 }
  0x32   :  { %152 = vmatprep.subr.bf16.mxu0 %v107_v13 }
  0x35   :  { %153 = vmatpush2.bf16.msra.mxu0 %v106_v18 }
  0x36   :  { %154 = vmatprep.subr.bf16.mxu0 %v105_v19 }
  0x39   :  { %155 = vmatpush2.bf16.msra.mxu0 %v104_v24 }
  0x3a   :  { %156 = vmatprep.subr.bf16.mxu0 %v103_v25 }
  0x3d   :  { %157 = vmatpush2.bf16.msra.mxu0 %v102_v30 }
  0x3e   :  { %158 = vmatprep.subr.bf16.mxu0 %v101_v31 }
  0x41   :  { %159 = vmatpush2.bf16.msra.mxu0 %v100_v34 }
  0x44   :  { %161 = vmatmul.mubr.bf16.vlgmr.msra.gmra.mxu0 %v18_v37 }
 0x104   :  { %v162_v45 = vpop.f32.mrf.mxu0 }
 0x105   :  { %v163_v46 = vadd.f32 %v162_v45, %v121_v43 }
 0x106   :  { %v164_v47 = vpop.f32.mrf.mxu0 }
 0x107   :  { %171 = vst [vmem:[%s421_s3] sm:$0xff] %v163_v46  ;;  %v165_v48 = vadd.f32 %v164_v47, %v125_v44 }
 0x108   :  { %v166_v49 = vpop.f32.mrf.mxu0 }
 0x109   :  { %172 = vst [vmem:[%s421_s3 + $0x8] sm:$0xff] %v165_v48  ;;  %v167_v50 = vadd.f32 %v166_v49, %v121_v43 }
 0x10a   :  { %v168_v51 = vpop.f32.mrf.mxu0 }
 0x10b   :  { %173 = vst [vmem:[%s421_s3 + $0x10] sm:$0x3f] %v167_v50  ;;  %v169_v52 = vadd.f32 %v168_v51, %v125_v44 }
 0x10d   :  { %174 = vst [vmem:[%s421_s3 + $0x18] sm:$0x3f] %v169_v52 }

// kernel: plate_recognition_forward.16
= control target key start
LH: loop header
LB: loop body
LE: loop exit
PB: predicated region body
PF: predicated region fallthrough
CT: control target
= control target key end

     0   :  { %s1534_s12 = smov 0   ;;  %s1536_s13 = smov 0   ;;  %s2487_s0 = inlined_call_operand.vmem [shape: f32[2,6,10,128], index: 0, kind: input, shape index: {}]   ;;  %s2488_s1 = inlined_call_operand.vmem [shape: f32[9,128,256], index: 1, kind: input, shape index: {}]   ;;  %s2489_s2 = inlined_call_operand.vmem [shape: f32[1,256], index: 2, kind: input, shape index: {}]   ;;  %s2490_s3 = inlined_call_operand.vmem [shape: f32[2,4,8,256], index: 3, kind: output, shape index: {}]  }
   0x1   :  { %s1538_s14 = smov 0   ;;  %s1540_s15 = smov 0  }
   0x2   :  { %s1542_s16 = smov 0  }
   0x3 LB: > { %s22_s17 = sadd.s32 1, %s1503_s14  ;;  %s25_s18 = sadd.s32 1, %s1507_s15  ;;  %s1511_s16 = sphi %s1542_s16, %s13_s16   ;;  %s1507_s15 = sphi %s1540_s15, %s2494_s15   ;;  %s1503_s14 = sphi %s1538_s14, %s2493_s14   ;;  %s1499_s13 = sphi %s1536_s13, %s2492_s13   ;;  %s1495_s12 = sphi %s1534_s12, %s2491_s12  }
   0x4   : > { %p23_p0 = scmp.ge.s32.totalorder %s22_s17, 4  ;;  %p1159_p1 = scmp.ge.s32.totalorder %s1511_s16, 1 }
   0x5   : > { %p151_p2 = scmp.lt.s32.totalorder %s1511_s16, 9 }
   0x6   : > { %s2496_s17 = smov (%p23_p0, %s22_s17), 0  ;;  %s2498_s18 = smov (!%p23_p0, %s25_s18), %s1507_s15 }
   0x7   : > { %p152_p3 = pnand %p1159_p1, %p151_p2  ;;  %p27_p4 = scmp.ge.s32.totalorder %s2498_s18, 2 }
   0x8   : > { %p179_p5 = scmp.lt.s32.totalorder (!%p152_p3), %s1499_s13, 1  ;;  %s1164_s20 = sshll.u32 (!%p152_p3), %s1495_s12, 4 }
   0x9   : > { %s2500_s18 = smov (%p27_p4, %s2498_s18), 0  ;;  %155 = sbr.rel (%p152_p3) target bundleno = 379 (0x17b), region = 32 }
   0xa   : > { %p186_p6 = scmp.lt.s32.totalorder (!%p152_p3), %s1495_s12, 3 }
   0xe   : > { %v1194_v0 = vld [vmem:[%s2488_s1 + $0x1e8] sm:$0xff]  ;;  %v1196_v1 = vld [vmem:[%s2488_s1 + $0x1f8] sm:$0xff]  ;;  %v1193_v5 = vld [vmem:[%s2488_s1 + $0x1e0] sm:$0xff]  ;;  %v1513_v7 = vmov 0   ;;  %s2502_s13 = smov (!%p179_p5, %s1499_s13), 1  ;;  %s2504_s12 = smov (!%p186_p6, %s1495_s12), 3 }
   0xf   : > { %v226_v2 = vld [vmem:[%s2488_s1 + $0xe8] sm:$0xff]  ;;  %v296_v3 = vpack.c.bf16 %v1196_v1, %v1194_v0  ;;  %v228_v4 = vld [vmem:[%s2488_s1 + $0xf8] sm:$0xff]  ;;  %v1195_v6 = vld [vmem:[%s2488_s1 + $0x1f0] sm:$0xff]  ;;  %329 = vmatprep.mubr.bf16.mxu0 %v1513_v7  ;;  %370 = vmatprep.mubr.bf16.mxu1 %v1513_v7  ;;  %s1431_s19 = smul.u32 96, %s2502_s13  ;;  %s1162_s25 = sshll.u32 %s2502_s13, 3 }
  0x10   : > { %v245_v8 = vpack.c.bf16 %v228_v4, %v226_v2  ;;  %v295_v9 = vpack.c.bf16 %v1195_v6, %v1193_v5  ;;  %v225_v10 = vld [vmem:[%s2488_s1 + $0xe0] sm:$0xff]  ;;  %v227_v11 = vld [vmem:[%s2488_s1 + $0xf0] sm:$0xff]  ;;  %v1190_v12 = vld [vmem:[%s2488_s1 + $0x1c8] sm:$0xff] }
  0x11   : > { %297 = vmatprep.subr.bf16.mxu0 %v296_v3  ;;  %v244_v13 = vpack.c.bf16 %v227_v11, %v225_v10  ;;  %v1192_v14 = vld [vmem:[%s2488_s1 + $0x1d8] sm:$0xff]  ;;  %v222_v15 = vld [vmem:[%s2488_s1 + $0xc8] sm:$0xff]  ;;  %v1189_v19 = vld [vmem:[%s2488_s1 + $0x1c0] sm:$0xff]  ;;  %s183_s11 = scalar_lea.vmem %s2487_s0, %s1431_s19 }
  0x12   : > { %v224_v16 = vld [vmem:[%s2488_s1 + $0xd8] sm:$0xff]  ;;  %338 = vmatprep.subr.bf16.mxu1 %v245_v8  ;;  %298 = vmatpush1.bf16.msra.mxu0 %v295_v9  ;;  %v294_v17 = vpack.c.bf16 %v1192_v14, %v1190_v12  ;;  %v1191_v20 = vld [vmem:[%s2488_s1 + $0x1d0] sm:$0xff]  ;;  %v221_v21 = vld [vmem:[%s2488_s1 + $0xc0] sm:$0xff]  ;;  %s1770_s30 = scalar_lea.vmem %s183_s11, %s1164_s20 }
  0x13   : > { %v243_v18 = vpack.c.bf16 %v224_v16, %v222_v15  ;;  %339 = vmatpush1.bf16.msra.mxu1 %v244_v13  ;;  %v293_v22 = vpack.c.bf16 %v1191_v20, %v1189_v19  ;;  %v223_v23 = vld [vmem:[%s2488_s1 + $0xd0] sm:$0xff]  ;;  %v1186_v24 = vld [vmem:[%s2488_s1 + $0x1a8] sm:$0xff]  ;;  %v1188_v25 = vld [vmem:[%s2488_s1 + $0x1b8] sm:$0xff] }
  0x14   : > { %299 = vmatprep.subr.bf16.mxu0 %v294_v17  ;;  %v242_v26 = vpack.c.bf16 %v223_v23, %v221_v21  ;;  %v292_v27 = vpack.c.bf16 %v1188_v25, %v1186_v24  ;;  %v218_v28 = vld [vmem:[%s2488_s1 + $0xa8] sm:$0xff]  ;;  %v220_v29 = vld [vmem:[%s2488_s1 + $0xb8] sm:$0xff]  ;;  %v1185_v30 = vld [vmem:[%s2488_s1 + $0x1a0] sm:$0xff] }
  0x15   : > { %340 = vmatprep.subr.bf16.mxu1 %v243_v18  ;;  %v241_v31 = vpack.c.bf16 %v220_v29, %v218_v28  ;;  %v1187_v32 = vld [vmem:[%s2488_s1 + $0x1b0] sm:$0xff]  ;;  %v217_v33 = vld [vmem:[%s2488_s1 + $0xa0] sm:$0xff]  ;;  %v1182_v36 = vld [vmem:[%s2488_s1 + $0x188] sm:$0xff] }
  0x16   : > { %v219_v34 = vld [vmem:[%s2488_s1 + $0xb0] sm:$0xff]  ;;  %300 = vmatpush1.bf16.msra.mxu0 %v293_v22  ;;  %v291_v35 = vpack.c.bf16 %v1187_v32, %v1185_v30  ;;  %v1184_v37 = vld [vmem:[%s2488_s1 + $0x198] sm:$0xff]  ;;  %v214_v38 = vld [vmem:[%s2488_s1 + $0x88] sm:$0xff] }
  0x17   : > { %341 = vmatpush1.bf16.msra.mxu1 %v242_v26  ;;  %301 = vmatprep.subr.bf16.mxu0 %v292_v27  ;;  %v240_v39 = vpack.c.bf16 %v219_v34, %v217_v33  ;;  %v290_v40 = vpack.c.bf16 %v1184_v37, %v1182_v36  ;;  %v216_v41 = vld [vmem:[%s2488_s1 + $0x98] sm:$0xff]  ;;  %v1181_v42 = vld [vmem:[%s2488_s1 + $0x180] sm:$0xff]  ;;  %v1183_v43 = vld [vmem:[%s2488_s1 + $0x190] sm:$0xff] }
  0x18   : > { %342 = vmatprep.subr.bf16.mxu1 %v241_v31  ;;  %v239_v44 = vpack.c.bf16 %v216_v41, %v214_v38  ;;  %v213_v45 = vld [vmem:[%s2488_s1 + $0x80] sm:$0xff]  ;;  %v215_v46 = vld [vmem:[%s2488_s1 + $0x90] sm:$0xff]  ;;  %v1178_v47 = vld [vmem:[%s2488_s1 + $0x168] sm:$0xff]  ;;  %v289_v51 = vpack.c.bf16 %v1183_v43, %v1181_v42 }
  0x19   : > { %v1180_v48 = vld [vmem:[%s2488_s1 + $0x178] sm:$0xff]  ;;  %v210_v49 = vld [vmem:[%s2488_s1 + $0x68] sm:$0xff]  ;;  %v238_v52 = vpack.c.bf16 %v215_v46, %v213_v45  ;;  %v1177_v54 = vld [vmem:[%s2488_s1 + $0x160] sm:$0xff] }
  0x1a   : > { %v212_v50 = vld [vmem:[%s2488_s1 + $0x78] sm:$0xff]  ;;  %302 = vmatpush1.bf16.msra.mxu0 %v291_v35  ;;  %v288_v53 = vpack.c.bf16 %v1180_v48, %v1178_v47  ;;  %v1179_v55 = vld [vmem:[%s2488_s1 + $0x170] sm:$0xff]  ;;  %v209_v56 = vld [vmem:[%s2488_s1 + $0x60] sm:$0xff] }
  0x1b   : > { %343 = vmatpush1.bf16.msra.mxu1 %v240_v39  ;;  %303 = vmatprep.subr.bf16.mxu0 %v290_v40  ;;  %v237_v57 = vpack.c.bf16 %v212_v50, %v210_v49  ;;  %v211_v58 = vld [vmem:[%s2488_s1 + $0x70] sm:$0xff]  ;;  %v1174_v59 = vld [vmem:[%s2488_s1 + $0x148] sm:$0xff]  ;;  %v1176_v60 = vld [vmem:[%s2488_s1 + $0x158] sm:$0xff]  ;;  %v287_v63 = vpack.c.bf16 %v1179_v55, %v1177_v54 }
  0x1c   : > { %344 = vmatprep.subr.bf16.mxu1 %v239_v44  ;;  %v206_v61 = vld [vmem:[%s2488_s1 + $0x48] sm:$0xff]  ;;  %v208_v62 = vld [vmem:[%s2488_s1 + $0x58] sm:$0xff]  ;;  %v236_v0 = vpack.c.bf16 %v211_v58, %v209_v56  ;;  %v286_v1 = vpack.c.bf16 %v1176_v60, %v1174_v59  ;;  %v1173_v2 = vld [vmem:[%s2488_s1 + $0x140] sm:$0xff] }
  0x1d   : > { %v1175_v3 = vld [vmem:[%s2488_s1 + $0x150] sm:$0xff]  ;;  %v205_v4 = vld [vmem:[%s2488_s1 + $0x40] sm:$0xff]  ;;  %v235_v5 = vpack.c.bf16 %v208_v62, %v206_v61  ;;  %v1170_v8 = vld [vmem:[%s2488_s1 + $0x128] sm:$0xff] }
  0x1e   : > { %304 = vmatpush1.bf16.msra.mxu0 %v289_v51  ;;  %v207_v6 = vld [vmem:[%s2488_s1 + $0x50] sm:$0xff]  ;;  %v1172_v9 = vld [vmem:[%s2488_s1 + $0x138] sm:$0xff]  ;;  %v202_v10 = vld [vmem:[%s2488_s1 + $0x28] sm:$0xff]  ;;  %v285_v12 = vpack.c.bf16 %v1175_v3, %v1173_v2 }
  0x1f   : > { %345 = vmatpush1.bf16.msra.mxu1 %v238_v52  ;;  %305 = vmatprep.subr.bf16.mxu0 %v288_v53  ;;  %v204_v11 = vld [vmem:[%s2488_s1 + $0x38] sm:$0xff]  ;;  %v234_v13 = vpack.c.bf16 %v207_v6, %v205_v4  ;;  %v284_v14 = vpack.c.bf16 %v1172_v9, %v1170_v8  ;;  %v1169_v15 = vld [vmem:[%s2488_s1 + $0x120] sm:$0xff]  ;;  %v1171_v16 = vld [vmem:[%s2488_s1 + $0x130] sm:$0xff] }
  0x20   : > { %346 = vmatprep.subr.bf16.mxu1 %v237_v57  ;;  %v201_v17 = vld [vmem:[%s2488_s1 + $0x20] sm:$0xff]  ;;  %v233_v18 = vpack.c.bf16 %v204_v11, %v202_v10  ;;  %v203_v19 = vld [vmem:[%s2488_s1 + $0x30] sm:$0xff]  ;;  %v1166_v20 = vld [vmem:[%s2488_s1 + $0x108] sm:$0xff]  ;;  %v283_v24 = vpack.c.bf16 %v1171_v16, %v1169_v15 }
  0x21   : > { %v1168_v21 = vld [vmem:[%s2488_s1 + $0x118] sm:$0xff]  ;;  %v198_v22 = vld [vmem:[%s2488_s1 + $0x8] sm:$0xff]  ;;  %v232_v25 = vpack.c.bf16 %v203_v19, %v201_v17  ;;  %v1165_v27 = vld [vmem:[%s2488_s1 + $0x100] sm:$0xff] }
  0x22   : > { %306 = vmatpush1.bf16.msra.mxu0 %v287_v63  ;;  %v200_v23 = vld [vmem:[%s2488_s1 + $0x18] sm:$0xff]  ;;  %v282_v26 = vpack.c.bf16 %v1168_v21, %v1166_v20  ;;  %v1167_v28 = vld [vmem:[%s2488_s1 + $0x110] sm:$0xff]  ;;  %v197_v29 = vld [vmem:[%s2488_s1] sm:$0xff] }
  0x23   : > { %347 = vmatpush1.bf16.msra.mxu1 %v236_v0  ;;  %307 = vmatprep.subr.bf16.mxu0 %v286_v1  ;;  %v231_v30 = vpack.c.bf16 %v200_v23, %v198_v22  ;;  %v199_v31 = vld [vmem:[%s2488_s1 + $0x10] sm:$0xff]  ;;  %v1226_v32 = vld [vmem:[%s2488_s1 + $0x2e8] sm:$0xff]  ;;  %v1228_v33 = vld [vmem:[%s2488_s1 + $0x2f8] sm:$0xff]  ;;  %v281_v36 = vpack.c.bf16 %v1167_v28, %v1165_v27 }
  0x24   : > { %348 = vmatprep.subr.bf16.mxu1 %v235_v5  ;;  %v1260_v34 = vld [vmem:[%s2488_s1 + $0x3e8] sm:$0xff]  ;;  %v1262_v35 = vld [vmem:[%s2488_s1 + $0x3f8] sm:$0xff]  ;;  %v196_v38 = vld [vmem:[%s1770_s30] sm:$0xff]  ;;  %v230_v39 = vpack.c.bf16 %v199_v31, %v197_v29  ;;  %v429_v40 = vpack.c.bf16 %v1228_v33, %v1226_v32 }
  0x25   : > { %v246_v37 = vld [vmem:[%s1770_s30 + $0x1] sm:$0xff]  ;;  %v1227_v42 = vld [vmem:[%s2488_s1 + $0x2f0] sm:$0xff]  ;;  %v526_v44 = vpack.c.bf16 %v1262_v35, %v1260_v34  ;;  %v1224_v47 = vld [vmem:[%s2488_s1 + $0x2d8] sm:$0xff]  ;;  %v229_v51 = vpack.c.bf16 %v196_v38, %v196_v38 }
  0x26   : > { %308 = vmatpush1.bf16.msra.mxu0 %v285_v12  ;;  %v1225_v41 = vld [vmem:[%s2488_s1 + $0x2e0] sm:$0xff]  ;;  %v1261_v45 = vld [vmem:[%s2488_s1 + $0x3f0] sm:$0xff]  ;;  %v1222_v46 = vld [vmem:[%s2488_s1 + $0x2c8] sm:$0xff]  ;;  %v280_v48 = vpack.c.bf16 %v246_v37, %v246_v37 }
  0x27   : > { %349 = vmatpush1.bf16.msra.mxu1 %v234_v13  ;;  %309 = vmatprep.subr.bf16.mxu0 %v284_v14  ;;  %v1259_v43 = vld [vmem:[%s2488_s1 + $0x3e0] sm:$0xff]  ;;  %v1256_v49 = vld [vmem:[%s2488_s1 + $0x3c8] sm:$0xff]  ;;  %v1258_v50 = vld [vmem:[%s2488_s1 + $0x3d8] sm:$0xff]  ;;  %v428_v52 = vpack.c.bf16 %v1227_v42, %v1225_v41  ;;  %v427_v54 = vpack.c.bf16 %v1224_v47, %v1222_v46 }
  0x28   : > { %350 = vmatprep.subr.bf16.mxu1 %v233_v18  ;;  %v525_v53 = vpack.c.bf16 %v1261_v45, %v1259_v43  ;;  %v1221_v55 = vld [vmem:[%s2488_s1 + $0x2c0] sm:$0xff]  ;;  %v1223_v56 = vld [vmem:[%s2488_s1 + $0x2d0] sm:$0xff]  ;;  %v524_v58 = vpack.c.bf16 %v1258_v50, %v1256_v49  ;;  %v1218_v60 = vld [vmem:[%s2488_s1 + $0x2a8] sm:$0xff] }
  0x29   : > { %v1255_v57 = vld [vmem:[%s2488_s1 + $0x3c0] sm:$0xff]  ;;  %v1257_v59 = vld [vmem:[%s2488_s1 + $0x3d0] sm:$0xff]  ;;  %v1220_v61 = vld [vmem:[%s2488_s1 + $0x2b8] sm:$0xff]  ;;  %v426_v0 = vpack.c.bf16 %v1223_v56, %v1221_v55 }
  0x2a   : > { %310 = vmatpush1.bf16.msra.mxu0 %v283_v24  ;;  %v1252_v62 = vld [vmem:[%s2488_s1 + $0x3a8] sm:$0xff]  ;;  %v1254_v63 = vld [vmem:[%s2488_s1 + $0x3b8] sm:$0xff]  ;;  %v523_v1 = vpack.c.bf16 %v1257_v59, %v1255_v57  ;;  %v425_v2 = vpack.c.bf16 %v1220_v61, %v1218_v60  ;;  %v1217_v3 = vld [vmem:[%s2488_s1 + $0x2a0] sm:$0xff] }
  0x2b   : > { %351 = vmatpush1.bf16.msra.mxu1 %v232_v25  ;;  %311 = vmatprep.subr.bf16.mxu0 %v282_v26  ;;  %v1219_v4 = vld [vmem:[%s2488_s1 + $0x2b0] sm:$0xff]  ;;  %v1251_v5 = vld [vmem:[%s2488_s1 + $0x3a0] sm:$0xff]  ;;  %v522_v6 = vpack.c.bf16 %v1254_v63, %v1252_v62  ;;  %v1214_v9 = vld [vmem:[%s2488_s1 + $0x288] sm:$0xff] }
  0x2c   : > { %352 = vmatprep.subr.bf16.mxu1 %v231_v30  ;;  %v1253_v8 = vld [vmem:[%s2488_s1 + $0x3b0] sm:$0xff]  ;;  %v1216_v10 = vld [vmem:[%s2488_s1 + $0x298] sm:$0xff]  ;;  %v1248_v11 = vld [vmem:[%s2488_s1 + $0x388] sm:$0xff]  ;;  %v424_v13 = vpack.c.bf16 %v1219_v4, %v1217_v3 }
  0x2d   : > { %v1250_v12 = vld [vmem:[%s2488_s1 + $0x398] sm:$0xff]  ;;  %v521_v14 = vpack.c.bf16 %v1253_v8, %v1251_v5  ;;  %v423_v15 = vpack.c.bf16 %v1216_v10, %v1214_v9  ;;  %v1213_v16 = vld [vmem:[%s2488_s1 + $0x280] sm:$0xff]  ;;  %v1215_v17 = vld [vmem:[%s2488_s1 + $0x290] sm:$0xff] }
  0x2e   : > { %312 = vmatpush1.bf16.msra.mxu0 %v281_v36  ;;  %v1247_v18 = vld [vmem:[%s2488_s1 + $0x380] sm:$0xff]  ;;  %v520_v19 = vpack.c.bf16 %v1250_v12, %v1248_v11  ;;  %v1249_v20 = vld [vmem:[%s2488_s1 + $0x390] sm:$0xff]  ;;  %v1210_v21 = vld [vmem:[%s2488_s1 + $0x268] sm:$0xff]  ;;  %v422_v25 = vpack.c.bf16 %v1215_v17, %v1213_v16 }
  0x2f   : > { %353 = vmatpush1.bf16.msra.mxu1 %v230_v39  ;;  %430 = vmatprep.subr.bf16.mxu0 %v429_v40  ;;  %v1212_v22 = vld [vmem:[%s2488_s1 + $0x278] sm:$0xff]  ;;  %v1244_v23 = vld [vmem:[%s2488_s1 + $0x368] sm:$0xff]  ;;  %v519_v26 = vpack.c.bf16 %v1249_v20, %v1247_v18  ;;  %v1209_v28 = vld [vmem:[%s2488_s1 + $0x260] sm:$0xff] }
  0x30   : > { %527 = vmatprep.subr.bf16.mxu1 %v526_v44  ;;  %v1246_v24 = vld [vmem:[%s2488_s1 + $0x378] sm:$0xff]  ;;  %v421_v27 = vpack.c.bf16 %v1212_v22, %v1210_v21  ;;  %v1211_v29 = vld [vmem:[%s2488_s1 + $0x270] sm:$0xff]  ;;  %v1243_v30 = vld [vmem:[%s2488_s1 + $0x360] sm:$0xff] }
  0x31   : > { %330 = vmatmul.mubr.bf16.vlgmr.msra.gmra.mxu0 %v280_v48  ;;  %v518_v31 = vpack.c.bf16 %v1246_v24, %v1244_v23  ;;  %v1245_v32 = vld [vmem:[%s2488_s1 + $0x370] sm:$0xff]  ;;  %v1206_v33 = vld [vmem:[%s2488_s1 + $0x248] sm:$0xff]  ;;  %v1208_v34 = vld [vmem:[%s2488_s1 + $0x258] sm:$0xff]  ;;  %v420_v37 = vpack.c.bf16 %v1211_v29, %v1209_v28 }
  0x32   : > { %371 = vmatmul.mubr.bf16.vlgmr.msra.gmra.mxu1 %v229_v51  ;;  %431 = vmatpush1.bf16.msra.mxu0 %v428_v52  ;;  %v1240_v35 = vld [vmem:[%s2488_s1 + $0x348] sm:$0xff]  ;;  %v1242_v36 = vld [vmem:[%s2488_s1 + $0x358] sm:$0xff]  ;;  %v517_v38 = vpack.c.bf16 %v1245_v32, %v1243_v30  ;;  %v419_v39 = vpack.c.bf16 %v1208_v34, %v1206_v33  ;;  %v1205_v40 = vld [vmem:[%s2488_s1 + $0x240] sm:$0xff] }
  0x33   : > { %528 = vmatpush1.bf16.msra.mxu1 %v525_v53  ;;  %432 = vmatprep.subr.bf16.mxu0 %v427_v54  ;;  %v1207_v41 = vld [vmem:[%s2488_s1 + $0x250] sm:$0xff]  ;;  %v1239_v42 = vld [vmem:[%s2488_s1 + $0x340] sm:$0xff]  ;;  %v516_v43 = vpack.c.bf16 %v1242_v36, %v1240_v35  ;;  %v1202_v45 = vld [vmem:[%s2488_s1 + $0x228] sm:$0xff] }
  0x34   : > { %529 = vmatprep.subr.bf16.mxu1 %v524_v58  ;;  %462 = vmatprep.mubr.bf16.mxu0 %v1513_v7  ;;  %v1241_v44 = vld [vmem:[%s2488_s1 + $0x350] sm:$0xff]  ;;  %v1204_v46 = vld [vmem:[%s2488_s1 + $0x238] sm:$0xff]  ;;  %v1236_v47 = vld [vmem:[%s2488_s1 + $0x328] sm:$0xff]  ;;  %v418_v49 = vpack.c.bf16 %v1207_v41, %v1205_v40 }
  0x35   : > { %559 = vmatprep.mubr.bf16.mxu1 %v1513_v7  ;;  %v1238_v48 = vld [vmem:[%s2488_s1 + $0x338] sm:$0xff]  ;;  %v515_v50 = vpack.c.bf16 %v1241_v44, %v1239_v42  ;;  %v417_v51 = vpack.c.bf16 %v1204_v46, %v1202_v45  ;;  %v1201_v52 = vld [vmem:[%s2488_s1 + $0x220] sm:$0xff]  ;;  %v1203_v53 = vld [vmem:[%s2488_s1 + $0x230] sm:$0xff] }
  0x36   : > { %433 = vmatpush1.bf16.msra.mxu0 %v426_v0  ;;  %v1235_v54 = vld [vmem:[%s2488_s1 + $0x320] sm:$0xff]  ;;  %v514_v55 = vpack.c.bf16 %v1238_v48, %v1236_v47  ;;  %v1237_v56 = vld [vmem:[%s2488_s1 + $0x330] sm:$0xff]  ;;  %v1198_v57 = vld [vmem:[%s2488_s1 + $0x208] sm:$0xff]  ;;  %v416_v61 = vpack.c.bf16 %v1203_v53, %v1201_v52 }
  0x37   : > { %530 = vmatpush1.bf16.msra.mxu1 %v523_v1  ;;  %434 = vmatprep.subr.bf16.mxu0 %v425_v2  ;;  %v1200_v58 = vld [vmem:[%s2488_s1 + $0x218] sm:$0xff]  ;;  %v1232_v59 = vld [vmem:[%s2488_s1 + $0x308] sm:$0xff]  ;;  %v513_v62 = vpack.c.bf16 %v1237_v56, %v1235_v54  ;;  %v1197_v0 = vld [vmem:[%s2488_s1 + $0x200] sm:$0xff] }
  0x38   : > { %531 = vmatprep.subr.bf16.mxu1 %v522_v6  ;;  %v1234_v60 = vld [vmem:[%s2488_s1 + $0x318] sm:$0xff]  ;;  %v415_v63 = vpack.c.bf16 %v1200_v58, %v1198_v57  ;;  %v1199_v1 = vld [vmem:[%s2488_s1 + $0x210] sm:$0xff]  ;;  %v1231_v2 = vld [vmem:[%s2488_s1 + $0x300] sm:$0xff] }
  0x39   : > { %v512_v3 = vpack.c.bf16 %v1234_v60, %v1232_v59  ;;  %v1233_v4 = vld [vmem:[%s2488_s1 + $0x310] sm:$0xff]  ;;  %v1293_v5 = vld [vmem:[%s2488_s1 + $0x4e8] sm:$0xff]  ;;  %v1295_v6 = vld [vmem:[%s2488_s1 + $0x4f8] sm:$0xff]  ;;  %v414_v10 = vpack.c.bf16 %v1199_v1, %v1197_v0 }
  0x3a   : > { %435 = vmatpush1.bf16.msra.mxu0 %v424_v13  ;;  %v1326_v8 = vld [vmem:[%s2488_s1 + $0x5e8] sm:$0xff]  ;;  %v1328_v9 = vld [vmem:[%s2488_s1 + $0x5f8] sm:$0xff]  ;;  %v1292_v12 = vld [vmem:[%s2488_s1 + $0x4e0] sm:$0xff]  ;;  %v511_v13 = vpack.c.bf16 %v1233_v4, %v1231_v2 }
  0x3b   : > { %532 = vmatpush1.bf16.msra.mxu1 %v521_v14  ;;  %436 = vmatprep.subr.bf16.mxu0 %v423_v15  ;;  %v379_v11 = vld [vmem:[%s1770_s30 + $0x2] sm:$0xff]  ;;  %v620_v14 = vpack.c.bf16 %v1295_v6, %v1293_v5  ;;  %v1294_v15 = vld [vmem:[%s2488_s1 + $0x4f0] sm:$0xff]  ;;  %v714_v18 = vpack.c.bf16 %v1328_v9, %v1326_v8  ;;  %v1291_v21 = vld [vmem:[%s2488_s1 + $0x4d8] sm:$0xff] }
  0x3c   : > { %533 = vmatprep.subr.bf16.mxu1 %v520_v19  ;;  %v1230_v16 = vld [vmem:[%s1770_s30 + $0x10] sm:$0xff]  ;;  %v1325_v17 = vld [vmem:[%s2488_s1 + $0x5e0] sm:$0xff]  ;;  %v1289_v20 = vld [vmem:[%s2488_s1 + $0x4c8] sm:$0xff]  ;;  %v413_v22 = vpack.c.bf16 %v379_v11, %v379_v11 }
  0x3d   : > { %v1327_v19 = vld [vmem:[%s2488_s1 + $0x5f0] sm:$0xff]  ;;  %v1322_v23 = vld [vmem:[%s2488_s1 + $0x5c8] sm:$0xff]  ;;  %v1324_v24 = vld [vmem:[%s2488_s1 + $0x5d8] sm:$0xff]  ;;  %v618_v28 = vpack.c.bf16 %v1291_v21, %v1289_v20 }
  0x3e   : > { %437 = vmatpush1.bf16.msra.mxu0 %v422_v25  ;;  %v619_v25 = vpack.c.bf16 %v1294_v15, %v1292_v12  ;;  %v1288_v29 = vld [vmem:[%s2488_s1 + $0x4c0] sm:$0xff]  ;;  %v1290_v30 = vld [vmem:[%s2488_s1 + $0x4d0] sm:$0xff]  ;;  %v712_v32 = vpack.c.bf16 %v1324_v24, %v1322_v23  ;;  %v1285_v34 = vld [vmem:[%s2488_s1 + $0x4a8] sm:$0xff] }
  0x3f   : > { %534 = vmatpush1.bf16.msra.mxu1 %v519_v26  ;;  %438 = vmatprep.subr.bf16.mxu0 %v421_v27  ;;  %v510_v26 = vpack.c.bf16 %v1230_v16, %v1230_v16  ;;  %v713_v27 = vpack.c.bf16 %v1327_v19, %v1325_v17  ;;  %v1323_v33 = vld [vmem:[%s2488_s1 + $0x5d0] sm:$0xff]  ;;  %v1287_v35 = vld [vmem:[%s2488_s1 + $0x4b8] sm:$0xff]  ;;  %v1318_v36 = vld [vmem:[%s2488_s1 + $0x5a8] sm:$0xff] }
  0x40   : > { %535 = vmatprep.subr.bf16.mxu1 %v518_v31  ;;  %v1321_v31 = vld [vmem:[%s2488_s1 + $0x5c0] sm:$0xff]  ;;  %v616_v40 = vpack.c.bf16 %v1287_v35, %v1285_v34  ;;  %v1286_v42 = vld [vmem:[%s2488_s1 + $0x4b0] sm:$0xff]  ;;  %v1281_v46 = vld [vmem:[%s2488_s1 + $0x488] sm:$0xff] }
  0x41   : > { %v1284_v41 = vld [vmem:[%s2488_s1 + $0x4a0] sm:$0xff]  ;;  %v1319_v45 = vld [vmem:[%s2488_s1 + $0x5b0] sm:$0xff]  ;;  %v1283_v47 = vld [vmem:[%s2488_s1 + $0x498] sm:$0xff] }
  0x42   : > { %439 = vmatpush1.bf16.msra.mxu0 %v420_v37  ;;  %v1320_v37 = vld [vmem:[%s2488_s1 + $0x5b8] sm:$0xff]  ;;  %v1314_v48 = vld [vmem:[%s2488_s1 + $0x588] sm:$0xff]  ;;  %v614_v52 = vpack.c.bf16 %v1283_v47, %v1281_v46  ;;  %v1280_v53 = vld [vmem:[%s2488_s1 + $0x480] sm:$0xff] }
  0x43   : > { %536 = vmatpush1.bf16.msra.mxu1 %v517_v38  ;;  %440 = vmatprep.subr.bf16.mxu0 %v419_v39  ;;  %v617_v38 = vpack.c.bf16 %v1290_v30, %v1288_v29  ;;  %v711_v39 = vpack.c.bf16 %v1323_v33, %v1321_v31  ;;  %v710_v44 = vpack.c.bf16 %v1320_v37, %v1318_v36  ;;  %v1282_v54 = vld [vmem:[%s2488_s1 + $0x490] sm:$0xff]  ;;  %v1277_v58 = vld [vmem:[%s2488_s1 + $0x468] sm:$0xff]  ;;  %v1279_v59 = vld [vmem:[%s2488_s1 + $0x478] sm:$0xff] }
  0x44   : > { %537 = vmatprep.subr.bf16.mxu1 %v516_v43  ;;  %v1317_v43 = vld [vmem:[%s2488_s1 + $0x5a0] sm:$0xff]  ;;  %v1315_v57 = vld [vmem:[%s2488_s1 + $0x590] sm:$0xff]  ;;  %v1310_v60 = vld [vmem:[%s2488_s1 + $0x568] sm:$0xff]  ;;  %v612_v0 = vpack.c.bf16 %v1279_v59, %v1277_v58 }
  0x45   : > { %v1276_v1 = vld [vmem:[%s2488_s1 + $0x460] sm:$0xff]  ;;  %v1278_v2 = vld [vmem:[%s2488_s1 + $0x470] sm:$0xff]  ;;  %v1273_v6 = vld [vmem:[%s2488_s1 + $0x448] sm:$0xff] }
  0x46   : > { %441 = vmatpush1.bf16.msra.mxu0 %v418_v49  ;;  %v1316_v49 = vld [vmem:[%s2488_s1 + $0x598] sm:$0xff]  ;;  %v1311_v5 = vld [vmem:[%s2488_s1 + $0x570] sm:$0xff]  ;;  %v1306_v9 = vld [vmem:[%s2488_s1 + $0x548] sm:$0xff]  ;;  %v611_v11 = vpack.c.bf16 %v1278_v2, %v1276_v1 }
  0x47   : > { %538 = vmatpush1.bf16.msra.mxu1 %v515_v50  ;;  %442 = vmatprep.subr.bf16.mxu0 %v417_v51  ;;  %v615_v50 = vpack.c.bf16 %v1286_v42, %v1284_v41  ;;  %v709_v51 = vpack.c.bf16 %v1319_v45, %v1317_v43  ;;  %v708_v56 = vpack.c.bf16 %v1316_v49, %v1314_v48  ;;  %v1275_v8 = vld [vmem:[%s2488_s1 + $0x458] sm:$0xff]  ;;  %v1274_v15 = vld [vmem:[%s2488_s1 + $0x450] sm:$0xff]  ;;  %v1305_v16 = vld [vmem:[%s2488_s1 + $0x540] sm:$0xff] }
  0x48   : > { %539 = vmatprep.subr.bf16.mxu1 %v514_v55  ;;  %v1313_v55 = vld [vmem:[%s2488_s1 + $0x580] sm:$0xff]  ;;  %v1269_v19 = vld [vmem:[%s2488_s1 + $0x428] sm:$0xff]  ;;  %v1271_v20 = vld [vmem:[%s2488_s1 + $0x438] sm:$0xff] }
  0x49   : > { %v1302_v21 = vld [vmem:[%s2488_s1 + $0x528] sm:$0xff]  ;;  %v1303_v30 = vld [vmem:[%s2488_s1 + $0x530] sm:$0xff]  ;;  %v1300_v34 = vld [vmem:[%s2488_s1 + $0x518] sm:$0xff] }
  0x4a   : > { %443 = vmatpush1.bf16.msra.mxu0 %v416_v61  ;;  %v1312_v61 = vld [vmem:[%s2488_s1 + $0x578] sm:$0xff]  ;;  %v1265_v31 = vld [vmem:[%s2488_s1 + $0x408] sm:$0xff]  ;;  %v1299_v42 = vld [vmem:[%s2488_s1 + $0x510] sm:$0xff] }
  0x4b   : > { %540 = vmatpush1.bf16.msra.mxu1 %v513_v62  ;;  %444 = vmatprep.subr.bf16.mxu0 %v415_v63  ;;  %v613_v62 = vpack.c.bf16 %v1282_v54, %v1280_v53  ;;  %v707_v63 = vpack.c.bf16 %v1315_v57, %v1313_v55  ;;  %v706_v4 = vpack.c.bf16 %v1312_v61, %v1310_v60  ;;  %v1298_v33 = vld [vmem:[%s2488_s1 + $0x508] sm:$0xff]  ;;  %v1395_v46 = vld [vmem:[%s2488_s1 + $0x7f8] sm:$0xff]  ;;  %v1359_v49 = vld [vmem:[%s2488_s1 + $0x6e0] sm:$0xff] }
  0x4c   : > { %541 = vmatprep.subr.bf16.mxu1 %v512_v3  ;;  %v1309_v3 = vld [vmem:[%s2488_s1 + $0x560] sm:$0xff]  ;;  %v700_v41 = vpack.c.bf16 %v1300_v34, %v1298_v33  ;;  %v1360_v43 = vld [vmem:[%s2488_s1 + $0x6e8] sm:$0xff]  ;;  %v1263_v48 = vld [vmem:[%s1770_s30 + $0x11] sm:$0xff] }
  0x4d   : > { %v705_v12 = vpack.c.bf16 %v1311_v5, %v1309_v3  ;;  %v1393_v45 = vld [vmem:[%s2488_s1 + $0x7e8] sm:$0xff]  ;;  %v1296_v53 = vld [vmem:[%s1770_s30 + $0x12] sm:$0xff]  ;;  %v1392_v54 = vld [vmem:[%s2488_s1 + $0x7e0] sm:$0xff]  ;;  %v604_v59 = vpack.c.bf16 %v1263_v48, %v1263_v48 }
  0x4e   : > { %445 = vmatpush1.bf16.msra.mxu0 %v414_v10  ;;  %v1308_v10 = vld [vmem:[%s2488_s1 + $0x558] sm:$0xff]  ;;  %v905_v55 = vpack.c.bf16 %v1395_v46, %v1393_v45  ;;  %v1356_v57 = vld [vmem:[%s2488_s1 + $0x6c8] sm:$0xff]  ;;  %v1355_v2 = vld [vmem:[%s2488_s1 + $0x6c0] sm:$0xff] }
  0x4f   : > { %542 = vmatpush1.bf16.msra.mxu1 %v511_v13  ;;  %621 = vmatprep.subr.bf16.mxu0 %v620_v14  ;;  %v610_v13 = vpack.c.bf16 %v1275_v8, %v1273_v6  ;;  %v1272_v14 = vld [vmem:[%s2488_s1 + $0x440] sm:$0xff]  ;;  %v704_v17 = vpack.c.bf16 %v1308_v10, %v1306_v9  ;;  %v1358_v58 = vld [vmem:[%s2488_s1 + $0x6d8] sm:$0xff]  ;;  %v1389_v60 = vld [vmem:[%s2488_s1 + $0x7c8] sm:$0xff] }
  0x50   : > { %715 = vmatprep.subr.bf16.mxu1 %v714_v18  ;;  %v1307_v18 = vld [vmem:[%s2488_s1 + $0x550] sm:$0xff]  ;;  %v609_v23 = vpack.c.bf16 %v1274_v15, %v1272_v14  ;;  %v1391_v61 = vld [vmem:[%s2488_s1 + $0x7d8] sm:$0xff]  ;;  %v809_v1 = vpack.c.bf16 %v1358_v58, %v1356_v57  ;;  %v1352_v8 = vld [vmem:[%s2488_s1 + $0x6a8] sm:$0xff] }
  0x51   : > { %463 = vmatmul.mubr.bf16.vlgmr.msra.gmra.mxu0 %v413_v22  ;;  %v1304_v22 = vld [vmem:[%s2488_s1 + $0x538] sm:$0xff]  ;;  %v703_v24 = vpack.c.bf16 %v1307_v18, %v1305_v16  ;;  %v1357_v3 = vld [vmem:[%s2488_s1 + $0x6d0] sm:$0xff]  ;;  %v903_v5 = vpack.c.bf16 %v1391_v61, %v1389_v60  ;;  %v1385_v10 = vld [vmem:[%s2488_s1 + $0x7a8] sm:$0xff] }
  0x52   : > { %622 = vmatpush1.bf16.msra.mxu0 %v619_v25  ;;  %560 = vmatmul.mubr.bf16.vlgmr.msra.gmra.mxu1 %v510_v26  ;;  %v608_v25 = vpack.c.bf16 %v1271_v20, %v1269_v19  ;;  %v1268_v26 = vld [vmem:[%s2488_s1 + $0x420] sm:$0xff]  ;;  %v702_v29 = vpack.c.bf16 %v1304_v22, %v1302_v21  ;;  %v1390_v6 = vld [vmem:[%s2488_s1 + $0x7d0] sm:$0xff]  ;;  %v1354_v9 = vld [vmem:[%s2488_s1 + $0x6b8] sm:$0xff] }
  0x53   : > { %716 = vmatpush1.bf16.msra.mxu1 %v713_v27  ;;  %623 = vmatprep.subr.bf16.mxu0 %v618_v28  ;;  %v1270_v27 = vld [vmem:[%s2488_s1 + $0x430] sm:$0xff]  ;;  %v1301_v28 = vld [vmem:[%s2488_s1 + $0x520] sm:$0xff]  ;;  %v807_v14 = vpack.c.bf16 %v1354_v9, %v1352_v8  ;;  %v1348_v20 = vld [vmem:[%s2488_s1 + $0x688] sm:$0xff] }
  0x54   : > { %717 = vmatprep.subr.bf16.mxu1 %v712_v32  ;;  %653 = vmatprep.mubr.bf16.mxu0 %v1513_v7  ;;  %v1267_v32 = vld [vmem:[%s2488_s1 + $0x418] sm:$0xff]  ;;  %v607_v35 = vpack.c.bf16 %v1270_v27, %v1268_v26  ;;  %v701_v36 = vpack.c.bf16 %v1303_v30, %v1301_v28  ;;  %v1351_v15 = vld [vmem:[%s2488_s1 + $0x6a0] sm:$0xff]  ;;  %v1353_v16 = vld [vmem:[%s2488_s1 + $0x6b0] sm:$0xff] }
  0x55   : > { %747 = vmatprep.mubr.bf16.mxu1 %v1513_v7  ;;  %v606_v37 = vpack.c.bf16 %v1267_v32, %v1265_v31  ;;  %v1386_v19 = vld [vmem:[%s2488_s1 + $0x7b0] sm:$0xff]  ;;  %v1350_v21 = vld [vmem:[%s2488_s1 + $0x698] sm:$0xff]  ;;  %v1381_v22 = vld [vmem:[%s2488_s1 + $0x788] sm:$0xff] }
  0x56   : > { %624 = vmatpush1.bf16.msra.mxu0 %v617_v38  ;;  %v1264_v38 = vld [vmem:[%s2488_s1 + $0x400] sm:$0xff]  ;;  %v805_v26 = vpack.c.bf16 %v1350_v21, %v1348_v20  ;;  %v1349_v28 = vld [vmem:[%s2488_s1 + $0x690] sm:$0xff]  ;;  %v1344_v32 = vld [vmem:[%s2488_s1 + $0x668] sm:$0xff] }
  0x57   : > { %718 = vmatpush1.bf16.msra.mxu1 %v711_v39  ;;  %625 = vmatprep.subr.bf16.mxu0 %v616_v40  ;;  %v1266_v39 = vld [vmem:[%s2488_s1 + $0x410] sm:$0xff]  ;;  %v1297_v40 = vld [vmem:[%s2488_s1 + $0x500] sm:$0xff]  ;;  %v1346_v33 = vld [vmem:[%s2488_s1 + $0x678] sm:$0xff] }
  0x58   : > { %719 = vmatprep.subr.bf16.mxu1 %v710_v44  ;;  %v1362_v44 = vld [vmem:[%s2488_s1 + $0x6f8] sm:$0xff]  ;;  %v605_v47 = vpack.c.bf16 %v1266_v39, %v1264_v38  ;;  %v1347_v27 = vld [vmem:[%s2488_s1 + $0x680] sm:$0xff]  ;;  %v1382_v31 = vld [vmem:[%s2488_s1 + $0x790] sm:$0xff]  ;;  %v803_v38 = vpack.c.bf16 %v1346_v33, %v1344_v32 }
  0x59   : > { %v1377_v34 = vld [vmem:[%s2488_s1 + $0x768] sm:$0xff]  ;;  %v1343_v39 = vld [vmem:[%s2488_s1 + $0x660] sm:$0xff]  ;;  %v1342_v45 = vld [vmem:[%s2488_s1 + $0x658] sm:$0xff] }
  0x5a   : > { %626 = vmatpush1.bf16.msra.mxu0 %v615_v50  ;;  %v699_v50 = vpack.c.bf16 %v1299_v42, %v1297_v40  ;;  %v1345_v40 = vld [vmem:[%s2488_s1 + $0x670] sm:$0xff]  ;;  %v1373_v46 = vld [vmem:[%s2488_s1 + $0x748] sm:$0xff]  ;;  %v1338_v57 = vld [vmem:[%s2488_s1 + $0x638] sm:$0xff] }
  0x5b   : > { %720 = vmatpush1.bf16.msra.mxu1 %v709_v51  ;;  %627 = vmatprep.subr.bf16.mxu0 %v614_v52  ;;  %v811_v51 = vpack.c.bf16 %v1362_v44, %v1360_v43  ;;  %v1361_v52 = vld [vmem:[%s2488_s1 + $0x6f0] sm:$0xff]  ;;  %v1340_v44 = vld [vmem:[%s2488_s1 + $0x648] sm:$0xff]  ;;  %v802_v48 = vpack.c.bf16 %v1345_v40, %v1343_v39  ;;  %v1367_v8 = vld [vmem:[%s2488_s1 + $0x718] sm:$0xff] }
  0x5c   : > { %721 = vmatprep.subr.bf16.mxu1 %v708_v56  ;;  %v1394_v56 = vld [vmem:[%s2488_s1 + $0x7f0] sm:$0xff]  ;;  %v1369_v58 = vld [vmem:[%s2488_s1 + $0x728] sm:$0xff]  ;;  %v1330_v20 = vld [vmem:[%s1770_s30 + $0x20] sm:$0xff] }
  0x5d   : > { %v1378_v43 = vld [vmem:[%s2488_s1 + $0x770] sm:$0xff]  ;;  %v1421_v32 = vld [vmem:[%s2488_s1 + $0x8c0] sm:$0xff]  ;;  %v1414_v40 = vld [vmem:[%s2488_s1 + $0x888] sm:$0xff] }
  0x5e   : > { %628 = vmatpush1.bf16.msra.mxu0 %v613_v62  ;;  %v810_v62 = vpack.c.bf16 %v1361_v52, %v1359_v49  ;;  %v1341_v52 = vld [vmem:[%s2488_s1 + $0x650] sm:$0xff] }
  0x5f   : > { %722 = vmatpush1.bf16.msra.mxu1 %v707_v63  ;;  %629 = vmatprep.subr.bf16.mxu0 %v612_v0  ;;  %v698_v63 = vpack.c.bf16 %v1296_v53, %v1296_v53  ;;  %v904_v0 = vpack.c.bf16 %v1394_v56, %v1392_v54  ;;  %v1372_v53 = vld [vmem:[%s2488_s1 + $0x740] sm:$0xff]  ;;  %v1336_v56 = vld [vmem:[%s2488_s1 + $0x628] sm:$0xff]  ;;  %v1423_v33 = vld [vmem:[%s2488_s1 + $0x8d0] sm:$0xff] }
  0x60   : > { %723 = vmatprep.subr.bf16.mxu1 %v706_v4  ;;  %v1388_v4 = vld [vmem:[%s2488_s1 + $0x7c0] sm:$0xff]  ;;  %v1419_v39 = vld [vmem:[%s2488_s1 + $0x8b0] sm:$0xff] }
  0x62   : > { %630 = vmatpush1.bf16.msra.mxu0 %v611_v11  ;;  %v1387_v11 = vld [vmem:[%s2488_s1 + $0x7b8] sm:$0xff] }
  0x63   : > { %724 = vmatpush1.bf16.msra.mxu1 %v705_v12  ;;  %631 = vmatprep.subr.bf16.mxu0 %v610_v13  ;;  %v808_v12 = vpack.c.bf16 %v1357_v3, %v1355_v2  ;;  %v902_v13 = vpack.c.bf16 %v1390_v6, %v1388_v4  ;;  %v901_v18 = vpack.c.bf16 %v1387_v11, %v1385_v10  ;;  %v1370_v3 = vld [vmem:[%s2488_s1 + $0x730] sm:$0xff]  ;;  %v1332_v4 = vld [vmem:[%s2488_s1 + $0x608] sm:$0xff] }
  0x64   : > { %725 = vmatprep.subr.bf16.mxu1 %v704_v17  ;;  %v1384_v17 = vld [vmem:[%s2488_s1 + $0x7a0] sm:$0xff]  ;;  %v1365_v6 = vld [vmem:[%s2488_s1 + $0x708] sm:$0xff] }
  0x66   : > { %632 = vmatpush1.bf16.msra.mxu0 %v609_v23  ;;  %v1383_v23 = vld [vmem:[%s2488_s1 + $0x798] sm:$0xff] }
  0x67   : > { %726 = vmatpush1.bf16.msra.mxu1 %v703_v24  ;;  %633 = vmatprep.subr.bf16.mxu0 %v608_v25  ;;  %v806_v24 = vpack.c.bf16 %v1353_v16, %v1351_v15  ;;  %v900_v25 = vpack.c.bf16 %v1386_v19, %v1384_v17  ;;  %v899_v30 = vpack.c.bf16 %v1383_v23, %v1381_v22  ;;  %v1366_v16 = vld [vmem:[%s2488_s1 + $0x710] sm:$0xff]  ;;  %v1426_v17 = vld [vmem:[%s2488_s1 + $0x8e8] sm:$0xff]  ;;  %v1425_v23 = vld [vmem:[%s2488_s1 + $0x8e0] sm:$0xff] }
  0x68   : > { %727 = vmatprep.subr.bf16.mxu1 %v702_v29  ;;  %v1380_v29 = vld [vmem:[%s2488_s1 + $0x780] sm:$0xff]  ;;  %v891_v15 = vpack.c.bf16 %v1367_v8, %v1365_v6 }
  0x69   : > { %v1396_v6 = vld [vmem:[%s1770_s30 + $0x22] sm:$0xff] }
  0x6a   : > { %634 = vmatpush1.bf16.msra.mxu0 %v607_v35  ;;  %v1379_v35 = vld [vmem:[%s2488_s1 + $0x778] sm:$0xff]  ;;  %v983_v8 = vpack.c.bf16 %v1396_v6, %v1396_v6 }
  0x6b   : > { %728 = vmatpush1.bf16.msra.mxu1 %v701_v36  ;;  %635 = vmatprep.subr.bf16.mxu0 %v606_v37  ;;  %v804_v36 = vpack.c.bf16 %v1349_v28, %v1347_v27  ;;  %v898_v37 = vpack.c.bf16 %v1382_v31, %v1380_v29  ;;  %v897_v42 = vpack.c.bf16 %v1379_v35, %v1377_v34  ;;  %v1424_v27 = vld [vmem:[%s2488_s1 + $0x8d8] sm:$0xff]  ;;  %v1418_v34 = vld [vmem:[%s2488_s1 + $0x8a8] sm:$0xff] }
  0x6c   : > { %729 = vmatprep.subr.bf16.mxu1 %v700_v41  ;;  %v1376_v41 = vld [vmem:[%s2488_s1 + $0x760] sm:$0xff]  ;;  %v795_v28 = vpack.c.bf16 %v1330_v20, %v1330_v20  ;;  %v1420_v35 = vld [vmem:[%s2488_s1 + $0x8b8] sm:$0xff] }
  0x6d   : > { %v896_v49 = vpack.c.bf16 %v1378_v43, %v1376_v41  ;;  %v1416_v41 = vld [vmem:[%s2488_s1 + $0x898] sm:$0xff] }
  0x6e   : > { %636 = vmatpush1.bf16.msra.mxu0 %v605_v47  ;;  %v1375_v47 = vld [vmem:[%s2488_s1 + $0x758] sm:$0xff]  ;;  %v993_v43 = vpack.c.bf16 %v1416_v41, %v1414_v40 }
  0x6f   : > { %730 = vmatpush1.bf16.msra.mxu1 %v699_v50  ;;  %812 = vmatprep.subr.bf16.mxu0 %v811_v51  ;;  %v801_v50 = vpack.c.bf16 %v1342_v45, %v1340_v44  ;;  %v1339_v51 = vld [vmem:[%s2488_s1 + $0x640] sm:$0xff]  ;;  %v895_v54 = vpack.c.bf16 %v1375_v47, %v1373_v46  ;;  %v1410_v45 = vld [vmem:[%s2488_s1 + $0x868] sm:$0xff]  ;;  %v1412_v46 = vld [vmem:[%s2488_s1 + $0x878] sm:$0xff] }
  0x70   : > { %906 = vmatprep.subr.bf16.mxu1 %v905_v55  ;;  %v1374_v55 = vld [vmem:[%s2488_s1 + $0x750] sm:$0xff]  ;;  %v800_v60 = vpack.c.bf16 %v1341_v52, %v1339_v51  ;;  %v1413_v44 = vld [vmem:[%s2488_s1 + $0x880] sm:$0xff]  ;;  %v1406_v51 = vld [vmem:[%s2488_s1 + $0x848] sm:$0xff] }
  0x71   : > { %654 = vmatmul.mubr.bf16.vlgmr.msra.gmra.mxu0 %v604_v59  ;;  %v1371_v59 = vld [vmem:[%s2488_s1 + $0x738] sm:$0xff]  ;;  %v894_v61 = vpack.c.bf16 %v1374_v55, %v1372_v53  ;;  %v1405_v55 = vld [vmem:[%s2488_s1 + $0x840] sm:$0xff] }
  0x72   : > { %813 = vmatpush1.bf16.msra.mxu0 %v810_v62  ;;  %748 = vmatmul.mubr.bf16.vlgmr.msra.gmra.mxu1 %v698_v63  ;;  %v799_v62 = vpack.c.bf16 %v1338_v57, %v1336_v56  ;;  %v1335_v63 = vld [vmem:[%s2488_s1 + $0x620] sm:$0xff]  ;;  %v893_v2 = vpack.c.bf16 %v1371_v59, %v1369_v58  ;;  %v1408_v52 = vld [vmem:[%s2488_s1 + $0x858] sm:$0xff]  ;;  %v1407_v56 = vld [vmem:[%s2488_s1 + $0x850] sm:$0xff] }
  0x73   : > { %907 = vmatpush1.bf16.msra.mxu1 %v904_v0  ;;  %814 = vmatprep.subr.bf16.mxu0 %v809_v1  ;;  %v1337_v0 = vld [vmem:[%s2488_s1 + $0x630] sm:$0xff]  ;;  %v1368_v1 = vld [vmem:[%s2488_s1 + $0x720] sm:$0xff]  ;;  %v1402_v57 = vld [vmem:[%s2488_s1 + $0x828] sm:$0xff]  ;;  %v988_v59 = vpack.c.bf16 %v1407_v56, %v1405_v55 }
  0x74   : > { %908 = vmatprep.subr.bf16.mxu1 %v903_v5  ;;  %844 = vmatprep.mubr.bf16.mxu0 %v1513_v7  ;;  %v1334_v5 = vld [vmem:[%s2488_s1 + $0x618] sm:$0xff]  ;;  %v798_v9 = vpack.c.bf16 %v1337_v0, %v1335_v63  ;;  %v892_v10 = vpack.c.bf16 %v1370_v3, %v1368_v1  ;;  %v1398_v63 = vld [vmem:[%s2488_s1 + $0x808] sm:$0xff]  ;;  %v1397_v3 = vld [vmem:[%s2488_s1 + $0x800] sm:$0xff] }
  0x75   : > { %938 = vmatprep.mubr.bf16.mxu1 %v1513_v7  ;;  %v797_v11 = vpack.c.bf16 %v1334_v5, %v1332_v4  ;;  %v1404_v58 = vld [vmem:[%s2488_s1 + $0x838] sm:$0xff]  ;;  %v1399_v4 = vld [vmem:[%s2488_s1 + $0x810] sm:$0xff] }
  0x76   : > { %815 = vmatpush1.bf16.msra.mxu0 %v808_v12  ;;  %v1331_v12 = vld [vmem:[%s2488_s1 + $0x600] sm:$0xff]  ;;  %v1400_v0 = vld [vmem:[%s2488_s1 + $0x818] sm:$0xff]  ;;  %v984_v5 = vpack.c.bf16 %v1399_v4, %v1397_v3 }
  0x77   : > { %909 = vmatpush1.bf16.msra.mxu1 %v902_v13  ;;  %816 = vmatprep.subr.bf16.mxu0 %v807_v14  ;;  %v1333_v13 = vld [vmem:[%s2488_s1 + $0x610] sm:$0xff]  ;;  %v1364_v14 = vld [vmem:[%s2488_s1 + $0x700] sm:$0xff] }
  0x78   : > { %910 = vmatprep.subr.bf16.mxu1 %v901_v18  ;;  %v1428_v18 = vld [vmem:[%s2488_s1 + $0x8f8] sm:$0xff]  ;;  %v796_v19 = vpack.c.bf16 %v1333_v13, %v1331_v12  ;;  %v890_v21 = vpack.c.bf16 %v1366_v16, %v1364_v14 }
  0x79   : > { %v999_v22 = vpack.c.bf16 %v1428_v18, %v1426_v17 }
  0x7a   : > { %817 = vmatpush1.bf16.msra.mxu0 %v806_v24  ;;  %v1427_v24 = vld [vmem:[%s2488_s1 + $0x8f0] sm:$0xff] }
  0x7b   : > { %911 = vmatpush1.bf16.msra.mxu1 %v900_v25  ;;  %818 = vmatprep.subr.bf16.mxu0 %v805_v26  ;;  %v1363_v25 = vld [vmem:[%s1770_s30 + $0x21] sm:$0xff]  ;;  %v998_v29 = vpack.c.bf16 %v1427_v24, %v1425_v23  ;;  %s1161_s30 = sshll.u32 %s2504_s12, 1 }
  0x7c   : > { %912 = vmatprep.subr.bf16.mxu1 %v899_v30  ;;  %v1422_v26 = vld [vmem:[%s2488_s1 + $0x8c8] sm:$0xff]  ;;  %v889_v30 = vpack.c.bf16 %v1363_v25, %v1363_v25  ;;  %s190_s27 = sadd.s32 %s1162_s25, %s1161_s30 }
  0x7d   : > { %v997_v31 = vpack.c.bf16 %v1424_v27, %v1422_v26  ;;  %s1163_s28 = sshll.u32 %s190_s27, 3 }
  0x7e   : > { %819 = vmatpush1.bf16.msra.mxu0 %v804_v36  ;;  %v996_v36 = vpack.c.bf16 %v1423_v33, %v1421_v32  ;;  %s192_s29 = scalar_lea.vmem %s2490_s3, %s1163_s28 }
  0x7f   : > { %913 = vmatpush1.bf16.msra.mxu1 %v898_v37  ;;  %820 = vmatprep.subr.bf16.mxu0 %v803_v38  ;;  %v995_v37 = vpack.c.bf16 %v1420_v35, %v1418_v34  ;;  %v1417_v38 = vld [vmem:[%s2488_s1 + $0x8a0] sm:$0xff] }
  0x80   : > { %914 = vmatprep.subr.bf16.mxu1 %v897_v42  ;;  %v994_v42 = vpack.c.bf16 %v1419_v39, %v1417_v38 }
  0x82   : > { %821 = vmatpush1.bf16.msra.mxu0 %v802_v48  ;;  %v991_v48 = vpack.c.bf16 %v1412_v46, %v1410_v45  ;;  %v1045_v46 = vlaneseq }
  0x83   : > { %915 = vmatpush1.bf16.msra.mxu1 %v896_v49  ;;  %822 = vmatprep.subr.bf16.mxu0 %v801_v50  ;;  %v1409_v49 = vld [vmem:[%s2488_s1 + $0x860] sm:$0xff]  ;;  %v1411_v50 = vld [vmem:[%s2488_s1 + $0x870] sm:$0xff] }
  0x84   : > { %916 = vmatprep.subr.bf16.mxu1 %v895_v54  ;;  %v990_v53 = vpack.c.bf16 %v1411_v50, %v1409_v49  ;;  %v989_v54 = vpack.c.bf16 %v1408_v52, %v1406_v51  ;;  %v1046_v49 = vshrl.u32 %v1045_v46, 7 }
  0x86   : > { %823 = vmatpush1.bf16.msra.mxu0 %v800_v60  ;;  %v987_v60 = vpack.c.bf16 %v1404_v58, %v1402_v57  ;;  %v1051_v56 = vsub.s32 1, %v1046_v49 }
  0x87   : > { %917 = vmatpush1.bf16.msra.mxu1 %v894_v61  ;;  %824 = vmatprep.subr.bf16.mxu0 %v799_v62  ;;  %v1401_v61 = vld [vmem:[%s2488_s1 + $0x820] sm:$0xff]  ;;  %v1403_v62 = vld [vmem:[%s2488_s1 + $0x830] sm:$0xff] }
  0x88   : > { %918 = vmatprep.subr.bf16.mxu1 %v893_v2  ;;  %v986_v1 = vpack.c.bf16 %v1403_v62, %v1401_v61  ;;  %v985_v2 = vpack.c.bf16 %v1400_v0, %v1398_v63 }
  0x8a   : > { %825 = vmatpush1.bf16.msra.mxu0 %v798_v9 }
  0x8b   : > { %919 = vmatpush1.bf16.msra.mxu1 %v892_v10  ;;  %826 = vmatprep.subr.bf16.mxu0 %v797_v11 }
  0x8c   : > { %920 = vmatprep.subr.bf16.mxu1 %v891_v15 }
  0x8e   : > { %827 = vmatpush1.bf16.msra.mxu0 %v796_v19 }
  0x8f   : > { %921 = vmatpush1.bf16.msra.mxu1 %v890_v21  ;;  %1000 = vmatprep.subr.bf16.mxu0 %v999_v22 }
  0x91   : > { %845 = vmatmul.mubr.bf16.vlgmr.msra.gmra.mxu0 %v795_v28 }
  0x92   : > { %1001 = vmatpush1.bf16.msra.mxu0 %v998_v29  ;;  %939 = vmatmul.mubr.bf16.vlgmr.msra.gmra.mxu1 %v889_v30 }
  0x93   : > { %1002 = vmatprep.subr.bf16.mxu0 %v997_v31  ;;  %1032 = vmatprep.mubr.bf16.mxu0 %v1513_v7  ;;  %v1415_v7 = vld [vmem:[%s2488_s1 + $0x890] sm:$0xff] }
  0x94   : > { %v992_v47 = vpack.c.bf16 %v1415_v7, %v1413_v44 }
  0x96   : > { %1003 = vmatpush1.bf16.msra.mxu0 %v996_v36 }
  0x97   : > { %1004 = vmatprep.subr.bf16.mxu0 %v995_v37 }
  0x9a   : > { %1005 = vmatpush1.bf16.msra.mxu0 %v994_v42 }
  0x9b   : > { %1006 = vmatprep.subr.bf16.mxu0 %v993_v43 }
  0x9e   : > { %1007 = vmatpush1.bf16.msra.mxu0 %v992_v47 }
  0x9f   : > { %1008 = vmatprep.subr.bf16.mxu0 %v991_v48 }
  0xa2   : > { %1009 = vmatpush1.bf16.msra.mxu0 %v990_v53  ;;  %v1047_v53 = vsub.s32 0, %v1046_v49 }
  0xa3   : > { %1010 = vmatprep.subr.bf16.mxu0 %v989_v54  ;;  %v1043_v54 = vld [vmem:[%s2489_s2] sm:$0x3] }
  0xa4   : > { %v1048_v58 = vrot.slane %v1043_v54, %v1047_v53  ;;  %v1052_v62 = vrot.slane %v1043_v54, %v1051_v56 }
  0xa6   : > { %1011 = vmatpush1.bf16.msra.mxu0 %v988_v59 }
  0xa7   : > { %1012 = vmatprep.subr.bf16.mxu0 %v987_v60 }
  0xaa   : > { %1013 = vmatpush1.bf16.msra.mxu0 %v986_v1 }
  0xab   : > { %1014 = vmatprep.subr.bf16.mxu0 %v985_v2 }
  0xae   : > { %1015 = vmatpush1.bf16.msra.mxu0 %v984_v5 }
  0xb1   : > { %1033 = vmatmul.mubr.bf16.vlgmr.msra.gmra.mxu0 %v983_v8 }
  0xf1   : > { %v331_v9 = vpop.f32.mrf.mxu0 }
  0xf2   : > { %v372_v10 = vpop.f32.mrf.mxu1 }
  0xf3   : > { %v373_v11 = vadd.f32 %v372_v10, %v331_v9  ;;  %v333_v12 = vpop.f32.mrf.mxu0 }
  0xf4   : > { %v374_v13 = vpop.f32.mrf.mxu1 }
  0xf5   : > { %v375_v14 = vadd.f32 %v374_v13, %v333_v12  ;;  %v335_v15 = vpop.f32.mrf.mxu0 }
  0xf6   : > { %v376_v16 = vpop.f32.mrf.mxu1 }
  0xf7   : > { %v336_v17 = vpop.f32.mrf.mxu0 }
  0xf8   : > { %v377_v18 = vpop.f32.mrf.mxu1 }
 0x111   : > { %v464_v19 = vpop.f32.mrf.mxu0 }
 0x112   : > { %v471_v20 = vadd.f32 %v464_v19, %v373_v11  ;;  %v561_v21 = vpop.f32.mrf.mxu1 }
 0x113   : > { %v466_v22 = vpop.f32.mrf.mxu0 }
 0x114   : > { %v472_v23 = vadd.f32 %v466_v22, %v375_v14  ;;  %v568_v24 = vadd.f32 %v561_v21, %v471_v20  ;;  %v563_v25 = vpop.f32.mrf.mxu1 }
 0x115   : > { %v468_v26 = vpop.f32.mrf.mxu0 }
 0x116   : > { %v569_v27 = vadd.f32 %v563_v25, %v472_v23  ;;  %v565_v28 = vpop.f32.mrf.mxu1 }
 0x117   : > { %v469_v29 = vpop.f32.mrf.mxu0 }
 0x118   : > { %v566_v30 = vpop.f32.mrf.mxu1 }
 0x131   : > { %v655_v31 = vpop.f32.mrf.mxu0 }
 0x132   : > { %v749_v32 = vpop.f32.mrf.mxu1  ;;  %v662_v47 = vadd.f32 %v655_v31, %v568_v24 }
 0x133   : > { %v657_v33 = vpop.f32.mrf.mxu0 }
 0x134   : > { %v751_v34 = vpop.f32.mrf.mxu1  ;;  %v663_v48 = vadd.f32 %v657_v33, %v569_v27  ;;  %v756_v50 = vadd.f32 %v749_v32, %v662_v47 }
 0x135   : > { %v659_v35 = vpop.f32.mrf.mxu0 }
 0x136   : > { %v753_v36 = vpop.f32.mrf.mxu1  ;;  %v757_v51 = vadd.f32 %v751_v34, %v663_v48 }
 0x137   : > { %v660_v37 = vpop.f32.mrf.mxu0 }
 0x138   : > { %v754_v38 = vpop.f32.mrf.mxu1 }
 0x151   : > { %v846_v39 = vpop.f32.mrf.mxu0 }
 0x152   : > { %v940_v40 = vpop.f32.mrf.mxu1  ;;  %v853_v52 = vadd.f32 %v846_v39, %v756_v50 }
 0x153   : > { %v848_v41 = vpop.f32.mrf.mxu0 }
 0x154   : > { %v942_v42 = vpop.f32.mrf.mxu1  ;;  %v854_v55 = vadd.f32 %v848_v41, %v757_v51  ;;  %v947_v57 = vadd.f32 %v940_v40, %v853_v52 }
 0x155   : > { %v850_v43 = vpop.f32.mrf.mxu0 }
 0x156   : > { %v944_v44 = vpop.f32.mrf.mxu1  ;;  %v948_v60 = vadd.f32 %v942_v42, %v854_v55 }
 0x157   : > { %v851_v7 = vpop.f32.mrf.mxu0 }
 0x158   : > { %v945_v45 = vpop.f32.mrf.mxu1 }
 0x171   : > { %v1034_v59 = vpop.f32.mrf.mxu0 }
 0x172   : > { %v1041_v61 = vadd.f32 %v1034_v59, %v947_v57 }
 0x173   : > { %v1036_v63 = vpop.f32.mrf.mxu0 }
 0x174   : > { %v1055_v0 = vadd.f32 %v1048_v58, %v1041_v61  ;;  %v1042_v1 = vadd.f32 %v1036_v63, %v948_v60 }
 0x175   : > { %v1038_v2 = vpop.f32.mrf.mxu0 }
 0x176   : > { %v1057_v3 = vmax.f32 %v1055_v0, 0.0  ;;  %v1056_v4 = vadd.f32 %v1052_v62, %v1042_v1 }
 0x177   : > { %v1039_v5 = vpop.f32.mrf.mxu0 }
 0x178   : > { %1059 = vst [vmem:[%s192_s29] sm:$0xff] %v1057_v3  ;;  %v1058_v6 = vmax.f32 %v1056_v4, 0.0 }
 0x17a   : > { %1060 = vst [vmem:[%s192_s29 + $0x8] sm:$0xff] %v1058_v6 }
 0x17b PF: > { %s13_s16 = sadd.s32 1, %s1511_s16   ;;  %s2491_s12 = smov %s1503_s14 }
 0x17c   : > { %p10_p7 = scmp.ge.s32.totalorder %s13_s16, 10   ;;  %s2492_s13 = smov %s1507_s15 }
 0x17d   : > { %s2493_s14 = smov %s2496_s17  ;;  %s2494_s15 = smov %s2500_s18 }
 0x17e   :  { %12 = sbr.rel (!%p10_p7) target bundleno = 3 (0x3), region = 73 }

// kernel: plate_recognition_forward.21
= control target key start
LH: loop header
LB: loop body
LE: loop exit
PB: predicated region body
PF: predicated region fallthrough
CT: control target
= control target key end

     0   :  { %v111_v3 = vmov 0   ;;  %vm54_vm0 = vcmask 523264   ;;  %v44_v28 = vlaneseq  ;;  %s201_s1 = inlined_call_operand.vmem [shape: f32[64,256], index: 1, kind: input, shape index: {}]   ;;  %s202_s0 = inlined_call_operand.vmem [shape: f32[14,64], index: 0, kind: input, shape index: {}]   ;;  %s203_s2 = inlined_call_operand.vmem [shape: f32[1,256], index: 2, kind: input, shape index: {}]   ;;  %s204_s3 = inlined_call_operand.vmem [shape: f32[14,256], index: 3, kind: output, shape index: {}]  }
   0x1   :  { %v31_v0 = vld [vmem:[%s201_s1 + $0x68] sm:$0xff]  ;;  %v33_v1 = vld [vmem:[%s201_s1 + $0x78] sm:$0xff]  ;;  %v30_v2 = vld [vmem:[%s201_s1 + $0x60] sm:$0xff]  ;;  %90 = vmatprep.mubr.bf16.mxu0 %v111_v3 }
   0x2   :  { %v41_v4 = vpack.c.bf16 %v33_v1, %v31_v0  ;;  %v32_v5 = vld [vmem:[%s201_s1 + $0x70] sm:$0xff]  ;;  %v27_v6 = vld [vmem:[%s201_s1 + $0x48] sm:$0xff]  ;;  %v29_v7 = vld [vmem:[%s201_s1 + $0x58] sm:$0xff]  ;;  %v45_v29 = vshrl.u32 %v44_v28, 7 }
   0x3   :  { %v40_v8 = vpack.c.bf16 %v32_v5, %v30_v2  ;;  %v39_v9 = vpack.c.bf16 %v29_v7, %v27_v6  ;;  %v26_v10 = vld [vmem:[%s201_s1 + $0x40] sm:$0xff]  ;;  %v28_v11 = vld [vmem:[%s201_s1 + $0x50] sm:$0xff]  ;;  %v23_v12 = vld [vmem:[%s201_s1 + $0x28] sm:$0xff] }
   0x4   :  { %66 = vmatprep.subr.bf16.mxu0 %v41_v4  ;;  %v25_v13 = vld [vmem:[%s201_s1 + $0x38] sm:$0xff]  ;;  %v38_v14 = vpack.c.bf16 %v28_v11, %v26_v10  ;;  %v22_v16 = vld [vmem:[%s201_s1 + $0x20] sm:$0xff]  ;;  %v24_v17 = vld [vmem:[%s201_s1 + $0x30] sm:$0xff]  ;;  %v46_v30 = vsub.s32 0, %v45_v29  ;;  %v50_v32 = vsub.s32 1, %v45_v29 }
   0x5   :  { %67 = vmatpush1.bf16.msra.mxu0 %v40_v8  ;;  %v37_v15 = vpack.c.bf16 %v25_v13, %v23_v12  ;;  %v19_v18 = vld [vmem:[%s201_s1 + $0x8] sm:$0xff]  ;;  %v21_v19 = vld [vmem:[%s201_s1 + $0x18] sm:$0xff]  ;;  %v36_v20 = vpack.c.bf16 %v24_v17, %v22_v16  ;;  %v18_v22 = vld [vmem:[%s201_s1] sm:$0xff] }
   0x6   :  { %68 = vmatprep.subr.bf16.mxu0 %v39_v9  ;;  %v35_v21 = vpack.c.bf16 %v21_v19, %v19_v18  ;;  %v20_v23 = vld [vmem:[%s201_s1 + $0x10] sm:$0xff]  ;;  %v15_v25 = vld [vmem:[%s202_s0] sm:$0xff]  ;;  %v16_v26 = vld [vmem:[%s202_s0 + $0x8] sm:$0x3f] }
   0x7   :  { %v34_v24 = vpack.c.bf16 %v20_v23, %v18_v22  ;;  %v17_v27 = vpack.c.bf16 %v16_v26, %v15_v25  ;;  %v42_v31 = vld [vmem:[%s203_s2] sm:$0x3] }
   0x8   :  { %v47_v33 = vrot.slane %v42_v31, %v46_v30  ;;  %v51_v34 = vrot.slane %v42_v31, %v50_v32 }
   0x9   :  { %69 = vmatpush1.bf16.msra.mxu0 %v38_v14 }
   0xa   :  { %70 = vmatprep.subr.bf16.mxu0 %v37_v15 }
   0xd   :  { %71 = vmatpush1.bf16.msra.mxu0 %v36_v20 }
   0xe   :  { %72 = vmatprep.subr.bf16.mxu0 %v35_v21 }
  0x11   :  { %73 = vmatpush1.bf16.msra.mxu0 %v34_v24 }
  0x14   :  { %109 = vmatmul.mubr.msk.bf16.vlgmr.msra.gmra.mxu0 %vm54_vm0, %v17_v27 }
  0xd4   :  { %v92_v35 = vpop.f32.mrf.mxu0 }
  0xd5   :  { %v93_v36 = vadd.f32 %v92_v35, %v47_v33 }
  0xd6   :  { %v94_v37 = vpop.f32.mrf.mxu0 }
  0xd7   :  { %101 = vst [vmem:[%s204_s3] sm:$0xff] %v93_v36  ;;  %v95_v38 = vadd.f32 %v94_v37, %v51_v34 }
  0xd8   :  { %v96_v39 = vpop.f32.mrf.mxu0 }
  0xd9   :  { %102 = vst [vmem:[%s204_s3 + $0x8] sm:$0xff] %v95_v38  ;;  %v97_v40 = vadd.f32 %v96_v39, %v47_v33 }
  0xda   :  { %v98_v41 = vpop.f32.mrf.mxu0 }
  0xdb   :  { %103 = vst [vmem:[%s204_s3 + $0x10] sm:$0x3f] %v97_v40  ;;  %v99_v42 = vadd.f32 %v98_v41, %v51_v34 }
  0xdd   :  { %104 = vst [vmem:[%s204_s3 + $0x18] sm:$0x3f] %v99_v42 }

// kernel: plate_recognition_forward.23
= control target key start
LH: loop header
LB: loop body
LE: loop exit
PB: predicated region body
PF: predicated region fallthrough
CT: control target
= control target key end

     0   :  { %v109_v0 = vmov 0.0   ;;  %vm110_vm0 = vmmov 0   ;;  %vm37_vm1 = vcmask 523264   ;;  %s170_s1 = inlined_call_operand.vmem [shape: f32[64,128], index: 1, kind: input, shape index: {}]   ;;  %s171_s0 = inlined_call_operand.vmem [shape: f32[14,64], index: 0, kind: input, shape index: {}]   ;;  %s172_s2 = inlined_call_operand.vmem [shape: f32[1,128], index: 2, kind: input, shape index: {}]   ;;  %s173_s3 = inlined_call_operand.vmem [shape: f32[14,128], index: 3, kind: output, shape index: {}]  }
   0x1   :  { %95 = vmatprep.subr.bf16.mxu0 %v109_v0  ;;  %v24_v1 = vld [vmem:[%s170_s1 + $0x30] sm:$0xff]  ;;  %v25_v2 = vld [vmem:[%s170_s1 + $0x38] sm:$0xff]  ;;  %v22_v3 = vld [vmem:[%s170_s1 + $0x20] sm:$0xff]  ;;  %103 = vmatprep.mubr.msk.bf16.mxu0 %vm110_vm0, %v109_v0 }
   0x2   :  { %v29_v4 = vpack.c.bf16 %v25_v2, %v24_v1  ;;  %v23_v5 = vld [vmem:[%s170_s1 + $0x28] sm:$0xff]  ;;  %v20_v7 = vld [vmem:[%s170_s1 + $0x10] sm:$0xff]  ;;  %v21_v8 = vld [vmem:[%s170_s1 + $0x18] sm:$0xff] }
   0x3   :  { %v28_v6 = vpack.c.bf16 %v23_v5, %v22_v3  ;;  %v27_v9 = vpack.c.bf16 %v21_v8, %v20_v7  ;;  %v18_v10 = vld [vmem:[%s170_s1] sm:$0xff]  ;;  %v19_v11 = vld [vmem:[%s170_s1 + $0x8] sm:$0xff] }
   0x4   :  { %96 = vmatpush3.bf16.msra.mxu0 %v29_v4  ;;  %v26_v12 = vpack.c.bf16 %v19_v11, %v18_v10  ;;  %v15_v13 = vld [vmem:[%s171_s0] sm:$0xff]  ;;  %v16_v14 = vld [vmem:[%s171_s0 + $0x8] sm:$0x3f] }
   0x5   :  { %97 = vmatprep.subr.bf16.mxu0 %v109_v0  ;;  %v17_v15 = vpack.c.bf16 %v16_v14, %v15_v13  ;;  %v88_v16 = vld [vmem:[%s172_s2] ss:$0 sm:$0xff] }
   0x8   :  { %98 = vmatpush3.bf16.msra.mxu0 %v28_v6 }
   0x9   :  { %99 = vmatprep.subr.bf16.mxu0 %v109_v0 }
   0xc   :  { %100 = vmatpush3.bf16.msra.mxu0 %v27_v9 }
   0xd   :  { %101 = vmatprep.subr.bf16.mxu0 %v109_v0 }
  0x10   :  { %102 = vmatpush3.bf16.msra.mxu0 %v26_v12 }
  0x13   :  { %104 = vmatmul.mubr.msk.bf16.vlgmr.msra.gmra.mxu0 %vm37_vm1, %v17_v15 }
  0xd3   :  { %v75_v17 = vpop.f32.mrf.mxu0 }
  0xd4   :  { %v76_v18 = vadd.f32 %v88_v16, %v75_v17 }
  0xd5   :  { %v105_v19 = vpop.f32.mrf.mxu0 }
  0xd6   :  { %82 = vst [vmem:[%s173_s3] sm:$0xff] %v76_v18 }
  0xd7   :  { %v78_v20 = vpop.f32.mrf.mxu0 }
  0xd8   :  { %v79_v21 = vadd.f32 %v88_v16, %v78_v20 }
  0xd9   :  { %v106_v22 = vpop.f32.mrf.mxu0 }
  0xda   :  { %83 = vst [vmem:[%s173_s3 + $0x8] sm:$0x3f] %v79_v21 }

// kernel: plate_recognition_forward.20
= control target key start
LH: loop header
LB: loop body
LE: loop exit
PB: predicated region body
PF: predicated region fallthrough
CT: control target
= control target key end

     0   :  { %s2271_s9 = smov 0   ;;  %s2631_s0 = inlined_call_operand.vmem [shape: f32[2,4,7,2,32], index: 0, kind: input, shape index: {}]   ;;  %s2632_s1 = inlined_call_operand.vmem [shape: f32[2,4,32,32], index: 1, kind: input, shape index: {}]   ;;  %s2633_s2 = inlined_call_operand.vmem [shape: f32[2,7,2,32], index: 2, kind: output, shape index: {}]  }
   0x1 LB: > { %s2277_s10 = sadd.s32 4294967295, %s2252_s9   ;;  %p1773_p0 = scmp.ge.s32.totalorder %s2252_s9, 1  ;;  %s2252_s9 = sphi %s2271_s9, %s12_s9  }
   0x2   : > { %p122_p1 = scmp.lt.s32.totalorder %s2252_s9, 3 }
   0x4   : > { %p123_p2 = pnand %p1773_p0, %p122_p1 }
   0x5   : > { %p149_p3 = scmp.lt.s32.totalorder (!%p123_p2), %s2277_s10, 1  ;;  %p192_p4 = scmp.eq.s32.totalorder (!%p123_p2), %s2277_s10, 0 }
   0x6   : > { %126 = sbr.rel (%p123_p2) target bundleno = 1745 (0x6d1), region = 28 }
   0xb   : > { %vm165_vm0 = vcmask 254976   ;;  %v2254_v0 = vmov 0.0   ;;  %s2289_s11 = scalar_select %p149_p3, %s2277_s10, 1  ;;  %vm2255_vm1 = vmmov 0   ;;  %vm199_vm2 = vcmask 261120  }
   0xc   : > { %1940 = vmatprep.subr.bf16.mxu0 %v2254_v0  ;;  %1948 = vmatprep.subr.bf16.mxu1 %v2254_v0  ;;  %166 = vst.msk [vmem:[#allocation2] sm:$0x3] %vm165_vm0, %v2254_v0  ;;  %167 = vst.msk [vmem:[#allocation3] sm:$0x3] %vm165_vm0, %v2254_v0  ;;  %s2372_s16 = scalar_select %p192_p4, 0, 6 }
   0xd   : > { %1944 = vmatprep.mubr.msk.bf16.mxu0 %vm2255_vm1, %v2254_v0  ;;  %1952 = vmatprep.mubr.msk.bf16.mxu1 %vm2255_vm1, %v2254_v0  ;;  %s1855_s12 = sshll.u32 %s2289_s11, 7  ;;  %s2164_s17 = smul.u32 56, %s2289_s11 }
   0xe   : > { %s2299_s15 = scalar_lea.vmem %s2632_s1, %s1855_s12  ;;  %s1778_s21 = sshll.u32 %s2372_s16, 1 }
   0xf   : > { %v170_v1 = vld [vmem:[%s2299_s15 + $0x10] sm:$0xff]  ;;  %v171_v2 = vld [vmem:[%s2299_s15 + $0x18] sm:$0xff]  ;;  %v168_v6 = vld [vmem:[%s2299_s15] sm:$0xff]  ;;  %s2378_s20 = scalar_lea.vmem %s2631_s0, %s2164_s17  ;;  %s2165_s23 = smul.u32 14, %s2289_s11 }
  0x10   : > { %v174_v3 = vld [vmem:[%s2299_s15 + $0x30] sm:$0xff]  ;;  %v2304_v4 = vpack.c.bf16 %v171_v2, %v170_v1  ;;  %v175_v5 = vld [vmem:[%s2299_s15 + $0x38] sm:$0xff]  ;;  %v169_v7 = vld [vmem:[%s2299_s15 + $0x8] sm:$0xff]  ;;  %s197_s22 = scalar_lea.vmem %s2378_s20, %s1778_s21 }
  0x11   : > { %v2309_v8 = vpack.c.bf16 %v175_v5, %v174_v3  ;;  %v172_v9 = vld [vmem:[%s2299_s15 + $0x20] sm:$0xff]  ;;  %v173_v10 = vld [vmem:[%s2299_s15 + $0x28] sm:$0xff]  ;;  %v2314_v11 = vpack.c.bf16 %v169_v7, %v168_v6  ;;  %v178_v14 = vld [vmem:[%s2299_s15 + $0x50] sm:$0xff]  ;;  %s2389_s26 = scalar_lea.vmem %s2633_s2, %s2165_s23 }
  0x12   : > { %1941 = vmatpush3.bf16.msra.mxu0 %v2304_v4  ;;  %v2318_v13 = vpack.c.bf16 %v173_v10, %v172_v9  ;;  %v179_v15 = vld [vmem:[%s2299_s15 + $0x58] sm:$0xff]  ;;  %v182_v17 = vld [vmem:[%s2299_s15 + $0x70] sm:$0xff]  ;;  %v176_v20 = vld [vmem:[%s2299_s15 + $0x40] sm:$0xff]  ;;  %s397_s27 = scalar_lea.vmem %s2389_s26, %s1778_s21 }
  0x13   : > { %v194_v12 = vld [vmem:[#allocation2] sm:$0x3]  ;;  %1949 = vmatpush3.bf16.msra.mxu1 %v2309_v8  ;;  %1942 = vmatprep.subr.bf16.mxu0 %v2254_v0  ;;  %v183_v18 = vld [vmem:[%s2299_s15 + $0x78] sm:$0xff]  ;;  %v2326_v19 = vpack.c.bf16 %v179_v15, %v178_v14  ;;  %v177_v21 = vld [vmem:[%s2299_s15 + $0x48] sm:$0xff]  ;;  %s2426_s28 = scalar_select %p192_p4, 1, 5 }
  0x14   : > { %1950 = vmatprep.subr.bf16.mxu1 %v2254_v0  ;;  %v195_v16 = vpack.c.bf16 %v194_v12, %v194_v12  ;;  %v2333_v22 = vpack.c.bf16 %v183_v18, %v182_v17  ;;  %v180_v23 = vld [vmem:[%s2299_s15 + $0x60] sm:$0xff]  ;;  %v181_v24 = vld [vmem:[%s2299_s15 + $0x68] sm:$0xff]  ;;  %v2340_v25 = vpack.c.bf16 %v177_v21, %v176_v20  ;;  %v1784_v40 = vld [vmem:[%s197_s22 + $0x1c] sm:$0x3]  ;;  %s2468_s4 = scalar_select %p192_p4, 2, 4 }
  0x15   : > { %v2346_v26 = vpack.c.bf16 %v181_v24, %v180_v23  ;;  %v198_v27 = vld [vmem:[%s197_s22] sm:$0x3]  ;;  %v1781_v28 = vld [vmem:[%s197_s22 + $0xe] sm:$0x3]  ;;  %v1787_v43 = vld [vmem:[%s197_s22 + $0x2a] sm:$0x3] }
  0x16   : > { %1943 = vmatpush3.bf16.msra.mxu0 %v2314_v11  ;;  %v389_v58 = vld [vmem:[#allocation3] sm:$0x3]  ;;  %s1789_s29 = sshll.u32 %s2426_s28, 1  ;;  %s1800_s5 = sshll.u32 %s2468_s4, 1 }
  0x17   : > { %1951 = vmatpush3.bf16.msra.mxu1 %v2318_v13  ;;  %1956 = vmatprep.subr.bf16.mxu0 %v2254_v0  ;;  %s403_s30 = scalar_lea.vmem %s2378_s20, %s1789_s29  ;;  %s602_s3 = scalar_lea.vmem %s2389_s26, %s1789_s29 }
  0x18   : > { %1964 = vmatprep.subr.bf16.mxu1 %v2254_v0  ;;  %v404_v12 = vld [vmem:[%s403_s30] sm:$0x3]  ;;  %v1792_v14 = vld [vmem:[%s403_s30 + $0xe] sm:$0x3]  ;;  %s608_s6 = scalar_lea.vmem %s2378_s20, %s1800_s5  ;;  %s807_s7 = scalar_lea.vmem %s2389_s26, %s1800_s5 }
  0x19   : > { %1945 = vmatmul.mubr.msk.bf16.vlgmr.msra.gmra.mxu0 %vm199_vm2, %v195_v16  ;;  %s2546_s8 = scalar_select %p192_p4, 4, 2 }
  0x1a   : > { %1953 = vmatmul.mubr.msk.bf16.vlgmr.msra.gmra.mxu1 %vm199_vm2, %v195_v16  ;;  %1957 = vmatpush3.bf16.msra.mxu0 %v2326_v19  ;;  %s2588_s14 = scalar_select %p192_p4, 5, 1 }
  0x1b   : > { %1958 = vmatprep.subr.bf16.mxu0 %v2254_v0  ;;  %1960 = vmatprep.mubr.msk.bf16.mxu0 %vm2255_vm1, %v2254_v0  ;;  %s1820_s11 = sshll.u32 %s2546_s8, 1 }
  0x1c   : > { %1965 = vmatpush3.bf16.msra.mxu1 %v2333_v22  ;;  %1968 = vmatprep.mubr.msk.bf16.mxu1 %vm2255_vm1, %v2254_v0  ;;  %s1013_s12 = scalar_lea.vmem %s2378_s20, %s1820_s11  ;;  %s1212_s13 = scalar_lea.vmem %s2389_s26, %s1820_s11 }
  0x1d   : > { %1966 = vmatprep.subr.bf16.mxu1 %v2254_v0  ;;  %s1831_s15 = sshll.u32 %s2588_s14, 1 }
  0x1e   : > { %1959 = vmatpush3.bf16.msra.mxu0 %v2340_v25  ;;  %s1218_s16 = scalar_lea.vmem %s2378_s20, %s1831_s15  ;;  %s1417_s17 = scalar_lea.vmem %s2389_s26, %s1831_s15 }
  0x1f   : > { %1972 = vmatprep.subr.bf16.mxu0 %v2254_v0  ;;  %s2616_s18 = scalar_select %p192_p4, 6, 0 }
  0x20   : > { %1967 = vmatpush3.bf16.msra.mxu1 %v2346_v26 }
  0x21   : > { %1961 = vmatmul.mubr.msk.bf16.vlgmr.msra.gmra.mxu0 %vm199_vm2, %v195_v16  ;;  %1980 = vmatprep.subr.bf16.mxu1 %v2254_v0  ;;  %s1842_s19 = sshll.u32 %s2616_s18, 1 }
  0x22   : > { %1973 = vmatpush3.bf16.msra.mxu0 %v2304_v4  ;;  %1976 = vmatprep.mubr.msk.bf16.mxu0 %vm2255_vm1, %v2254_v0  ;;  %s1423_s21 = scalar_lea.vmem %s2378_s20, %s1842_s19  ;;  %s1622_s10 = scalar_lea.vmem %s2389_s26, %s1842_s19 }
  0x23   : > { %1969 = vmatmul.mubr.msk.bf16.vlgmr.msra.gmra.mxu1 %vm199_vm2, %v195_v16  ;;  %1974 = vmatprep.subr.bf16.mxu0 %v2254_v0 }
  0x24   : > { %1981 = vmatpush3.bf16.msra.mxu1 %v2309_v8  ;;  %1984 = vmatprep.mubr.msk.bf16.mxu1 %vm2255_vm1, %v2254_v0 }
  0x25   : > { %1982 = vmatprep.subr.bf16.mxu1 %v2254_v0 }
  0x26   : > { %1975 = vmatpush3.bf16.msra.mxu0 %v2314_v11 }
  0x27   : > { %1988 = vmatprep.subr.bf16.mxu0 %v2254_v0 }
  0x28   : > { %1983 = vmatpush3.bf16.msra.mxu1 %v2318_v13 }
  0x29   : > { %1996 = vmatprep.subr.bf16.mxu1 %v2254_v0 }
  0xd9   : > { %v237_v29 = vpop.f32.mrf.mxu0 }
  0xda   : > { %v243_v30 = vadd.f32 %v237_v29, %v198_v27  ;;  %v285_v31 = vpop.f32.mrf.mxu1 }
  0xdb   : > { %v291_v32 = vadd.f32 %v1781_v28, %v285_v31  ;;  %v1946_v33 = vpop.f32.mrf.mxu0  ;;  %v1795_v31 = vld [vmem:[%s403_s30 + $0x1c] sm:$0x3] }
  0xdc   : > { %v244_v34 = vmul.f32 0.5, %v243_v30  ;;  %v1954_v35 = vpop.f32.mrf.mxu1 }
  0xdd   : > { %v292_v36 = vmul.f32 0.5, %v291_v32  ;;  %v240_v37 = vpop.f32.mrf.mxu0  ;;  %v1798_v35 = vld [vmem:[%s403_s30 + $0x2a] sm:$0x3] }
  0xde   : > { %2176 = vtanh.f32 %v244_v34  ;;  %v288_v38 = vpop.f32.mrf.mxu1 }
  0xdf   : > { %2178 = vtanh.f32 %v292_v36  ;;  %v1947_v39 = vpop.f32.mrf.mxu0 }
  0xe0   : > { %v1955_v41 = vpop.f32.mrf.mxu1 }
  0xe1   : > { %v333_v42 = vpop.f32.mrf.mxu0 }
  0xe2   : > { %v339_v44 = vadd.f32 %v1784_v40, %v333_v42 }
  0xe3   : > { %v1962_v45 = vpop.f32.mrf.mxu0  ;;  %v378_v46 = vpop.f32.mrf.mxu1 }
  0xe4   : > { %2180 = vtanh.f32 %v339_v44  ;;  %v384_v47 = vadd.f32 %v1787_v43, %v378_v46 }
  0xe5   : > { %v336_v48 = vpop.f32.mrf.mxu0  ;;  %v1970_v49 = vpop.f32.mrf.mxu1 }
  0xe6   : > { %v385_v52 = vmul.f32 0.5, %v384_v47 }
  0xe7   : > { %v1963_v50 = vpop.f32.mrf.mxu0  ;;  %v381_v51 = vpop.f32.mrf.mxu1 }
  0xe8   : > { %2182 = vtanh.f32 %v385_v52 }
  0xe9   : > { %v1971_v53 = vpop.f32.mrf.mxu1 }
  0xeb   : > { %v2177_v54 = vpop.eup %2176 }
  0xec   : > { %v2179_v55 = vpop.eup %2178  ;;  %v246_v56 = vadd.f32 1.0, %v2177_v54 }
  0xed   : > { %v294_v57 = vadd.f32 1.0, %v2179_v55 }
  0xee   : > { %v247_v60 = vmul.f32 0.5, %v246_v56 }
  0xef   : > { %v295_v59 = vmul.f32 0.5, %v294_v57 }
  0xf1   : > { %v2181_v61 = vpop.eup %2180  ;;  %v390_v62 = vmul.f32 %v389_v58, %v295_v59 }
  0xf2   : > { %v391_v63 = vmul.f32 %v2181_v61, %v247_v60 }
  0xf4   : > { %v392_v1 = vadd.f32 %v391_v63, %v390_v62  ;;  %v609_v62 = vld [vmem:[%s608_s6] sm:$0x3]  ;;  %v1803_v63 = vld [vmem:[%s608_s6 + $0xe] sm:$0x3] }
  0xf5   : > { %v2183_v2 = vpop.eup %2182 }
  0xf6   : > { %2184 = vtanh.f32 %v392_v1  ;;  %395 = vst.msk [vmem:[#allocation3] sm:$0x3] %vm165_vm0, %v392_v1  ;;  %v387_v3 = vadd.f32 1.0, %v2183_v2 }
  0xf8   : > { %v388_v5 = vmul.f32 0.5, %v387_v3 }
  0xfd   : > { %v594_v51 = vld [vmem:[#allocation3] sm:$0x3] }
 0x103   : > { %v2185_v6 = vpop.eup %2184 }
 0x104   : > { %v394_v7 = vmul.f32 %v2185_v6, %v388_v5 }
 0x106   : > { %396 = vst.msk [vmem:[#allocation2] sm:$0x3] %vm165_vm0, %v394_v7  ;;  %398 = vst.msk [vmem:[%s397_s27] sm:$0x3] %vm165_vm0, %v394_v7 }
 0x10d   : > { %v400_v9 = vld [vmem:[#allocation2] sm:$0x3] }
 0x10e   : > { %v401_v10 = vpack.c.bf16 %v400_v9, %v400_v9 }
 0x110   : > { %1977 = vmatmul.mubr.msk.bf16.vlgmr.msra.gmra.mxu0 %vm199_vm2, %v401_v10  ;;  %1985 = vmatmul.mubr.msk.bf16.vlgmr.msra.gmra.mxu1 %vm199_vm2, %v401_v10 }
 0x111   : > { %1989 = vmatpush3.bf16.msra.mxu0 %v2326_v19  ;;  %1997 = vmatpush3.bf16.msra.mxu1 %v2333_v22 }
 0x112   : > { %1990 = vmatprep.subr.bf16.mxu0 %v2254_v0  ;;  %1998 = vmatprep.subr.bf16.mxu1 %v2254_v0 }
 0x113   : > { %1992 = vmatprep.mubr.msk.bf16.mxu0 %vm2255_vm1, %v2254_v0  ;;  %2000 = vmatprep.mubr.msk.bf16.mxu1 %vm2255_vm1, %v2254_v0 }
 0x115   : > { %1991 = vmatpush3.bf16.msra.mxu0 %v2340_v25  ;;  %1999 = vmatpush3.bf16.msra.mxu1 %v2346_v26 }
 0x116   : > { %2004 = vmatprep.subr.bf16.mxu0 %v2254_v0  ;;  %2012 = vmatprep.subr.bf16.mxu1 %v2254_v0 }
 0x118   : > { %1993 = vmatmul.mubr.msk.bf16.vlgmr.msra.gmra.mxu0 %vm199_vm2, %v401_v10  ;;  %2001 = vmatmul.mubr.msk.bf16.vlgmr.msra.gmra.mxu1 %vm199_vm2, %v401_v10 }
 0x119   : > { %2005 = vmatpush3.bf16.msra.mxu0 %v2304_v4  ;;  %2013 = vmatpush3.bf16.msra.mxu1 %v2309_v8 }
 0x11a   : > { %2006 = vmatprep.subr.bf16.mxu0 %v2254_v0  ;;  %2014 = vmatprep.subr.bf16.mxu1 %v2254_v0 }
 0x11b   : > { %2008 = vmatprep.mubr.msk.bf16.mxu0 %vm2255_vm1, %v2254_v0  ;;  %2016 = vmatprep.mubr.msk.bf16.mxu1 %vm2255_vm1, %v2254_v0 }
 0x11d   : > { %2007 = vmatpush3.bf16.msra.mxu0 %v2314_v11  ;;  %2015 = vmatpush3.bf16.msra.mxu1 %v2318_v13 }
 0x11e   : > { %2020 = vmatprep.subr.bf16.mxu0 %v2254_v0  ;;  %2028 = vmatprep.subr.bf16.mxu1 %v2254_v0 }
 0x1d0   : > { %v442_v15 = vpop.f32.mrf.mxu0  ;;  %v490_v16 = vpop.f32.mrf.mxu1 }
 0x1d1   : > { %v448_v17 = vadd.f32 %v442_v15, %v404_v12  ;;  %v496_v18 = vadd.f32 %v1792_v14, %v490_v16 }
 0x1d2   : > { %v1978_v20 = vpop.f32.mrf.mxu0  ;;  %v1986_v21 = vpop.f32.mrf.mxu1 }
 0x1d3   : > { %v449_v23 = vmul.f32 0.5, %v448_v17  ;;  %v497_v24 = vmul.f32 0.5, %v496_v18  ;;  %v1806_v17 = vld [vmem:[%s608_s6 + $0x1c] sm:$0x3] }
 0x1d4   : > { %v445_v27 = vpop.f32.mrf.mxu0  ;;  %v493_v28 = vpop.f32.mrf.mxu1 }
 0x1d5   : > { %2186 = vtanh.f32 %v449_v23  ;;  %v1809_v23 = vld [vmem:[%s608_s6 + $0x2a] sm:$0x3] }
 0x1d6   : > { %2188 = vtanh.f32 %v497_v24  ;;  %v1979_v29 = vpop.f32.mrf.mxu0  ;;  %v1987_v30 = vpop.f32.mrf.mxu1 }
 0x1d8   : > { %v538_v32 = vpop.f32.mrf.mxu0  ;;  %v583_v33 = vpop.f32.mrf.mxu1 }
 0x1d9   : > { %v544_v34 = vadd.f32 %v1795_v31, %v538_v32  ;;  %v589_v40 = vadd.f32 %v1798_v35, %v583_v33 }
 0x1da   : > { %v1994_v36 = vpop.f32.mrf.mxu0  ;;  %v2002_v37 = vpop.f32.mrf.mxu1 }
 0x1db   : > { %2190 = vtanh.f32 %v544_v34  ;;  %v590_v43 = vmul.f32 0.5, %v589_v40 }
 0x1dc   : > { %v541_v38 = vpop.f32.mrf.mxu0  ;;  %v586_v39 = vpop.f32.mrf.mxu1 }
 0x1dd   : > { %2192 = vtanh.f32 %v590_v43 }
 0x1de   : > { %v1995_v41 = vpop.f32.mrf.mxu0  ;;  %v2003_v42 = vpop.f32.mrf.mxu1 }
 0x1e2   : > { %v2187_v44 = vpop.eup %2186 }
 0x1e3   : > { %v2189_v45 = vpop.eup %2188  ;;  %v451_v46 = vadd.f32 1.0, %v2187_v44 }
 0x1e4   : > { %v499_v47 = vadd.f32 1.0, %v2189_v45 }
 0x1e5   : > { %v452_v49 = vmul.f32 0.5, %v451_v46 }
 0x1e6   : > { %v500_v48 = vmul.f32 0.5, %v499_v47 }
 0x1e8   : > { %v2191_v50 = vpop.eup %2190  ;;  %v595_v52 = vmul.f32 %v594_v51, %v500_v48 }
 0x1e9   : > { %v596_v53 = vmul.f32 %v2191_v50, %v452_v49 }
 0x1ea   : > { %v2193_v55 = vpop.eup %2192 }
 0x1eb   : > { %v597_v54 = vadd.f32 %v596_v53, %v595_v52  ;;  %v592_v56 = vadd.f32 1.0, %v2193_v55  ;;  %v1811_v52 = vld [vmem:[%s2378_s20 + $0x6] sm:$0x3]  ;;  %v1813_v53 = vld [vmem:[%s2378_s20 + $0x14] sm:$0x3] }
 0x1ed   : > { %2194 = vtanh.f32 %v597_v54  ;;  %600 = vst.msk [vmem:[#allocation3] sm:$0x3] %vm165_vm0, %v597_v54  ;;  %v593_v57 = vmul.f32 0.5, %v592_v56 }
 0x1f4   : > { %v799_v41 = vld [vmem:[#allocation3] sm:$0x3] }
 0x1fa   : > { %v2195_v58 = vpop.eup %2194 }
 0x1fb   : > { %v599_v59 = vmul.f32 %v2195_v58, %v593_v57 }
 0x1fd   : > { %601 = vst.msk [vmem:[#allocation2] sm:$0x3] %vm165_vm0, %v599_v59  ;;  %603 = vst.msk [vmem:[%s602_s3] sm:$0x3] %vm165_vm0, %v599_v59 }
 0x204   : > { %v605_v60 = vld [vmem:[#allocation2] sm:$0x3] }
 0x205   : > { %v606_v61 = vpack.c.bf16 %v605_v60, %v605_v60 }
 0x207   : > { %2009 = vmatmul.mubr.msk.bf16.vlgmr.msra.gmra.mxu0 %vm199_vm2, %v606_v61  ;;  %2017 = vmatmul.mubr.msk.bf16.vlgmr.msra.gmra.mxu1 %vm199_vm2, %v606_v61 }
 0x208   : > { %2021 = vmatpush3.bf16.msra.mxu0 %v2326_v19  ;;  %2029 = vmatpush3.bf16.msra.mxu1 %v2333_v22 }
 0x209   : > { %2022 = vmatprep.subr.bf16.mxu0 %v2254_v0  ;;  %2030 = vmatprep.subr.bf16.mxu1 %v2254_v0 }
 0x20a   : > { %2024 = vmatprep.mubr.msk.bf16.mxu0 %vm2255_vm1, %v2254_v0  ;;  %2032 = vmatprep.mubr.msk.bf16.mxu1 %vm2255_vm1, %v2254_v0 }
 0x20c   : > { %2023 = vmatpush3.bf16.msra.mxu0 %v2340_v25  ;;  %2031 = vmatpush3.bf16.msra.mxu1 %v2346_v26 }
 0x20d   : > { %2036 = vmatprep.subr.bf16.mxu0 %v2254_v0  ;;  %2044 = vmatprep.subr.bf16.mxu1 %v2254_v0 }
 0x20f   : > { %2025 = vmatmul.mubr.msk.bf16.vlgmr.msra.gmra.mxu0 %vm199_vm2, %v606_v61  ;;  %2033 = vmatmul.mubr.msk.bf16.vlgmr.msra.gmra.mxu1 %vm199_vm2, %v606_v61 }
 0x210   : > { %2037 = vmatpush3.bf16.msra.mxu0 %v2304_v4  ;;  %2045 = vmatpush3.bf16.msra.mxu1 %v2309_v8 }
 0x211   : > { %2038 = vmatprep.subr.bf16.mxu0 %v2254_v0  ;;  %2046 = vmatprep.subr.bf16.mxu1 %v2254_v0 }
 0x212   : > { %2040 = vmatprep.mubr.msk.bf16.mxu0 %vm2255_vm1, %v2254_v0  ;;  %2048 = vmatprep.mubr.msk.bf16.mxu1 %vm2255_vm1, %v2254_v0 }
 0x214   : > { %2039 = vmatpush3.bf16.msra.mxu0 %v2314_v11  ;;  %2047 = vmatpush3.bf16.msra.mxu1 %v2318_v13 }
 0x215   : > { %2052 = vmatprep.subr.bf16.mxu0 %v2254_v0  ;;  %2060 = vmatprep.subr.bf16.mxu1 %v2254_v0 }
 0x2c7   : > { %v647_v1 = vpop.f32.mrf.mxu0  ;;  %v695_v2 = vpop.f32.mrf.mxu1 }
 0x2c8   : > { %v653_v3 = vadd.f32 %v647_v1, %v609_v62  ;;  %v701_v5 = vadd.f32 %v1803_v63, %v695_v2 }
 0x2c9   : > { %v2010_v6 = vpop.f32.mrf.mxu0  ;;  %v2018_v7 = vpop.f32.mrf.mxu1 }
 0x2ca   : > { %v654_v9 = vmul.f32 0.5, %v653_v3  ;;  %v702_v10 = vmul.f32 0.5, %v701_v5  ;;  %v1815_v3 = vld [vmem:[%s2378_s20 + $0x22] sm:$0x3] }
 0x2cb   : > { %v650_v12 = vpop.f32.mrf.mxu0  ;;  %v698_v14 = vpop.f32.mrf.mxu1 }
 0x2cc   : > { %2196 = vtanh.f32 %v654_v9  ;;  %v1817_v9 = vld [vmem:[%s2378_s20 + $0x30] sm:$0x3] }
 0x2cd   : > { %2198 = vtanh.f32 %v702_v10  ;;  %v2011_v15 = vpop.f32.mrf.mxu0  ;;  %v2019_v16 = vpop.f32.mrf.mxu1 }
 0x2cf   : > { %v743_v18 = vpop.f32.mrf.mxu0  ;;  %v788_v20 = vpop.f32.mrf.mxu1 }
 0x2d0   : > { %v749_v21 = vadd.f32 %v1806_v17, %v743_v18  ;;  %v794_v30 = vadd.f32 %v1809_v23, %v788_v20 }
 0x2d1   : > { %v2026_v24 = vpop.f32.mrf.mxu0  ;;  %v2034_v27 = vpop.f32.mrf.mxu1 }
 0x2d2   : > { %2200 = vtanh.f32 %v749_v21  ;;  %v795_v33 = vmul.f32 0.5, %v794_v30 }
 0x2d3   : > { %v746_v28 = vpop.f32.mrf.mxu0  ;;  %v791_v29 = vpop.f32.mrf.mxu1 }
 0x2d4   : > { %2202 = vtanh.f32 %v795_v33 }
 0x2d5   : > { %v2027_v31 = vpop.f32.mrf.mxu0  ;;  %v2035_v32 = vpop.f32.mrf.mxu1 }
 0x2d9   : > { %v2197_v34 = vpop.eup %2196 }
 0x2da   : > { %v2199_v35 = vpop.eup %2198  ;;  %v656_v36 = vadd.f32 1.0, %v2197_v34 }
 0x2db   : > { %v704_v37 = vadd.f32 1.0, %v2199_v35 }
 0x2dc   : > { %v657_v39 = vmul.f32 0.5, %v656_v36 }
 0x2dd   : > { %v705_v38 = vmul.f32 0.5, %v704_v37 }
 0x2df   : > { %v2201_v40 = vpop.eup %2200  ;;  %v800_v42 = vmul.f32 %v799_v41, %v705_v38 }
 0x2e0   : > { %v801_v43 = vmul.f32 %v2201_v40, %v657_v39 }
 0x2e1   : > { %v2203_v45 = vpop.eup %2202 }
 0x2e2   : > { %v802_v44 = vadd.f32 %v801_v43, %v800_v42  ;;  %v797_v46 = vadd.f32 1.0, %v2203_v45  ;;  %v1014_v42 = vld [vmem:[%s1013_s12] sm:$0x3]  ;;  %v1823_v43 = vld [vmem:[%s1013_s12 + $0xe] sm:$0x3] }
 0x2e4   : > { %2204 = vtanh.f32 %v802_v44  ;;  %805 = vst.msk [vmem:[#allocation3] sm:$0x3] %vm165_vm0, %v802_v44  ;;  %v798_v47 = vmul.f32 0.5, %v797_v46 }
 0x2eb   : > { %v999_v31 = vld [vmem:[#allocation3] sm:$0x3] }
 0x2f1   : > { %v2205_v48 = vpop.eup %2204 }
 0x2f2   : > { %v804_v49 = vmul.f32 %v2205_v48, %v798_v47 }
 0x2f4   : > { %806 = vst.msk [vmem:[#allocation2] sm:$0x3] %vm165_vm0, %v804_v49  ;;  %808 = vst.msk [vmem:[%s807_s7] sm:$0x3] %vm165_vm0, %v804_v49 }
 0x2fb   : > { %v809_v50 = vld [vmem:[#allocation2] sm:$0x3] }
 0x2fc   : > { %v810_v51 = vpack.c.bf16 %v809_v50, %v809_v50 }
 0x2fe   : > { %2041 = vmatmul.mubr.msk.bf16.vlgmr.msra.gmra.mxu0 %vm199_vm2, %v810_v51  ;;  %2049 = vmatmul.mubr.msk.bf16.vlgmr.msra.gmra.mxu1 %vm199_vm2, %v810_v51 }
 0x2ff   : > { %2053 = vmatpush3.bf16.msra.mxu0 %v2326_v19  ;;  %2061 = vmatpush3.bf16.msra.mxu1 %v2333_v22 }
 0x300   : > { %2054 = vmatprep.subr.bf16.mxu0 %v2254_v0  ;;  %2062 = vmatprep.subr.bf16.mxu1 %v2254_v0 }
 0x301   : > { %2056 = vmatprep.mubr.msk.bf16.mxu0 %vm2255_vm1, %v2254_v0  ;;  %2064 = vmatprep.mubr.msk.bf16.mxu1 %vm2255_vm1, %v2254_v0 }
 0x303   : > { %2055 = vmatpush3.bf16.msra.mxu0 %v2340_v25  ;;  %2063 = vmatpush3.bf16.msra.mxu1 %v2346_v26 }
 0x304   : > { %2068 = vmatprep.subr.bf16.mxu0 %v2254_v0  ;;  %2076 = vmatprep.subr.bf16.mxu1 %v2254_v0 }
 0x306   : > { %2057 = vmatmul.mubr.msk.bf16.vlgmr.msra.gmra.mxu0 %vm199_vm2, %v810_v51  ;;  %2065 = vmatmul.mubr.msk.bf16.vlgmr.msra.gmra.mxu1 %vm199_vm2, %v810_v51 }
 0x307   : > { %2069 = vmatpush3.bf16.msra.mxu0 %v2304_v4  ;;  %2077 = vmatpush3.bf16.msra.mxu1 %v2309_v8 }
 0x308   : > { %2070 = vmatprep.subr.bf16.mxu0 %v2254_v0  ;;  %2078 = vmatprep.subr.bf16.mxu1 %v2254_v0 }
 0x309   : > { %2072 = vmatprep.mubr.msk.bf16.mxu0 %vm2255_vm1, %v2254_v0  ;;  %2080 = vmatprep.mubr.msk.bf16.mxu1 %vm2255_vm1, %v2254_v0 }
 0x30b   : > { %2071 = vmatpush3.bf16.msra.mxu0 %v2314_v11  ;;  %2079 = vmatpush3.bf16.msra.mxu1 %v2318_v13 }
 0x30c   : > { %2084 = vmatprep.subr.bf16.mxu0 %v2254_v0  ;;  %2092 = vmatprep.subr.bf16.mxu1 %v2254_v0 }
 0x3be   : > { %v850_v54 = vpop.f32.mrf.mxu0  ;;  %v897_v55 = vpop.f32.mrf.mxu1 }
 0x3bf   : > { %v856_v56 = vadd.f32 %v1811_v52, %v850_v54  ;;  %v903_v57 = vadd.f32 %v1813_v53, %v897_v55 }
 0x3c0   : > { %v2042_v58 = vpop.f32.mrf.mxu0  ;;  %v2050_v59 = vpop.f32.mrf.mxu1 }
 0x3c1   : > { %v857_v60 = vmul.f32 0.5, %v856_v56  ;;  %v904_v61 = vmul.f32 0.5, %v903_v57  ;;  %v1826_v56 = vld [vmem:[%s1013_s12 + $0x1c] sm:$0x3] }
 0x3c2   : > { %v853_v62 = vpop.f32.mrf.mxu0  ;;  %v900_v63 = vpop.f32.mrf.mxu1 }
 0x3c3   : > { %2206 = vtanh.f32 %v857_v60  ;;  %v1829_v60 = vld [vmem:[%s1013_s12 + $0x2a] sm:$0x3] }
 0x3c4   : > { %2208 = vtanh.f32 %v904_v61  ;;  %v2043_v1 = vpop.f32.mrf.mxu0  ;;  %v2051_v2 = vpop.f32.mrf.mxu1 }
 0x3c6   : > { %v944_v5 = vpop.f32.mrf.mxu0  ;;  %v988_v6 = vpop.f32.mrf.mxu1 }
 0x3c7   : > { %v950_v7 = vadd.f32 %v1815_v3, %v944_v5  ;;  %v994_v16 = vadd.f32 %v1817_v9, %v988_v6 }
 0x3c8   : > { %v2058_v10 = vpop.f32.mrf.mxu0  ;;  %v2066_v12 = vpop.f32.mrf.mxu1 }
 0x3c9   : > { %2210 = vtanh.f32 %v950_v7  ;;  %v995_v20 = vmul.f32 0.5, %v994_v16 }
 0x3ca   : > { %v947_v14 = vpop.f32.mrf.mxu0  ;;  %v991_v15 = vpop.f32.mrf.mxu1 }
 0x3cb   : > { %2212 = vtanh.f32 %v995_v20 }
 0x3cc   : > { %v2059_v17 = vpop.f32.mrf.mxu0  ;;  %v2067_v18 = vpop.f32.mrf.mxu1 }
 0x3d0   : > { %v2207_v21 = vpop.eup %2206 }
 0x3d1   : > { %v2209_v23 = vpop.eup %2208  ;;  %v859_v24 = vadd.f32 1.0, %v2207_v21 }
 0x3d2   : > { %v906_v27 = vadd.f32 1.0, %v2209_v23 }
 0x3d3   : > { %v860_v29 = vmul.f32 0.5, %v859_v24 }
 0x3d4   : > { %v907_v28 = vmul.f32 0.5, %v906_v27 }
 0x3d6   : > { %v2211_v30 = vpop.eup %2210  ;;  %v1000_v32 = vmul.f32 %v999_v31, %v907_v28 }
 0x3d7   : > { %v1001_v33 = vmul.f32 %v2211_v30, %v860_v29 }
 0x3d8   : > { %v2213_v35 = vpop.eup %2212 }
 0x3d9   : > { %v1002_v34 = vadd.f32 %v1001_v33, %v1000_v32  ;;  %v997_v36 = vadd.f32 1.0, %v2213_v35 }
 0x3db   : > { %2214 = vtanh.f32 %v1002_v34  ;;  %1005 = vst.msk [vmem:[#allocation3] sm:$0x3] %vm165_vm0, %v1002_v34  ;;  %v998_v37 = vmul.f32 0.5, %v997_v36 }
 0x3e2   : > { %v1204_v17 = vld [vmem:[#allocation3] sm:$0x3] }
 0x3e8   : > { %v2215_v38 = vpop.eup %2214 }
 0x3e9   : > { %v1004_v39 = vmul.f32 %v2215_v38, %v998_v37 }
 0x3eb   : > { %1006 = vst.msk [vmem:[#allocation2] sm:$0x3] %vm165_vm0, %v1004_v39  ;;  %1819 = vst.msk [vmem:[%s2389_s26 + $0x6] sm:$0x3] %vm165_vm0, %v1004_v39 }
 0x3f2   : > { %v1010_v40 = vld [vmem:[#allocation2] sm:$0x3] }
 0x3f3   : > { %v1011_v41 = vpack.c.bf16 %v1010_v40, %v1010_v40 }
 0x3f5   : > { %2073 = vmatmul.mubr.msk.bf16.vlgmr.msra.gmra.mxu0 %vm199_vm2, %v1011_v41  ;;  %2081 = vmatmul.mubr.msk.bf16.vlgmr.msra.gmra.mxu1 %vm199_vm2, %v1011_v41 }
 0x3f6   : > { %2085 = vmatpush3.bf16.msra.mxu0 %v2326_v19  ;;  %2093 = vmatpush3.bf16.msra.mxu1 %v2333_v22 }
 0x3f7   : > { %2086 = vmatprep.subr.bf16.mxu0 %v2254_v0  ;;  %2094 = vmatprep.subr.bf16.mxu1 %v2254_v0 }
 0x3f8   : > { %2088 = vmatprep.mubr.msk.bf16.mxu0 %vm2255_vm1, %v2254_v0  ;;  %2096 = vmatprep.mubr.msk.bf16.mxu1 %vm2255_vm1, %v2254_v0 }
 0x3fa   : > { %2087 = vmatpush3.bf16.msra.mxu0 %v2340_v25  ;;  %2095 = vmatpush3.bf16.msra.mxu1 %v2346_v26 }
 0x3fb   : > { %2100 = vmatprep.subr.bf16.mxu0 %v2254_v0  ;;  %2108 = vmatprep.subr.bf16.mxu1 %v2254_v0 }
 0x3fd   : > { %2089 = vmatmul.mubr.msk.bf16.vlgmr.msra.gmra.mxu0 %vm199_vm2, %v1011_v41  ;;  %2097 = vmatmul.mubr.msk.bf16.vlgmr.msra.gmra.mxu1 %vm199_vm2, %v1011_v41 }
 0x3fe   : > { %2101 = vmatpush3.bf16.msra.mxu0 %v2304_v4  ;;  %2109 = vmatpush3.bf16.msra.mxu1 %v2309_v8 }
 0x3ff   : > { %2102 = vmatprep.subr.bf16.mxu0 %v2254_v0  ;;  %2110 = vmatprep.subr.bf16.mxu1 %v2254_v0 }
 0x400   : > { %2104 = vmatprep.mubr.msk.bf16.mxu0 %vm2255_vm1, %v2254_v0  ;;  %2112 = vmatprep.mubr.msk.bf16.mxu1 %vm2255_vm1, %v2254_v0 }
 0x402   : > { %2103 = vmatpush3.bf16.msra.mxu0 %v2314_v11  ;;  %2111 = vmatpush3.bf16.msra.mxu1 %v2318_v13 }
 0x403   : > { %2116 = vmatprep.subr.bf16.mxu0 %v2254_v0  ;;  %2124 = vmatprep.subr.bf16.mxu1 %v2254_v0 }
 0x4b5   : > { %v1052_v44 = vpop.f32.mrf.mxu0  ;;  %v1100_v45 = vpop.f32.mrf.mxu1 }
 0x4b6   : > { %v1058_v46 = vadd.f32 %v1052_v44, %v1014_v42  ;;  %v1106_v47 = vadd.f32 %v1823_v43, %v1100_v45  ;;  %v1837_v42 = vld [vmem:[%s1218_s16 + $0x1c] sm:$0x3] }
 0x4b7   : > { %v2074_v48 = vpop.f32.mrf.mxu0  ;;  %v2082_v49 = vpop.f32.mrf.mxu1 }
 0x4b8   : > { %v1059_v50 = vmul.f32 0.5, %v1058_v46  ;;  %v1107_v51 = vmul.f32 0.5, %v1106_v47  ;;  %v1840_v46 = vld [vmem:[%s1218_s16 + $0x2a] sm:$0x3] }
 0x4b9   : > { %v1055_v52 = vpop.f32.mrf.mxu0  ;;  %v1103_v53 = vpop.f32.mrf.mxu1 }
 0x4ba   : > { %2216 = vtanh.f32 %v1059_v50 }
 0x4bb   : > { %2218 = vtanh.f32 %v1107_v51  ;;  %v2075_v54 = vpop.f32.mrf.mxu0  ;;  %v2083_v55 = vpop.f32.mrf.mxu1 }
 0x4bd   : > { %v1148_v57 = vpop.f32.mrf.mxu0  ;;  %v1193_v58 = vpop.f32.mrf.mxu1 }
 0x4be   : > { %v1154_v59 = vadd.f32 %v1826_v56, %v1148_v57  ;;  %v1199_v2 = vadd.f32 %v1829_v60, %v1193_v58 }
 0x4bf   : > { %v2090_v61 = vpop.f32.mrf.mxu0  ;;  %v2098_v62 = vpop.f32.mrf.mxu1 }
 0x4c0   : > { %2220 = vtanh.f32 %v1154_v59  ;;  %v1200_v6 = vmul.f32 0.5, %v1199_v2 }
 0x4c1   : > { %v1151_v63 = vpop.f32.mrf.mxu0  ;;  %v1196_v1 = vpop.f32.mrf.mxu1 }
 0x4c2   : > { %2222 = vtanh.f32 %v1200_v6 }
 0x4c3   : > { %v2091_v3 = vpop.f32.mrf.mxu0  ;;  %v2099_v5 = vpop.f32.mrf.mxu1 }
 0x4c7   : > { %v2217_v7 = vpop.eup %2216 }
 0x4c8   : > { %v2219_v9 = vpop.eup %2218  ;;  %v1061_v10 = vadd.f32 1.0, %v2217_v7 }
 0x4c9   : > { %v1109_v12 = vadd.f32 1.0, %v2219_v9 }
 0x4ca   : > { %v1062_v15 = vmul.f32 0.5, %v1061_v10 }
 0x4cb   : > { %v1110_v14 = vmul.f32 0.5, %v1109_v12 }
 0x4cd   : > { %v2221_v16 = vpop.eup %2220  ;;  %v1205_v18 = vmul.f32 %v1204_v17, %v1110_v14 }
 0x4ce   : > { %v1206_v20 = vmul.f32 %v2221_v16, %v1062_v15 }
 0x4cf   : > { %v2223_v23 = vpop.eup %2222 }
 0x4d0   : > { %v1207_v21 = vadd.f32 %v1206_v20, %v1205_v18  ;;  %v1202_v24 = vadd.f32 1.0, %v2223_v23 }
 0x4d2   : > { %2224 = vtanh.f32 %v1207_v21  ;;  %1210 = vst.msk [vmem:[#allocation3] sm:$0x3] %vm165_vm0, %v1207_v21  ;;  %v1203_v27 = vmul.f32 0.5, %v1202_v24 }
 0x4d9   : > { %v1409_v62 = vld [vmem:[#allocation3] sm:$0x3] }
 0x4df   : > { %v2225_v28 = vpop.eup %2224 }
 0x4e0   : > { %v1209_v29 = vmul.f32 %v2225_v28, %v1203_v27  ;;  %v1848_v27 = vld [vmem:[%s1423_s21 + $0x1c] sm:$0x3] }
 0x4e2   : > { %1211 = vst.msk [vmem:[#allocation2] sm:$0x3] %vm165_vm0, %v1209_v29  ;;  %1213 = vst.msk [vmem:[%s1212_s13] sm:$0x3] %vm165_vm0, %v1209_v29 }
 0x4e9   : > { %v1215_v30 = vld [vmem:[#allocation2] sm:$0x3] }
 0x4ea   : > { %v1216_v31 = vpack.c.bf16 %v1215_v30, %v1215_v30 }
 0x4ec   : > { %2105 = vmatmul.mubr.msk.bf16.vlgmr.msra.gmra.mxu0 %vm199_vm2, %v1216_v31  ;;  %2113 = vmatmul.mubr.msk.bf16.vlgmr.msra.gmra.mxu1 %vm199_vm2, %v1216_v31 }
 0x4ed   : > { %2117 = vmatpush3.bf16.msra.mxu0 %v2326_v19  ;;  %2125 = vmatpush3.bf16.msra.mxu1 %v2333_v22 }
 0x4ee   : > { %2118 = vmatprep.subr.bf16.mxu0 %v2254_v0  ;;  %2126 = vmatprep.subr.bf16.mxu1 %v2254_v0 }
 0x4ef   : > { %2120 = vmatprep.mubr.msk.bf16.mxu0 %vm2255_vm1, %v2254_v0  ;;  %2128 = vmatprep.mubr.msk.bf16.mxu1 %vm2255_vm1, %v2254_v0 }
 0x4f1   : > { %2119 = vmatpush3.bf16.msra.mxu0 %v2340_v25  ;;  %2127 = vmatpush3.bf16.msra.mxu1 %v2346_v26 }
 0x4f2   : > { %2132 = vmatprep.subr.bf16.mxu0 %v2254_v0  ;;  %2140 = vmatprep.subr.bf16.mxu1 %v2254_v0 }
 0x4f4   : > { %2121 = vmatmul.mubr.msk.bf16.vlgmr.msra.gmra.mxu0 %vm199_vm2, %v1216_v31  ;;  %2129 = vmatmul.mubr.msk.bf16.vlgmr.msra.gmra.mxu1 %vm199_vm2, %v1216_v31  ;;  %v1851_v31 = vld [vmem:[%s1423_s21 + $0x2a] sm:$0x3] }
 0x4f5   : > { %2133 = vmatpush3.bf16.msra.mxu0 %v2304_v4  ;;  %2141 = vmatpush3.bf16.msra.mxu1 %v2309_v8  ;;  %v1219_v4 = vld [vmem:[%s1218_s16] sm:$0x3]  ;;  %v1834_v8 = vld [vmem:[%s1218_s16 + $0xe] sm:$0x3] }
 0x4f6   : > { %2134 = vmatprep.subr.bf16.mxu0 %v2254_v0  ;;  %2142 = vmatprep.subr.bf16.mxu1 %v2254_v0 }
 0x4f7   : > { %2136 = vmatprep.mubr.msk.bf16.mxu0 %vm2255_vm1, %v2254_v0  ;;  %2144 = vmatprep.mubr.msk.bf16.mxu1 %vm2255_vm1, %v2254_v0 }
 0x4f9   : > { %2135 = vmatpush3.bf16.msra.mxu0 %v2314_v11  ;;  %2143 = vmatpush3.bf16.msra.mxu1 %v2318_v13 }
 0x4fa   : > { %2148 = vmatprep.subr.bf16.mxu0 %v2254_v0  ;;  %2156 = vmatprep.subr.bf16.mxu1 %v2254_v0 }
 0x5ac   : > { %v1257_v32 = vpop.f32.mrf.mxu0  ;;  %v1305_v33 = vpop.f32.mrf.mxu1 }
 0x5ad   : > { %v1263_v34 = vadd.f32 %v1257_v32, %v1219_v4  ;;  %v1311_v11 = vadd.f32 %v1834_v8, %v1305_v33 }
 0x5ae   : > { %v2106_v35 = vpop.f32.mrf.mxu0  ;;  %v2114_v13 = vpop.f32.mrf.mxu1 }
 0x5af   : > { %v1264_v36 = vmul.f32 0.5, %v1263_v34  ;;  %v1312_v37 = vmul.f32 0.5, %v1311_v11 }
 0x5b0   : > { %v1260_v38 = vpop.f32.mrf.mxu0  ;;  %v1308_v39 = vpop.f32.mrf.mxu1 }
 0x5b1   : > { %2226 = vtanh.f32 %v1264_v36 }
 0x5b2   : > { %2228 = vtanh.f32 %v1312_v37  ;;  %v2107_v40 = vpop.f32.mrf.mxu0  ;;  %v2115_v41 = vpop.f32.mrf.mxu1 }
 0x5b4   : > { %v1353_v43 = vpop.f32.mrf.mxu0  ;;  %v1398_v44 = vpop.f32.mrf.mxu1 }
 0x5b5   : > { %v1359_v45 = vadd.f32 %v1837_v42, %v1353_v43  ;;  %v1404_v51 = vadd.f32 %v1840_v46, %v1398_v44 }
 0x5b6   : > { %v2122_v47 = vpop.f32.mrf.mxu0  ;;  %v2130_v48 = vpop.f32.mrf.mxu1 }
 0x5b7   : > { %2230 = vtanh.f32 %v1359_v45  ;;  %v1405_v54 = vmul.f32 0.5, %v1404_v51 }
 0x5b8   : > { %v1356_v49 = vpop.f32.mrf.mxu0  ;;  %v1401_v50 = vpop.f32.mrf.mxu1 }
 0x5b9   : > { %2232 = vtanh.f32 %v1405_v54 }
 0x5ba   : > { %v2123_v52 = vpop.f32.mrf.mxu0  ;;  %v2131_v53 = vpop.f32.mrf.mxu1 }
 0x5be   : > { %v2227_v55 = vpop.eup %2226 }
 0x5bf   : > { %v2229_v56 = vpop.eup %2228  ;;  %v1266_v57 = vadd.f32 1.0, %v2227_v55 }
 0x5c0   : > { %v1314_v58 = vadd.f32 1.0, %v2229_v56 }
 0x5c1   : > { %v1267_v60 = vmul.f32 0.5, %v1266_v57 }
 0x5c2   : > { %v1315_v59 = vmul.f32 0.5, %v1314_v58 }
 0x5c4   : > { %v2231_v61 = vpop.eup %2230  ;;  %v1410_v63 = vmul.f32 %v1409_v62, %v1315_v59 }
 0x5c5   : > { %v1411_v1 = vmul.f32 %v2231_v61, %v1267_v60 }
 0x5c6   : > { %v2233_v3 = vpop.eup %2232 }
 0x5c7   : > { %v1412_v2 = vadd.f32 %v1411_v1, %v1410_v63  ;;  %v1407_v5 = vadd.f32 1.0, %v2233_v3 }
 0x5c9   : > { %2234 = vtanh.f32 %v1412_v2  ;;  %1415 = vst.msk [vmem:[#allocation3] sm:$0x3] %vm165_vm0, %v1412_v2  ;;  %v1408_v6 = vmul.f32 0.5, %v1407_v5 }
 0x5d0   : > { %v1614_v43 = vld [vmem:[#allocation3] sm:$0x3] }
 0x5d6   : > { %v2235_v7 = vpop.eup %2234 }
 0x5d7   : > { %v1414_v9 = vmul.f32 %v2235_v7, %v1408_v6 }
 0x5d9   : > { %1418 = vst.msk [vmem:[%s1417_s17] sm:$0x3] %vm165_vm0, %v1414_v9  ;;  %1416 = vst.msk [vmem:[#allocation2] sm:$0x3] %vm165_vm0, %v1414_v9 }
 0x5e0   : > { %v1420_v10 = vld [vmem:[#allocation2] sm:$0x3] }
 0x5e1   : > { %v1421_v12 = vpack.c.bf16 %v1420_v10, %v1420_v10 }
 0x5e3   : > { %2137 = vmatmul.mubr.msk.bf16.vlgmr.msra.gmra.mxu0 %vm199_vm2, %v1421_v12  ;;  %2145 = vmatmul.mubr.msk.bf16.vlgmr.msra.gmra.mxu1 %vm199_vm2, %v1421_v12 }
 0x5e4   : > { %2149 = vmatpush3.bf16.msra.mxu0 %v2326_v19  ;;  %2157 = vmatpush3.bf16.msra.mxu1 %v2333_v22  ;;  %v1424_v19 = vld [vmem:[%s1423_s21] sm:$0x3]  ;;  %v1845_v22 = vld [vmem:[%s1423_s21 + $0xe] sm:$0x3] }
 0x5e5   : > { %2150 = vmatprep.subr.bf16.mxu0 %v2254_v0  ;;  %2158 = vmatprep.subr.bf16.mxu1 %v2254_v0 }
 0x5e6   : > { %2152 = vmatprep.mubr.msk.bf16.mxu0 %vm2255_vm1, %v2254_v0  ;;  %2160 = vmatprep.mubr.msk.bf16.mxu1 %vm2255_vm1, %v2254_v0 }
 0x5e8   : > { %2151 = vmatpush3.bf16.msra.mxu0 %v2340_v25  ;;  %2159 = vmatpush3.bf16.msra.mxu1 %v2346_v26 }
 0x5eb   : > { %2153 = vmatmul.mubr.msk.bf16.vlgmr.msra.gmra.mxu0 %vm199_vm2, %v1421_v12  ;;  %2161 = vmatmul.mubr.msk.bf16.vlgmr.msra.gmra.mxu1 %vm199_vm2, %v1421_v12 }
 0x6a3   : > { %v1462_v14 = vpop.f32.mrf.mxu0  ;;  %v1510_v0 = vpop.f32.mrf.mxu1 }
 0x6a4   : > { %v1468_v15 = vadd.f32 %v1462_v14, %v1424_v19  ;;  %v1516_v25 = vadd.f32 %v1845_v22, %v1510_v0 }
 0x6a5   : > { %v2138_v16 = vpop.f32.mrf.mxu0  ;;  %v2146_v26 = vpop.f32.mrf.mxu1 }
 0x6a6   : > { %v1469_v17 = vmul.f32 0.5, %v1468_v15  ;;  %v1517_v18 = vmul.f32 0.5, %v1516_v25 }
 0x6a7   : > { %v1465_v20 = vpop.f32.mrf.mxu0  ;;  %v1513_v21 = vpop.f32.mrf.mxu1 }
 0x6a8   : > { %2236 = vtanh.f32 %v1469_v17 }
 0x6a9   : > { %2238 = vtanh.f32 %v1517_v18  ;;  %v2139_v23 = vpop.f32.mrf.mxu0  ;;  %v2147_v24 = vpop.f32.mrf.mxu1 }
 0x6ab   : > { %v1558_v28 = vpop.f32.mrf.mxu0  ;;  %v1603_v29 = vpop.f32.mrf.mxu1 }
 0x6ac   : > { %v1564_v30 = vadd.f32 %v1848_v27, %v1558_v28  ;;  %v1609_v34 = vadd.f32 %v1851_v31, %v1603_v29 }
 0x6ad   : > { %v2154_v4 = vpop.f32.mrf.mxu0  ;;  %v2162_v8 = vpop.f32.mrf.mxu1 }
 0x6ae   : > { %2240 = vtanh.f32 %v1564_v30  ;;  %v1610_v13 = vmul.f32 0.5, %v1609_v34 }
 0x6af   : > { %v1561_v32 = vpop.f32.mrf.mxu0  ;;  %v1606_v33 = vpop.f32.mrf.mxu1 }
 0x6b0   : > { %2242 = vtanh.f32 %v1610_v13 }
 0x6b1   : > { %v2155_v11 = vpop.f32.mrf.mxu0  ;;  %v2163_v35 = vpop.f32.mrf.mxu1 }
 0x6b5   : > { %v2237_v36 = vpop.eup %2236 }
 0x6b6   : > { %v2239_v37 = vpop.eup %2238  ;;  %v1471_v38 = vadd.f32 1.0, %v2237_v36 }
 0x6b7   : > { %v1519_v39 = vadd.f32 1.0, %v2239_v37 }
 0x6b8   : > { %v1472_v41 = vmul.f32 0.5, %v1471_v38 }
 0x6b9   : > { %v1520_v40 = vmul.f32 0.5, %v1519_v39 }
 0x6bb   : > { %v2241_v42 = vpop.eup %2240  ;;  %v1615_v44 = vmul.f32 %v1614_v43, %v1520_v40 }
 0x6bc   : > { %v1616_v45 = vmul.f32 %v2241_v42, %v1472_v41 }
 0x6bd   : > { %v2243_v47 = vpop.eup %2242 }
 0x6be   : > { %v1617_v46 = vadd.f32 %v1616_v45, %v1615_v44  ;;  %v1612_v48 = vadd.f32 1.0, %v2243_v47 }
 0x6c0   : > { %2244 = vtanh.f32 %v1617_v46  ;;  %1620 = vst.msk [vmem:[#allocation3] sm:$0x3] %vm165_vm0, %v1617_v46  ;;  %v1613_v49 = vmul.f32 0.5, %v1612_v48 }
 0x6cd   : > { %v2245_v50 = vpop.eup %2244 }
 0x6ce   : > { %v1619_v51 = vmul.f32 %v2245_v50, %v1613_v49 }
 0x6d0   : > { %1621 = vst.msk [vmem:[#allocation2] sm:$0x3] %vm165_vm0, %v1619_v51  ;;  %1623 = vst.msk [vmem:[%s1622_s10] sm:$0x3] %vm165_vm0, %v1619_v51 }
 0x6d1 PF: > { %s12_s9 = sadd.s32 1, %s2252_s9  }
 0x6d2   : > { %p9_p5 = scmp.ge.s32.totalorder %s12_s9, 4  }
 0x6d4   :  { %11 = sbr.rel (!%p9_p5) target bundleno = 1 (0x1), region = 96 }

</bundles_post_ra>
